<compile_context>
chip_gen: v5e
topology: v5e:2x2
jax: 0.10.0
libtpu: 0.0.40
codegen_flags: <defaults>
</compile_context>

<pallas_src>
import jax
import jax.numpy as jnp
from jax import lax
from jax.experimental import pallas as pl
from jax.experimental.pallas import tpu as pltpu


VMEM_SPEC = pl.BlockSpec(memory_space=pltpu.MemorySpace.VMEM)


# ----------------------------- Pallas kernel ------------------------------ #

def bigru_fc_fused_kernel(x_ref, vecs_ref, wall_ref, fcw_ref, sel_ref, out_ref):
    """Fused single-layer bidirectional GRU + FC head.

    x_ref    : (N, L)        scalar time series per (batch*channel) row
    vecs_ref : (8, VW)       rows: w_ir, w_iz, w_in, b_r, b_z, b_in, b_hn, fc_b
                             (weights/biases packed [fwd | bwd] along lanes; b_r/b_z are
                             b_ih+b_hh pre-folded, b_hn stays separate inside r*(...))
    wall_ref : (2H, 3*GP)    fused block-diagonal recurrent weights [Whr | Whz | Whn],
                             each gate block padded to GP = round_up(2H, 128) lanes
    fcw_ref  : (O, N, 2H)    per-row FC weights (channel pattern tiled over batch)
    sel_ref  : (B, N)        batch selector (1 where n // C == b)
    out_ref  : (B, O)
    """
    N, L = x_ref.shape
    H2 = wall_ref.shape[0]            # 2H (both directions)
    GP = wall_ref.shape[1] // 3       # per-gate lane stride (128-aligned)
    H = H2 // 2
    O = out_ref.shape[1]

    x = x_ref[...]                    # (N, L)   — one small dense tile
    vecs = vecs_ref[...]              # (8, VW)
    w_all = wall_ref[...]             # (2H, 3*GP)

    # Hoisted (1,2H)->(N,2H) broadcasts of the packed vectors (used every step).
    def row(k):
        return jnp.broadcast_to(vecs[k:k + 1, :H2], (N, H2))

    w_ir, w_iz, w_in = row(0), row(1), row(2)
    b_r, b_z, b_in, b_hn = row(3), row(4), row(5), row(6)

    # Per-step input projection: input_size == 1, so gi = x[t] * w + b (broadcast mul).
    # Forward half reads x[:, i]; backward half reads x[:, L-1-i] (static indices).
    def gates_in(i):
        xf = jnp.broadcast_to(x[:, i:i + 1], (N, H))
        xb = jnp.broadcast_to(x[:, L - 1 - i:L - i], (N, H))
        x_dir = jnp.concatenate([xf, xb], axis=-1)            # (N, 2H) = [fwd | bwd]
        return (x_dir * w_ir + b_r, x_dir * w_iz + b_z, x_dir * w_in + b_in)

    # ---- step 0: h == 0, so the recurrent matmul vanishes ----
    gi_r, gi_z, gi_n = gates_in(0)
    r = jax.nn.sigmoid(gi_r)
    z = jax.nn.sigmoid(gi_z)
    n = jnp.tanh(gi_n + r * b_hn)
    h = (1.0 - z) * n                                          # (N, 2H) = [h_fwd | h_bwd]

    # ---- remaining steps: both directions advance together; ONE fused gate matmul ----
    for i in range(1, L):
        gi_r, gi_z, gi_n = gates_in(i)
        gh = jnp.dot(h, w_all, preferred_element_type=jnp.float32)   # (N, 3*GP)
        r = jax.nn.sigmoid(gi_r + gh[:, 0:H2])
        z = jax.nn.sigmoid(gi_z + gh[:, GP:GP + H2])
        n = jnp.tanh(gi_n + r * (gh[:, 2 * GP:2 * GP + H2] + b_hn))
        h = (1.0 - z) * n + z * h

    # ---- fused FC: out[b,o] = sum_{c,j} h[b*C+c, j] * fc_w[o, c*2H+j] + fc_b[o] ----
    contrib = jnp.sum(h[None, :, :] * fcw_ref[...], axis=-1)         # (O, N)
    out = lax.dot_general(sel_ref[...], contrib,
                          dimension_numbers=(((1,), (1,)), ((), ())),
                          preferred_element_type=jnp.float32)        # (B, O)
    out_ref[...] = out + vecs[7:8, :O]


# ------------------------------ Python wrapper ----------------------------- #

def bigru_model_forward(x, kparams):
    """x: (B, C, L) float32  ->  (B, output_size) float32."""
    B, C, L = x.shape
    N = B * C
    O = kparams["fcw_rows"].shape[0]

    x2 = x.reshape(N, L).astype(jnp.float32)     # dense (N, L); no reverse, no (.,.,1) pad

    return pl.pallas_call(
        bigru_fc_fused_kernel,
        out_shape=jax.ShapeDtypeStruct((B, O), jnp.float32),
        in_specs=[VMEM_SPEC] * 5,
        out_specs=VMEM_SPEC,
    )(x2, kparams["vecs"], kparams["W_all"], kparams["fcw_rows"], kparams["sel"])


# --------------------------- Deterministic params --------------------------- #

def init_params(key, input_size, hidden_size, output_size, num_channels, batch_size):
    assert input_size == 1, "x.view(B*C, L, -1) on (B, C, L) implies input_size == 1"
    H = hidden_size
    H2 = 2 * H
    GP = ((H2 + 127) // 128) * 128               # 128-lane-aligned per-gate stride
    O = output_size
    C = num_channels
    B = batch_size
    VW = max(H2, O)

    k_gru = 1.0 / float(H) ** 0.5
    fc_in = H2 * C
    k_fc = 1.0 / float(fc_in) ** 0.5
    keys = jax.random.split(key, 10)
    u = lambda k, shape, s: jax.random.uniform(k, shape, jnp.float32, -s, s)

    wih_f = u(keys[0], (3 * H, input_size), k_gru)
    whh_f = u(keys[1], (3 * H, H), k_gru)
    bih_f = u(keys[2], (3 * H,), k_gru)
    bhh_f = u(keys[3], (3 * H,), k_gru)
    wih_b = u(keys[4], (3 * H, input_size), k_gru)
    whh_b = u(keys[5], (3 * H, H), k_gru)
    bih_b = u(keys[6], (3 * H,), k_gru)
    bhh_b = u(keys[7], (3 * H,), k_gru)
    fc_w = u(keys[8], (O, fc_in), k_fc)
    fc_b = u(keys[9], (O,), k_fc)

    r, zg, ng = slice(0, H), slice(H, 2 * H), slice(2 * H, 3 * H)

    def pack_row(vf, vb):                        # (H,),(H,) -> (VW,)  [fwd | bwd | 0-pad]
        v = jnp.concatenate([vf, vb])
        return jnp.pad(v, (0, VW - H2))

    vecs = jnp.stack([
        pack_row(wih_f[r, 0], wih_b[r, 0]),                              # 0: w_ir
        pack_row(wih_f[zg, 0], wih_b[zg, 0]),                            # 1: w_iz
        pack_row(wih_f[ng, 0], wih_b[ng, 0]),                            # 2: w_in
        pack_row(bih_f[r] + bhh_f[r], bih_b[r] + bhh_b[r]),              # 3: b_r
        pack_row(bih_f[zg] + bhh_f[zg], bih_b[zg] + bhh_b[zg]),          # 4: b_z
        pack_row(bih_f[ng], bih_b[ng]),                                  # 5: b_in
        pack_row(bhh_f[ng], bhh_b[ng]),                                  # 6: b_hn
        jnp.pad(fc_b, (0, VW - O)),                                      # 7: fc_b
    ], axis=0).astype(jnp.float32)                                       # (8, VW)

    def block_diag(af, ab):                      # (H,H),(H,H) -> (2H, 2H)
        zero = jnp.zeros((H, H), jnp.float32)
        return jnp.block([[af, zero], [zero, ab]]).astype(jnp.float32)

    def pad_gate(w):                             # (2H, 2H) -> (2H, GP)
        return jnp.pad(w, ((0, 0), (0, GP - H2)))

    W_all = jnp.concatenate([
        pad_gate(block_diag(whh_f[r, :].T, whh_b[r, :].T)),
        pad_gate(block_diag(whh_f[zg, :].T, whh_b[zg, :].T)),
        pad_gate(block_diag(whh_f[ng, :].T, whh_b[ng, :].T)),
    ], axis=1).astype(jnp.float32)               # (2H, 3*GP)

    # FC helpers precomputed ONCE (they depend only on params/shapes).
    fcw_rows = jnp.tile(fc_w.reshape(O, C, H2), (1, B, 1)).astype(jnp.float32)  # (O, N, 2H)
    sel = jnp.repeat(jnp.eye(B, dtype=jnp.float32), C, axis=1)                  # (B, N)

    kernel_params = dict(vecs=vecs, W_all=W_all, fcw_rows=fcw_rows, sel=sel)
    raw_params = dict(wih_f=wih_f, whh_f=whh_f, bih_f=bih_f, bhh_f=bhh_f,
                      wih_b=wih_b, whh_b=whh_b, bih_b=bih_b, bhh_b=bhh_b,
                      fc_w=fc_w, fc_b=fc_b)
    return kernel_params, raw_params


# ------------------------------ Pure-JAX reference -------------------------- #

def _gru_dir_ref(x2, wih, whh, bih, bhh, reverse):
    N, L = x2.shape
    H = whh.shape[1]

    def step(h, x_t):
        gi = x_t[:, None] @ wih.T + bih           # (N, 3H)
        gh = h @ whh.T                            # (N, 3H)
        r = jax.nn.sigmoid(gi[:, :H] + gh[:, :H] + bhh[:H])
        z = jax.nn.sigmoid(gi[:, H:2 * H] + gh[:, H:2 * H] + bhh[H:2 * H])
        n = jnp.tanh(gi[:, 2 * H:] + r * (gh[:, 2 * H:] + bhh[2 * H:]))
        return (1.0 - z) * n + z * h, None

    xs = x2.T
    if reverse:
        xs = xs[::-1]
    h, _ = jax.lax.scan(step, jnp.zeros((N, H), jnp.float32), xs)
    return h


def reference_forward(x, raw):
    B, C, L = x.shape
    x2 = x.reshape(B * C, L)
    h_f = _gru_dir_ref(x2, raw["wih_f"], raw["whh_f"], raw["bih_f"], raw["bhh_f"], False)
    h_b = _gru_dir_ref(x2, raw["wih_b"], raw["whh_b"], raw["bih_b"], raw["bhh_b"], True)
    out = jnp.concatenate([h_f, h_b], axis=1).reshape(B, -1)
    return out @ raw["fc_w"].T + raw["fc_b"]


# ----------------------------------- Main ----------------------------------- #

if __name__ == "__main__":
    B, C, L = 2, 12, 16          # batch, num_channels (module default 12), sequence_length
    input_size, H, O = 1, 32, 3  # GRU input_size is 1 (implied by x.view(B*C, L, -1))

    key = jax.random.PRNGKey(0)
    kx, kp = jax.random.split(key)
    x = jax.random.normal(kx, (B, C, L), jnp.float32)
    kparams, raw = init_params(kp, input_size, H, O, C, B)

    out = jax.block_until_ready(bigru_model_forward(x, kparams))
    ref = reference_forward(x, raw)

    assert out.shape == (B, O), out.shape
    assert jnp.allclose(out, ref, atol=1e-4, rtol=1e-4), (out, ref)
    print("KERNEL_OK")
</pallas_src>

<mosaic_0001>
module attributes {stable_mosaic.version = 11 : i64} {
  func.func @bigru_fc_fused_kernel(%arg0: memref<24x16xf32, #tpu.memory_space<vmem>>, %arg1: memref<8x64xf32, #tpu.memory_space<vmem>>, %arg2: memref<64x384xf32, #tpu.memory_space<vmem>>, %arg3: memref<3x24x64xf32, #tpu.memory_space<vmem>>, %arg4: memref<2x24xf32, #tpu.memory_space<vmem>>, %arg5: memref<2x3xf32, #tpu.memory_space<vmem>>) attributes {dimension_semantics = [], scalar_prefetch = 0 : i64, scratch_operands = 0 : i64, tpu.core_type = #tpu.core_type<tc>} {
    %c0 = arith.constant 0 : index
    %c0_0 = arith.constant 0 : index
    %0 = vector.load %arg0[%c0, %c0_0] : memref<24x16xf32, #tpu.memory_space<vmem>>, vector<24x16xf32>
    %c0_1 = arith.constant 0 : index
    %c0_2 = arith.constant 0 : index
    %1 = vector.load %arg1[%c0_1, %c0_2] : memref<8x64xf32, #tpu.memory_space<vmem>>, vector<8x64xf32>
    %c0_3 = arith.constant 0 : index
    %c0_4 = arith.constant 0 : index
    %2 = vector.load %arg2[%c0_3, %c0_4] : memref<64x384xf32, #tpu.memory_space<vmem>>, vector<64x384xf32>
    %3 = vector.extract_strided_slice %1 {offsets = [0, 0], sizes = [1, 64], strides = [1, 1]} : vector<8x64xf32> to vector<1x64xf32>
    %4 = vector.shape_cast %3 : vector<1x64xf32> to vector<1x64xf32>
    %5 = vector.broadcast %4 : vector<1x64xf32> to vector<24x64xf32>
    %6 = vector.extract_strided_slice %1 {offsets = [1, 0], sizes = [1, 64], strides = [1, 1]} : vector<8x64xf32> to vector<1x64xf32>
    %7 = vector.shape_cast %6 : vector<1x64xf32> to vector<1x64xf32>
    %8 = vector.broadcast %7 : vector<1x64xf32> to vector<24x64xf32>
    %9 = vector.extract_strided_slice %1 {offsets = [2, 0], sizes = [1, 64], strides = [1, 1]} : vector<8x64xf32> to vector<1x64xf32>
    %10 = vector.shape_cast %9 : vector<1x64xf32> to vector<1x64xf32>
    %11 = vector.broadcast %10 : vector<1x64xf32> to vector<24x64xf32>
    %12 = vector.extract_strided_slice %1 {offsets = [3, 0], sizes = [1, 64], strides = [1, 1]} : vector<8x64xf32> to vector<1x64xf32>
    %13 = vector.shape_cast %12 : vector<1x64xf32> to vector<1x64xf32>
    %14 = vector.broadcast %13 : vector<1x64xf32> to vector<24x64xf32>
    %15 = vector.extract_strided_slice %1 {offsets = [4, 0], sizes = [1, 64], strides = [1, 1]} : vector<8x64xf32> to vector<1x64xf32>
    %16 = vector.shape_cast %15 : vector<1x64xf32> to vector<1x64xf32>
    %17 = vector.broadcast %16 : vector<1x64xf32> to vector<24x64xf32>
    %18 = vector.extract_strided_slice %1 {offsets = [5, 0], sizes = [1, 64], strides = [1, 1]} : vector<8x64xf32> to vector<1x64xf32>
    %19 = vector.shape_cast %18 : vector<1x64xf32> to vector<1x64xf32>
    %20 = vector.broadcast %19 : vector<1x64xf32> to vector<24x64xf32>
    %21 = vector.extract_strided_slice %1 {offsets = [6, 0], sizes = [1, 64], strides = [1, 1]} : vector<8x64xf32> to vector<1x64xf32>
    %22 = vector.shape_cast %21 : vector<1x64xf32> to vector<1x64xf32>
    %23 = vector.broadcast %22 : vector<1x64xf32> to vector<24x64xf32>
    %24 = vector.extract_strided_slice %0 {offsets = [0, 0], sizes = [24, 1], strides = [1, 1]} : vector<24x16xf32> to vector<24x1xf32>
    %25 = vector.shape_cast %24 : vector<24x1xf32> to vector<24x1xf32>
    %26 = vector.broadcast %25 : vector<24x1xf32> to vector<24x32xf32>
    %27 = vector.extract_strided_slice %0 {offsets = [0, 15], sizes = [24, 1], strides = [1, 1]} : vector<24x16xf32> to vector<24x1xf32>
    %28 = vector.shape_cast %27 : vector<24x1xf32> to vector<24x1xf32>
    %29 = vector.broadcast %28 : vector<24x1xf32> to vector<24x32xf32>
    %30 = tpu.concatenate %26, %29 in 1 : vector<24x32xf32>, vector<24x32xf32> -> vector<24x64xf32>
    %31 = arith.mulf %30, %5 : vector<24x64xf32>
    %32 = arith.addf %31, %14 : vector<24x64xf32>
    %33 = arith.mulf %30, %8 : vector<24x64xf32>
    %34 = arith.addf %33, %17 : vector<24x64xf32>
    %35 = arith.mulf %30, %11 : vector<24x64xf32>
    %36 = arith.addf %35, %20 : vector<24x64xf32>
    %37 = arith.negf %32 : vector<24x64xf32>
    %38 = math.exp %37 : vector<24x64xf32>
    %cst = arith.constant 1.000000e+00 : f32
    %39 = vector.broadcast %cst : f32 to vector<24x64xf32>
    %40 = arith.addf %39, %38 : vector<24x64xf32>
    %41 = arith.divf %39, %40 : vector<24x64xf32>
    %42 = arith.negf %34 : vector<24x64xf32>
    %43 = math.exp %42 : vector<24x64xf32>
    %cst_5 = arith.constant 1.000000e+00 : f32
    %44 = vector.broadcast %cst_5 : f32 to vector<24x64xf32>
    %45 = arith.addf %44, %43 : vector<24x64xf32>
    %46 = arith.divf %44, %45 : vector<24x64xf32>
    %47 = arith.mulf %41, %23 : vector<24x64xf32>
    %48 = arith.addf %36, %47 : vector<24x64xf32>
    %49 = math.tanh %48 : vector<24x64xf32>
    %cst_6 = arith.constant 1.000000e+00 : f32
    %50 = vector.broadcast %cst_6 : f32 to vector<24x64xf32>
    %51 = arith.subf %50, %46 : vector<24x64xf32>
    %52 = arith.mulf %51, %49 : vector<24x64xf32>
    %53 = vector.extract_strided_slice %0 {offsets = [0, 1], sizes = [24, 1], strides = [1, 1]} : vector<24x16xf32> to vector<24x1xf32>
    %54 = vector.shape_cast %53 : vector<24x1xf32> to vector<24x1xf32>
    %55 = vector.broadcast %54 : vector<24x1xf32> to vector<24x32xf32>
    %56 = vector.extract_strided_slice %0 {offsets = [0, 14], sizes = [24, 1], strides = [1, 1]} : vector<24x16xf32> to vector<24x1xf32>
    %57 = vector.shape_cast %56 : vector<24x1xf32> to vector<24x1xf32>
    %58 = vector.broadcast %57 : vector<24x1xf32> to vector<24x32xf32>
    %59 = tpu.concatenate %55, %58 in 1 : vector<24x32xf32>, vector<24x32xf32> -> vector<24x64xf32>
    %60 = arith.mulf %59, %5 : vector<24x64xf32>
    %61 = arith.addf %60, %14 : vector<24x64xf32>
    %62 = arith.mulf %59, %8 : vector<24x64xf32>
    %63 = arith.addf %62, %17 : vector<24x64xf32>
    %64 = arith.mulf %59, %11 : vector<24x64xf32>
    %65 = arith.addf %64, %20 : vector<24x64xf32>
    %cst_7 = arith.constant dense<0.000000e+00> : vector<24x384xf32>
    %66 = tpu.matmul %52, %2, %cst_7 {dimension_numbers = #tpu.dot_dimension_numbers<[1], [0], [0], [1], [0, 0, 1, 1], [], []>} : vector<24x64xf32>, vector<64x384xf32>, vector<24x384xf32> -> vector<24x384xf32>
    %67 = vector.extract_strided_slice %66 {offsets = [0, 0], sizes = [24, 64], strides = [1, 1]} : vector<24x384xf32> to vector<24x64xf32>
    %68 = arith.addf %61, %67 : vector<24x64xf32>
    %69 = arith.negf %68 : vector<24x64xf32>
    %70 = math.exp %69 : vector<24x64xf32>
    %cst_8 = arith.constant 1.000000e+00 : f32
    %71 = vector.broadcast %cst_8 : f32 to vector<24x64xf32>
    %72 = arith.addf %71, %70 : vector<24x64xf32>
    %73 = arith.divf %71, %72 : vector<24x64xf32>
    %74 = vector.extract_strided_slice %66 {offsets = [0, 128], sizes = [24, 64], strides = [1, 1]} : vector<24x384xf32> to vector<24x64xf32>
    %75 = arith.addf %63, %74 : vector<24x64xf32>
    %76 = arith.negf %75 : vector<24x64xf32>
    %77 = math.exp %76 : vector<24x64xf32>
    %cst_9 = arith.constant 1.000000e+00 : f32
    %78 = vector.broadcast %cst_9 : f32 to vector<24x64xf32>
    %79 = arith.addf %78, %77 : vector<24x64xf32>
    %80 = arith.divf %78, %79 : vector<24x64xf32>
    %81 = vector.extract_strided_slice %66 {offsets = [0, 256], sizes = [24, 64], strides = [1, 1]} : vector<24x384xf32> to vector<24x64xf32>
    %82 = arith.addf %81, %23 : vector<24x64xf32>
    %83 = arith.mulf %73, %82 : vector<24x64xf32>
    %84 = arith.addf %65, %83 : vector<24x64xf32>
    %85 = math.tanh %84 : vector<24x64xf32>
    %cst_10 = arith.constant 1.000000e+00 : f32
    %86 = vector.broadcast %cst_10 : f32 to vector<24x64xf32>
    %87 = arith.subf %86, %80 : vector<24x64xf32>
    %88 = arith.mulf %87, %85 : vector<24x64xf32>
    %89 = arith.mulf %80, %52 : vector<24x64xf32>
    %90 = arith.addf %88, %89 : vector<24x64xf32>
    %91 = vector.extract_strided_slice %0 {offsets = [0, 2], sizes = [24, 1], strides = [1, 1]} : vector<24x16xf32> to vector<24x1xf32>
    %92 = vector.shape_cast %91 : vector<24x1xf32> to vector<24x1xf32>
    %93 = vector.broadcast %92 : vector<24x1xf32> to vector<24x32xf32>
    %94 = vector.extract_strided_slice %0 {offsets = [0, 13], sizes = [24, 1], strides = [1, 1]} : vector<24x16xf32> to vector<24x1xf32>
    %95 = vector.shape_cast %94 : vector<24x1xf32> to vector<24x1xf32>
    %96 = vector.broadcast %95 : vector<24x1xf32> to vector<24x32xf32>
    %97 = tpu.concatenate %93, %96 in 1 : vector<24x32xf32>, vector<24x32xf32> -> vector<24x64xf32>
    %98 = arith.mulf %97, %5 : vector<24x64xf32>
    %99 = arith.addf %98, %14 : vector<24x64xf32>
    %100 = arith.mulf %97, %8 : vector<24x64xf32>
    %101 = arith.addf %100, %17 : vector<24x64xf32>
    %102 = arith.mulf %97, %11 : vector<24x64xf32>
    %103 = arith.addf %102, %20 : vector<24x64xf32>
    %cst_11 = arith.constant dense<0.000000e+00> : vector<24x384xf32>
    %104 = tpu.matmul %90, %2, %cst_11 {dimension_numbers = #tpu.dot_dimension_numbers<[1], [0], [0], [1], [0, 0, 1, 1], [], []>} : vector<24x64xf32>, vector<64x384xf32>, vector<24x384xf32> -> vector<24x384xf32>
    %105 = vector.extract_strided_slice %104 {offsets = [0, 0], sizes = [24, 64], strides = [1, 1]} : vector<24x384xf32> to vector<24x64xf32>
    %106 = arith.addf %99, %105 : vector<24x64xf32>
    %107 = arith.negf %106 : vector<24x64xf32>
    %108 = math.exp %107 : vector<24x64xf32>
    %cst_12 = arith.constant 1.000000e+00 : f32
    %109 = vector.broadcast %cst_12 : f32 to vector<24x64xf32>
    %110 = arith.addf %109, %108 : vector<24x64xf32>
    %111 = arith.divf %109, %110 : vector<24x64xf32>
    %112 = vector.extract_strided_slice %104 {offsets = [0, 128], sizes = [24, 64], strides = [1, 1]} : vector<24x384xf32> to vector<24x64xf32>
    %113 = arith.addf %101, %112 : vector<24x64xf32>
    %114 = arith.negf %113 : vector<24x64xf32>
    %115 = math.exp %114 : vector<24x64xf32>
    %cst_13 = arith.constant 1.000000e+00 : f32
    %116 = vector.broadcast %cst_13 : f32 to vector<24x64xf32>
    %117 = arith.addf %116, %115 : vector<24x64xf32>
    %118 = arith.divf %116, %117 : vector<24x64xf32>
    %119 = vector.extract_strided_slice %104 {offsets = [0, 256], sizes = [24, 64], strides = [1, 1]} : vector<24x384xf32> to vector<24x64xf32>
    %120 = arith.addf %119, %23 : vector<24x64xf32>
    %121 = arith.mulf %111, %120 : vector<24x64xf32>
    %122 = arith.addf %103, %121 : vector<24x64xf32>
    %123 = math.tanh %122 : vector<24x64xf32>
    %cst_14 = arith.constant 1.000000e+00 : f32
    %124 = vector.broadcast %cst_14 : f32 to vector<24x64xf32>
    %125 = arith.subf %124, %118 : vector<24x64xf32>
    %126 = arith.mulf %125, %123 : vector<24x64xf32>
    %127 = arith.mulf %118, %90 : vector<24x64xf32>
    %128 = arith.addf %126, %127 : vector<24x64xf32>
    %129 = vector.extract_strided_slice %0 {offsets = [0, 3], sizes = [24, 1], strides = [1, 1]} : vector<24x16xf32> to vector<24x1xf32>
    %130 = vector.shape_cast %129 : vector<24x1xf32> to vector<24x1xf32>
    %131 = vector.broadcast %130 : vector<24x1xf32> to vector<24x32xf32>
    %132 = vector.extract_strided_slice %0 {offsets = [0, 12], sizes = [24, 1], strides = [1, 1]} : vector<24x16xf32> to vector<24x1xf32>
    %133 = vector.shape_cast %132 : vector<24x1xf32> to vector<24x1xf32>
    %134 = vector.broadcast %133 : vector<24x1xf32> to vector<24x32xf32>
    %135 = tpu.concatenate %131, %134 in 1 : vector<24x32xf32>, vector<24x32xf32> -> vector<24x64xf32>
    %136 = arith.mulf %135, %5 : vector<24x64xf32>
    %137 = arith.addf %136, %14 : vector<24x64xf32>
    %138 = arith.mulf %135, %8 : vector<24x64xf32>
    %139 = arith.addf %138, %17 : vector<24x64xf32>
    %140 = arith.mulf %135, %11 : vector<24x64xf32>
    %141 = arith.addf %140, %20 : vector<24x64xf32>
    %cst_15 = arith.constant dense<0.000000e+00> : vector<24x384xf32>
    %142 = tpu.matmul %128, %2, %cst_15 {dimension_numbers = #tpu.dot_dimension_numbers<[1], [0], [0], [1], [0, 0, 1, 1], [], []>} : vector<24x64xf32>, vector<64x384xf32>, vector<24x384xf32> -> vector<24x384xf32>
    %143 = vector.extract_strided_slice %142 {offsets = [0, 0], sizes = [24, 64], strides = [1, 1]} : vector<24x384xf32> to vector<24x64xf32>
    %144 = arith.addf %137, %143 : vector<24x64xf32>
    %145 = arith.negf %144 : vector<24x64xf32>
    %146 = math.exp %145 : vector<24x64xf32>
    %cst_16 = arith.constant 1.000000e+00 : f32
    %147 = vector.broadcast %cst_16 : f32 to vector<24x64xf32>
    %148 = arith.addf %147, %146 : vector<24x64xf32>
    %149 = arith.divf %147, %148 : vector<24x64xf32>
    %150 = vector.extract_strided_slice %142 {offsets = [0, 128], sizes = [24, 64], strides = [1, 1]} : vector<24x384xf32> to vector<24x64xf32>
    %151 = arith.addf %139, %150 : vector<24x64xf32>
    %152 = arith.negf %151 : vector<24x64xf32>
    %153 = math.exp %152 : vector<24x64xf32>
    %cst_17 = arith.constant 1.000000e+00 : f32
    %154 = vector.broadcast %cst_17 : f32 to vector<24x64xf32>
    %155 = arith.addf %154, %153 : vector<24x64xf32>
    %156 = arith.divf %154, %155 : vector<24x64xf32>
    %157 = vector.extract_strided_slice %142 {offsets = [0, 256], sizes = [24, 64], strides = [1, 1]} : vector<24x384xf32> to vector<24x64xf32>
    %158 = arith.addf %157, %23 : vector<24x64xf32>
    %159 = arith.mulf %149, %158 : vector<24x64xf32>
    %160 = arith.addf %141, %159 : vector<24x64xf32>
    %161 = math.tanh %160 : vector<24x64xf32>
    %cst_18 = arith.constant 1.000000e+00 : f32
    %162 = vector.broadcast %cst_18 : f32 to vector<24x64xf32>
    %163 = arith.subf %162, %156 : vector<24x64xf32>
    %164 = arith.mulf %163, %161 : vector<24x64xf32>
    %165 = arith.mulf %156, %128 : vector<24x64xf32>
    %166 = arith.addf %164, %165 : vector<24x64xf32>
    %167 = vector.extract_strided_slice %0 {offsets = [0, 4], sizes = [24, 1], strides = [1, 1]} : vector<24x16xf32> to vector<24x1xf32>
    %168 = vector.shape_cast %167 : vector<24x1xf32> to vector<24x1xf32>
    %169 = vector.broadcast %168 : vector<24x1xf32> to vector<24x32xf32>
    %170 = vector.extract_strided_slice %0 {offsets = [0, 11], sizes = [24, 1], strides = [1, 1]} : vector<24x16xf32> to vector<24x1xf32>
    %171 = vector.shape_cast %170 : vector<24x1xf32> to vector<24x1xf32>
    %172 = vector.broadcast %171 : vector<24x1xf32> to vector<24x32xf32>
    %173 = tpu.concatenate %169, %172 in 1 : vector<24x32xf32>, vector<24x32xf32> -> vector<24x64xf32>
    %174 = arith.mulf %173, %5 : vector<24x64xf32>
    %175 = arith.addf %174, %14 : vector<24x64xf32>
    %176 = arith.mulf %173, %8 : vector<24x64xf32>
    %177 = arith.addf %176, %17 : vector<24x64xf32>
    %178 = arith.mulf %173, %11 : vector<24x64xf32>
    %179 = arith.addf %178, %20 : vector<24x64xf32>
    %cst_19 = arith.constant dense<0.000000e+00> : vector<24x384xf32>
    %180 = tpu.matmul %166, %2, %cst_19 {dimension_numbers = #tpu.dot_dimension_numbers<[1], [0], [0], [1], [0, 0, 1, 1], [], []>} : vector<24x64xf32>, vector<64x384xf32>, vector<24x384xf32> -> vector<24x384xf32>
    %181 = vector.extract_strided_slice %180 {offsets = [0, 0], sizes = [24, 64], strides = [1, 1]} : vector<24x384xf32> to vector<24x64xf32>
    %182 = arith.addf %175, %181 : vector<24x64xf32>
    %183 = arith.negf %182 : vector<24x64xf32>
    %184 = math.exp %183 : vector<24x64xf32>
    %cst_20 = arith.constant 1.000000e+00 : f32
    %185 = vector.broadcast %cst_20 : f32 to vector<24x64xf32>
    %186 = arith.addf %185, %184 : vector<24x64xf32>
    %187 = arith.divf %185, %186 : vector<24x64xf32>
    %188 = vector.extract_strided_slice %180 {offsets = [0, 128], sizes = [24, 64], strides = [1, 1]} : vector<24x384xf32> to vector<24x64xf32>
    %189 = arith.addf %177, %188 : vector<24x64xf32>
    %190 = arith.negf %189 : vector<24x64xf32>
    %191 = math.exp %190 : vector<24x64xf32>
    %cst_21 = arith.constant 1.000000e+00 : f32
    %192 = vector.broadcast %cst_21 : f32 to vector<24x64xf32>
    %193 = arith.addf %192, %191 : vector<24x64xf32>
    %194 = arith.divf %192, %193 : vector<24x64xf32>
    %195 = vector.extract_strided_slice %180 {offsets = [0, 256], sizes = [24, 64], strides = [1, 1]} : vector<24x384xf32> to vector<24x64xf32>
    %196 = arith.addf %195, %23 : vector<24x64xf32>
    %197 = arith.mulf %187, %196 : vector<24x64xf32>
    %198 = arith.addf %179, %197 : vector<24x64xf32>
    %199 = math.tanh %198 : vector<24x64xf32>
    %cst_22 = arith.constant 1.000000e+00 : f32
    %200 = vector.broadcast %cst_22 : f32 to vector<24x64xf32>
    %201 = arith.subf %200, %194 : vector<24x64xf32>
    %202 = arith.mulf %201, %199 : vector<24x64xf32>
    %203 = arith.mulf %194, %166 : vector<24x64xf32>
    %204 = arith.addf %202, %203 : vector<24x64xf32>
    %205 = vector.extract_strided_slice %0 {offsets = [0, 5], sizes = [24, 1], strides = [1, 1]} : vector<24x16xf32> to vector<24x1xf32>
    %206 = vector.shape_cast %205 : vector<24x1xf32> to vector<24x1xf32>
    %207 = vector.broadcast %206 : vector<24x1xf32> to vector<24x32xf32>
    %208 = vector.extract_strided_slice %0 {offsets = [0, 10], sizes = [24, 1], strides = [1, 1]} : vector<24x16xf32> to vector<24x1xf32>
    %209 = vector.shape_cast %208 : vector<24x1xf32> to vector<24x1xf32>
    %210 = vector.broadcast %209 : vector<24x1xf32> to vector<24x32xf32>
    %211 = tpu.concatenate %207, %210 in 1 : vector<24x32xf32>, vector<24x32xf32> -> vector<24x64xf32>
    %212 = arith.mulf %211, %5 : vector<24x64xf32>
    %213 = arith.addf %212, %14 : vector<24x64xf32>
    %214 = arith.mulf %211, %8 : vector<24x64xf32>
    %215 = arith.addf %214, %17 : vector<24x64xf32>
    %216 = arith.mulf %211, %11 : vector<24x64xf32>
    %217 = arith.addf %216, %20 : vector<24x64xf32>
    %cst_23 = arith.constant dense<0.000000e+00> : vector<24x384xf32>
    %218 = tpu.matmul %204, %2, %cst_23 {dimension_numbers = #tpu.dot_dimension_numbers<[1], [0], [0], [1], [0, 0, 1, 1], [], []>} : vector<24x64xf32>, vector<64x384xf32>, vector<24x384xf32> -> vector<24x384xf32>
    %219 = vector.extract_strided_slice %218 {offsets = [0, 0], sizes = [24, 64], strides = [1, 1]} : vector<24x384xf32> to vector<24x64xf32>
    %220 = arith.addf %213, %219 : vector<24x64xf32>
    %221 = arith.negf %220 : vector<24x64xf32>
    %222 = math.exp %221 : vector<24x64xf32>
    %cst_24 = arith.constant 1.000000e+00 : f32
    %223 = vector.broadcast %cst_24 : f32 to vector<24x64xf32>
    %224 = arith.addf %223, %222 : vector<24x64xf32>
    %225 = arith.divf %223, %224 : vector<24x64xf32>
    %226 = vector.extract_strided_slice %218 {offsets = [0, 128], sizes = [24, 64], strides = [1, 1]} : vector<24x384xf32> to vector<24x64xf32>
    %227 = arith.addf %215, %226 : vector<24x64xf32>
    %228 = arith.negf %227 : vector<24x64xf32>
    %229 = math.exp %228 : vector<24x64xf32>
    %cst_25 = arith.constant 1.000000e+00 : f32
    %230 = vector.broadcast %cst_25 : f32 to vector<24x64xf32>
    %231 = arith.addf %230, %229 : vector<24x64xf32>
    %232 = arith.divf %230, %231 : vector<24x64xf32>
    %233 = vector.extract_strided_slice %218 {offsets = [0, 256], sizes = [24, 64], strides = [1, 1]} : vector<24x384xf32> to vector<24x64xf32>
    %234 = arith.addf %233, %23 : vector<24x64xf32>
    %235 = arith.mulf %225, %234 : vector<24x64xf32>
    %236 = arith.addf %217, %235 : vector<24x64xf32>
    %237 = math.tanh %236 : vector<24x64xf32>
    %cst_26 = arith.constant 1.000000e+00 : f32
    %238 = vector.broadcast %cst_26 : f32 to vector<24x64xf32>
    %239 = arith.subf %238, %232 : vector<24x64xf32>
    %240 = arith.mulf %239, %237 : vector<24x64xf32>
    %241 = arith.mulf %232, %204 : vector<24x64xf32>
    %242 = arith.addf %240, %241 : vector<24x64xf32>
    %243 = vector.extract_strided_slice %0 {offsets = [0, 6], sizes = [24, 1], strides = [1, 1]} : vector<24x16xf32> to vector<24x1xf32>
    %244 = vector.shape_cast %243 : vector<24x1xf32> to vector<24x1xf32>
    %245 = vector.broadcast %244 : vector<24x1xf32> to vector<24x32xf32>
    %246 = vector.extract_strided_slice %0 {offsets = [0, 9], sizes = [24, 1], strides = [1, 1]} : vector<24x16xf32> to vector<24x1xf32>
    %247 = vector.shape_cast %246 : vector<24x1xf32> to vector<24x1xf32>
    %248 = vector.broadcast %247 : vector<24x1xf32> to vector<24x32xf32>
    %249 = tpu.concatenate %245, %248 in 1 : vector<24x32xf32>, vector<24x32xf32> -> vector<24x64xf32>
    %250 = arith.mulf %249, %5 : vector<24x64xf32>
    %251 = arith.addf %250, %14 : vector<24x64xf32>
    %252 = arith.mulf %249, %8 : vector<24x64xf32>
    %253 = arith.addf %252, %17 : vector<24x64xf32>
    %254 = arith.mulf %249, %11 : vector<24x64xf32>
    %255 = arith.addf %254, %20 : vector<24x64xf32>
    %cst_27 = arith.constant dense<0.000000e+00> : vector<24x384xf32>
    %256 = tpu.matmul %242, %2, %cst_27 {dimension_numbers = #tpu.dot_dimension_numbers<[1], [0], [0], [1], [0, 0, 1, 1], [], []>} : vector<24x64xf32>, vector<64x384xf32>, vector<24x384xf32> -> vector<24x384xf32>
    %257 = vector.extract_strided_slice %256 {offsets = [0, 0], sizes = [24, 64], strides = [1, 1]} : vector<24x384xf32> to vector<24x64xf32>
    %258 = arith.addf %251, %257 : vector<24x64xf32>
    %259 = arith.negf %258 : vector<24x64xf32>
    %260 = math.exp %259 : vector<24x64xf32>
    %cst_28 = arith.constant 1.000000e+00 : f32
    %261 = vector.broadcast %cst_28 : f32 to vector<24x64xf32>
    %262 = arith.addf %261, %260 : vector<24x64xf32>
    %263 = arith.divf %261, %262 : vector<24x64xf32>
    %264 = vector.extract_strided_slice %256 {offsets = [0, 128], sizes = [24, 64], strides = [1, 1]} : vector<24x384xf32> to vector<24x64xf32>
    %265 = arith.addf %253, %264 : vector<24x64xf32>
    %266 = arith.negf %265 : vector<24x64xf32>
    %267 = math.exp %266 : vector<24x64xf32>
    %cst_29 = arith.constant 1.000000e+00 : f32
    %268 = vector.broadcast %cst_29 : f32 to vector<24x64xf32>
    %269 = arith.addf %268, %267 : vector<24x64xf32>
    %270 = arith.divf %268, %269 : vector<24x64xf32>
    %271 = vector.extract_strided_slice %256 {offsets = [0, 256], sizes = [24, 64], strides = [1, 1]} : vector<24x384xf32> to vector<24x64xf32>
    %272 = arith.addf %271, %23 : vector<24x64xf32>
    %273 = arith.mulf %263, %272 : vector<24x64xf32>
    %274 = arith.addf %255, %273 : vector<24x64xf32>
    %275 = math.tanh %274 : vector<24x64xf32>
    %cst_30 = arith.constant 1.000000e+00 : f32
    %276 = vector.broadcast %cst_30 : f32 to vector<24x64xf32>
    %277 = arith.subf %276, %270 : vector<24x64xf32>
    %278 = arith.mulf %277, %275 : vector<24x64xf32>
    %279 = arith.mulf %270, %242 : vector<24x64xf32>
    %280 = arith.addf %278, %279 : vector<24x64xf32>
    %281 = vector.extract_strided_slice %0 {offsets = [0, 7], sizes = [24, 1], strides = [1, 1]} : vector<24x16xf32> to vector<24x1xf32>
    %282 = vector.shape_cast %281 : vector<24x1xf32> to vector<24x1xf32>
    %283 = vector.broadcast %282 : vector<24x1xf32> to vector<24x32xf32>
    %284 = vector.extract_strided_slice %0 {offsets = [0, 8], sizes = [24, 1], strides = [1, 1]} : vector<24x16xf32> to vector<24x1xf32>
    %285 = vector.shape_cast %284 : vector<24x1xf32> to vector<24x1xf32>
    %286 = vector.broadcast %285 : vector<24x1xf32> to vector<24x32xf32>
    %287 = tpu.concatenate %283, %286 in 1 : vector<24x32xf32>, vector<24x32xf32> -> vector<24x64xf32>
    %288 = arith.mulf %287, %5 : vector<24x64xf32>
    %289 = arith.addf %288, %14 : vector<24x64xf32>
    %290 = arith.mulf %287, %8 : vector<24x64xf32>
    %291 = arith.addf %290, %17 : vector<24x64xf32>
    %292 = arith.mulf %287, %11 : vector<24x64xf32>
    %293 = arith.addf %292, %20 : vector<24x64xf32>
    %cst_31 = arith.constant dense<0.000000e+00> : vector<24x384xf32>
    %294 = tpu.matmul %280, %2, %cst_31 {dimension_numbers = #tpu.dot_dimension_numbers<[1], [0], [0], [1], [0, 0, 1, 1], [], []>} : vector<24x64xf32>, vector<64x384xf32>, vector<24x384xf32> -> vector<24x384xf32>
    %295 = vector.extract_strided_slice %294 {offsets = [0, 0], sizes = [24, 64], strides = [1, 1]} : vector<24x384xf32> to vector<24x64xf32>
    %296 = arith.addf %289, %295 : vector<24x64xf32>
    %297 = arith.negf %296 : vector<24x64xf32>
    %298 = math.exp %297 : vector<24x64xf32>
    %cst_32 = arith.constant 1.000000e+00 : f32
    %299 = vector.broadcast %cst_32 : f32 to vector<24x64xf32>
    %300 = arith.addf %299, %298 : vector<24x64xf32>
    %301 = arith.divf %299, %300 : vector<24x64xf32>
    %302 = vector.extract_strided_slice %294 {offsets = [0, 128], sizes = [24, 64], strides = [1, 1]} : vector<24x384xf32> to vector<24x64xf32>
    %303 = arith.addf %291, %302 : vector<24x64xf32>
    %304 = arith.negf %303 : vector<24x64xf32>
    %305 = math.exp %304 : vector<24x64xf32>
    %cst_33 = arith.constant 1.000000e+00 : f32
    %306 = vector.broadcast %cst_33 : f32 to vector<24x64xf32>
    %307 = arith.addf %306, %305 : vector<24x64xf32>
    %308 = arith.divf %306, %307 : vector<24x64xf32>
    %309 = vector.extract_strided_slice %294 {offsets = [0, 256], sizes = [24, 64], strides = [1, 1]} : vector<24x384xf32> to vector<24x64xf32>
    %310 = arith.addf %309, %23 : vector<24x64xf32>
    %311 = arith.mulf %301, %310 : vector<24x64xf32>
    %312 = arith.addf %293, %311 : vector<24x64xf32>
    %313 = math.tanh %312 : vector<24x64xf32>
    %cst_34 = arith.constant 1.000000e+00 : f32
    %314 = vector.broadcast %cst_34 : f32 to vector<24x64xf32>
    %315 = arith.subf %314, %308 : vector<24x64xf32>
    %316 = arith.mulf %315, %313 : vector<24x64xf32>
    %317 = arith.mulf %308, %280 : vector<24x64xf32>
    %318 = arith.addf %316, %317 : vector<24x64xf32>
    %319 = vector.extract_strided_slice %0 {offsets = [0, 8], sizes = [24, 1], strides = [1, 1]} : vector<24x16xf32> to vector<24x1xf32>
    %320 = vector.shape_cast %319 : vector<24x1xf32> to vector<24x1xf32>
    %321 = vector.broadcast %320 : vector<24x1xf32> to vector<24x32xf32>
    %322 = vector.extract_strided_slice %0 {offsets = [0, 7], sizes = [24, 1], strides = [1, 1]} : vector<24x16xf32> to vector<24x1xf32>
    %323 = vector.shape_cast %322 : vector<24x1xf32> to vector<24x1xf32>
    %324 = vector.broadcast %323 : vector<24x1xf32> to vector<24x32xf32>
    %325 = tpu.concatenate %321, %324 in 1 : vector<24x32xf32>, vector<24x32xf32> -> vector<24x64xf32>
    %326 = arith.mulf %325, %5 : vector<24x64xf32>
    %327 = arith.addf %326, %14 : vector<24x64xf32>
    %328 = arith.mulf %325, %8 : vector<24x64xf32>
    %329 = arith.addf %328, %17 : vector<24x64xf32>
    %330 = arith.mulf %325, %11 : vector<24x64xf32>
    %331 = arith.addf %330, %20 : vector<24x64xf32>
    %cst_35 = arith.constant dense<0.000000e+00> : vector<24x384xf32>
    %332 = tpu.matmul %318, %2, %cst_35 {dimension_numbers = #tpu.dot_dimension_numbers<[1], [0], [0], [1], [0, 0, 1, 1], [], []>} : vector<24x64xf32>, vector<64x384xf32>, vector<24x384xf32> -> vector<24x384xf32>
    %333 = vector.extract_strided_slice %332 {offsets = [0, 0], sizes = [24, 64], strides = [1, 1]} : vector<24x384xf32> to vector<24x64xf32>
    %334 = arith.addf %327, %333 : vector<24x64xf32>
    %335 = arith.negf %334 : vector<24x64xf32>
    %336 = math.exp %335 : vector<24x64xf32>
    %cst_36 = arith.constant 1.000000e+00 : f32
    %337 = vector.broadcast %cst_36 : f32 to vector<24x64xf32>
    %338 = arith.addf %337, %336 : vector<24x64xf32>
    %339 = arith.divf %337, %338 : vector<24x64xf32>
    %340 = vector.extract_strided_slice %332 {offsets = [0, 128], sizes = [24, 64], strides = [1, 1]} : vector<24x384xf32> to vector<24x64xf32>
    %341 = arith.addf %329, %340 : vector<24x64xf32>
    %342 = arith.negf %341 : vector<24x64xf32>
    %343 = math.exp %342 : vector<24x64xf32>
    %cst_37 = arith.constant 1.000000e+00 : f32
    %344 = vector.broadcast %cst_37 : f32 to vector<24x64xf32>
    %345 = arith.addf %344, %343 : vector<24x64xf32>
    %346 = arith.divf %344, %345 : vector<24x64xf32>
    %347 = vector.extract_strided_slice %332 {offsets = [0, 256], sizes = [24, 64], strides = [1, 1]} : vector<24x384xf32> to vector<24x64xf32>
    %348 = arith.addf %347, %23 : vector<24x64xf32>
    %349 = arith.mulf %339, %348 : vector<24x64xf32>
    %350 = arith.addf %331, %349 : vector<24x64xf32>
    %351 = math.tanh %350 : vector<24x64xf32>
    %cst_38 = arith.constant 1.000000e+00 : f32
    %352 = vector.broadcast %cst_38 : f32 to vector<24x64xf32>
    %353 = arith.subf %352, %346 : vector<24x64xf32>
    %354 = arith.mulf %353, %351 : vector<24x64xf32>
    %355 = arith.mulf %346, %318 : vector<24x64xf32>
    %356 = arith.addf %354, %355 : vector<24x64xf32>
    %357 = vector.extract_strided_slice %0 {offsets = [0, 9], sizes = [24, 1], strides = [1, 1]} : vector<24x16xf32> to vector<24x1xf32>
    %358 = vector.shape_cast %357 : vector<24x1xf32> to vector<24x1xf32>
    %359 = vector.broadcast %358 : vector<24x1xf32> to vector<24x32xf32>
    %360 = vector.extract_strided_slice %0 {offsets = [0, 6], sizes = [24, 1], strides = [1, 1]} : vector<24x16xf32> to vector<24x1xf32>
    %361 = vector.shape_cast %360 : vector<24x1xf32> to vector<24x1xf32>
    %362 = vector.broadcast %361 : vector<24x1xf32> to vector<24x32xf32>
    %363 = tpu.concatenate %359, %362 in 1 : vector<24x32xf32>, vector<24x32xf32> -> vector<24x64xf32>
    %364 = arith.mulf %363, %5 : vector<24x64xf32>
    %365 = arith.addf %364, %14 : vector<24x64xf32>
    %366 = arith.mulf %363, %8 : vector<24x64xf32>
    %367 = arith.addf %366, %17 : vector<24x64xf32>
    %368 = arith.mulf %363, %11 : vector<24x64xf32>
    %369 = arith.addf %368, %20 : vector<24x64xf32>
    %cst_39 = arith.constant dense<0.000000e+00> : vector<24x384xf32>
    %370 = tpu.matmul %356, %2, %cst_39 {dimension_numbers = #tpu.dot_dimension_numbers<[1], [0], [0], [1], [0, 0, 1, 1], [], []>} : vector<24x64xf32>, vector<64x384xf32>, vector<24x384xf32> -> vector<24x384xf32>
    %371 = vector.extract_strided_slice %370 {offsets = [0, 0], sizes = [24, 64], strides = [1, 1]} : vector<24x384xf32> to vector<24x64xf32>
    %372 = arith.addf %365, %371 : vector<24x64xf32>
    %373 = arith.negf %372 : vector<24x64xf32>
    %374 = math.exp %373 : vector<24x64xf32>
    %cst_40 = arith.constant 1.000000e+00 : f32
    %375 = vector.broadcast %cst_40 : f32 to vector<24x64xf32>
    %376 = arith.addf %375, %374 : vector<24x64xf32>
    %377 = arith.divf %375, %376 : vector<24x64xf32>
    %378 = vector.extract_strided_slice %370 {offsets = [0, 128], sizes = [24, 64], strides = [1, 1]} : vector<24x384xf32> to vector<24x64xf32>
    %379 = arith.addf %367, %378 : vector<24x64xf32>
    %380 = arith.negf %379 : vector<24x64xf32>
    %381 = math.exp %380 : vector<24x64xf32>
    %cst_41 = arith.constant 1.000000e+00 : f32
    %382 = vector.broadcast %cst_41 : f32 to vector<24x64xf32>
    %383 = arith.addf %382, %381 : vector<24x64xf32>
    %384 = arith.divf %382, %383 : vector<24x64xf32>
    %385 = vector.extract_strided_slice %370 {offsets = [0, 256], sizes = [24, 64], strides = [1, 1]} : vector<24x384xf32> to vector<24x64xf32>
    %386 = arith.addf %385, %23 : vector<24x64xf32>
    %387 = arith.mulf %377, %386 : vector<24x64xf32>
    %388 = arith.addf %369, %387 : vector<24x64xf32>
    %389 = math.tanh %388 : vector<24x64xf32>
    %cst_42 = arith.constant 1.000000e+00 : f32
    %390 = vector.broadcast %cst_42 : f32 to vector<24x64xf32>
    %391 = arith.subf %390, %384 : vector<24x64xf32>
    %392 = arith.mulf %391, %389 : vector<24x64xf32>
    %393 = arith.mulf %384, %356 : vector<24x64xf32>
    %394 = arith.addf %392, %393 : vector<24x64xf32>
    %395 = vector.extract_strided_slice %0 {offsets = [0, 10], sizes = [24, 1], strides = [1, 1]} : vector<24x16xf32> to vector<24x1xf32>
    %396 = vector.shape_cast %395 : vector<24x1xf32> to vector<24x1xf32>
    %397 = vector.broadcast %396 : vector<24x1xf32> to vector<24x32xf32>
    %398 = vector.extract_strided_slice %0 {offsets = [0, 5], sizes = [24, 1], strides = [1, 1]} : vector<24x16xf32> to vector<24x1xf32>
    %399 = vector.shape_cast %398 : vector<24x1xf32> to vector<24x1xf32>
    %400 = vector.broadcast %399 : vector<24x1xf32> to vector<24x32xf32>
    %401 = tpu.concatenate %397, %400 in 1 : vector<24x32xf32>, vector<24x32xf32> -> vector<24x64xf32>
    %402 = arith.mulf %401, %5 : vector<24x64xf32>
    %403 = arith.addf %402, %14 : vector<24x64xf32>
    %404 = arith.mulf %401, %8 : vector<24x64xf32>
    %405 = arith.addf %404, %17 : vector<24x64xf32>
    %406 = arith.mulf %401, %11 : vector<24x64xf32>
    %407 = arith.addf %406, %20 : vector<24x64xf32>
    %cst_43 = arith.constant dense<0.000000e+00> : vector<24x384xf32>
    %408 = tpu.matmul %394, %2, %cst_43 {dimension_numbers = #tpu.dot_dimension_numbers<[1], [0], [0], [1], [0, 0, 1, 1], [], []>} : vector<24x64xf32>, vector<64x384xf32>, vector<24x384xf32> -> vector<24x384xf32>
    %409 = vector.extract_strided_slice %408 {offsets = [0, 0], sizes = [24, 64], strides = [1, 1]} : vector<24x384xf32> to vector<24x64xf32>
    %410 = arith.addf %403, %409 : vector<24x64xf32>
    %411 = arith.negf %410 : vector<24x64xf32>
    %412 = math.exp %411 : vector<24x64xf32>
    %cst_44 = arith.constant 1.000000e+00 : f32
    %413 = vector.broadcast %cst_44 : f32 to vector<24x64xf32>
    %414 = arith.addf %413, %412 : vector<24x64xf32>
    %415 = arith.divf %413, %414 : vector<24x64xf32>
    %416 = vector.extract_strided_slice %408 {offsets = [0, 128], sizes = [24, 64], strides = [1, 1]} : vector<24x384xf32> to vector<24x64xf32>
    %417 = arith.addf %405, %416 : vector<24x64xf32>
    %418 = arith.negf %417 : vector<24x64xf32>
    %419 = math.exp %418 : vector<24x64xf32>
    %cst_45 = arith.constant 1.000000e+00 : f32
    %420 = vector.broadcast %cst_45 : f32 to vector<24x64xf32>
    %421 = arith.addf %420, %419 : vector<24x64xf32>
    %422 = arith.divf %420, %421 : vector<24x64xf32>
    %423 = vector.extract_strided_slice %408 {offsets = [0, 256], sizes = [24, 64], strides = [1, 1]} : vector<24x384xf32> to vector<24x64xf32>
    %424 = arith.addf %423, %23 : vector<24x64xf32>
    %425 = arith.mulf %415, %424 : vector<24x64xf32>
    %426 = arith.addf %407, %425 : vector<24x64xf32>
    %427 = math.tanh %426 : vector<24x64xf32>
    %cst_46 = arith.constant 1.000000e+00 : f32
    %428 = vector.broadcast %cst_46 : f32 to vector<24x64xf32>
    %429 = arith.subf %428, %422 : vector<24x64xf32>
    %430 = arith.mulf %429, %427 : vector<24x64xf32>
    %431 = arith.mulf %422, %394 : vector<24x64xf32>
    %432 = arith.addf %430, %431 : vector<24x64xf32>
    %433 = vector.extract_strided_slice %0 {offsets = [0, 11], sizes = [24, 1], strides = [1, 1]} : vector<24x16xf32> to vector<24x1xf32>
    %434 = vector.shape_cast %433 : vector<24x1xf32> to vector<24x1xf32>
    %435 = vector.broadcast %434 : vector<24x1xf32> to vector<24x32xf32>
    %436 = vector.extract_strided_slice %0 {offsets = [0, 4], sizes = [24, 1], strides = [1, 1]} : vector<24x16xf32> to vector<24x1xf32>
    %437 = vector.shape_cast %436 : vector<24x1xf32> to vector<24x1xf32>
    %438 = vector.broadcast %437 : vector<24x1xf32> to vector<24x32xf32>
    %439 = tpu.concatenate %435, %438 in 1 : vector<24x32xf32>, vector<24x32xf32> -> vector<24x64xf32>
    %440 = arith.mulf %439, %5 : vector<24x64xf32>
    %441 = arith.addf %440, %14 : vector<24x64xf32>
    %442 = arith.mulf %439, %8 : vector<24x64xf32>
    %443 = arith.addf %442, %17 : vector<24x64xf32>
    %444 = arith.mulf %439, %11 : vector<24x64xf32>
    %445 = arith.addf %444, %20 : vector<24x64xf32>
    %cst_47 = arith.constant dense<0.000000e+00> : vector<24x384xf32>
    %446 = tpu.matmul %432, %2, %cst_47 {dimension_numbers = #tpu.dot_dimension_numbers<[1], [0], [0], [1], [0, 0, 1, 1], [], []>} : vector<24x64xf32>, vector<64x384xf32>, vector<24x384xf32> -> vector<24x384xf32>
    %447 = vector.extract_strided_slice %446 {offsets = [0, 0], sizes = [24, 64], strides = [1, 1]} : vector<24x384xf32> to vector<24x64xf32>
    %448 = arith.addf %441, %447 : vector<24x64xf32>
    %449 = arith.negf %448 : vector<24x64xf32>
    %450 = math.exp %449 : vector<24x64xf32>
    %cst_48 = arith.constant 1.000000e+00 : f32
    %451 = vector.broadcast %cst_48 : f32 to vector<24x64xf32>
    %452 = arith.addf %451, %450 : vector<24x64xf32>
    %453 = arith.divf %451, %452 : vector<24x64xf32>
    %454 = vector.extract_strided_slice %446 {offsets = [0, 128], sizes = [24, 64], strides = [1, 1]} : vector<24x384xf32> to vector<24x64xf32>
    %455 = arith.addf %443, %454 : vector<24x64xf32>
    %456 = arith.negf %455 : vector<24x64xf32>
    %457 = math.exp %456 : vector<24x64xf32>
    %cst_49 = arith.constant 1.000000e+00 : f32
    %458 = vector.broadcast %cst_49 : f32 to vector<24x64xf32>
    %459 = arith.addf %458, %457 : vector<24x64xf32>
    %460 = arith.divf %458, %459 : vector<24x64xf32>
    %461 = vector.extract_strided_slice %446 {offsets = [0, 256], sizes = [24, 64], strides = [1, 1]} : vector<24x384xf32> to vector<24x64xf32>
    %462 = arith.addf %461, %23 : vector<24x64xf32>
    %463 = arith.mulf %453, %462 : vector<24x64xf32>
    %464 = arith.addf %445, %463 : vector<24x64xf32>
    %465 = math.tanh %464 : vector<24x64xf32>
    %cst_50 = arith.constant 1.000000e+00 : f32
    %466 = vector.broadcast %cst_50 : f32 to vector<24x64xf32>
    %467 = arith.subf %466, %460 : vector<24x64xf32>
    %468 = arith.mulf %467, %465 : vector<24x64xf32>
    %469 = arith.mulf %460, %432 : vector<24x64xf32>
    %470 = arith.addf %468, %469 : vector<24x64xf32>
    %471 = vector.extract_strided_slice %0 {offsets = [0, 12], sizes = [24, 1], strides = [1, 1]} : vector<24x16xf32> to vector<24x1xf32>
    %472 = vector.shape_cast %471 : vector<24x1xf32> to vector<24x1xf32>
    %473 = vector.broadcast %472 : vector<24x1xf32> to vector<24x32xf32>
    %474 = vector.extract_strided_slice %0 {offsets = [0, 3], sizes = [24, 1], strides = [1, 1]} : vector<24x16xf32> to vector<24x1xf32>
    %475 = vector.shape_cast %474 : vector<24x1xf32> to vector<24x1xf32>
    %476 = vector.broadcast %475 : vector<24x1xf32> to vector<24x32xf32>
    %477 = tpu.concatenate %473, %476 in 1 : vector<24x32xf32>, vector<24x32xf32> -> vector<24x64xf32>
    %478 = arith.mulf %477, %5 : vector<24x64xf32>
    %479 = arith.addf %478, %14 : vector<24x64xf32>
    %480 = arith.mulf %477, %8 : vector<24x64xf32>
    %481 = arith.addf %480, %17 : vector<24x64xf32>
    %482 = arith.mulf %477, %11 : vector<24x64xf32>
    %483 = arith.addf %482, %20 : vector<24x64xf32>
    %cst_51 = arith.constant dense<0.000000e+00> : vector<24x384xf32>
    %484 = tpu.matmul %470, %2, %cst_51 {dimension_numbers = #tpu.dot_dimension_numbers<[1], [0], [0], [1], [0, 0, 1, 1], [], []>} : vector<24x64xf32>, vector<64x384xf32>, vector<24x384xf32> -> vector<24x384xf32>
    %485 = vector.extract_strided_slice %484 {offsets = [0, 0], sizes = [24, 64], strides = [1, 1]} : vector<24x384xf32> to vector<24x64xf32>
    %486 = arith.addf %479, %485 : vector<24x64xf32>
    %487 = arith.negf %486 : vector<24x64xf32>
    %488 = math.exp %487 : vector<24x64xf32>
    %cst_52 = arith.constant 1.000000e+00 : f32
    %489 = vector.broadcast %cst_52 : f32 to vector<24x64xf32>
    %490 = arith.addf %489, %488 : vector<24x64xf32>
    %491 = arith.divf %489, %490 : vector<24x64xf32>
    %492 = vector.extract_strided_slice %484 {offsets = [0, 128], sizes = [24, 64], strides = [1, 1]} : vector<24x384xf32> to vector<24x64xf32>
    %493 = arith.addf %481, %492 : vector<24x64xf32>
    %494 = arith.negf %493 : vector<24x64xf32>
    %495 = math.exp %494 : vector<24x64xf32>
    %cst_53 = arith.constant 1.000000e+00 : f32
    %496 = vector.broadcast %cst_53 : f32 to vector<24x64xf32>
    %497 = arith.addf %496, %495 : vector<24x64xf32>
    %498 = arith.divf %496, %497 : vector<24x64xf32>
    %499 = vector.extract_strided_slice %484 {offsets = [0, 256], sizes = [24, 64], strides = [1, 1]} : vector<24x384xf32> to vector<24x64xf32>
    %500 = arith.addf %499, %23 : vector<24x64xf32>
    %501 = arith.mulf %491, %500 : vector<24x64xf32>
    %502 = arith.addf %483, %501 : vector<24x64xf32>
    %503 = math.tanh %502 : vector<24x64xf32>
    %cst_54 = arith.constant 1.000000e+00 : f32
    %504 = vector.broadcast %cst_54 : f32 to vector<24x64xf32>
    %505 = arith.subf %504, %498 : vector<24x64xf32>
    %506 = arith.mulf %505, %503 : vector<24x64xf32>
    %507 = arith.mulf %498, %470 : vector<24x64xf32>
    %508 = arith.addf %506, %507 : vector<24x64xf32>
    %509 = vector.extract_strided_slice %0 {offsets = [0, 13], sizes = [24, 1], strides = [1, 1]} : vector<24x16xf32> to vector<24x1xf32>
    %510 = vector.shape_cast %509 : vector<24x1xf32> to vector<24x1xf32>
    %511 = vector.broadcast %510 : vector<24x1xf32> to vector<24x32xf32>
    %512 = vector.extract_strided_slice %0 {offsets = [0, 2], sizes = [24, 1], strides = [1, 1]} : vector<24x16xf32> to vector<24x1xf32>
    %513 = vector.shape_cast %512 : vector<24x1xf32> to vector<24x1xf32>
    %514 = vector.broadcast %513 : vector<24x1xf32> to vector<24x32xf32>
    %515 = tpu.concatenate %511, %514 in 1 : vector<24x32xf32>, vector<24x32xf32> -> vector<24x64xf32>
    %516 = arith.mulf %515, %5 : vector<24x64xf32>
    %517 = arith.addf %516, %14 : vector<24x64xf32>
    %518 = arith.mulf %515, %8 : vector<24x64xf32>
    %519 = arith.addf %518, %17 : vector<24x64xf32>
    %520 = arith.mulf %515, %11 : vector<24x64xf32>
    %521 = arith.addf %520, %20 : vector<24x64xf32>
    %cst_55 = arith.constant dense<0.000000e+00> : vector<24x384xf32>
    %522 = tpu.matmul %508, %2, %cst_55 {dimension_numbers = #tpu.dot_dimension_numbers<[1], [0], [0], [1], [0, 0, 1, 1], [], []>} : vector<24x64xf32>, vector<64x384xf32>, vector<24x384xf32> -> vector<24x384xf32>
    %523 = vector.extract_strided_slice %522 {offsets = [0, 0], sizes = [24, 64], strides = [1, 1]} : vector<24x384xf32> to vector<24x64xf32>
    %524 = arith.addf %517, %523 : vector<24x64xf32>
    %525 = arith.negf %524 : vector<24x64xf32>
    %526 = math.exp %525 : vector<24x64xf32>
    %cst_56 = arith.constant 1.000000e+00 : f32
    %527 = vector.broadcast %cst_56 : f32 to vector<24x64xf32>
    %528 = arith.addf %527, %526 : vector<24x64xf32>
    %529 = arith.divf %527, %528 : vector<24x64xf32>
    %530 = vector.extract_strided_slice %522 {offsets = [0, 128], sizes = [24, 64], strides = [1, 1]} : vector<24x384xf32> to vector<24x64xf32>
    %531 = arith.addf %519, %530 : vector<24x64xf32>
    %532 = arith.negf %531 : vector<24x64xf32>
    %533 = math.exp %532 : vector<24x64xf32>
    %cst_57 = arith.constant 1.000000e+00 : f32
    %534 = vector.broadcast %cst_57 : f32 to vector<24x64xf32>
    %535 = arith.addf %534, %533 : vector<24x64xf32>
    %536 = arith.divf %534, %535 : vector<24x64xf32>
    %537 = vector.extract_strided_slice %522 {offsets = [0, 256], sizes = [24, 64], strides = [1, 1]} : vector<24x384xf32> to vector<24x64xf32>
    %538 = arith.addf %537, %23 : vector<24x64xf32>
    %539 = arith.mulf %529, %538 : vector<24x64xf32>
    %540 = arith.addf %521, %539 : vector<24x64xf32>
    %541 = math.tanh %540 : vector<24x64xf32>
    %cst_58 = arith.constant 1.000000e+00 : f32
    %542 = vector.broadcast %cst_58 : f32 to vector<24x64xf32>
    %543 = arith.subf %542, %536 : vector<24x64xf32>
    %544 = arith.mulf %543, %541 : vector<24x64xf32>
    %545 = arith.mulf %536, %508 : vector<24x64xf32>
    %546 = arith.addf %544, %545 : vector<24x64xf32>
    %547 = vector.extract_strided_slice %0 {offsets = [0, 14], sizes = [24, 1], strides = [1, 1]} : vector<24x16xf32> to vector<24x1xf32>
    %548 = vector.shape_cast %547 : vector<24x1xf32> to vector<24x1xf32>
    %549 = vector.broadcast %548 : vector<24x1xf32> to vector<24x32xf32>
    %550 = vector.extract_strided_slice %0 {offsets = [0, 1], sizes = [24, 1], strides = [1, 1]} : vector<24x16xf32> to vector<24x1xf32>
    %551 = vector.shape_cast %550 : vector<24x1xf32> to vector<24x1xf32>
    %552 = vector.broadcast %551 : vector<24x1xf32> to vector<24x32xf32>
    %553 = tpu.concatenate %549, %552 in 1 : vector<24x32xf32>, vector<24x32xf32> -> vector<24x64xf32>
    %554 = arith.mulf %553, %5 : vector<24x64xf32>
    %555 = arith.addf %554, %14 : vector<24x64xf32>
    %556 = arith.mulf %553, %8 : vector<24x64xf32>
    %557 = arith.addf %556, %17 : vector<24x64xf32>
    %558 = arith.mulf %553, %11 : vector<24x64xf32>
    %559 = arith.addf %558, %20 : vector<24x64xf32>
    %cst_59 = arith.constant dense<0.000000e+00> : vector<24x384xf32>
    %560 = tpu.matmul %546, %2, %cst_59 {dimension_numbers = #tpu.dot_dimension_numbers<[1], [0], [0], [1], [0, 0, 1, 1], [], []>} : vector<24x64xf32>, vector<64x384xf32>, vector<24x384xf32> -> vector<24x384xf32>
    %561 = vector.extract_strided_slice %560 {offsets = [0, 0], sizes = [24, 64], strides = [1, 1]} : vector<24x384xf32> to vector<24x64xf32>
    %562 = arith.addf %555, %561 : vector<24x64xf32>
    %563 = arith.negf %562 : vector<24x64xf32>
    %564 = math.exp %563 : vector<24x64xf32>
    %cst_60 = arith.constant 1.000000e+00 : f32
    %565 = vector.broadcast %cst_60 : f32 to vector<24x64xf32>
    %566 = arith.addf %565, %564 : vector<24x64xf32>
    %567 = arith.divf %565, %566 : vector<24x64xf32>
    %568 = vector.extract_strided_slice %560 {offsets = [0, 128], sizes = [24, 64], strides = [1, 1]} : vector<24x384xf32> to vector<24x64xf32>
    %569 = arith.addf %557, %568 : vector<24x64xf32>
    %570 = arith.negf %569 : vector<24x64xf32>
    %571 = math.exp %570 : vector<24x64xf32>
    %cst_61 = arith.constant 1.000000e+00 : f32
    %572 = vector.broadcast %cst_61 : f32 to vector<24x64xf32>
    %573 = arith.addf %572, %571 : vector<24x64xf32>
    %574 = arith.divf %572, %573 : vector<24x64xf32>
    %575 = vector.extract_strided_slice %560 {offsets = [0, 256], sizes = [24, 64], strides = [1, 1]} : vector<24x384xf32> to vector<24x64xf32>
    %576 = arith.addf %575, %23 : vector<24x64xf32>
    %577 = arith.mulf %567, %576 : vector<24x64xf32>
    %578 = arith.addf %559, %577 : vector<24x64xf32>
    %579 = math.tanh %578 : vector<24x64xf32>
    %cst_62 = arith.constant 1.000000e+00 : f32
    %580 = vector.broadcast %cst_62 : f32 to vector<24x64xf32>
    %581 = arith.subf %580, %574 : vector<24x64xf32>
    %582 = arith.mulf %581, %579 : vector<24x64xf32>
    %583 = arith.mulf %574, %546 : vector<24x64xf32>
    %584 = arith.addf %582, %583 : vector<24x64xf32>
    %585 = vector.extract_strided_slice %0 {offsets = [0, 15], sizes = [24, 1], strides = [1, 1]} : vector<24x16xf32> to vector<24x1xf32>
    %586 = vector.shape_cast %585 : vector<24x1xf32> to vector<24x1xf32>
    %587 = vector.broadcast %586 : vector<24x1xf32> to vector<24x32xf32>
    %588 = vector.extract_strided_slice %0 {offsets = [0, 0], sizes = [24, 1], strides = [1, 1]} : vector<24x16xf32> to vector<24x1xf32>
    %589 = vector.shape_cast %588 : vector<24x1xf32> to vector<24x1xf32>
    %590 = vector.broadcast %589 : vector<24x1xf32> to vector<24x32xf32>
    %591 = tpu.concatenate %587, %590 in 1 : vector<24x32xf32>, vector<24x32xf32> -> vector<24x64xf32>
    %592 = arith.mulf %591, %5 : vector<24x64xf32>
    %593 = arith.addf %592, %14 : vector<24x64xf32>
    %594 = arith.mulf %591, %8 : vector<24x64xf32>
    %595 = arith.addf %594, %17 : vector<24x64xf32>
    %596 = arith.mulf %591, %11 : vector<24x64xf32>
    %597 = arith.addf %596, %20 : vector<24x64xf32>
    %cst_63 = arith.constant dense<0.000000e+00> : vector<24x384xf32>
    %598 = tpu.matmul %584, %2, %cst_63 {dimension_numbers = #tpu.dot_dimension_numbers<[1], [0], [0], [1], [0, 0, 1, 1], [], []>} : vector<24x64xf32>, vector<64x384xf32>, vector<24x384xf32> -> vector<24x384xf32>
    %599 = vector.extract_strided_slice %598 {offsets = [0, 0], sizes = [24, 64], strides = [1, 1]} : vector<24x384xf32> to vector<24x64xf32>
    %600 = arith.addf %593, %599 : vector<24x64xf32>
    %601 = arith.negf %600 : vector<24x64xf32>
    %602 = math.exp %601 : vector<24x64xf32>
    %cst_64 = arith.constant 1.000000e+00 : f32
    %603 = vector.broadcast %cst_64 : f32 to vector<24x64xf32>
    %604 = arith.addf %603, %602 : vector<24x64xf32>
    %605 = arith.divf %603, %604 : vector<24x64xf32>
    %606 = vector.extract_strided_slice %598 {offsets = [0, 128], sizes = [24, 64], strides = [1, 1]} : vector<24x384xf32> to vector<24x64xf32>
    %607 = arith.addf %595, %606 : vector<24x64xf32>
    %608 = arith.negf %607 : vector<24x64xf32>
    %609 = math.exp %608 : vector<24x64xf32>
    %cst_65 = arith.constant 1.000000e+00 : f32
    %610 = vector.broadcast %cst_65 : f32 to vector<24x64xf32>
    %611 = arith.addf %610, %609 : vector<24x64xf32>
    %612 = arith.divf %610, %611 : vector<24x64xf32>
    %613 = vector.extract_strided_slice %598 {offsets = [0, 256], sizes = [24, 64], strides = [1, 1]} : vector<24x384xf32> to vector<24x64xf32>
    %614 = arith.addf %613, %23 : vector<24x64xf32>
    %615 = arith.mulf %605, %614 : vector<24x64xf32>
    %616 = arith.addf %597, %615 : vector<24x64xf32>
    %617 = math.tanh %616 : vector<24x64xf32>
    %cst_66 = arith.constant 1.000000e+00 : f32
    %618 = vector.broadcast %cst_66 : f32 to vector<24x64xf32>
    %619 = arith.subf %618, %612 : vector<24x64xf32>
    %620 = arith.mulf %619, %617 : vector<24x64xf32>
    %621 = arith.mulf %612, %584 : vector<24x64xf32>
    %622 = arith.addf %620, %621 : vector<24x64xf32>
    %623 = vector.shape_cast %622 : vector<24x64xf32> to vector<1x24x64xf32>
    %c0_67 = arith.constant 0 : index
    %c0_68 = arith.constant 0 : index
    %c0_69 = arith.constant 0 : index
    %624 = vector.load %arg3[%c0_67, %c0_68, %c0_69] : memref<3x24x64xf32, #tpu.memory_space<vmem>>, vector<3x24x64xf32>
    %625 = vector.broadcast %623 : vector<1x24x64xf32> to vector<3x24x64xf32>
    %626 = arith.mulf %625, %624 : vector<3x24x64xf32>
    %cst_70 = arith.constant dense<0.000000e+00> : vector<3x24xf32>
    %627 = vector.multi_reduction <add>, %626, %cst_70 [2] : vector<3x24x64xf32> to vector<3x24xf32>
    %c0_71 = arith.constant 0 : index
    %c0_72 = arith.constant 0 : index
    %628 = vector.load %arg4[%c0_71, %c0_72] : memref<2x24xf32, #tpu.memory_space<vmem>>, vector<2x24xf32>
    %cst_73 = arith.constant dense<0.000000e+00> : vector<2x3xf32>
    %629 = tpu.matmul %628, %627, %cst_73 {dimension_numbers = #tpu.dot_dimension_numbers<[1], [1], [0], [0], [0, 0, 1, 0], [], []>} : vector<2x24xf32>, vector<3x24xf32>, vector<2x3xf32> -> vector<2x3xf32>
    %630 = vector.extract_strided_slice %1 {offsets = [7, 0], sizes = [1, 3], strides = [1, 1]} : vector<8x64xf32> to vector<1x3xf32>
    %631 = vector.broadcast %630 : vector<1x3xf32> to vector<2x3xf32>
    %632 = arith.addf %629, %631 : vector<2x3xf32>
    %c0_74 = arith.constant 0 : index
    %c0_75 = arith.constant 0 : index
    %633 = vector.load %arg5[%c0_74, %c0_75] : memref<2x3xf32, #tpu.memory_space<vmem>>, vector<2x3xf32>
    tpu.vector_store %arg5[%c0_74, %c0_75], %632 {strides = array<i32>} : memref<2x3xf32, #tpu.memory_space<vmem>>, vector<2x3xf32>,
    return
  }
}

</mosaic_0001>

<bundles_post_ra>
// kernel: tpu_custom_call.1
= control target key start
LH: loop header
LB: loop body
LE: loop exit
PB: predicated region body
PF: predicated region fallthrough
CT: control target
= control target key end

     0   :  { %10 = vsyncpa [#allocation3], 0  ;;  %s8227_s0 = inlined_call_operand.vmem [shape: f32[24,16], index: 0, kind: input, shape index: {}]   ;;  %s8228_s1 = inlined_call_operand.vmem [shape: f32[8,64], index: 1, kind: input, shape index: {}]   ;;  %s8229_s2 = inlined_call_operand.hbm [shape: f32[64,384], index: 2, kind: input, shape index: {}]   ;;  %s8230_s3 = inlined_call_operand.hbm [shape: f32[3,24,64], index: 3, kind: input, shape index: {}]   ;;  %s8231_s4 = inlined_call_operand.vmem [shape: f32[2,24], index: 4, kind: input, shape index: {}]   ;;  %s8232_s5 = inlined_call_operand.hbm [shape: f32[2,3], index: 5, kind: output, shape index: {}]  }
   0x1   :  { %11 = vsyncpa [#allocation6], 0 }
   0x2   :  { %12 = vsyncpa [#allocation4], 0  ;;  %s21_s20 = sshll.u32 %s8229_s2, 4  ;;  %s5304_s21 = smov [#allocation2]   ;;  %s22_s20 = int_to_ptr.hbm [resolvable:$true] %s21_s20 }
   0x3   :  { %s23_s22 = sshll.u32 %s5304_s21, 4  ;;  %s34_s25 = sshll.u32 %s8230_s3, 4  ;;  %s24_s22 = int_to_ptr.vmem [resolvable:$true] %s23_s22  ;;  %s35_s25 = int_to_ptr.hbm [resolvable:$true] %s34_s25 }
   0x4   :  { %s5305_s26 = smov 384   ;;  %s5306_s27 = smov 24  }
   0x5   :  { %29 = dma.hbm_to_vmem [thread:$0]  %s22_s20, 3072, %s24_s22, [#allocation3], %s5305_s26, %s5305_s26, %s5306_s27  }
   0x6   :  { %s5307_s28 = smov [#allocation5]   ;;  %s5308_s30 = smov 128  }
   0x7   :  { %s36_s29 = sshll.u32 %s5307_s28, 4  ;;  %s5309_s6 = smov 8   ;;  %s37_s29 = int_to_ptr.vmem [resolvable:$true] %s36_s29 }
   0x8   :  { %42 = dma.hbm_to_vmem [thread:$0]  %s35_s25, 1152, %s37_s29, [#allocation6], %s5308_s30, %s5308_s30, %s5309_s6  }
   0x9   :  { %5298 = dma.done.wait [#allocation3], 3072  }
   0xa   :  { %5299 = vsyncadd [#allocation3], 4294964224 }
   0xb   :  { %5300 = dma.done.wait [#allocation6], 1152  }
   0xc   :  { %5301 = vsyncadd [#allocation6], 4294966144  ;;  %v5310_v0 = vmov 0   ;;  %v5366_v1 = vld [vmem:[%s8227_s0 + $0x10] sm:$0xff]  ;;  %v5371_v2 = vld [vmem:[%s8227_s0 + $0x8] sm:$0xff]  ;;  %v5311_v4 = vmov 15  }
   0xd   :  { %4610 = vset.pattern.permute.xlu2 %v5310_v0  ;;  %4608 = vset.pattern.permute.xlu1 %v5310_v0  ;;  %v5376_v3 = vld [vmem:[%s8227_s0] sm:$0xff]  ;;  %vm115_vm0 = vcmask 261120   ;;  %v5416_v19 = vld [vmem:[#allocation2 + $0xa8] sm:$0xff]  ;;  %v5420_v20 = vld [vmem:[#allocation2 + $0x90] sm:$0xff]  ;;  %v5312_v30 = vmov 1   ;;  %v5313_v44 = vmov 14  }
   0xe   :  { %4606 = vset.pattern.permute.xlu0 %v5310_v0  ;;  %100 = vperm.xlu2 %4610, %v5366_v1   ;;  %v5389_v6 = vld [vmem:[%s8228_s1] sm:$0xff]  ;;  %v5425_v21 = vld [vmem:[#allocation2 + $0x78] sm:$0xff]  ;;  %v5437_v27 = vld [vmem:[#allocation2 + $0x48] sm:$0xff]  ;;  %vm311_vm9 = vcmask 523264   ;;  %s5326_s28 = smov [#allocation7]   ;;  %s4331_s2 = sshll.u32 %s8232_s5, 4  ;;  %s4332_s2 = int_to_ptr.hbm [resolvable:$true] %s4331_s2 }
   0xf   :  { %95 = vperm.xlu1 %4608, %v5371_v2   ;;  %90 = vperm.xlu0 %4606, %v5376_v3   ;;  %v5392_v7 = vperm.slane %v5389_v6, 0  ;;  %v5395_v8 = vperm.slane %v5389_v6, 1  ;;  %v5398_v9 = vperm.slane %v5389_v6, 3  ;;  %v5401_v10 = vperm.slane %v5389_v6, 4  ;;  %v5430_v22 = vld [vmem:[#allocation2 + $0x60] sm:$0xff]  ;;  %v5447_v31 = vld [vmem:[#allocation2 + $0x30] sm:$0xff] }
  0x10   :  { %4575 = vmatpush.msra.mxu2 %v5416_v19  ;;  %329 = vmatpush.msra.mxu0 %v5416_v19  ;;  %v5452_v32 = vld [vmem:[#allocation2 + $0x18] sm:$0xff]  ;;  %v5459_v33 = vld [vmem:[#allocation2] sm:$0xff]  ;;  %v5465_v35 = vperm.slane %v5389_v6, 2  ;;  %v5486_v46 = vperm.slane %v5389_v6, 5  ;;  %v5496_v50 = vperm.slane %v5389_v6, 6  ;;  %s4329_s29 = sshll.u32 %s5326_s28, 4  ;;  %s4330_s29 = int_to_ptr.vmem [resolvable:$true] %s4329_s29 }
  0x11   :  { %8293 = vst [vmem:[#allocation12_spill] sm:$0xff] %v5392_v7  ;;  %605 = vmatpush.msra.mxu3 %v5416_v19  ;;  %v5519_v6 = vld [vmem:[#allocation2 + $0xb8] sm:$0xff] }
  0x12   :  { %8294 = vst [vmem:[#allocation13_spill] sm:$0xff] %v5395_v8  ;;  %4576 = vmatpush.msra.mxu2 %v5420_v20  ;;  %330 = vmatpush.msra.mxu0 %v5420_v20  ;;  %v5568_v53 = vld [vmem:[#allocation2 + $0x38] sm:$0xff] }
  0x13   :  { %8295 = vst [vmem:[#allocation14_spill] sm:$0xff] %v5398_v9  ;;  %606 = vmatpush.msra.mxu3 %v5420_v20 }
  0x14   :  { %8296 = vst [vmem:[#allocation15_spill] sm:$0xff] %v5401_v10  ;;  %4577 = vmatpush.msra.mxu2 %v5425_v21  ;;  %331 = vmatpush.msra.mxu0 %v5425_v21 }
  0x15   :  { %607 = vmatpush.msra.mxu3 %v5425_v21  ;;  %8300 = vst [vmem:[#allocation19_spill] sm:$0xff] %v5465_v35 }
  0x16   :  { %4611 = vset.pattern.permute.xlu2 %v5311_v4  ;;  %4578 = vmatpush.msra.mxu2 %v5430_v22 }
  0x17   :  { %4609 = vset.pattern.permute.xlu1 %v5311_v4  ;;  %4607 = vset.pattern.permute.xlu0 %v5311_v4  ;;  %v5517_v4 = vld [vmem:[#allocation2 + $0xb0] sm:$0xff] }
  0x18   :  { %112 = vperm.xlu2 %4611, %v5366_v1   ;;  %108 = vperm.xlu1 %4609, %v5371_v2  }
  0x19   :  { %104 = vperm.xlu0 %4607, %v5376_v3   ;;  %332 = vmatpush.msra.mxu0 %v5430_v22 }
  0x1a   :  { %608 = vmatpush.msra.mxu3 %v5430_v22  ;;  %4579 = vmatpush.msra.mxu2 %v5437_v27 }
  0x1b   :  { %333 = vmatpush.msra.mxu0 %v5437_v27  ;;  %355 = vmatpush.msra.mxu1 %v5517_v4 }
  0x1c   :  { %4580 = vmatpush.msra.mxu2 %v5447_v31  ;;  %609 = vmatpush.msra.mxu3 %v5437_v27 }
  0x1d   :  { %334 = vmatpush.msra.mxu0 %v5447_v31 }
  0x1e   :  { %4581 = vmatpush.msra.mxu2 %v5452_v32  ;;  %610 = vmatpush.msra.mxu3 %v5447_v31 }
  0x1f   :  { %335 = vmatpush.msra.mxu0 %v5452_v32 }
  0x20   :  { %4612 = vset.pattern.permute.xlu1 %v5312_v30  ;;  %4582 = vmatpush.msra.mxu2 %v5459_v33 }
  0x21   :  { %4614 = vset.pattern.permute.xlu0 %v5312_v30  ;;  %267 = vperm.xlu1 %4612, %v5376_v3  }
  0x22   :  { %271 = vperm.xlu0 %4614, %v5371_v2   ;;  %336 = vmatpush.msra.mxu0 %v5459_v33 }
  0x23   :  { %611 = vmatpush.msra.mxu3 %v5452_v32  ;;  %4613 = vset.pattern.permute.xlu2 %v5313_v44 }
  0x24   :  { %279 = vperm.xlu2 %4613, %v5376_v3   ;;  %381 = vmatpush.msrb.mxu2 %v5519_v6 }
  0x25   :  { %612 = vmatpush.msra.mxu3 %v5459_v33  ;;  %631 = vmatpush.msrb.mxu0 %v5517_v4 }
  0x27   :  { %907 = vmatpush.msrb.mxu3 %v5517_v4 }
  0x29   :  { %4615 = vset.pattern.permute.xlu1 %v5313_v44 }
  0x2a   :  { %283 = vperm.xlu1 %4615, %v5371_v2  }
  0x2c   :  { %4616 = vset.pattern.permute.xlu2 %v5312_v30 }
  0x2d   :  { %275 = vperm.xlu2 %4616, %v5366_v1  }
  0x32   :  { %287 = vperm.xlu1 %4615, %v5366_v1  }
  0x68   :  { %v5384_v5 = vpop.permute.xlu2 %100 }
  0x69   :  { %8292 = vst [vmem:[#allocation11_spill] sm:$0xff] %v5384_v5 }
  0x72   :  { %v5403_v11 = vpop.permute.xlu2 %112 }
  0x73   :  { %8297 = vst [vmem:[#allocation16_spill] sm:$0xff] %v5403_v11  ;;  %v5408_v12 = vsel %vm115_vm0, %v5384_v5, %v5403_v11 }
  0x74   :  { %v121_v13 = vmul.f32 %v5408_v12, %v5392_v7  ;;  %v127_v14 = vmul.f32 %v5408_v12, %v5395_v8  ;;  %v133_v47 = vmul.f32 %v5408_v12, %v5465_v35 }
  0x76   :  { %v124_v15 = vadd.f32 %v121_v13, %v5398_v9  ;;  %v130_v16 = vadd.f32 %v127_v14, %v5401_v10  ;;  %v136_v61 = vadd.f32 %v133_v47, %v5486_v46 }
  0x78   :  { %v4344_v17 = vmul.f32 -1.442695, %v124_v15  ;;  %v4347_v18 = vmul.f32 -1.442695, %v130_v16 }
  0x7a   :  { %4643 = vpow2.f32 %v4344_v17 }
  0x7b   :  { %4645 = vpow2.f32 %v4347_v18  ;;  %v5528_v18 = vld [vmem:[#allocation2 + $0x98] sm:$0xff] }
  0x7c   :  { %356 = vmatpush.msra.mxu1 %v5528_v18  ;;  %632 = vmatpush.msrb.mxu0 %v5528_v18 }
  0x7d   :  { %908 = vmatpush.msrb.mxu3 %v5528_v18 }
  0x80   :  { %v4644_v23 = vpop.eup %4643 }
  0x81   :  { %v4646_v24 = vpop.eup %4645  ;;  %v148_v25 = vadd.f32 1.0, %v4644_v23  ;;  %v5435_v26 = vpop.permute.xlu1 %95  ;;  %v5530_v23 = vld [vmem:[#allocation2 + $0xa0] sm:$0xff] }
  0x82   :  { %8298 = vst [vmem:[#allocation17_spill] sm:$0xff] %v5435_v26  ;;  %v5440_v28 = vpop.permute.xlu0 %90  ;;  %v5444_v29 = vadd.f32 1.0, %v4646_v24  ;;  %382 = vmatpush.msrb.mxu2 %v5530_v23 }
  0x83   :  { %8299 = vst [vmem:[#allocation18_spill] sm:$0xff] %v5440_v28  ;;  %4647 = vrcp.f32 %v148_v25  ;;  %vm184_vm1 = vweird.f32 %v148_v25  ;;  %v188_v37 = vand.u32 2147483647, %v148_v25  ;;  %v190_v38 = vand.u32 2147483648, %v148_v25 }
  0x84   :  { %4649 = vrcp.f32 %v5444_v29  ;;  %vm241_vm5 = vweird.f32 %v5444_v29  ;;  %v245_v14 = vand.u32 2147483647, %v5444_v29  ;;  %v247_v17 = vand.u32 2147483648, %v5444_v29 }
  0x85   :  { %v191_v54 = vor.u32 1.1754944e-38, %v190_v38  ;;  %vm189_vm4 = vcmp.eq.f32.partialorder %v188_v37, 8.507059e+37  ;;  %v5543_v37 = vld [vmem:[#allocation2 + $0x68] sm:$0xff]  ;;  %v5545_v38 = vld [vmem:[#allocation2 + $0x70] sm:$0xff] }
  0x86   :  { %vm246_vm8 = vcmp.eq.f32.partialorder %v245_v14, 8.507059e+37 }
  0x89   :  { %v4648_v34 = vpop.eup %4647 }
  0x8a   :  { %v180_v36 = vmul.f32 %v4648_v34, %v148_v25  ;;  %v5469_v39 = vpop.permute.xlu1 %108  ;;  %vm185_vm2 = vweird.f32 %v4648_v34  ;;  %v5483_v45 = vpop.eup %4649 }
  0x8b   :  { %8301 = vst [vmem:[#allocation20_spill] sm:$0xff] %v5469_v39  ;;  %v5471_v40 = vpop.permute.xlu0 %104  ;;  %v5476_v42 = vsel %vm115_vm0, %v5435_v26, %v5469_v39  ;;  %vm5503_vm3 = vmor %vm184_vm1, %vm185_vm2  ;;  %v237_v60 = vmul.f32 %v5483_v45, %v5444_v29  ;;  %vm242_vm6 = vweird.f32 %v5483_v45 }
  0x8c   :  { %8302 = vst [vmem:[#allocation21_spill] sm:$0xff] %v5471_v40  ;;  %v181_v41 = vsub.f32 1.0, %v180_v36  ;;  %v5481_v43 = vsel %vm115_vm0, %v5440_v28, %v5471_v40  ;;  %v120_v48 = vmul.f32 %v5476_v42, %v5392_v7  ;;  %v126_v49 = vmul.f32 %v5476_v42, %v5395_v8  ;;  %v5540_v36 = vld [vmem:[#allocation2 + $0x88] sm:$0xff]  ;;  %vm5555_vm7 = vmor %vm241_vm5, %vm242_vm6 }
  0x8d   :  { %v119_v52 = vmul.f32 %v5481_v43, %v5392_v7  ;;  %v125_v57 = vmul.f32 %v5481_v43, %v5395_v8  ;;  %v238_v25 = vsub.f32 1.0, %v237_v60  ;;  %383 = vmatpush.msrb.mxu2 %v5540_v36  ;;  %v5583_v60 = vld [vmem:[#allocation2 + $0x28] sm:$0xff] }
  0x8e   :  { %v182_v51 = vmul.f32 %v4648_v34, %v181_v41  ;;  %v123_v55 = vadd.f32 %v120_v48, %v5398_v9  ;;  %v129_v56 = vadd.f32 %v126_v49, %v5401_v10  ;;  %v248_v48 = vor.u32 1.1754944e-38, %v247_v17  ;;  %v5559_v49 = vld [vmem:[#allocation2 + $0x50] sm:$0xff] }
  0x8f   :  { %v122_v59 = vadd.f32 %v119_v52, %v5398_v9  ;;  %v128_v0 = vadd.f32 %v125_v57, %v5401_v10  ;;  %v239_v44 = vmul.f32 %v5483_v45, %v238_v25  ;;  %384 = vmatpush.msrb.mxu2 %v5545_v38 }
  0x90   :  { %v183_v58 = vadd.f32 %v4648_v34, %v182_v51  ;;  %v4343_v62 = vmul.f32 -1.442695, %v123_v55  ;;  %v4346_v63 = vmul.f32 -1.442695, %v129_v56  ;;  %v5561_v51 = vld [vmem:[#allocation2 + $0x58] sm:$0xff] }
  0x91   :  { %v4342_v13 = vmul.f32 -1.442695, %v122_v59  ;;  %v4345_v16 = vmul.f32 -1.442695, %v128_v0  ;;  %v240_v52 = vadd.f32 %v5483_v45, %v239_v44  ;;  %385 = vmatpush.msrb.mxu2 %v5561_v51  ;;  %v5581_v59 = vld [vmem:[#allocation2 + $0x20] sm:$0xff] }
  0x92   :  { %v187_v12 = vsel %vm5503_vm3, %v4648_v34, %v183_v58  ;;  %4651 = vpow2.f32 %v4343_v62  ;;  %v5538_v34 = vld [vmem:[#allocation2 + $0x80] sm:$0xff] }
  0x93   :  { %v192_v15 = vsel %vm189_vm4, %v191_v54, %v187_v12  ;;  %4653 = vpow2.f32 %v4346_v63  ;;  %357 = vmatpush.msra.mxu1 %v5538_v34  ;;  %633 = vmatpush.msrb.mxu0 %v5538_v34  ;;  %v5570_v54 = vld [vmem:[#allocation2 + $0x40] sm:$0xff]  ;;  %v244_v56 = vsel %vm5555_vm7, %v5483_v45, %v240_v52  ;;  %v5596_v12 = vld [vmem:[#allocation2 + $0x8] sm:$0xff] }
  0x94   :  { %v253_v24 = vmul.f32 %v192_v15, %v5496_v50  ;;  %4655 = vpow2.f32 %v4342_v13  ;;  %v249_v58 = vsel %vm246_vm8, %v248_v48, %v244_v56  ;;  %386 = vmatpush.msrb.mxu2 %v5570_v54  ;;  %v5598_v13 = vld [vmem:[#allocation2 + $0x10] sm:$0xff]  ;;  %909 = vmatpush.msrb.mxu3 %v5538_v34 }
  0x95   :  { %4657 = vpow2.f32 %v4345_v16  ;;  %358 = vmatpush.msra.mxu1 %v5543_v37  ;;  %634 = vmatpush.msrb.mxu0 %v5543_v37  ;;  %v262_v0 = vsub.f32 1.0, %v249_v58 }
  0x96   :  { %v256_v41 = vadd.f32 %v253_v24, %v136_v61  ;;  %387 = vmatpush.msrb.mxu2 %v5583_v60  ;;  %910 = vmatpush.msrb.mxu3 %v5543_v37 }
  0x97   :  { %359 = vmatpush.msra.mxu1 %v5559_v49  ;;  %635 = vmatpush.msrb.mxu0 %v5559_v49 }
  0x98   :  { %4659 = vtanh.f32 %v256_v41  ;;  %v4652_v29 = vpop.eup %4651  ;;  %388 = vmatpush.msrb.mxu2 %v5598_v13  ;;  %911 = vmatpush.msrb.mxu3 %v5559_v49 }
  0x99   :  { %v4654_v30 = vpop.eup %4653  ;;  %v5574_v55 = vadd.f32 1.0, %v4652_v29  ;;  %360 = vmatpush.msra.mxu1 %v5568_v53  ;;  %636 = vmatpush.msrb.mxu0 %v5568_v53 }
  0x9a   :  { %v4656_v57 = vpop.eup %4655  ;;  %v5590_v45 = vadd.f32 1.0, %v4654_v30  ;;  %912 = vmatpush.msrb.mxu3 %v5568_v53 }
  0x9b   :  { %v4658_v61 = vpop.eup %4657  ;;  %4661 = vrcp.f32 %v5574_v55  ;;  %v5592_v62 = vadd.f32 1.0, %v4656_v57  ;;  %361 = vmatpush.msra.mxu1 %v5581_v59  ;;  %637 = vmatpush.msrb.mxu0 %v5581_v59  ;;  %vm169_vm10 = vweird.f32 %v5574_v55  ;;  %v173_v29 = vand.u32 2147483647, %v5574_v55 }
  0x9c   :  { %v5594_v63 = vadd.f32 1.0, %v4658_v61  ;;  %913 = vmatpush.msrb.mxu3 %v5581_v59  ;;  %v175_v57 = vand.u32 2147483648, %v5574_v55  ;;  %vm226_vm8 = vweird.f32 %v5590_v45 }
  0x9d   :  { %4663 = vrcp.f32 %v5592_v62  ;;  %362 = vmatpush.msra.mxu1 %v5596_v12  ;;  %638 = vmatpush.msrb.mxu0 %v5596_v12  ;;  %v160_v58 = vand.u32 2147483648, %v5592_v62  ;;  %vm154_vm14 = vweird.f32 %v5592_v62  ;;  %vm174_vm1 = vcmp.eq.f32.partialorder %v173_v29, 8.507059e+37 }
  0x9e   :  { %v4660_v14 = vpop.eup %4659  ;;  %4665 = vrcp.f32 %v5594_v63  ;;  %914 = vmatpush.msrb.mxu3 %v5596_v12  ;;  %vm211_vm4 = vweird.f32 %v5594_v63 }
  0x9f   :  { %v5608_v15 = vmul.f32 %v4660_v14, %v262_v0  ;;  %4667 = vrcp.f32 %v5590_v45  ;;  %657 = vmatpush.msrb.mxu1 %v5519_v6  ;;  %v158_v14 = vand.u32 2147483647, %v5592_v62  ;;  %v161_v11 = vor.u32 1.1754944e-38, %v160_v58 }
  0xa1   :  { %v4662_v16 = vpop.eup %4661  ;;  %4350 = vmatmul.msk.f32.vlgmr.msra.gmra.mxu2 %vm311_vm9, %v5608_v15  ;;  %658 = vmatpush.msrb.mxu1 %v5530_v23  ;;  %vm159_vm2 = vcmp.eq.f32.partialorder %v158_v14, 8.507059e+37 }
  0xa2   :  { %v165_v17 = vmul.f32 %v4662_v16, %v5574_v55  ;;  %881 = vmatpush.msra.mxu2 %v5416_v19  ;;  %vm170_vm11 = vweird.f32 %v4662_v16  ;;  %v176_v55 = vor.u32 1.1754944e-38, %v175_v57 }
  0xa3   :  { %v4664_v24 = vpop.eup %4663  ;;  %659 = vmatpush.msrb.mxu1 %v5540_v36  ;;  %vm5646_vm13 = vmor %vm169_vm10, %vm170_vm11 }
  0xa4   :  { %v166_v25 = vsub.f32 1.0, %v165_v17  ;;  %882 = vmatpush.msra.mxu2 %v5420_v20  ;;  %v5624_v41 = vpop.eup %4665  ;;  %v150_v44 = vmul.f32 %v4664_v24, %v5592_v62  ;;  %vm155_vm12 = vweird.f32 %v4664_v24 }
  0xa5   :  { %v5628_v47 = vpop.eup %4667  ;;  %v207_v52 = vmul.f32 %v5624_v41, %v5594_v63  ;;  %660 = vmatpush.msrb.mxu1 %v5545_v38  ;;  %vm156_vm15 = vmor %vm154_vm14, %vm155_vm12  ;;  %vm212_vm3 = vweird.f32 %v5624_v41 }
  0xa6   :  { %v167_v48 = vmul.f32 %v4662_v16, %v166_v25  ;;  %883 = vmatpush.msra.mxu2 %v5425_v21  ;;  %v151_v30 = vsub.f32 1.0, %v150_v44  ;;  %v222_v17 = vmul.f32 %v5628_v47, %v5590_v45  ;;  %vm213_vm5 = vmor %vm211_vm4, %vm212_vm3  ;;  %vm227_vm7 = vweird.f32 %v5628_v47 }
  0xa7   :  { %v208_v61 = vsub.f32 1.0, %v207_v52  ;;  %661 = vmatpush.msrb.mxu1 %v5561_v51  ;;  %v131_v52 = vmul.f32 %v5481_v43, %v5465_v35  ;;  %v132_v43 = vmul.f32 %v5476_v42, %v5465_v35  ;;  %vm228_vm10 = vmor %vm226_vm8, %vm227_vm7 }
  0xa8   :  { %v168_v56 = vadd.f32 %v4662_v16, %v167_v48  ;;  %884 = vmatpush.msra.mxu2 %v5430_v22  ;;  %v152_v0 = vmul.f32 %v4664_v24, %v151_v30  ;;  %v223_v5 = vsub.f32 1.0, %v222_v17 }
  0xa9   :  { %v209_v44 = vmul.f32 %v5624_v41, %v208_v61  ;;  %662 = vmatpush.msrb.mxu1 %v5570_v54  ;;  %v134_v62 = vadd.f32 %v131_v52, %v5486_v46 }
  0xaa   :  { %885 = vmatpush.msra.mxu2 %v5437_v27  ;;  %v172_v48 = vsel %vm5646_vm13, %v4662_v16, %v168_v56  ;;  %v153_v30 = vadd.f32 %v4664_v24, %v152_v0  ;;  %v224_v42 = vmul.f32 %v5628_v47, %v223_v5  ;;  %v135_v0 = vadd.f32 %v132_v43, %v5486_v46  ;;  %v280_v43 = vpop.permute.xlu2 %279 }
  0xab   :  { %663 = vmatpush.msrb.mxu1 %v5583_v60  ;;  %v177_v39 = vsel %vm174_vm1, %v176_v55, %v172_v48  ;;  %v210_v16 = vadd.f32 %v5624_v41, %v209_v44 }
  0xac   :  { %886 = vmatpush.msra.mxu2 %v5447_v31  ;;  %v157_v61 = vsel %vm156_vm15, %v4664_v24, %v153_v30  ;;  %v217_v24 = vand.u32 2147483648, %v5594_v63  ;;  %v252_v56 = vmul.f32 %v177_v39, %v5496_v50  ;;  %v225_v48 = vadd.f32 %v5628_v47, %v224_v42 }
  0xad   :  { %v162_v25 = vsel %vm159_vm2, %v161_v11, %v157_v61  ;;  %664 = vmatpush.msrb.mxu1 %v5598_v13  ;;  %v215_v11 = vand.u32 2147483647, %v5594_v63  ;;  %v214_v58 = vsel %vm213_vm5, %v5624_v41, %v210_v16  ;;  %v232_v63 = vand.u32 2147483648, %v5590_v45  ;;  %v268_v16 = vpop.permute.xlu1 %267 }
  0xae   :  { %887 = vmatpush.msra.mxu2 %v5452_v32  ;;  %v251_v29 = vmul.f32 %v162_v25, %v5496_v50  ;;  %v218_v14 = vor.u32 1.1754944e-38, %v217_v24  ;;  %v255_v17 = vadd.f32 %v252_v56, %v135_v0  ;;  %v230_v41 = vand.u32 2147483647, %v5590_v45 }
  0xaf   :  { %vm216_vm6 = vcmp.eq.f32.partialorder %v215_v11, 8.507059e+37  ;;  %v229_v30 = vsel %vm228_vm10, %v5628_v47, %v225_v48  ;;  %v233_v55 = vor.u32 1.1754944e-38, %v232_v63  ;;  %v5746_v63 = vpop.permute.xlu0 %271 }
  0xb0   :  { %888 = vmatpush.msra.mxu2 %v5459_v33  ;;  %v254_v57 = vadd.f32 %v251_v29, %v134_v62  ;;  %v219_v44 = vsel %vm216_vm6, %v218_v14, %v214_v58  ;;  %vm231_vm11 = vcmp.eq.f32.partialorder %v230_v41, 8.507059e+37  ;;  %v5727_v62 = vsel %vm115_vm0, %v280_v43, %v268_v16  ;;  %8313 = vst [vmem:[#allocation26_spill] sm:$0xff] %v5746_v63 }
  0xb1   :  { %v260_v39 = vsub.f32 1.0, %v219_v44  ;;  %v234_v61 = vsel %vm231_vm11, %v233_v55, %v229_v30  ;;  %8309 = vst [vmem:[#allocation22_spill] sm:$0xff] %v5727_v62  ;;  %v290_v14 = vsel %vm115_vm0, %v268_v16, %v280_v43 }
  0xb2   :  { %4669 = vtanh.f32 %v254_v57  ;;  %v261_v47 = vsub.f32 1.0, %v234_v61  ;;  %v5731_v24 = vpop.permute.xlu2 %275  ;;  %v293_v44 = vmul.f32 %v290_v14, %v5392_v7  ;;  %v299_v48 = vmul.f32 %v290_v14, %v5395_v8 }
  0xb3   :  { %4671 = vtanh.f32 %v255_v17  ;;  %8311 = vst [vmem:[#allocation24_spill] sm:$0xff] %v5731_v24 }
  0xb4   :  { %v302_v41 = vadd.f32 %v299_v48, %v5401_v10 }
  0xb5   :  { %v5729_v29 = vpop.permute.xlu1 %283 }
  0xb6   :  { %8310 = vst [vmem:[#allocation23_spill] sm:$0xff] %v5729_v29 }
  0xb8   :  { %v4670_v52 = vpop.eup %4669 }
  0xb9   :  { %v5681_v5 = vmul.f32 %v4670_v52, %v260_v39  ;;  %v4672_v45 = vpop.eup %4671  ;;  %v296_v39 = vadd.f32 %v293_v44, %v5398_v9  ;;  %v291_v52 = vsel %vm115_vm0, %v5746_v63, %v5729_v29  ;;  %v5315_v63 = vmov 2  }
  0xba   :  { %v5697_v25 = vmul.f32 %v4672_v45, %v261_v47  ;;  %v294_v16 = vmul.f32 %v291_v52, %v5392_v7  ;;  %v300_v43 = vmul.f32 %v291_v52, %v5395_v8  ;;  %4619 = vset.pattern.permute.xlu1 %v5315_v63  ;;  %4617 = vset.pattern.permute.xlu2 %v5315_v63 }
  0xbb   :  { %4348 = vmatmul.msk.f32.vlgmr.msra.gmra.mxu0 %vm311_vm9, %v5681_v5  ;;  %4351 = vmatmul.msk.f32.vlgmr.msra.gmra.mxu1 %vm311_vm9, %v5681_v5 }
  0xbc   :  { %4354 = vmatmul.msk.f32.vlgmr.msrb.gmra.mxu2 %vm311_vm9, %v5681_v5  ;;  %933 = vmatpush.msra.mxu0 %v5519_v6 }
  0xbd   :  { %1157 = vmatpush.msra.mxu1 %v5416_v19  ;;  %1183 = vmatpush.msrb.mxu2 %v5517_v4  ;;  %v5733_v11 = vpop.permute.xlu1 %287 }
  0xbe   :  { %934 = vmatpush.msra.mxu0 %v5530_v23  ;;  %8312 = vst [vmem:[#allocation25_spill] sm:$0xff] %v5733_v11  ;;  %v5738_v56 = vsel %vm115_vm0, %v5731_v24, %v5733_v11  ;;  %548 = vperm.xlu1 %4619, %v5371_v2  }
  0xbf   :  { %1158 = vmatpush.msra.mxu1 %v5420_v20  ;;  %1184 = vmatpush.msrb.mxu2 %v5528_v18  ;;  %v295_v57 = vmul.f32 %v5738_v56, %v5392_v7 }
  0xc0   :  { %935 = vmatpush.msra.mxu0 %v5540_v36  ;;  %544 = vperm.xlu2 %4617, %v5376_v3  }
  0xc1   :  { %1159 = vmatpush.msra.mxu1 %v5425_v21  ;;  %1185 = vmatpush.msrb.mxu2 %v5538_v34  ;;  %v298_v58 = vadd.f32 %v295_v57, %v5398_v9 }
  0xc2   :  { %936 = vmatpush.msra.mxu0 %v5545_v38 }
  0xc3   :  { %4349 = vmatmul.msk.f32.gmra.mxu0 %vm311_vm9, %v5697_v25  ;;  %4352 = vmatmul.msk.f32.gmra.mxu1 %vm311_vm9, %v5697_v25 }
  0xc4   :  { %4355 = vmatmul.msk.f32.gmra.mxu2 %vm311_vm9, %v5697_v25  ;;  %937 = vmatpush.msra.mxu0 %v5561_v51 }
  0xc5   :  { %1160 = vmatpush.msra.mxu1 %v5430_v22  ;;  %1186 = vmatpush.msrb.mxu2 %v5543_v37 }
  0xc6   :  { %938 = vmatpush.msra.mxu0 %v5570_v54  ;;  %552 = vperm.xlu1 %4619, %v5366_v1  }
  0xc7   :  { %1161 = vmatpush.msra.mxu1 %v5437_v27  ;;  %1187 = vmatpush.msrb.mxu2 %v5559_v49 }
  0xc8   :  { %939 = vmatpush.msra.mxu0 %v5583_v60 }
  0xc9   :  { %1162 = vmatpush.msra.mxu1 %v5447_v31  ;;  %1188 = vmatpush.msrb.mxu2 %v5568_v53 }
  0xca   :  { %940 = vmatpush.msra.mxu0 %v5598_v13 }
  0xcb   :  { %4353 = vmatmul.msk.f32.gmra.mxu1 %vm311_vm9, %v5608_v15  ;;  %1189 = vmatpush.msrb.mxu2 %v5581_v59 }
  0xcc   :  { %4356 = vmatmul.msk.f32.gmra.mxu2 %vm311_vm9, %v5608_v15  ;;  %1163 = vmatpush.msra.mxu1 %v5452_v32 }
  0xcd   :  { %1190 = vmatpush.msrb.mxu2 %v5596_v12 }
  0xce   :  { %1164 = vmatpush.msra.mxu1 %v5459_v33 }
 0x124   :  { %v344_v42 = vpop.f32.mrf.mxu2 }
 0x125   :  { %v401_v0 = vadd.f32 %v344_v42, %v298_v58 }
 0x127   :  { %v4359_v17 = vmul.f32 -1.442695, %v401_v0  ;;  %v297_v0 = vadd.f32 %v294_v16, %v5398_v9 }
 0x129   :  { %4673 = vpow2.f32 %v4359_v17  ;;  %v303_v17 = vadd.f32 %v300_v43, %v5401_v10 }
 0x12f   :  { %v4674_v30 = vpop.eup %4673 }
 0x130   :  { %v5755_v57 = vadd.f32 1.0, %v4674_v30 }
 0x132   :  { %vm449_vm14 = vweird.f32 %v5755_v57  ;;  %v453_v63 = vand.u32 2147483647, %v5755_v57 }
 0x138   :  { %v338_v55 = vpop.f32.mrf.mxu0  ;;  %v364_v61 = vpop.f32.mrf.mxu1 }
 0x139   :  { %v399_v45 = vadd.f32 %v338_v55, %v296_v39  ;;  %v459_v47 = vadd.f32 %v364_v61, %v302_v41  ;;  %v301_v61 = vmul.f32 %v5738_v56, %v5395_v8 }
 0x13b   :  { %v4357_v58 = vmul.f32 -1.442695, %v399_v45  ;;  %v4360_v42 = vmul.f32 -1.442695, %v459_v47 }
 0x13d   :  { %4675 = vpow2.f32 %v4357_v58 }
 0x13e   :  { %4677 = vpow2.f32 %v4360_v42  ;;  %v304_v42 = vadd.f32 %v301_v61, %v5401_v10 }
 0x13f   :  { %4679 = vrcp.f32 %v5755_v57  ;;  %v390_v43 = vpop.f32.mrf.mxu2 }
 0x140   :  { %v341_v44 = vpop.f32.mrf.mxu0  ;;  %v367_v48 = vpop.f32.mrf.mxu1 }
 0x141   :  { %v400_v39 = vadd.f32 %v341_v44, %v297_v0  ;;  %v460_v41 = vadd.f32 %v367_v48, %v303_v17  ;;  %v8239_v48 = vmov 13  }
 0x142   :  { %4618 = vset.pattern.permute.xlu0 %v8239_v48 }
 0x143   :  { %v4676_v55 = vpop.eup %4675  ;;  %v4358_v30 = vmul.f32 -1.442695, %v400_v39  ;;  %v4361_v47 = vmul.f32 -1.442695, %v460_v41  ;;  %556 = vperm.xlu0 %4618, %v5376_v3   ;;  %v519_v3 = vadd.f32 %v390_v43, %v5496_v50 }
 0x144   :  { %v4678_v26 = vpop.eup %4677  ;;  %v411_v45 = vadd.f32 1.0, %v4676_v55 }
 0x145   :  { %v5762_v58 = vpop.eup %4679  ;;  %v5764_v16 = vadd.f32 1.0, %v4678_v26  ;;  %4681 = vpow2.f32 %v4358_v30  ;;  %v305_v26 = vmul.f32 %v290_v14, %v5465_v35 }
 0x146   :  { %4683 = vrcp.f32 %v411_v45  ;;  %v445_v17 = vmul.f32 %v5762_v58, %v5755_v57  ;;  %v425_v11 = vand.u32 2147483648, %v411_v45  ;;  %vm419_vm13 = vweird.f32 %v411_v45 }
 0x147   :  { %4685 = vrcp.f32 %v5764_v16  ;;  %v308_v14 = vadd.f32 %v305_v26, %v5486_v46  ;;  %vm450_vm1 = vweird.f32 %v5762_v58  ;;  %vm479_vm4 = vweird.f32 %v5764_v16 }
 0x148   :  { %4687 = vpow2.f32 %v4361_v47  ;;  %v370_v0 = vpop.f32.mrf.mxu1  ;;  %v446_v40 = vsub.f32 1.0, %v445_v17  ;;  %v393_v17 = vpop.f32.mrf.mxu2  ;;  %vm5820_vm5 = vmor %vm449_vm14, %vm450_vm1  ;;  %vm454_vm14 = vcmp.eq.f32.partialorder %v453_v63, 8.507059e+37 }
 0x149   :  { %v461_v44 = vadd.f32 %v370_v0, %v304_v42  ;;  %v306_v0 = vmul.f32 %v291_v52, %v5465_v35  ;;  %v5788_v52 = vmul.f32 %v5738_v56, %v5465_v35  ;;  %v426_v56 = vor.u32 1.1754944e-38, %v425_v11 }
 0x14a   :  { %v447_v24 = vmul.f32 %v5762_v58, %v446_v40  ;;  %v520_v9 = vadd.f32 %v393_v17, %v5496_v50 }
 0x14b   :  { %v4682_v39 = vpop.eup %4681  ;;  %v4362_v41 = vmul.f32 -1.442695, %v461_v44 }
 0x14c   :  { %v4684_v55 = vpop.eup %4683  ;;  %v5773_v30 = vadd.f32 1.0, %v4682_v39 }
 0x14d   :  { %v5775_v61 = vpop.eup %4685  ;;  %v415_v47 = vmul.f32 %v4684_v55, %v411_v45  ;;  %4689 = vpow2.f32 %v4362_v41  ;;  %vm420_vm12 = vweird.f32 %v4684_v55  ;;  %v423_v41 = vand.u32 2147483647, %v411_v45 }
 0x14e   :  { %v4688_v28 = vpop.eup %4687  ;;  %v475_v42 = vmul.f32 %v5775_v61, %v5764_v16  ;;  %4691 = vrcp.f32 %v5773_v30  ;;  %vm421_vm15 = vmor %vm419_vm13, %vm420_vm12  ;;  %vm480_vm3 = vweird.f32 %v5775_v61  ;;  %vm434_vm8 = vweird.f32 %v5773_v30 }
 0x14f   :  { %v416_v44 = vsub.f32 1.0, %v415_v47  ;;  %v5782_v48 = vadd.f32 1.0, %v4688_v28  ;;  %v5791_v28 = vadd.f32 %v306_v0, %v5486_v46  ;;  %v448_v0 = vadd.f32 %v5762_v58, %v447_v24  ;;  %vm5828_vm7 = vmor %vm479_vm4, %vm480_vm3 }
 0x150   :  { %v476_v39 = vsub.f32 1.0, %v475_v42  ;;  %vm424_vm2 = vcmp.eq.f32.partialorder %v423_v41, 8.507059e+37  ;;  %v485_v24 = vand.u32 2147483648, %v5764_v16  ;;  %v440_v41 = vand.u32 2147483648, %v5773_v30  ;;  %v396_v7 = vpop.f32.mrf.mxu2 }
 0x151   :  { %v417_v29 = vmul.f32 %v4684_v55, %v416_v44  ;;  %4693 = vrcp.f32 %v5782_v48  ;;  %v452_v10 = vsel %vm5820_vm5, %v5762_v58, %v448_v0 }
 0x152   :  { %v477_v26 = vmul.f32 %v5775_v61, %v476_v39  ;;  %v441_v58 = vor.u32 1.1754944e-38, %v440_v41 }
 0x153   :  { %v4690_v40 = vpop.eup %4689  ;;  %v418_v47 = vadd.f32 %v4684_v55, %v417_v29 }
 0x154   :  { %v4692_v42 = vpop.eup %4691  ;;  %v5799_v44 = vadd.f32 1.0, %v4690_v40  ;;  %v478_v62 = vadd.f32 %v5775_v61, %v477_v26 }
 0x155   :  { %v422_v39 = vsel %vm421_vm15, %v4684_v55, %v418_v47  ;;  %v430_v29 = vmul.f32 %v4692_v42, %v5773_v30  ;;  %v438_v55 = vand.u32 2147483647, %v5773_v30  ;;  %v483_v47 = vand.u32 2147483647, %v5764_v16 }
 0x156   :  { %v427_v45 = vsel %vm424_vm2, %v426_v56, %v422_v39  ;;  %4695 = vrcp.f32 %v5799_v44  ;;  %vm435_vm6 = vweird.f32 %v4692_v42  ;;  %vm494_vm15 = vweird.f32 %v5782_v48 }
 0x157   :  { %v5808_v11 = vpop.eup %4693  ;;  %v522_v40 = vmul.f32 %v519_v3, %v427_v45  ;;  %v431_v35 = vsub.f32 1.0, %v430_v29  ;;  %v455_v3 = vand.u32 2147483648, %v5755_v57  ;;  %v8318_v57 = vmov 13   ;;  %vm436_vm10 = vmor %vm434_vm8, %vm435_vm6 }
 0x158   :  { %v490_v43 = vmul.f32 %v5808_v11, %v5782_v48  ;;  %4620 = vset.pattern.permute.xlu2 %v8318_v57  ;;  %vm439_vm11 = vcmp.eq.f32.partialorder %v438_v55, 8.507059e+37  ;;  %vm484_vm12 = vcmp.eq.f32.partialorder %v483_v47, 8.507059e+37  ;;  %vm495_vm13 = vweird.f32 %v5808_v11 }
 0x159   :  { %v525_v56 = vadd.f32 %v522_v40, %v308_v14  ;;  %v432_v39 = vmul.f32 %v4692_v42, %v431_v35  ;;  %v482_v35 = vsel %vm5828_vm7, %v5775_v61, %v478_v62  ;;  %v486_v14 = vor.u32 1.1754944e-38, %v485_v24  ;;  %560 = vperm.xlu2 %4620, %v5371_v2   ;;  %vm5855_vm1 = vmor %vm494_vm15, %vm495_vm13 }
 0x15a   :  { %v491_v45 = vsub.f32 1.0, %v490_v43  ;;  %v521_v40 = vadd.f32 %v396_v7, %v5496_v50  ;;  %v500_v55 = vand.u32 2147483648, %v5782_v48  ;;  %v310_v7 = vadd.f32 %v5788_v52, %v5486_v46 }
 0x15b   :  { %4697 = vtanh.f32 %v525_v56  ;;  %v433_v16 = vadd.f32 %v4692_v42, %v432_v39  ;;  %v487_v43 = vsel %vm484_vm12, %v486_v14, %v482_v35  ;;  %v456_v56 = vor.u32 1.1754944e-38, %v455_v3 }
 0x15c   :  { %v4696_v17 = vpop.eup %4695  ;;  %v492_v0 = vmul.f32 %v5808_v11, %v491_v45  ;;  %v531_v47 = vsub.f32 1.0, %v487_v43  ;;  %v515_v52 = vand.u32 2147483648, %v5799_v44  ;;  %vm509_vm4 = vweird.f32 %v5799_v44 }
 0x15d   :  { %v437_v62 = vsel %vm436_vm10, %v4692_v42, %v433_v16  ;;  %v505_v61 = vmul.f32 %v4696_v17, %v5799_v44  ;;  %v457_v41 = vsel %vm454_vm14, %v456_v56, %v452_v10  ;;  %v498_v42 = vand.u32 2147483647, %v5782_v48 }
 0x15e   :  { %v442_v26 = vsel %vm439_vm11, %v441_v58, %v437_v62  ;;  %v493_v30 = vadd.f32 %v5808_v11, %v492_v0  ;;  %v524_v29 = vmul.f32 %v521_v40, %v457_v41  ;;  %v537_v10 = vmul.f32 %v487_v43, %v5681_v5 }
 0x15f   :  { %v523_v2 = vmul.f32 %v520_v9, %v442_v26  ;;  %v506_v24 = vsub.f32 1.0, %v505_v61  ;;  %vm510_vm2 = vweird.f32 %v4696_v17  ;;  %v501_v48 = vor.u32 1.1754944e-38, %v500_v55 }
 0x160   :  { %v497_v35 = vsel %vm5855_vm1, %v5808_v11, %v493_v30  ;;  %vm499_vm3 = vcmp.eq.f32.partialorder %v498_v42, 8.507059e+37  ;;  %v513_v16 = vand.u32 2147483647, %v5799_v44  ;;  %v527_v5 = vadd.f32 %v524_v29, %v310_v7  ;;  %vm511_vm5 = vmor %vm509_vm4, %vm510_vm2 }
 0x161   :  { %v4698_v39 = vpop.eup %4697  ;;  %v526_v3 = vadd.f32 %v523_v2, %v5791_v28  ;;  %v507_v9 = vmul.f32 %v4696_v17, %v506_v24  ;;  %564 = vperm.xlu2 %4620, %v5366_v1   ;;  %v502_v14 = vsel %vm499_vm3, %v501_v48, %v497_v35  ;;  %v516_v1 = vor.u32 1.1754944e-38, %v515_v52 }
 0x162   :  { %v534_v63 = vmul.f32 %v4698_v39, %v531_v47  ;;  %v532_v58 = vsub.f32 1.0, %v502_v14  ;;  %vm514_vm6 = vcmp.eq.f32.partialorder %v513_v16, 8.507059e+37 }
 0x163   :  { %4699 = vtanh.f32 %v526_v3  ;;  %v508_v57 = vadd.f32 %v4696_v17, %v507_v9 }
 0x164   :  { %v5865_v28 = vadd.f32 %v537_v10, %v534_v63  ;;  %4701 = vtanh.f32 %v527_v5 }
 0x165   :  { %v512_v11 = vsel %vm511_vm5, %v4696_v17, %v508_v57  ;;  %v538_v17 = vmul.f32 %v502_v14, %v5697_v25 }
 0x166   :  { %4363 = vmatmul.msk.f32.vlgmr.msra.gmra.mxu3 %vm311_vm9, %v5865_v28  ;;  %4366 = vmatmul.msk.f32.vlgmr.msrb.gmra.mxu0 %vm311_vm9, %v5865_v28  ;;  %v517_v0 = vsel %vm514_vm6, %v516_v1, %v512_v11 }
 0x167   :  { %4369 = vmatmul.msk.f32.vlgmr.msrb.gmra.mxu1 %vm311_vm9, %v5865_v28  ;;  %1209 = vmatpush.msra.mxu3 %v5519_v6  ;;  %v533_v61 = vsub.f32 1.0, %v517_v0 }
 0x168   :  { %1433 = vmatpush.msrb.mxu0 %v5416_v19  ;;  %1459 = vmatpush.msrb.mxu1 %v5517_v4 }
 0x169   :  { %v4700_v44 = vpop.eup %4699  ;;  %1210 = vmatpush.msra.mxu3 %v5530_v23 }
 0x16a   :  { %v535_v62 = vmul.f32 %v4700_v44, %v532_v58  ;;  %1434 = vmatpush.msrb.mxu0 %v5420_v20  ;;  %1460 = vmatpush.msrb.mxu1 %v5528_v18  ;;  %v4702_v19 = vpop.eup %4701  ;;  %v5316_v58 = vmov 12  }
 0x16b   :  { %1211 = vmatpush.msra.mxu3 %v5540_v36  ;;  %v536_v20 = vmul.f32 %v4702_v19, %v533_v61  ;;  %4622 = vset.pattern.permute.xlu1 %v5316_v58 }
 0x16c   :  { %v5883_v6 = vadd.f32 %v538_v17, %v535_v62  ;;  %1435 = vmatpush.msrb.mxu0 %v5425_v21  ;;  %1461 = vmatpush.msrb.mxu1 %v5538_v34  ;;  %v539_v21 = vmul.f32 %v517_v0, %v5608_v15  ;;  %v5973_v0 = vld [vmem:[%s8227_s0] sm:$0xff] }
 0x16d   :  { %1212 = vmatpush.msra.mxu3 %v5545_v38  ;;  %v8325_v38 = vld [vmem:[#allocation12_spill] sm:$0xff]  ;;  %832 = vperm.xlu1 %4622, %v5973_v0  }
 0x16e   :  { %4364 = vmatmul.msk.f32.gmra.mxu3 %vm311_vm9, %v5883_v6  ;;  %4367 = vmatmul.msk.f32.gmra.mxu0 %vm311_vm9, %v5883_v6  ;;  %v5902_v4 = vadd.f32 %v539_v21, %v536_v20 }
 0x16f   :  { %4370 = vmatmul.msk.f32.gmra.mxu1 %vm311_vm9, %v5883_v6  ;;  %1213 = vmatpush.msra.mxu3 %v5561_v51 }
 0x170   :  { %1436 = vmatpush.msrb.mxu0 %v5430_v22  ;;  %1462 = vmatpush.msrb.mxu1 %v5543_v37  ;;  %v5917_v22 = vpop.permute.xlu2 %544 }
 0x171   :  { %1214 = vmatpush.msra.mxu3 %v5570_v54  ;;  %8321 = vst [vmem:[#allocation27_spill] sm:$0xff] %v5917_v22 }
 0x172   :  { %1437 = vmatpush.msrb.mxu0 %v5437_v27  ;;  %1463 = vmatpush.msrb.mxu1 %v5559_v49 }
 0x173   :  { %1215 = vmatpush.msra.mxu3 %v5583_v60  ;;  %v8326_v60 = vld [vmem:[#allocation14_spill] sm:$0xff] }
 0x174   :  { %1438 = vmatpush.msrb.mxu0 %v5447_v31  ;;  %1464 = vmatpush.msrb.mxu1 %v5568_v53  ;;  %v549_v31 = vpop.permute.xlu1 %548 }
 0x175   :  { %1216 = vmatpush.msra.mxu3 %v5598_v13 }
 0x176   :  { %4365 = vmatmul.msk.f32.gmra.mxu3 %vm311_vm9, %v5902_v4  ;;  %4368 = vmatmul.msk.f32.gmra.mxu0 %vm311_vm9, %v5902_v4 }
 0x177   :  { %4371 = vmatmul.msk.f32.gmra.mxu1 %vm311_vm9, %v5902_v4  ;;  %1439 = vmatpush.msrb.mxu0 %v5452_v32 }
 0x178   :  { %1465 = vmatpush.msrb.mxu1 %v5581_v59 }
 0x179   :  { %1440 = vmatpush.msrb.mxu0 %v5459_v33  ;;  %v8324_v33 = vld [vmem:[#allocation15_spill] sm:$0xff] }
 0x17a   :  { %1466 = vmatpush.msrb.mxu1 %v5596_v12 }
 0x17c   :  { %v5943_v25 = vpop.permute.xlu1 %552 }
 0x17d   :  { %8328 = vst [vmem:[#allocation30_spill] sm:$0xff] %v5943_v25 }
 0x1b3   :  { %v561_v27 = vpop.permute.xlu2 %560 }
 0x1b4   :  { %v5920_v18 = vsel %vm115_vm0, %v561_v27, %v549_v31  ;;  %v5933_v37 = vsel %vm115_vm0, %v549_v31, %v561_v27 }
 0x1b5   :  { %8322 = vst [vmem:[#allocation28_spill] sm:$0xff] %v5920_v18  ;;  %v5922_v23 = vpop.permute.xlu0 %556  ;;  %v577_v54 = vmul.f32 %v5933_v37, %v5395_v8  ;;  %v571_v43 = vmul.f32 %v5933_v37, %v8325_v38  ;;  %v5318_v18 = vmov 4  }
 0x1b6   :  { %8323 = vst [vmem:[#allocation29_spill] sm:$0xff] %v5922_v23  ;;  %v5927_v34 = vsel %vm115_vm0, %v5917_v22, %v5922_v23 }
 0x1b7   :  { %v576_v32 = vmul.f32 %v5927_v34, %v5395_v8  ;;  %v570_v49 = vmul.f32 %v5927_v34, %v8325_v38  ;;  %v580_v13 = vadd.f32 %v577_v54, %v8324_v33  ;;  %v574_v42 = vadd.f32 %v571_v43, %v8326_v60 }
 0x1b9   :  { %v579_v36 = vadd.f32 %v576_v32, %v8324_v33  ;;  %v573_v12 = vadd.f32 %v570_v49, %v8326_v60 }
 0x1bb   :  { %v5941_v15 = vpop.permute.xlu2 %564 }
 0x1bc   :  { %8327 = vst [vmem:[#allocation12_spill] sm:$0xff] %v5941_v15  ;;  %v5950_v30 = vsel %vm115_vm0, %v5943_v25, %v5941_v15 }
 0x1bd   :  { %v578_v47 = vmul.f32 %v5950_v30, %v5395_v8  ;;  %v572_v63 = vmul.f32 %v5950_v30, %v8325_v38 }
 0x1bf   :  { %v581_v29 = vadd.f32 %v578_v47, %v8324_v33  ;;  %v575_v14 = vadd.f32 %v572_v63, %v8326_v60 }
 0x1e3   :  { %v640_v51 = vpop.f32.mrf.mxu0 }
 0x1e4   :  { %v735_v53 = vadd.f32 %v640_v51, %v579_v36  ;;  %v666_v31 = vpop.f32.mrf.mxu1 }
 0x1e6   :  { %v4375_v59 = vmul.f32 -1.442695, %v735_v53  ;;  %v5317_v53 = vmov 3  }
 0x1e7   :  { %4621 = vset.pattern.permute.xlu0 %v5317_v53  ;;  %4623 = vset.pattern.permute.xlu2 %v5317_v53 }
 0x1e8   :  { %4703 = vpow2.f32 %v4375_v59  ;;  %820 = vperm.xlu0 %4621, %v5973_v0  }
 0x1e9   :  { %v614_v40 = vpop.f32.mrf.mxu3 }
 0x1ea   :  { %v675_v26 = vadd.f32 %v614_v40, %v573_v12  ;;  %v5988_v12 = vld [vmem:[%s8227_s0 + $0x8] sm:$0xff] }
 0x1eb   :  { %v643_v56 = vpop.f32.mrf.mxu0  ;;  %824 = vperm.xlu2 %4623, %v5988_v12   ;;  %836 = vperm.xlu1 %4622, %v5988_v12  }
 0x1ec   :  { %v4372_v2 = vmul.f32 -1.442695, %v675_v26  ;;  %v736_v24 = vadd.f32 %v643_v56, %v580_v13  ;;  %v8329_v26 = vld [vmem:[#allocation19_spill] sm:$0xff] }
 0x1ed   :  { %v582_v56 = vmul.f32 %v5927_v34, %v8329_v26 }
 0x1ee   :  { %v4704_v55 = vpop.eup %4703  ;;  %4705 = vpow2.f32 %v4372_v2  ;;  %v4376_v41 = vmul.f32 -1.442695, %v736_v24 }
 0x1ef   :  { %v5955_v39 = vadd.f32 1.0, %v4704_v55  ;;  %v795_v55 = vadd.f32 %v666_v31, %v5496_v50 }
 0x1f0   :  { %4707 = vpow2.f32 %v4376_v41  ;;  %4624 = vset.pattern.permute.xlu0 %v5316_v58 }
 0x1f1   :  { %v617_v7 = vpop.f32.mrf.mxu3  ;;  %4709 = vrcp.f32 %v5955_v39  ;;  %v761_v63 = vand.u32 2147483648, %v5955_v39  ;;  %vm755_vm13 = vweird.f32 %v5955_v39 }
 0x1f2   :  { %v676_v3 = vadd.f32 %v617_v7, %v574_v42 }
 0x1f3   :  { %v646_v45 = vpop.f32.mrf.mxu0  ;;  %v762_v58 = vor.u32 1.1754944e-38, %v761_v63  ;;  %4625 = vset.pattern.permute.xlu1 %v5318_v18 }
 0x1f4   :  { %v4706_v9 = vpop.eup %4705  ;;  %v4373_v10 = vmul.f32 -1.442695, %v676_v3  ;;  %v737_v35 = vadd.f32 %v646_v45, %v581_v29  ;;  %1096 = vperm.xlu1 %4625, %v5973_v0  }
 0x1f5   :  { %v687_v48 = vadd.f32 1.0, %v4706_v9  ;;  %v585_v9 = vadd.f32 %v582_v56, %v5486_v46 }
 0x1f6   :  { %v4708_v57 = vpop.eup %4707  ;;  %4711 = vpow2.f32 %v4373_v10  ;;  %v4377_v52 = vmul.f32 -1.442695, %v737_v35 }
 0x1f7   :  { %4713 = vrcp.f32 %v687_v48  ;;  %v5961_v16 = vpop.eup %4709  ;;  %v5963_v5 = vadd.f32 1.0, %v4708_v57  ;;  %v701_v51 = vand.u32 2147483648, %v687_v48  ;;  %v699_v59 = vand.u32 2147483647, %v687_v48  ;;  %v669_v57 = vpop.f32.mrf.mxu1 }
 0x1f8   :  { %4715 = vpow2.f32 %v4377_v52  ;;  %v751_v44 = vmul.f32 %v5961_v16, %v5955_v39  ;;  %vm695_vm8 = vweird.f32 %v687_v48  ;;  %vm756_vm11 = vweird.f32 %v5961_v16 }
 0x1f9   :  { %v620_v11 = vpop.f32.mrf.mxu3  ;;  %4717 = vrcp.f32 %v5963_v5  ;;  %v702_v41 = vor.u32 1.1754944e-38, %v701_v51  ;;  %vm700_vm12 = vcmp.eq.f32.partialorder %v699_v59, 8.507059e+37  ;;  %vm6014_vm14 = vmor %vm755_vm13, %vm756_vm11  ;;  %v796_v31 = vadd.f32 %v669_v57, %v5496_v50 }
 0x1fa   :  { %v677_v1 = vadd.f32 %v620_v11, %v575_v14  ;;  %v752_v27 = vsub.f32 1.0, %v751_v44  ;;  %vm770_vm6 = vweird.f32 %v5963_v5 }
 0x1fc   :  { %v4712_v62 = vpop.eup %4711  ;;  %v4374_v17 = vmul.f32 -1.442695, %v677_v1  ;;  %v753_v13 = vmul.f32 %v5961_v16, %v752_v27  ;;  %1100 = vperm.xlu1 %4625, %v5988_v12  }
 0x1fd   :  { %v4714_v61 = vpop.eup %4713  ;;  %v5976_v19 = vadd.f32 1.0, %v4712_v62  ;;  %v583_v62 = vmul.f32 %v5933_v37, %v8329_v26  ;;  %v584_v37 = vmul.f32 %v5950_v30, %v8329_v26  ;;  %v776_v30 = vand.u32 2147483648, %v5963_v5 }
 0x1fe   :  { %v4716_v20 = vpop.eup %4715  ;;  %v691_v21 = vmul.f32 %v4714_v61, %v687_v48  ;;  %4719 = vpow2.f32 %v4374_v17  ;;  %vm696_vm7 = vweird.f32 %v4714_v61  ;;  %v754_v3 = vadd.f32 %v5961_v16, %v753_v13 }
 0x1ff   :  { %4721 = vrcp.f32 %v5976_v19  ;;  %v5979_v32 = vpop.eup %4717  ;;  %v5981_v49 = vadd.f32 1.0, %v4716_v20  ;;  %vm697_vm10 = vmor %vm695_vm8, %vm696_vm7  ;;  %v759_v48 = vand.u32 2147483647, %v5955_v39  ;;  %v716_v52 = vand.u32 2147483648, %v5976_v19  ;;  %v6023_v39 = vld [vmem:[%s8227_s0 + $0x10] sm:$0xff] }
 0x200   :  { %v692_v36 = vsub.f32 1.0, %v691_v21  ;;  %v766_v40 = vmul.f32 %v5979_v32, %v5963_v5  ;;  %v714_v1 = vand.u32 2147483647, %v5976_v19  ;;  %828 = vperm.xlu2 %4623, %v6023_v39   ;;  %840 = vperm.xlu0 %4624, %v6023_v39   ;;  %vm710_vm1 = vweird.f32 %v5976_v19 }
 0x201   :  { %4723 = vrcp.f32 %v5981_v49  ;;  %vm760_vm3 = vcmp.eq.f32.partialorder %v759_v48, 8.507059e+37  ;;  %vm771_vm5 = vweird.f32 %v5979_v32  ;;  %v586_v13 = vadd.f32 %v583_v62, %v5486_v46  ;;  %v6072_v62 = vld [vmem:[#allocation2 + $0xb8] sm:$0xff] }
 0x202   :  { %v693_v54 = vmul.f32 %v4714_v61, %v692_v36  ;;  %v767_v34 = vsub.f32 1.0, %v766_v40  ;;  %v717_v36 = vor.u32 1.1754944e-38, %v716_v52  ;;  %vm715_vm4 = vcmp.eq.f32.partialorder %v714_v1, 8.507059e+37  ;;  %vm6049_vm8 = vmor %vm770_vm6, %vm771_vm5 }
 0x203   :  { %v791_v1 = vand.u32 2147483648, %v5981_v49 }
 0x204   :  { %v4720_v43 = vpop.eup %4719  ;;  %v694_v2 = vadd.f32 %v4714_v61, %v693_v54  ;;  %v768_v20 = vmul.f32 %v5979_v32, %v767_v34 }
 0x205   :  { %v4722_v24 = vpop.eup %4721  ;;  %v5999_v47 = vadd.f32 1.0, %v4720_v43 }
 0x206   :  { %v698_v42 = vsel %vm697_vm10, %v4714_v61, %v694_v2  ;;  %v706_v7 = vmul.f32 %v4722_v24, %v5976_v19  ;;  %vm711_vm15 = vweird.f32 %v4722_v24  ;;  %v758_v61 = vsel %vm6014_vm14, %v5961_v16, %v754_v3 }
 0x207   :  { %v703_v29 = vsel %vm700_vm12, %v702_v41, %v698_v42  ;;  %4725 = vrcp.f32 %v5999_v47  ;;  %v6005_v45 = vpop.eup %4723  ;;  %vm712_vm2 = vmor %vm710_vm1, %vm711_vm15  ;;  %v763_v53 = vsel %vm760_vm3, %v762_v58, %v758_v61  ;;  %v769_v19 = vadd.f32 %v5979_v32, %v768_v20  ;;  %v6077_v20 = vld [vmem:[#allocation2 + $0xa8] sm:$0xff]  ;;  %v6080_v58 = vld [vmem:[#allocation2 + $0xb0] sm:$0xff] }
 0x208   :  { %v798_v10 = vmul.f32 %v795_v55, %v703_v29  ;;  %v707_v35 = vsub.f32 1.0, %v706_v7  ;;  %v781_v17 = vmul.f32 %v6005_v45, %v5981_v49  ;;  %v731_v56 = vand.u32 2147483648, %v5999_v47  ;;  %v672_v29 = vpop.f32.mrf.mxu1  ;;  %v6135_v7 = vld [vmem:[#allocation2 + $0x48] sm:$0xff]  ;;  %4627 = vset.pattern.permute.xlu0 %v5318_v18 }
 0x209   :  { %v807_v2 = vsub.f32 1.0, %v763_v53  ;;  %v729_v42 = vand.u32 2147483647, %v5999_v47  ;;  %v773_v63 = vsel %vm6049_vm8, %v5979_v32, %v769_v19  ;;  %vm725_vm10 = vweird.f32 %v5999_v47  ;;  %1104 = vperm.xlu0 %4627, %v6023_v39  }
 0x20a   :  { %v708_v11 = vmul.f32 %v4722_v24, %v707_v35  ;;  %v801_v44 = vadd.f32 %v798_v10, %v585_v9  ;;  %v782_v59 = vsub.f32 1.0, %v781_v17  ;;  %v813_v9 = vmul.f32 %v763_v53, %v5865_v28  ;;  %v6099_v53 = vld [vmem:[#allocation2 + $0x98] sm:$0xff] }
 0x20b   :  { %v777_v35 = vor.u32 1.1754944e-38, %v776_v30  ;;  %v732_v48 = vor.u32 1.1754944e-38, %v731_v56  ;;  %v797_v52 = vadd.f32 %v672_v29, %v5496_v50  ;;  %vm730_vm13 = vcmp.eq.f32.partialorder %v729_v42, 8.507059e+37  ;;  %v6122_v30 = vld [vmem:[#allocation2 + $0x58] sm:$0xff]  ;;  %v6125_v56 = vld [vmem:[#allocation2 + $0x60] sm:$0xff]  ;;  %v6141_v29 = vld [vmem:[#allocation2 + $0x28] sm:$0xff] }
 0x20c   :  { %v709_v21 = vadd.f32 %v4722_v24, %v708_v11  ;;  %4727 = vtanh.f32 %v801_v44  ;;  %vm786_vm14 = vweird.f32 %v6005_v45  ;;  %vm785_vm15 = vweird.f32 %v5981_v49 }
 0x20d   :  { %v4726_v27 = vpop.eup %4725  ;;  %v789_v61 = vand.u32 2147483647, %v5981_v49  ;;  %vm6085_vm1 = vmor %vm785_vm15, %vm786_vm14 }
 0x20e   :  { %v713_v16 = vsel %vm712_vm2, %v4722_v24, %v709_v21  ;;  %v721_v51 = vmul.f32 %v4726_v27, %v5999_v47  ;;  %v774_v24 = vand.u32 2147483647, %v5963_v5  ;;  %vm726_vm7 = vweird.f32 %v4726_v27 }
 0x20f   :  { %v718_v54 = vsel %vm715_vm4, %v717_v36, %v713_v16  ;;  %v783_v5 = vmul.f32 %v6005_v45, %v782_v59  ;;  %vm727_vm11 = vmor %vm725_vm10, %vm726_vm7  ;;  %v587_v47 = vadd.f32 %v584_v37, %v5486_v46  ;;  %v6089_v37 = vld [vmem:[#allocation2 + $0xa0] sm:$0xff]  ;;  %v6102_v59 = vld [vmem:[#allocation2 + $0x88] sm:$0xff]  ;;  %vm790_vm2 = vcmp.eq.f32.partialorder %v789_v61, 8.507059e+37 }
 0x210   :  { %v722_v40 = vsub.f32 1.0, %v721_v51  ;;  %v799_v43 = vmul.f32 %v796_v31, %v718_v54  ;;  %vm775_vm12 = vcmp.eq.f32.partialorder %v774_v24, 8.507059e+37  ;;  %v6096_v51 = vld [vmem:[#allocation2 + $0x90] sm:$0xff]  ;;  %v792_v54 = vor.u32 1.1754944e-38, %v791_v1 }
 0x211   :  { %v778_v28 = vsel %vm775_vm12, %v777_v35, %v773_v63  ;;  %v784_v32 = vadd.f32 %v6005_v45, %v783_v5  ;;  %v6149_v63 = vld [vmem:[#allocation2 + $0x38] sm:$0xff]  ;;  %v6167_v35 = vld [vmem:[#allocation2] sm:$0xff] }
 0x212   :  { %v4728_v55 = vpop.eup %4727  ;;  %v723_v41 = vmul.f32 %v4726_v27, %v722_v40  ;;  %v802_v3 = vadd.f32 %v799_v43, %v586_v13  ;;  %v808_v17 = vsub.f32 1.0, %v778_v28  ;;  %v814_v36 = vmul.f32 %v778_v28, %v5883_v6  ;;  %v6107_v6 = vld [vmem:[#allocation2 + $0x78] sm:$0xff]  ;;  %v6113_v40 = vld [vmem:[#allocation2 + $0x70] sm:$0xff] }
 0x213   :  { %v810_v34 = vmul.f32 %v4728_v55, %v807_v2  ;;  %v788_v16 = vsel %vm6085_vm1, %v6005_v45, %v784_v32  ;;  %v6110_v45 = vld [vmem:[#allocation2 + $0x80] sm:$0xff]  ;;  %v6128_v2 = vld [vmem:[#allocation2 + $0x68] sm:$0xff]  ;;  %v6161_v5 = vld [vmem:[#allocation2 + $0x18] sm:$0xff] }
 0x214   :  { %v724_v10 = vadd.f32 %v4726_v27, %v723_v41  ;;  %4729 = vtanh.f32 %v802_v3  ;;  %v793_v13 = vsel %vm790_vm2, %v792_v54, %v788_v16  ;;  %v6131_v55 = vld [vmem:[#allocation2 + $0x40] sm:$0xff]  ;;  %v6138_v3 = vld [vmem:[#allocation2 + $0x50] sm:$0xff] }
 0x215   :  { %v6059_v57 = vadd.f32 %v813_v9, %v810_v34  ;;  %v809_v43 = vsub.f32 1.0, %v793_v13  ;;  %v815_v42 = vmul.f32 %v793_v13, %v5902_v4  ;;  %v6146_v9 = vld [vmem:[#allocation2 + $0x30] sm:$0xff] }
 0x216   :  { %v728_v14 = vsel %vm727_vm11, %v4726_v27, %v724_v10  ;;  %v6152_v4 = vld [vmem:[#allocation2 + $0x10] sm:$0xff]  ;;  %v6164_v10 = vld [vmem:[#allocation2 + $0x20] sm:$0xff] }
 0x217   :  { %v733_v11 = vsel %vm730_vm13, %v732_v48, %v728_v14  ;;  %4378 = vmatmul.msk.f32.vlgmr.msra.gmra.mxu2 %vm311_vm9, %v6059_v57  ;;  %4381 = vmatmul.msk.f32.vlgmr.msrb.gmra.mxu3 %vm311_vm9, %v6059_v57  ;;  %v6170_v48 = vld [vmem:[#allocation2 + $0x8] sm:$0xff]  ;;  %v833_v14 = vpop.permute.xlu1 %832 }
 0x218   :  { %4384 = vmatmul.msk.f32.vlgmr.msra.gmra.mxu0 %vm311_vm9, %v6059_v57  ;;  %v800_v44 = vmul.f32 %v797_v52, %v733_v11  ;;  %1485 = vmatpush.msra.mxu2 %v6072_v62 }
 0x219   :  { %1709 = vmatpush.msrb.mxu3 %v6077_v20  ;;  %1735 = vmatpush.msra.mxu0 %v6080_v58 }
 0x21a   :  { %v4730_v21 = vpop.eup %4729  ;;  %v803_v31 = vadd.f32 %v800_v44, %v587_v47  ;;  %1486 = vmatpush.msra.mxu2 %v6089_v37 }
 0x21b   :  { %v811_v49 = vmul.f32 %v4730_v21, %v808_v17  ;;  %1710 = vmatpush.msrb.mxu3 %v6096_v51  ;;  %1736 = vmatpush.msra.mxu0 %v6099_v53 }
 0x21c   :  { %4731 = vtanh.f32 %v803_v31  ;;  %1487 = vmatpush.msra.mxu2 %v6102_v59 }
 0x21d   :  { %v6105_v19 = vadd.f32 %v814_v36, %v811_v49  ;;  %1711 = vmatpush.msrb.mxu3 %v6107_v6  ;;  %1737 = vmatpush.msra.mxu0 %v6110_v45 }
 0x21e   :  { %1488 = vmatpush.msra.mxu2 %v6113_v40 }
 0x21f   :  { %4379 = vmatmul.msk.f32.gmra.mxu2 %vm311_vm9, %v6105_v19  ;;  %4382 = vmatmul.msk.f32.gmra.mxu3 %vm311_vm9, %v6105_v19 }
 0x220   :  { %4385 = vmatmul.msk.f32.gmra.mxu0 %vm311_vm9, %v6105_v19  ;;  %1489 = vmatpush.msra.mxu2 %v6122_v30 }
 0x221   :  { %1712 = vmatpush.msrb.mxu3 %v6125_v56  ;;  %1738 = vmatpush.msra.mxu0 %v6128_v2 }
 0x222   :  { %v4732_v24 = vpop.eup %4731  ;;  %1490 = vmatpush.msra.mxu2 %v6131_v55 }
 0x223   :  { %v812_v41 = vmul.f32 %v4732_v24, %v809_v43  ;;  %1713 = vmatpush.msrb.mxu3 %v6135_v7  ;;  %1739 = vmatpush.msra.mxu0 %v6138_v3 }
 0x224   :  { %1491 = vmatpush.msra.mxu2 %v6141_v29 }
 0x225   :  { %v6144_v34 = vadd.f32 %v815_v42, %v812_v41  ;;  %1714 = vmatpush.msrb.mxu3 %v6146_v9  ;;  %1740 = vmatpush.msra.mxu0 %v6149_v63 }
 0x226   :  { %1492 = vmatpush.msra.mxu2 %v6152_v4 }
 0x227   :  { %4380 = vmatmul.msk.f32.gmra.mxu2 %vm311_vm9, %v6144_v34  ;;  %4383 = vmatmul.msk.f32.gmra.mxu3 %vm311_vm9, %v6144_v34 }
 0x228   :  { %4386 = vmatmul.msk.f32.gmra.mxu0 %vm311_vm9, %v6144_v34  ;;  %1715 = vmatpush.msrb.mxu3 %v6161_v5 }
 0x229   :  { %1741 = vmatpush.msra.mxu0 %v6164_v10 }
 0x22a   :  { %1716 = vmatpush.msrb.mxu3 %v6167_v35 }
 0x22b   :  { %1742 = vmatpush.msra.mxu0 %v6170_v48 }
 0x245   :  { %v6183_v1 = vpop.permute.xlu2 %824 }
 0x246   :  { %8337 = vst [vmem:[#allocation31_spill] sm:$0xff] %v6183_v1 }
 0x25a   :  { %v821_v52 = vpop.permute.xlu0 %820  ;;  %v6194_v24 = vpop.permute.xlu2 %828 }
 0x25b   :  { %v6174_v28 = vsel %vm115_vm0, %v833_v14, %v821_v52  ;;  %v6177_v11 = vsel %vm115_vm0, %v821_v52, %v833_v14  ;;  %8339 = vst [vmem:[#allocation33_spill] sm:$0xff] %v6194_v24 }
 0x25c   :  { %8336 = vst [vmem:[#allocation19_spill] sm:$0xff] %v6174_v28  ;;  %v846_v32 = vmul.f32 %v6177_v11, %v8325_v38  ;;  %v852_v47 = vmul.f32 %v6177_v11, %v5395_v8 }
 0x25d   :  { %v6185_v44 = vpop.permute.xlu1 %836 }
 0x25e   :  { %8338 = vst [vmem:[#allocation32_spill] sm:$0xff] %v6185_v44  ;;  %v849_v17 = vadd.f32 %v846_v32, %v8326_v60  ;;  %v855_v61 = vadd.f32 %v852_v47, %v8324_v33  ;;  %v844_v21 = vsel %vm115_vm0, %v6183_v1, %v6185_v44 }
 0x25f   :  { %v847_v16 = vmul.f32 %v844_v21, %v8325_v38  ;;  %v853_v54 = vmul.f32 %v844_v21, %v5395_v8  ;;  %v859_v18 = vmul.f32 %v844_v21, %v8329_v26 }
 0x261   :  { %v850_v42 = vadd.f32 %v847_v16, %v8326_v60  ;;  %v856_v52 = vadd.f32 %v853_v54, %v8324_v33  ;;  %v6229_v22 = vadd.f32 %v859_v18, %v5486_v46 }
 0x272   :  { %v6196_v41 = vpop.permute.xlu0 %840 }
 0x273   :  { %8340 = vst [vmem:[#allocation34_spill] sm:$0xff] %v6196_v41  ;;  %v6203_v14 = vsel %vm115_vm0, %v6194_v24, %v6196_v41 }
 0x29a   :  { %v890_v27 = vpop.f32.mrf.mxu2  ;;  %v916_v31 = vpop.f32.mrf.mxu3 }
 0x29b   :  { %v951_v49 = vadd.f32 %v890_v27, %v849_v17  ;;  %v1011_v36 = vadd.f32 %v916_v31, %v855_v61  ;;  %v848_v31 = vmul.f32 %v6203_v14, %v8325_v38 }
 0x29d   :  { %v4387_v13 = vmul.f32 -1.442695, %v951_v49  ;;  %v4390_v43 = vmul.f32 -1.442695, %v1011_v36  ;;  %v854_v49 = vmul.f32 %v6203_v14, %v5395_v8 }
 0x29f   :  { %4733 = vpow2.f32 %v4387_v13 }
 0x2a0   :  { %4735 = vpow2.f32 %v4390_v43 }
 0x2a2   :  { %v893_v32 = vpop.f32.mrf.mxu2  ;;  %v919_v47 = vpop.f32.mrf.mxu3 }
 0x2a3   :  { %v952_v17 = vadd.f32 %v893_v32, %v850_v42  ;;  %v1012_v61 = vadd.f32 %v919_v47, %v856_v52  ;;  %v851_v42 = vadd.f32 %v848_v31, %v8326_v60  ;;  %v857_v52 = vadd.f32 %v854_v49, %v8324_v33  ;;  %v942_v49 = vpop.f32.mrf.mxu0 }
 0x2a5   :  { %v4734_v27 = vpop.eup %4733  ;;  %v4388_v36 = vmul.f32 -1.442695, %v952_v17  ;;  %v4391_v54 = vmul.f32 -1.442695, %v1012_v61 }
 0x2a6   :  { %v4736_v16 = vpop.eup %4735  ;;  %v963_v13 = vadd.f32 1.0, %v4734_v27 }
 0x2a7   :  { %v6209_v43 = vadd.f32 1.0, %v4736_v16  ;;  %4737 = vpow2.f32 %v4388_v36 }
 0x2a8   :  { %4739 = vrcp.f32 %v963_v13  ;;  %v975_v23 = vand.u32 2147483647, %v963_v13  ;;  %vm971_vm4 = vweird.f32 %v963_v13 }
 0x2a9   :  { %4741 = vrcp.f32 %v6209_v43  ;;  %v1035_v44 = vand.u32 2147483647, %v6209_v43  ;;  %vm1031_vm8 = vweird.f32 %v6209_v43 }
 0x2aa   :  { %4743 = vpow2.f32 %v4391_v54  ;;  %v896_v32 = vpop.f32.mrf.mxu2  ;;  %v922_v47 = vpop.f32.mrf.mxu3  ;;  %vm976_vm6 = vcmp.eq.f32.partialorder %v975_v23, 8.507059e+37 }
 0x2ab   :  { %v953_v15 = vadd.f32 %v896_v32, %v851_v42  ;;  %v1013_v25 = vadd.f32 %v922_v47, %v857_v52  ;;  %vm1036_vm13 = vcmp.eq.f32.partialorder %v1035_v44, 8.507059e+37 }
 0x2ad   :  { %v4738_v17 = vpop.eup %4737  ;;  %v4389_v61 = vmul.f32 -1.442695, %v953_v15  ;;  %v4392_v31 = vmul.f32 -1.442695, %v1013_v25  ;;  %v977_v15 = vand.u32 2147483648, %v963_v13 }
 0x2ae   :  { %v4740_v27 = vpop.eup %4739  ;;  %v6216_v36 = vadd.f32 1.0, %v4738_v17 }
 0x2af   :  { %v6218_v16 = vpop.eup %4741  ;;  %v967_v54 = vmul.f32 %v4740_v27, %v963_v13  ;;  %4745 = vpow2.f32 %v4389_v61  ;;  %vm972_vm3 = vweird.f32 %v4740_v27 }
 0x2b0   :  { %v4744_v42 = vpop.eup %4743  ;;  %v1027_v52 = vmul.f32 %v6218_v16, %v6209_v43  ;;  %4747 = vrcp.f32 %v6216_v36  ;;  %vm973_vm5 = vmor %vm971_vm4, %vm972_vm3  ;;  %vm1032_vm7 = vweird.f32 %v6218_v16  ;;  %v990_v28 = vand.u32 2147483647, %v6216_v36 }
 0x2b1   :  { %v968_v32 = vsub.f32 1.0, %v967_v54  ;;  %v6224_v47 = vadd.f32 1.0, %v4744_v42  ;;  %4749 = vpow2.f32 %v4392_v31  ;;  %v1071_v42 = vadd.f32 %v942_v49, %v5496_v50  ;;  %vm6256_vm11 = vmor %vm1031_vm8, %vm1032_vm7 }
 0x2b2   :  { %v1028_v17 = vsub.f32 1.0, %v1027_v52  ;;  %v858_v31 = vmul.f32 %v6177_v11, %v8329_v26  ;;  %v978_v52 = vor.u32 1.1754944e-38, %v977_v15  ;;  %vm986_vm12 = vweird.f32 %v6216_v36 }
 0x2b3   :  { %v969_v25 = vmul.f32 %v4740_v27, %v968_v32  ;;  %4751 = vrcp.f32 %v6224_v47  ;;  %vm991_vm15 = vcmp.eq.f32.partialorder %v990_v28, 8.507059e+37  ;;  %v860_v28 = vmul.f32 %v6203_v14, %v8329_v26 }
 0x2b4   :  { %v1029_v21 = vmul.f32 %v6218_v16, %v1028_v17  ;;  %v1037_v17 = vand.u32 2147483648, %v6209_v43  ;;  %vm1046_vm2 = vweird.f32 %v6224_v47 }
 0x2b5   :  { %v4746_v61 = vpop.eup %4745  ;;  %v970_v41 = vadd.f32 %v4740_v27, %v969_v25 }
 0x2b6   :  { %v4748_v54 = vpop.eup %4747  ;;  %v6235_v32 = vadd.f32 1.0, %v4746_v61  ;;  %v1030_v15 = vadd.f32 %v6218_v16, %v1029_v21  ;;  %v945_v61 = vpop.f32.mrf.mxu0 }
 0x2b7   :  { %v974_v24 = vsel %vm973_vm5, %v4740_v27, %v970_v41  ;;  %v982_v18 = vmul.f32 %v4748_v54, %v6216_v36  ;;  %v4750_v25 = vpop.eup %4749  ;;  %v861_v27 = vadd.f32 %v858_v31, %v5486_v46  ;;  %vm987_vm10 = vweird.f32 %v4748_v54 }
 0x2b8   :  { %v979_v13 = vsel %vm976_vm6, %v978_v52, %v974_v24  ;;  %4753 = vrcp.f32 %v6235_v32  ;;  %v6245_v23 = vadd.f32 1.0, %v4750_v25  ;;  %v992_v24 = vand.u32 2147483648, %v6216_v36  ;;  %vm988_vm14 = vmor %vm986_vm12, %vm987_vm10 }
 0x2b9   :  { %v6242_v49 = vpop.eup %4751  ;;  %v1074_v11 = vmul.f32 %v1071_v42, %v979_v13  ;;  %v983_v41 = vsub.f32 1.0, %v982_v18  ;;  %v1038_v42 = vor.u32 1.1754944e-38, %v1037_v17  ;;  %v1072_v43 = vadd.f32 %v945_v61, %v5496_v50 }
 0x2ba   :  { %v1042_v52 = vmul.f32 %v6242_v49, %v6224_v47  ;;  %4755 = vrcp.f32 %v6245_v23  ;;  %v1034_v13 = vsel %vm6256_vm11, %v6218_v16, %v1030_v15  ;;  %v993_v33 = vor.u32 1.1754944e-38, %v992_v24 }
 0x2bb   :  { %v984_v1 = vmul.f32 %v4748_v54, %v983_v41  ;;  %v1077_v18 = vadd.f32 %v1074_v11, %v861_v27  ;;  %v1052_v11 = vand.u32 2147483648, %v6224_v47  ;;  %v1039_v61 = vsel %vm1036_vm13, %v1038_v42, %v1034_v13 }
 0x2bc   :  { %v1043_v31 = vsub.f32 1.0, %v1042_v52  ;;  %vm1047_vm1 = vweird.f32 %v6242_v49  ;;  %v1050_v27 = vand.u32 2147483647, %v6224_v47  ;;  %v1083_v21 = vsub.f32 1.0, %v1039_v61 }
 0x2bd   :  { %v985_v25 = vadd.f32 %v4748_v54, %v984_v1  ;;  %4757 = vtanh.f32 %v1077_v18  ;;  %v5319_v1 = vmov 11   ;;  %vm6284_vm4 = vmor %vm1046_vm2, %vm1047_vm1  ;;  %vm1001_vm5 = vweird.f32 %v6235_v32 }
 0x2be   :  { %v4754_v41 = vpop.eup %4753  ;;  %v1044_v8 = vmul.f32 %v6242_v49, %v1043_v31  ;;  %4626 = vset.pattern.permute.xlu2 %v5319_v1  ;;  %4628 = vset.pattern.permute.xlu1 %v5319_v1  ;;  %v948_v24 = vpop.f32.mrf.mxu0  ;;  %v1053_v18 = vor.u32 1.1754944e-38, %v1052_v11  ;;  %vm1051_vm7 = vcmp.eq.f32.partialorder %v1050_v27, 8.507059e+37  ;;  %vm1061_vm11 = vweird.f32 %v6245_v23 }
 0x2bf   :  { %v989_v60 = vsel %vm988_vm14, %v4748_v54, %v985_v25  ;;  %v997_v17 = vmul.f32 %v4754_v41, %v6235_v32  ;;  %1108 = vperm.xlu2 %4626, %v5973_v0   ;;  %1116 = vperm.xlu1 %4628, %v6023_v39   ;;  %vm1002_vm3 = vweird.f32 %v4754_v41  ;;  %v1073_v1 = vadd.f32 %v948_v24, %v5496_v50 }
 0x2c0   :  { %v994_v36 = vsel %vm991_vm15, %v993_v33, %v989_v60  ;;  %v1045_v16 = vadd.f32 %v6242_v49, %v1044_v8  ;;  %v6272_v44 = vpop.eup %4755  ;;  %v1005_v33 = vand.u32 2147483647, %v6235_v32  ;;  %v1007_v60 = vand.u32 2147483648, %v6235_v32  ;;  %vm1003_vm6 = vmor %vm1001_vm5, %vm1002_vm3 }
 0x2c1   :  { %v998_v54 = vsub.f32 1.0, %v997_v17  ;;  %v1075_v15 = vmul.f32 %v1072_v43, %v994_v36  ;;  %v1057_v8 = vmul.f32 %v6272_v44, %v6245_v23  ;;  %v1089_v17 = vmul.f32 %v1039_v61, %v6059_v57 }
 0x2c2   :  { %v1049_v47 = vsel %vm6284_vm4, %v6242_v49, %v1045_v16  ;;  %v1008_v36 = vor.u32 1.1754944e-38, %v1007_v60  ;;  %vm1006_vm8 = vcmp.eq.f32.partialorder %v1005_v33, 8.507059e+37  ;;  %vm1062_vm10 = vweird.f32 %v6272_v44 }
 0x2c3   :  { %v999_v52 = vmul.f32 %v4754_v41, %v998_v54  ;;  %v1078_v42 = vadd.f32 %v1075_v15, %v6229_v22  ;;  %v4758_v43 = vpop.eup %4757  ;;  %v1058_v31 = vsub.f32 1.0, %v1057_v8  ;;  %v1054_v15 = vsel %vm1051_vm7, %v1053_v18, %v1049_v47  ;;  %vm6312_vm12 = vmor %vm1061_vm11, %vm1062_vm10  ;;  %v1097_v47 = vpop.permute.xlu1 %1096 }
 0x2c4   :  { %v1086_v13 = vmul.f32 %v4758_v43, %v1083_v21  ;;  %v863_v57 = vadd.f32 %v860_v28, %v5486_v46  ;;  %v1084_v61 = vsub.f32 1.0, %v1054_v15  ;;  %v1065_v16 = vand.u32 2147483647, %v6245_v23 }
 0x2c5   :  { %v1000_v25 = vadd.f32 %v4754_v41, %v999_v52  ;;  %4759 = vtanh.f32 %v1078_v42  ;;  %v1059_v22 = vmul.f32 %v6272_v44, %v1058_v31  ;;  %v1090_v24 = vmul.f32 %v1054_v15, %v6105_v19 }
 0x2c6   :  { %v6296_v32 = vadd.f32 %v1089_v17, %v1086_v13  ;;  %vm1066_vm13 = vcmp.eq.f32.partialorder %v1065_v16, 8.507059e+37  ;;  %v6380_v16 = vpop.permute.xlu0 %1104 }
 0x2c7   :  { %v1004_v54 = vsel %vm1003_vm6, %v4754_v41, %v1000_v25  ;;  %v1060_v49 = vadd.f32 %v6272_v44, %v1059_v22  ;;  %1112 = vperm.xlu2 %4626, %v5988_v12   ;;  %v1067_v41 = vand.u32 2147483648, %v6245_v23  ;;  %8353 = vst [vmem:[#allocation39_spill] sm:$0xff] %v6380_v16 }
 0x2c8   :  { %v1009_v8 = vsel %vm1006_vm8, %v1008_v36, %v1004_v54  ;;  %4393 = vmatmul.msk.f32.vlgmr.msra.gmra.mxu1 %vm311_vm9, %v6296_v32  ;;  %4396 = vmatmul.msk.f32.vlgmr.msrb.gmra.mxu2 %vm311_vm9, %v6296_v32  ;;  %v8350_v36 = vld [vmem:[#allocation14_spill] sm:$0xff] }
 0x2c9   :  { %v1076_v11 = vmul.f32 %v1073_v1, %v1009_v8  ;;  %4399 = vmatmul.msk.f32.vlgmr.msra.gmra.mxu3 %vm311_vm9, %v6296_v32  ;;  %1761 = vmatpush.msra.mxu1 %v6072_v62  ;;  %v1064_v52 = vsel %vm6312_vm12, %v6272_v44, %v1060_v49  ;;  %v1068_v23 = vor.u32 1.1754944e-38, %v1067_v41  ;;  %v8351_v8 = vld [vmem:[#allocation13_spill] sm:$0xff] }
 0x2ca   :  { %1985 = vmatpush.msrb.mxu2 %v6077_v20  ;;  %2011 = vmatpush.msra.mxu3 %v6080_v58 }
 0x2cb   :  { %v4760_v28 = vpop.eup %4759  ;;  %v1079_v60 = vadd.f32 %v1076_v11, %v863_v57  ;;  %1762 = vmatpush.msra.mxu1 %v6089_v37  ;;  %v1069_v14 = vsel %vm1066_vm13, %v1068_v23, %v1064_v52  ;;  %v6365_v17 = vpop.permute.xlu1 %1100 }
 0x2cc   :  { %v1087_v27 = vmul.f32 %v4760_v28, %v1084_v61  ;;  %1986 = vmatpush.msrb.mxu2 %v6096_v51  ;;  %2012 = vmatpush.msra.mxu3 %v6099_v53  ;;  %v1085_v19 = vsub.f32 1.0, %v1069_v14  ;;  %v1091_v43 = vmul.f32 %v1069_v14, %v6144_v34  ;;  %8348 = vst [vmem:[#allocation36_spill] sm:$0xff] %v6365_v17  ;;  %v8354_v28 = vld [vmem:[#allocation15_spill] sm:$0xff] }
 0x2cd   :  { %4761 = vtanh.f32 %v1079_v60  ;;  %1763 = vmatpush.msra.mxu1 %v6102_v59 }
 0x2ce   :  { %v6325_v21 = vadd.f32 %v1090_v24, %v1087_v27  ;;  %1987 = vmatpush.msrb.mxu2 %v6107_v6  ;;  %2013 = vmatpush.msra.mxu3 %v6110_v45 }
 0x2cf   :  { %1764 = vmatpush.msra.mxu1 %v6113_v40 }
 0x2d0   :  { %4394 = vmatmul.msk.f32.gmra.mxu1 %vm311_vm9, %v6325_v21  ;;  %4397 = vmatmul.msk.f32.gmra.mxu2 %vm311_vm9, %v6325_v21 }
 0x2d1   :  { %4400 = vmatmul.msk.f32.gmra.mxu3 %vm311_vm9, %v6325_v21  ;;  %1765 = vmatpush.msra.mxu1 %v6122_v30 }
 0x2d2   :  { %1988 = vmatpush.msrb.mxu2 %v6125_v56  ;;  %2014 = vmatpush.msra.mxu3 %v6128_v2 }
 0x2d3   :  { %v4762_v44 = vpop.eup %4761  ;;  %1766 = vmatpush.msra.mxu1 %v6131_v55 }
 0x2d4   :  { %v1088_v42 = vmul.f32 %v4762_v44, %v1085_v19  ;;  %1989 = vmatpush.msrb.mxu2 %v6135_v7  ;;  %2015 = vmatpush.msra.mxu3 %v6138_v3 }
 0x2d5   :  { %1767 = vmatpush.msra.mxu1 %v6141_v29 }
 0x2d6   :  { %v6344_v31 = vadd.f32 %v1091_v43, %v1088_v42  ;;  %1990 = vmatpush.msrb.mxu2 %v6146_v9  ;;  %2016 = vmatpush.msra.mxu3 %v6149_v63 }
 0x2d7   :  { %1768 = vmatpush.msra.mxu1 %v6152_v4 }
 0x2d8   :  { %4395 = vmatmul.msk.f32.gmra.mxu1 %vm311_vm9, %v6344_v31  ;;  %4398 = vmatmul.msk.f32.gmra.mxu2 %vm311_vm9, %v6344_v31 }
 0x2d9   :  { %4401 = vmatmul.msk.f32.gmra.mxu3 %vm311_vm9, %v6344_v31  ;;  %1991 = vmatpush.msrb.mxu2 %v6161_v5 }
 0x2da   :  { %2017 = vmatpush.msra.mxu3 %v6164_v10 }
 0x2db   :  { %1992 = vmatpush.msrb.mxu2 %v6167_v35 }
 0x2dc   :  { %2018 = vmatpush.msra.mxu3 %v6170_v48 }
 0x319   :  { %v1109_v34 = vpop.permute.xlu2 %1108 }
 0x31a   :  { %v6361_v18 = vsel %vm115_vm0, %v1109_v34, %v1097_v47  ;;  %v1119_v25 = vsel %vm115_vm0, %v1097_v47, %v1109_v34 }
 0x31b   :  { %8347 = vst [vmem:[#allocation35_spill] sm:$0xff] %v6361_v18  ;;  %v1122_v13 = vmul.f32 %v1119_v25, %v8325_v38  ;;  %v1128_v49 = vmul.f32 %v1119_v25, %v8351_v8 }
 0x31d   :  { %v1125_v22 = vadd.f32 %v1122_v13, %v8350_v36  ;;  %v1131_v33 = vadd.f32 %v1128_v49, %v8354_v28 }
 0x321   :  { %v6367_v1 = vpop.permute.xlu2 %1112 }
 0x322   :  { %8349 = vst [vmem:[#allocation37_spill] sm:$0xff] %v6367_v1  ;;  %v6373_v54 = vsel %vm115_vm0, %v6365_v17, %v6367_v1 }
 0x323   :  { %v1123_v41 = vmul.f32 %v6373_v54, %v8325_v38  ;;  %v1129_v14 = vmul.f32 %v6373_v54, %v8351_v8 }
 0x325   :  { %v1126_v52 = vadd.f32 %v1123_v41, %v8350_v36  ;;  %v1132_v13 = vadd.f32 %v1129_v14, %v8354_v28 }
 0x331   :  { %v6378_v61 = vpop.permute.xlu1 %1116 }
 0x332   :  { %8352 = vst [vmem:[#allocation38_spill] sm:$0xff] %v6378_v61  ;;  %v6386_v27 = vsel %vm115_vm0, %v6380_v16, %v6378_v61 }
 0x333   :  { %v1124_v42 = vmul.f32 %v6386_v27, %v8325_v38 }
 0x345   :  { %v1166_v15 = vpop.f32.mrf.mxu1 }
 0x346   :  { %v1227_v57 = vadd.f32 %v1166_v15, %v1125_v22  ;;  %v1127_v22 = vadd.f32 %v1124_v42, %v8350_v36 }
 0x348   :  { %v4402_v11 = vmul.f32 -1.442695, %v1227_v57 }
 0x34a   :  { %4763 = vpow2.f32 %v4402_v11 }
 0x34b   :  { %v1192_v60 = vpop.f32.mrf.mxu2 }
 0x34c   :  { %v1287_v24 = vadd.f32 %v1192_v60, %v1131_v33  ;;  %v1218_v14 = vpop.f32.mrf.mxu3 }
 0x34d   :  { %v1169_v23 = vpop.f32.mrf.mxu1 }
 0x34e   :  { %v4405_v19 = vmul.f32 -1.442695, %v1287_v24  ;;  %v1228_v44 = vadd.f32 %v1169_v23, %v1126_v52  ;;  %v1130_v24 = vmul.f32 %v6386_v27, %v8351_v8 }
 0x350   :  { %v4764_v43 = vpop.eup %4763  ;;  %4765 = vpow2.f32 %v4405_v19  ;;  %v4403_v34 = vmul.f32 -1.442695, %v1228_v44  ;;  %v8267_v44 = vmov 10  }
 0x351   :  { %v1239_v47 = vadd.f32 1.0, %v4764_v43  ;;  %4630 = vset.pattern.permute.xlu1 %v8267_v44  ;;  %4631 = vset.pattern.permute.xlu0 %v8267_v44 }
 0x352   :  { %4767 = vpow2.f32 %v4403_v34  ;;  %1384 = vperm.xlu1 %4630, %v5973_v0   ;;  %1388 = vperm.xlu0 %4631, %v5988_v12   ;;  %v1134_v34 = vmul.f32 %v1119_v25, %v8329_v26  ;;  %v1135_v25 = vmul.f32 %v6373_v54, %v8329_v26 }
 0x353   :  { %4769 = vrcp.f32 %v1239_v47  ;;  %v1195_v15 = vpop.f32.mrf.mxu2  ;;  %vm1247_vm15 = vweird.f32 %v1239_v47 }
 0x354   :  { %v1288_v49 = vadd.f32 %v1195_v15, %v1132_v13  ;;  %v1133_v13 = vadd.f32 %v1130_v24, %v8354_v28  ;;  %v1221_v16 = vpop.f32.mrf.mxu3 }
 0x355   :  { %v1172_v57 = vpop.f32.mrf.mxu1 }
 0x356   :  { %v4766_v41 = vpop.eup %4765  ;;  %v4406_v11 = vmul.f32 -1.442695, %v1288_v49  ;;  %v1229_v33 = vadd.f32 %v1172_v57, %v1127_v22  ;;  %v1253_v49 = vand.u32 2147483648, %v1239_v47 }
 0x357   :  { %v6395_v60 = vadd.f32 1.0, %v4766_v41 }
 0x358   :  { %v4768_v52 = vpop.eup %4767  ;;  %4771 = vpow2.f32 %v4406_v11  ;;  %v4404_v23 = vmul.f32 -1.442695, %v1229_v33  ;;  %v1251_v33 = vand.u32 2147483647, %v1239_v47 }
 0x359   :  { %v4770_v19 = vpop.eup %4769  ;;  %4773 = vrcp.f32 %v6395_v60  ;;  %v6402_v43 = vadd.f32 1.0, %v4768_v52  ;;  %vm1307_vm4 = vweird.f32 %v6395_v60 }
 0x35a   :  { %v1243_v42 = vmul.f32 %v4770_v19, %v1239_v47  ;;  %4775 = vpow2.f32 %v4404_v23  ;;  %vm1248_vm14 = vweird.f32 %v4770_v19  ;;  %v1137_v23 = vadd.f32 %v1134_v34, %v5486_v46 }
 0x35b   :  { %v1198_v22 = vpop.f32.mrf.mxu2  ;;  %4777 = vrcp.f32 %v6402_v43  ;;  %vm1249_vm1 = vmor %vm1247_vm15, %vm1248_vm14  ;;  %vm1252_vm2 = vcmp.eq.f32.partialorder %v1251_v33, 8.507059e+37  ;;  %v1266_v33 = vand.u32 2147483647, %v6402_v43  ;;  %vm1262_vm8 = vweird.f32 %v6402_v43 }
 0x35c   :  { %v1244_v15 = vsub.f32 1.0, %v1243_v42  ;;  %v1289_v57 = vadd.f32 %v1198_v22, %v1133_v13  ;;  %v1254_v13 = vor.u32 1.1754944e-38, %v1253_v49  ;;  %v1347_v22 = vadd.f32 %v1218_v14, %v5496_v50 }
 0x35d   :  { %v1313_v14 = vand.u32 2147483648, %v6395_v60  ;;  %vm1267_vm10 = vcmp.eq.f32.partialorder %v1266_v33, 8.507059e+37 }
 0x35e   :  { %v4772_v41 = vpop.eup %4771  ;;  %v1245_v11 = vmul.f32 %v4770_v19, %v1244_v15  ;;  %v4407_v12 = vmul.f32 -1.442695, %v1289_v57  ;;  %v1311_v57 = vand.u32 2147483647, %v6395_v60 }
 0x35f   :  { %v4774_v52 = vpop.eup %4773  ;;  %v6410_v0 = vadd.f32 1.0, %v4772_v41 }
 0x360   :  { %v4776_v44 = vpop.eup %4775  ;;  %v1303_v24 = vmul.f32 %v4774_v52, %v6395_v60  ;;  %v1246_v42 = vadd.f32 %v4770_v19, %v1245_v11  ;;  %vm1308_vm3 = vweird.f32 %v4774_v52  ;;  %vm6433_vm6 = vcmp.eq.f32.partialorder %v1311_v57, 8.507059e+37  ;;  %v6445_v57 = vld [vmem:[%s8227_s0] sm:$0xff] }
 0x361   :  { %4779 = vrcp.f32 %v6410_v0  ;;  %v6417_v15 = vadd.f32 1.0, %v4776_v44  ;;  %v4778_v34 = vpop.eup %4777  ;;  %v1138_v44 = vadd.f32 %v1135_v25, %v5486_v46  ;;  %vm6429_vm5 = vmor %vm1307_vm4, %vm1308_vm3  ;;  %v1348_v60 = vadd.f32 %v1221_v16, %v5496_v50 }
 0x362   :  { %v1304_v41 = vsub.f32 1.0, %v1303_v24  ;;  %v1250_v61 = vsel %vm1249_vm1, %v4770_v19, %v1246_v42  ;;  %4781 = vpow2.f32 %v4407_v12  ;;  %v1258_v11 = vmul.f32 %v4778_v34, %v6402_v43 }
 0x363   :  { %v1255_v54 = vsel %vm1252_vm2, %v1254_v13, %v1250_v61  ;;  %4783 = vrcp.f32 %v6417_v15  ;;  %v1268_v61 = vand.u32 2147483648, %v6402_v43  ;;  %vm1263_vm7 = vweird.f32 %v4778_v34 }
 0x364   :  { %v1305_v47 = vmul.f32 %v4774_v52, %v1304_v41  ;;  %v1350_v49 = vmul.f32 %v1347_v22, %v1255_v54  ;;  %v1259_v19 = vsub.f32 1.0, %v1258_v11  ;;  %v5321_v22 = vmov 5   ;;  %vm1264_vm11 = vmor %vm1262_vm8, %vm1263_vm7 }
 0x365   :  { %4629 = vset.pattern.permute.xlu2 %v5321_v22  ;;  %4632 = vset.pattern.permute.xlu1 %v5321_v22  ;;  %v1314_v54 = vor.u32 1.1754944e-38, %v1313_v14  ;;  %vm1322_vm12 = vweird.f32 %v6410_v0  ;;  %vm1277_vm1 = vweird.f32 %v6417_v15 }
 0x366   :  { %v1306_v12 = vadd.f32 %v4774_v52, %v1305_v47  ;;  %v1353_v24 = vadd.f32 %v1350_v49, %v1137_v23  ;;  %v1260_v25 = vmul.f32 %v4778_v34, %v1259_v19  ;;  %1372 = vperm.xlu2 %4629, %v6445_v57   ;;  %1380 = vperm.xlu1 %4632, %v6023_v39   ;;  %v1326_v39 = vand.u32 2147483647, %v6410_v0 }
 0x367   :  { %v6427_v42 = vpop.eup %4779 }
 0x368   :  { %v4782_v23 = vpop.eup %4781  ;;  %v1310_v11 = vsel %vm6429_vm5, %v4774_v52, %v1306_v12  ;;  %4785 = vtanh.f32 %v1353_v24  ;;  %v1318_v47 = vmul.f32 %v6427_v42, %v6410_v0  ;;  %v1261_v49 = vadd.f32 %v4778_v34, %v1260_v25 }
 0x369   :  { %v4784_v16 = vpop.eup %4783  ;;  %v6450_v14 = vadd.f32 1.0, %v4782_v23  ;;  %v1315_v52 = vsel %vm6433_vm6, %v1314_v54, %v1310_v11  ;;  %v1269_v12 = vor.u32 1.1754944e-38, %v1268_v61  ;;  %vm1323_vm13 = vweird.f32 %v6427_v42  ;;  %v1224_v23 = vpop.f32.mrf.mxu3 }
 0x36a   :  { %v1319_v19 = vsub.f32 1.0, %v1318_v47  ;;  %v1273_v24 = vmul.f32 %v4784_v16, %v6417_v15  ;;  %v1265_v13 = vsel %vm1264_vm11, %v4778_v34, %v1261_v49  ;;  %v1359_v41 = vsub.f32 1.0, %v1315_v52  ;;  %vm6472_vm15 = vmor %vm1322_vm12, %vm1323_vm13 }
 0x36b   :  { %4787 = vrcp.f32 %v6450_v14  ;;  %v1270_v43 = vsel %vm1267_vm10, %v1269_v12, %v1265_v13  ;;  %v1283_v61 = vand.u32 2147483648, %v6417_v15  ;;  %v1328_v54 = vand.u32 2147483648, %v6410_v0 }
 0x36c   :  { %v1274_v33 = vsub.f32 1.0, %v1273_v24  ;;  %v1320_v25 = vmul.f32 %v6427_v42, %v1319_v19  ;;  %v1351_v22 = vmul.f32 %v1348_v60, %v1270_v43  ;;  %vm1278_vm14 = vweird.f32 %v4784_v16 }
 0x36d   :  { %v1281_v47 = vand.u32 2147483647, %v6417_v15  ;;  %v1136_v19 = vmul.f32 %v6386_v27, %v8329_v26  ;;  %v1365_v13 = vmul.f32 %v1315_v52, %v6296_v32  ;;  %v6484_v32 = vld [vmem:[%s8227_s0 + $0x8] sm:$0xff]  ;;  %vm1279_vm2 = vmor %vm1277_vm1, %vm1278_vm14  ;;  %v1329_v15 = vor.u32 1.1754944e-38, %v1328_v54 }
 0x36e   :  { %v4786_v34 = vpop.eup %4785  ;;  %v1275_v11 = vmul.f32 %v4784_v16, %v1274_v33  ;;  %v1321_v49 = vadd.f32 %v6427_v42, %v1320_v25  ;;  %v1354_v24 = vadd.f32 %v1351_v22, %v1138_v44  ;;  %v1349_v33 = vadd.f32 %v1224_v23, %v5496_v50  ;;  %1376 = vperm.xlu2 %4629, %v6484_v32  }
 0x36f   :  { %v1362_v12 = vmul.f32 %v4786_v34, %v1359_v41  ;;  %v1284_v44 = vor.u32 1.1754944e-38, %v1283_v61  ;;  %vm1282_vm3 = vcmp.eq.f32.partialorder %v1281_v47, 8.507059e+37  ;;  %vm1327_vm4 = vcmp.eq.f32.partialorder %v1326_v39, 8.507059e+37 }
 0x370   :  { %v1276_v43 = vadd.f32 %v4784_v16, %v1275_v11  ;;  %v1325_v27 = vsel %vm6472_vm15, %v6427_v42, %v1321_v49  ;;  %4789 = vtanh.f32 %v1354_v24  ;;  %v1139_v23 = vadd.f32 %v1136_v19, %v5486_v46 }
 0x371   :  { %v4788_v0 = vpop.eup %4787  ;;  %v6488_v52 = vadd.f32 %v1365_v13, %v1362_v12  ;;  %v1330_v22 = vsel %vm1327_vm4, %v1329_v15, %v1325_v27  ;;  %v1343_v39 = vand.u32 2147483648, %v6450_v14  ;;  %vm1337_vm6 = vweird.f32 %v6450_v14 }
 0x372   :  { %v1333_v25 = vmul.f32 %v4788_v0, %v6450_v14  ;;  %v1280_v41 = vsel %vm1279_vm2, %v4784_v16, %v1276_v43  ;;  %v1341_v16 = vand.u32 2147483647, %v6450_v14  ;;  %v1360_v11 = vsub.f32 1.0, %v1330_v22 }
 0x373   :  { %v1285_v42 = vsel %vm1282_vm3, %v1284_v44, %v1280_v41  ;;  %4408 = vmatmul.msk.f32.vlgmr.msrb.gmra.mxu0 %vm311_vm9, %v6488_v52  ;;  %4411 = vmatmul.msk.f32.vlgmr.msrb.gmra.mxu1 %vm311_vm9, %v6488_v52  ;;  %vm1338_vm5 = vweird.f32 %v4788_v0  ;;  %v1366_v12 = vmul.f32 %v1330_v22, %v6325_v21  ;;  %v8361_v19 = vmov 10  }
 0x374   :  { %v1334_v34 = vsub.f32 1.0, %v1333_v25  ;;  %v1352_v61 = vmul.f32 %v1349_v33, %v1285_v42  ;;  %4414 = vmatmul.msk.f32.vlgmr.msra.gmra.mxu2 %vm311_vm9, %v6488_v52  ;;  %2037 = vmatpush.msrb.mxu0 %v6072_v62  ;;  %vm1339_vm7 = vmor %vm1337_vm6, %vm1338_vm5  ;;  %vm1342_vm8 = vcmp.eq.f32.partialorder %v1341_v16, 8.507059e+37 }
 0x375   :  { %2237 = vmatpush.msrb.mxu1 %v6077_v20  ;;  %2263 = vmatpush.msra.mxu2 %v6080_v58  ;;  %v1344_v58 = vor.u32 1.1754944e-38, %v1343_v39 }
 0x376   :  { %v1355_v54 = vadd.f32 %v1352_v61, %v1139_v23  ;;  %v1335_v47 = vmul.f32 %v4788_v0, %v1334_v34  ;;  %2038 = vmatpush.msrb.mxu0 %v6089_v37  ;;  %v4790_v49 = vpop.eup %4789  ;;  %4633 = vset.pattern.permute.xlu2 %v8361_v19  ;;  %v6513_v37 = vld [vmem:[%s8227_s0 + $0x10] sm:$0xff] }
 0x377   :  { %2238 = vmatpush.msrb.mxu1 %v6096_v51  ;;  %2264 = vmatpush.msra.mxu2 %v6099_v53  ;;  %v1363_v62 = vmul.f32 %v4790_v49, %v1360_v11 }
 0x378   :  { %4791 = vtanh.f32 %v1355_v54  ;;  %v1336_v20 = vadd.f32 %v4788_v0, %v1335_v47  ;;  %2039 = vmatpush.msrb.mxu0 %v6102_v59  ;;  %1392 = vperm.xlu2 %4633, %v6513_v37  }
 0x379   :  { %2239 = vmatpush.msrb.mxu1 %v6107_v6  ;;  %v6517_v51 = vadd.f32 %v1366_v12, %v1363_v62  ;;  %2265 = vmatpush.msra.mxu2 %v6110_v45 }
 0x37a   :  { %v1340_v53 = vsel %vm1339_vm7, %v4788_v0, %v1336_v20  ;;  %2040 = vmatpush.msrb.mxu0 %v6113_v40 }
 0x37b   :  { %v1345_v59 = vsel %vm1342_vm8, %v1344_v58, %v1340_v53  ;;  %2240 = vmatpush.msrb.mxu1 %v6125_v56  ;;  %4409 = vmatmul.msk.f32.gmra.mxu0 %vm311_vm9, %v6517_v51 }
 0x37c   :  { %4412 = vmatmul.msk.f32.gmra.mxu1 %vm311_vm9, %v6517_v51  ;;  %4415 = vmatmul.msk.f32.gmra.mxu2 %vm311_vm9, %v6517_v51  ;;  %v1361_v6 = vsub.f32 1.0, %v1345_v59  ;;  %v1367_v40 = vmul.f32 %v1345_v59, %v6344_v31 }
 0x37d   :  { %2041 = vmatpush.msrb.mxu0 %v6122_v30  ;;  %2266 = vmatpush.msra.mxu2 %v6128_v2 }
 0x37e   :  { %v4792_v21 = vpop.eup %4791  ;;  %2241 = vmatpush.msrb.mxu1 %v6135_v7 }
 0x37f   :  { %v1364_v45 = vmul.f32 %v4792_v21, %v1361_v6  ;;  %2042 = vmatpush.msrb.mxu0 %v6131_v55  ;;  %2267 = vmatpush.msra.mxu2 %v6138_v3 }
 0x380   :  { %2242 = vmatpush.msrb.mxu1 %v6146_v9 }
 0x381   :  { %v6535_v56 = vadd.f32 %v1367_v40, %v1364_v45  ;;  %2043 = vmatpush.msrb.mxu0 %v6141_v29  ;;  %2268 = vmatpush.msra.mxu2 %v6149_v63  ;;  %v5322_v40 = vmov 6  }
 0x382   :  { %2243 = vmatpush.msrb.mxu1 %v6161_v5  ;;  %4634 = vset.pattern.permute.xlu1 %v5322_v40 }
 0x383   :  { %2044 = vmatpush.msrb.mxu0 %v6152_v4  ;;  %2269 = vmatpush.msra.mxu2 %v6164_v10 }
 0x384   :  { %4410 = vmatmul.msk.f32.gmra.mxu0 %vm311_vm9, %v6535_v56  ;;  %4413 = vmatmul.msk.f32.gmra.mxu1 %vm311_vm9, %v6535_v56 }
 0x385   :  { %4416 = vmatmul.msk.f32.gmra.mxu2 %vm311_vm9, %v6535_v56  ;;  %2244 = vmatpush.msrb.mxu1 %v6167_v35 }
 0x386   :  { %2270 = vmatpush.msra.mxu2 %v6170_v48  ;;  %4636 = vset.pattern.permute.xlu0 %v5322_v40 }
 0x387   :  { %1648 = vperm.xlu1 %4634, %v6445_v57   ;;  %1652 = vperm.xlu0 %4636, %v6484_v32  }
 0x3c0   :  { %v1373_v30 = vpop.permute.xlu2 %1372 }
 0x3c4   :  { %v1385_v2 = vpop.permute.xlu1 %1384  ;;  %v6564_v5 = vpop.permute.xlu0 %1388 }
 0x3c5   :  { %v6551_v55 = vsel %vm115_vm0, %v1385_v2, %v1373_v30  ;;  %v6554_v7 = vsel %vm115_vm0, %v1373_v30, %v1385_v2  ;;  %8364 = vst [vmem:[#allocation42_spill] sm:$0xff] %v6564_v5 }
 0x3c6   :  { %8362 = vst [vmem:[#allocation40_spill] sm:$0xff] %v6551_v55  ;;  %v1398_v3 = vmul.f32 %v6554_v7, %v8325_v38  ;;  %v1404_v29 = vmul.f32 %v6554_v7, %v8351_v8 }
 0x3c8   :  { %v6560_v9 = vpop.permute.xlu2 %1376  ;;  %v1401_v63 = vadd.f32 %v1398_v3, %v8350_v36  ;;  %v1407_v4 = vadd.f32 %v1404_v29, %v8354_v28 }
 0x3c9   :  { %8363 = vst [vmem:[#allocation41_spill] sm:$0xff] %v6560_v9  ;;  %v6569_v48 = vsel %vm115_vm0, %v6560_v9, %v6564_v5 }
 0x3ca   :  { %v1399_v60 = vmul.f32 %v6569_v48, %v8325_v38  ;;  %v1405_v43 = vmul.f32 %v6569_v48, %v8351_v8 }
 0x3cc   :  { %v1402_v44 = vadd.f32 %v1399_v60, %v8350_v36  ;;  %v1408_v15 = vadd.f32 %v1405_v43, %v8354_v28 }
 0x3d2   :  { %v6575_v33 = vpop.permute.xlu2 %1392 }
 0x3d3   :  { %8365 = vst [vmem:[#allocation43_spill] sm:$0xff] %v6575_v33 }
 0x3d8   :  { %v6577_v27 = vpop.permute.xlu1 %1380 }
 0x3d9   :  { %8366 = vst [vmem:[#allocation44_spill] sm:$0xff] %v6577_v27  ;;  %v6582_v0 = vsel %vm115_vm0, %v6577_v27, %v6575_v33 }
 0x3da   :  { %v1400_v23 = vmul.f32 %v6582_v0, %v8325_v38  ;;  %v1406_v34 = vmul.f32 %v6582_v0, %v8351_v8 }
 0x3dc   :  { %v1403_v49 = vadd.f32 %v1400_v23, %v8350_v36  ;;  %v1409_v62 = vadd.f32 %v1406_v34, %v8354_v28 }
 0x3f0   :  { %v1442_v10 = vpop.f32.mrf.mxu0  ;;  %v1468_v35 = vpop.f32.mrf.mxu1 }
 0x3f1   :  { %v1503_v31 = vadd.f32 %v1442_v10, %v1401_v63  ;;  %v1563_v14 = vadd.f32 %v1468_v35, %v1407_v4 }
 0x3f3   :  { %v4417_v24 = vmul.f32 -1.442695, %v1503_v31  ;;  %v4420_v13 = vmul.f32 -1.442695, %v1563_v14 }
 0x3f5   :  { %4793 = vpow2.f32 %v4417_v24 }
 0x3f6   :  { %4795 = vpow2.f32 %v4420_v13  ;;  %v1410_v13 = vmul.f32 %v6554_v7, %v8329_v26  ;;  %v5323_v7 = vmov 9  }
 0x3f7   :  { %v1494_v3 = vpop.f32.mrf.mxu2  ;;  %4635 = vset.pattern.permute.xlu2 %v5323_v7  ;;  %4637 = vset.pattern.permute.xlu1 %v5323_v7 }
 0x3f8   :  { %v1445_v25 = vpop.f32.mrf.mxu0  ;;  %v1413_v34 = vadd.f32 %v1410_v13, %v5486_v46  ;;  %1660 = vperm.xlu2 %4635, %v6445_v57   ;;  %1664 = vperm.xlu1 %4637, %v6484_v32  }
 0x3f9   :  { %v1471_v41 = vpop.f32.mrf.mxu1  ;;  %v1504_v42 = vadd.f32 %v1445_v25, %v1402_v44  ;;  %v1623_v25 = vadd.f32 %v1494_v3, %v5496_v50 }
 0x3fa   :  { %v1564_v22 = vadd.f32 %v1471_v41, %v1408_v15 }
 0x3fb   :  { %v4794_v61 = vpop.eup %4793  ;;  %v4418_v54 = vmul.f32 -1.442695, %v1504_v42 }
 0x3fc   :  { %v4796_v16 = vpop.eup %4795  ;;  %v1515_v39 = vadd.f32 1.0, %v4794_v61  ;;  %v4421_v47 = vmul.f32 -1.442695, %v1564_v22 }
 0x3fd   :  { %v6590_v11 = vadd.f32 1.0, %v4796_v16 }
 0x3fe   :  { %4797 = vrcp.f32 %v1515_v39  ;;  %v1527_v35 = vand.u32 2147483647, %v1515_v39  ;;  %v1529_v31 = vand.u32 2147483648, %v1515_v39  ;;  %vm1523_vm11 = vweird.f32 %v1515_v39 }
 0x3ff   :  { %4799 = vrcp.f32 %v6590_v11  ;;  %v1589_v61 = vand.u32 2147483648, %v6590_v11  ;;  %vm1583_vm15 = vweird.f32 %v6590_v11 }
 0x400   :  { %4801 = vpow2.f32 %v4418_v54  ;;  %vm1528_vm13 = vcmp.eq.f32.partialorder %v1527_v35, 8.507059e+37  ;;  %v1530_v15 = vor.u32 1.1754944e-38, %v1529_v31  ;;  %4638 = vset.pattern.permute.xlu2 %v5322_v40  ;;  %1668 = vperm.xlu1 %4637, %v6513_v37  }
 0x401   :  { %4803 = vpow2.f32 %v4421_v47  ;;  %v1448_v12 = vpop.f32.mrf.mxu0  ;;  %v1474_v20 = vpop.f32.mrf.mxu1  ;;  %v1587_v47 = vand.u32 2147483647, %v6590_v11  ;;  %1656 = vperm.xlu2 %4638, %v6513_v37  }
 0x402   :  { %v1505_v19 = vadd.f32 %v1448_v12, %v1403_v49  ;;  %v1565_v58 = vadd.f32 %v1474_v20, %v1409_v62  ;;  %v1497_v20 = vpop.f32.mrf.mxu2 }
 0x403   :  { %vm1588_vm2 = vcmp.eq.f32.partialorder %v1587_v47, 8.507059e+37  ;;  %v1624_v35 = vadd.f32 %v1497_v20, %v5496_v50 }
 0x404   :  { %v4798_v53 = vpop.eup %4797  ;;  %v4419_v59 = vmul.f32 -1.442695, %v1505_v19  ;;  %v4422_v6 = vmul.f32 -1.442695, %v1565_v58 }
 0x405   :  { %v6595_v21 = vpop.eup %4799  ;;  %v1519_v45 = vmul.f32 %v4798_v53, %v1515_v39  ;;  %vm1524_vm10 = vweird.f32 %v4798_v53 }
 0x406   :  { %v4802_v30 = vpop.eup %4801  ;;  %v1579_v2 = vmul.f32 %v6595_v21, %v6590_v11  ;;  %4805 = vpow2.f32 %v4419_v59  ;;  %vm1525_vm12 = vmor %vm1523_vm11, %vm1524_vm10  ;;  %vm1584_vm14 = vweird.f32 %v6595_v21  ;;  %v1411_v11 = vmul.f32 %v6569_v48, %v8329_v26 }
 0x407   :  { %v4804_v29 = vpop.eup %4803  ;;  %v1520_v63 = vsub.f32 1.0, %v1519_v45  ;;  %v6603_v4 = vadd.f32 1.0, %v4802_v30  ;;  %4807 = vpow2.f32 %v4422_v6  ;;  %vm6630_vm1 = vmor %vm1583_vm15, %vm1584_vm14  ;;  %v1590_v6 = vor.u32 1.1754944e-38, %v1589_v61 }
 0x408   :  { %v1580_v10 = vsub.f32 1.0, %v1579_v2  ;;  %v6605_v14 = vadd.f32 1.0, %v4804_v29 }
 0x409   :  { %v1521_v24 = vmul.f32 %v4798_v53, %v1520_v63  ;;  %4809 = vrcp.f32 %v6603_v4  ;;  %v1542_v30 = vand.u32 2147483647, %v6603_v4  ;;  %v1544_v2 = vand.u32 2147483648, %v6603_v4 }
 0x40a   :  { %v1581_v60 = vmul.f32 %v6595_v21, %v1580_v10  ;;  %4811 = vrcp.f32 %v6605_v14  ;;  %v1414_v10 = vadd.f32 %v1411_v11, %v5486_v46  ;;  %vm1538_vm4 = vweird.f32 %v6603_v4  ;;  %v1500_v12 = vpop.f32.mrf.mxu2 }
 0x40b   :  { %v1522_v43 = vadd.f32 %v4798_v53, %v1521_v24  ;;  %vm6651_vm5 = vcmp.eq.f32.partialorder %v1542_v30, 8.507059e+37  ;;  %vm1598_vm10 = vweird.f32 %v6605_v14 }
 0x40c   :  { %v4806_v44 = vpop.eup %4805  ;;  %v1582_v42 = vadd.f32 %v6595_v21, %v1581_v60  ;;  %v1545_v60 = vor.u32 1.1754944e-38, %v1544_v2 }
 0x40d   :  { %v4808_v41 = vpop.eup %4807  ;;  %v1526_v22 = vsel %vm1525_vm12, %v4798_v53, %v1522_v43  ;;  %v6615_v23 = vadd.f32 1.0, %v4806_v44 }
 0x40e   :  { %v1531_v16 = vsel %vm1528_vm13, %v1530_v15, %v1526_v22  ;;  %v6619_v39 = vadd.f32 1.0, %v4808_v41  ;;  %v1586_v58 = vsel %vm6630_vm1, %v6595_v21, %v1582_v42 }
 0x40f   :  { %v4810_v54 = vpop.eup %4809  ;;  %v1626_v49 = vmul.f32 %v1623_v25, %v1531_v16  ;;  %4813 = vrcp.f32 %v6615_v23  ;;  %v1591_v29 = vsel %vm1588_vm2, %v1590_v6, %v1586_v58  ;;  %v1604_v25 = vand.u32 2147483648, %v6605_v14 }
 0x410   :  { %v6626_v62 = vpop.eup %4811  ;;  %v1534_v19 = vmul.f32 %v4810_v54, %v6603_v4  ;;  %4815 = vrcp.f32 %v6619_v39  ;;  %vm1539_vm3 = vweird.f32 %v4810_v54  ;;  %v1635_v44 = vsub.f32 1.0, %v1591_v29 }
 0x411   :  { %v1629_v53 = vadd.f32 %v1626_v49, %v1413_v34  ;;  %v1594_v59 = vmul.f32 %v6626_v62, %v6605_v14  ;;  %vm1540_vm6 = vmor %vm1538_vm4, %vm1539_vm3  ;;  %v1557_v4 = vand.u32 2147483647, %v6615_v23  ;;  %v1559_v22 = vand.u32 2147483648, %v6615_v23 }
 0x412   :  { %v1535_v45 = vsub.f32 1.0, %v1534_v19  ;;  %v1641_v7 = vmul.f32 %v1591_v29, %v6488_v52  ;;  %vm1599_vm7 = vweird.f32 %v6626_v62  ;;  %v1602_v19 = vand.u32 2147483647, %v6605_v14 }
 0x413   :  { %4817 = vtanh.f32 %v1629_v53  ;;  %v1595_v3 = vsub.f32 1.0, %v1594_v59  ;;  %vm1553_vm11 = vweird.f32 %v6615_v23  ;;  %vm6677_vm12 = vmor %vm1598_vm10, %vm1599_vm7  ;;  %v1560_v6 = vor.u32 1.1754944e-38, %v1559_v22  ;;  %v6730_v22 = vld [vmem:[#allocation2 + $0x80] sm:$0xff]  ;;  %v6767_v59 = vld [vmem:[#allocation2 + $0x38] sm:$0xff] }
 0x414   :  { %v1536_v63 = vmul.f32 %v4810_v54, %v1535_v45  ;;  %v1625_v45 = vadd.f32 %v1500_v12, %v5496_v50  ;;  %vm1558_vm14 = vcmp.eq.f32.partialorder %v1557_v4, 8.507059e+37  ;;  %vm1603_vm15 = vcmp.eq.f32.partialorder %v1602_v19, 8.507059e+37  ;;  %v6724_v4 = vld [vmem:[#allocation2 + $0x88] sm:$0xff]  ;;  %v6751_v12 = vld [vmem:[#allocation2 + $0x50] sm:$0xff] }
 0x415   :  { %v4814_v48 = vpop.eup %4813  ;;  %v1596_v21 = vmul.f32 %v6626_v62, %v1595_v3  ;;  %vm1613_vm2 = vweird.f32 %v6619_v39 }
 0x416   :  { %v6649_v31 = vpop.eup %4815  ;;  %v1537_v24 = vadd.f32 %v4810_v54, %v1536_v63  ;;  %v1549_v43 = vmul.f32 %v4814_v48, %v6615_v23  ;;  %vm1554_vm8 = vweird.f32 %v4814_v48  ;;  %v1605_v23 = vor.u32 1.1754944e-38, %v1604_v25 }
 0x417   :  { %v1609_v15 = vmul.f32 %v6649_v31, %v6619_v39  ;;  %v1597_v16 = vadd.f32 %v6626_v62, %v1596_v21  ;;  %vm1555_vm13 = vmor %vm1553_vm11, %vm1554_vm8  ;;  %vm1614_vm1 = vweird.f32 %v6649_v31  ;;  %v6701_v21 = vld [vmem:[#allocation2 + $0xb0] sm:$0xff] }
 0x418   :  { %v1541_v41 = vsel %vm1540_vm6, %v4810_v54, %v1537_v24  ;;  %v1550_v42 = vsub.f32 1.0, %v1549_v43  ;;  %v1412_v54 = vmul.f32 %v6582_v0, %v8329_v26  ;;  %v6706_v24 = vld [vmem:[#allocation2 + $0xa0] sm:$0xff]  ;;  %vm6711_vm3 = vmor %vm1613_vm2, %vm1614_vm1  ;;  %v6715_v43 = vld [vmem:[#allocation2 + $0x90] sm:$0xff] }
 0x419   :  { %v4818_v40 = vpop.eup %4817  ;;  %v1546_v34 = vsel %vm6651_vm5, %v1545_v60, %v1541_v41  ;;  %v1610_v61 = vsub.f32 1.0, %v1609_v15  ;;  %v1601_v0 = vsel %vm6677_vm12, %v6626_v62, %v1597_v16  ;;  %v6693_v62 = vld [vmem:[#allocation2 + $0xb8] sm:$0xff]  ;;  %v6740_v16 = vld [vmem:[#allocation2 + $0x68] sm:$0xff] }
 0x41a   :  { %v1638_v47 = vmul.f32 %v4818_v40, %v1635_v44  ;;  %v1627_v49 = vmul.f32 %v1624_v35, %v1546_v34  ;;  %v1551_v20 = vmul.f32 %v4814_v48, %v1550_v42  ;;  %v1415_v3 = vadd.f32 %v1412_v54, %v5486_v46  ;;  %v6718_v44 = vld [vmem:[#allocation2 + $0x98] sm:$0xff] }
 0x41b   :  { %v1611_v52 = vmul.f32 %v6649_v31, %v1610_v61  ;;  %v1606_v63 = vsel %vm1603_vm15, %v1605_v23, %v1601_v0  ;;  %v1617_v35 = vand.u32 2147483647, %v6619_v39  ;;  %v6727_v42 = vld [vmem:[#allocation2 + $0x78] sm:$0xff]  ;;  %v6737_v61 = vld [vmem:[#allocation2 + $0x60] sm:$0xff] }
 0x41c   :  { %v1630_v11 = vadd.f32 %v1627_v49, %v1414_v10  ;;  %v1552_v58 = vadd.f32 %v4814_v48, %v1551_v20  ;;  %v6675_v53 = vadd.f32 %v1641_v7, %v1638_v47  ;;  %v6698_v10 = vld [vmem:[#allocation2 + $0xa8] sm:$0xff]  ;;  %v1642_v40 = vmul.f32 %v1606_v63, %v6517_v51  ;;  %v6745_v49 = vld [vmem:[#allocation2 + $0x58] sm:$0xff]  ;;  %v6784_v23 = vld [vmem:[#allocation2] sm:$0xff] }
 0x41d   :  { %v1612_v2 = vadd.f32 %v6649_v31, %v1611_v52  ;;  %vm1618_vm4 = vcmp.eq.f32.partialorder %v1617_v35, 8.507059e+37  ;;  %v6748_v51 = vld [vmem:[#allocation2 + $0x48] sm:$0xff]  ;;  %v6760_v52 = vld [vmem:[#allocation2 + $0x40] sm:$0xff]  ;;  %v6775_v0 = vld [vmem:[#allocation2 + $0x18] sm:$0xff] }
 0x41e   :  { %4819 = vtanh.f32 %v1630_v11  ;;  %v1556_v14 = vsel %vm1555_vm13, %v4814_v48, %v1552_v58  ;;  %4423 = vmatmul.msk.f32.vlgmr.msrb.gmra.mxu3 %vm311_vm9, %v6675_v53  ;;  %4426 = vmatmul.msk.f32.vlgmr.msra.gmra.mxu0 %vm311_vm9, %v6675_v53  ;;  %v1619_v48 = vand.u32 2147483648, %v6619_v39  ;;  %v1636_v39 = vsub.f32 1.0, %v1606_v63  ;;  %v6764_v58 = vld [vmem:[#allocation2 + $0x30] sm:$0xff] }
 0x41f   :  { %v1561_v30 = vsel %vm1558_vm14, %v1560_v6, %v1556_v14  ;;  %4429 = vmatmul.msk.f32.vlgmr.msra.gmra.mxu1 %vm311_vm9, %v6675_v53  ;;  %2289 = vmatpush.msrb.mxu3 %v6693_v62  ;;  %v1616_v15 = vsel %vm6711_vm3, %v6649_v31, %v1612_v2  ;;  %v6734_v31 = vld [vmem:[#allocation2 + $0x70] sm:$0xff]  ;;  %v6770_v6 = vld [vmem:[#allocation2 + $0x28] sm:$0xff]  ;;  %v6778_v14 = vld [vmem:[#allocation2 + $0x20] sm:$0xff]  ;;  %v1649_v2 = vpop.permute.xlu1 %1648 }
 0x420   :  { %v1628_v29 = vmul.f32 %v1625_v45, %v1561_v30  ;;  %2489 = vmatpush.msra.mxu0 %v6698_v10  ;;  %2515 = vmatpush.msra.mxu1 %v6701_v21  ;;  %v1620_v41 = vor.u32 1.1754944e-38, %v1619_v48  ;;  %v6787_v30 = vld [vmem:[#allocation2 + $0x8] sm:$0xff] }
 0x421   :  { %2290 = vmatpush.msrb.mxu3 %v6706_v24 }
 0x422   :  { %v1631_v13 = vadd.f32 %v1628_v29, %v1415_v3  ;;  %2490 = vmatpush.msra.mxu0 %v6715_v43  ;;  %2516 = vmatpush.msra.mxu1 %v6718_v44  ;;  %v1621_v34 = vsel %vm1618_vm4, %v1620_v41, %v1616_v15 }
 0x423   :  { %2291 = vmatpush.msrb.mxu3 %v6724_v4  ;;  %v1637_v20 = vsub.f32 1.0, %v1621_v34  ;;  %v1643_v11 = vmul.f32 %v1621_v34, %v6535_v56  ;;  %v6781_v56 = vld [vmem:[#allocation2 + $0x10] sm:$0xff] }
 0x424   :  { %v4820_v25 = vpop.eup %4819  ;;  %4821 = vtanh.f32 %v1631_v13  ;;  %2491 = vmatpush.msra.mxu0 %v6727_v42  ;;  %2517 = vmatpush.msra.mxu1 %v6730_v22  ;;  %v6805_v13 = vpop.permute.xlu0 %1652 }
 0x425   :  { %v1639_v7 = vmul.f32 %v4820_v25, %v1636_v39  ;;  %2292 = vmatpush.msrb.mxu3 %v6734_v31  ;;  %8376 = vst [vmem:[#allocation46_spill] sm:$0xff] %v6805_v13 }
 0x426   :  { %2492 = vmatpush.msra.mxu0 %v6737_v61  ;;  %2518 = vmatpush.msra.mxu1 %v6740_v16 }
 0x427   :  { %v6743_v47 = vadd.f32 %v1642_v40, %v1639_v7  ;;  %2293 = vmatpush.msrb.mxu3 %v6745_v49 }
 0x428   :  { %2493 = vmatpush.msra.mxu0 %v6748_v51  ;;  %2519 = vmatpush.msra.mxu1 %v6751_v12 }
 0x429   :  { %4424 = vmatmul.msk.f32.gmra.mxu3 %vm311_vm9, %v6743_v47  ;;  %4427 = vmatmul.msk.f32.gmra.mxu0 %vm311_vm9, %v6743_v47 }
 0x42a   :  { %v4822_v54 = vpop.eup %4821  ;;  %4430 = vmatmul.msk.f32.gmra.mxu1 %vm311_vm9, %v6743_v47  ;;  %2294 = vmatpush.msrb.mxu3 %v6760_v52 }
 0x42b   :  { %v1640_v19 = vmul.f32 %v4822_v54, %v1637_v20  ;;  %2494 = vmatpush.msra.mxu0 %v6764_v58  ;;  %2520 = vmatpush.msra.mxu1 %v6767_v59 }
 0x42c   :  { %2295 = vmatpush.msrb.mxu3 %v6770_v6 }
 0x42d   :  { %v6773_v45 = vadd.f32 %v1643_v11, %v1640_v19  ;;  %2495 = vmatpush.msra.mxu0 %v6775_v0  ;;  %2521 = vmatpush.msra.mxu1 %v6778_v14 }
 0x42e   :  { %2296 = vmatpush.msrb.mxu3 %v6781_v56 }
 0x42f   :  { %2496 = vmatpush.msra.mxu0 %v6784_v23  ;;  %2522 = vmatpush.msra.mxu1 %v6787_v30 }
 0x431   :  { %4425 = vmatmul.msk.f32.gmra.mxu3 %vm311_vm9, %v6773_v45  ;;  %4428 = vmatmul.msk.f32.gmra.mxu0 %vm311_vm9, %v6773_v45 }
 0x432   :  { %4431 = vmatmul.msk.f32.gmra.mxu1 %vm311_vm9, %v6773_v45 }
 0x452   :  { %v1661_v3 = vpop.permute.xlu2 %1660 }
 0x453   :  { %v6797_v29 = vsel %vm115_vm0, %v1661_v3, %v1649_v2  ;;  %v6800_v63 = vsel %vm115_vm0, %v1649_v2, %v1661_v3 }
 0x454   :  { %8375 = vst [vmem:[#allocation45_spill] sm:$0xff] %v6797_v29  ;;  %v1680_v48 = vmul.f32 %v6800_v63, %v8351_v8  ;;  %v1674_v60 = vmul.f32 %v6800_v63, %v8325_v38 }
 0x456   :  { %v1683_v35 = vadd.f32 %v1680_v48, %v8354_v28  ;;  %v1677_v40 = vadd.f32 %v1674_v60, %v8350_v36 }
 0x45b   :  { %v6820_v2 = vpop.permute.xlu2 %1656 }
 0x45c   :  { %8378 = vst [vmem:[#allocation48_spill] sm:$0xff] %v6820_v2 }
 0x46a   :  { %v6809_v39 = vpop.permute.xlu1 %1664 }
 0x46b   :  { %8377 = vst [vmem:[#allocation47_spill] sm:$0xff] %v6809_v39  ;;  %v6814_v41 = vsel %vm115_vm0, %v6805_v13, %v6809_v39  ;;  %v5325_v39 = vmov 7  }
 0x46c   :  { %v1681_v34 = vmul.f32 %v6814_v41, %v8351_v8  ;;  %v1675_v48 = vmul.f32 %v6814_v41, %v8325_v38  ;;  %4641 = vset.pattern.permute.xlu1 %v5325_v39  ;;  %4639 = vset.pattern.permute.xlu2 %v5325_v39 }
 0x46d   :  { %1928 = vperm.xlu1 %4641, %v6484_v32   ;;  %1924 = vperm.xlu2 %4639, %v6445_v57  }
 0x46e   :  { %v1684_v19 = vadd.f32 %v1681_v34, %v8354_v28 }
 0x472   :  { %v6822_v3 = vpop.permute.xlu1 %1668 }
 0x473   :  { %8379 = vst [vmem:[#allocation49_spill] sm:$0xff] %v6822_v3 }
 0x475   :  { %1932 = vperm.xlu1 %4641, %v6513_v37  }
 0x49b   :  { %v1744_v15 = vpop.f32.mrf.mxu0 }
 0x49c   :  { %v1839_v25 = vadd.f32 %v1744_v15, %v1683_v35 }
 0x49e   :  { %v4435_v7 = vmul.f32 -1.442695, %v1839_v25 }
 0x4a0   :  { %4823 = vpow2.f32 %v4435_v7  ;;  %v6831_v7 = vsel %vm115_vm0, %v6820_v2, %v6822_v3 }
 0x4a1   :  { %v1718_v20 = vpop.f32.mrf.mxu3  ;;  %v1676_v17 = vmul.f32 %v6831_v7, %v8325_v38 }
 0x4a2   :  { %v1779_v54 = vadd.f32 %v1718_v20, %v1677_v40  ;;  %v1678_v40 = vadd.f32 %v1675_v48, %v8350_v36  ;;  %v1682_v20 = vmul.f32 %v6831_v7, %v8351_v8 }
 0x4a4   :  { %v4432_v11 = vmul.f32 -1.442695, %v1779_v54 }
 0x4a6   :  { %v4824_v35 = vpop.eup %4823  ;;  %4825 = vpow2.f32 %v4432_v11  ;;  %v1747_v15 = vpop.f32.mrf.mxu0 }
 0x4a7   :  { %v6826_v60 = vadd.f32 1.0, %v4824_v35  ;;  %v1840_v25 = vadd.f32 %v1747_v15, %v1684_v19  ;;  %v1685_v19 = vadd.f32 %v1682_v20, %v8354_v28 }
 0x4a9   :  { %v4436_v34 = vmul.f32 -1.442695, %v1840_v25  ;;  %4827 = vrcp.f32 %v6826_v60  ;;  %vm1859_vm11 = vweird.f32 %v6826_v60 }
 0x4ab   :  { %4829 = vpow2.f32 %v4436_v34  ;;  %v1679_v34 = vadd.f32 %v1676_v17, %v8350_v36  ;;  %v1770_v17 = vpop.f32.mrf.mxu1 }
 0x4ac   :  { %v4826_v54 = vpop.eup %4825  ;;  %v1721_v11 = vpop.f32.mrf.mxu3 }
 0x4ad   :  { %v1791_v1 = vadd.f32 1.0, %v4826_v54  ;;  %v1780_v35 = vadd.f32 %v1721_v11, %v1678_v40 }
 0x4ae   :  { %v1750_v15 = vpop.f32.mrf.mxu0 }
 0x4af   :  { %4831 = vrcp.f32 %v1791_v1  ;;  %v4433_v18 = vmul.f32 -1.442695, %v1780_v35  ;;  %v1841_v48 = vadd.f32 %v1750_v15, %v1685_v19  ;;  %v6840_v25 = vpop.eup %4827  ;;  %v1803_v2 = vand.u32 2147483647, %v1791_v1 }
 0x4b0   :  { %v1855_v40 = vmul.f32 %v6840_v25, %v6826_v60  ;;  %vm1799_vm6 = vweird.f32 %v1791_v1  ;;  %vm1860_vm10 = vweird.f32 %v6840_v25 }
 0x4b1   :  { %v4830_v33 = vpop.eup %4829  ;;  %4833 = vpow2.f32 %v4433_v18  ;;  %v4437_v27 = vmul.f32 -1.442695, %v1841_v48  ;;  %v1805_v18 = vand.u32 2147483648, %v1791_v1  ;;  %vm1804_vm8 = vcmp.eq.f32.partialorder %v1803_v2, 8.507059e+37  ;;  %vm6875_vm12 = vmor %vm1859_vm11, %vm1860_vm10 }
 0x4b2   :  { %v6842_v5 = vadd.f32 1.0, %v4830_v33  ;;  %v1856_v15 = vsub.f32 1.0, %v1855_v40 }
 0x4b3   :  { %4835 = vpow2.f32 %v4437_v27  ;;  %v1806_v40 = vor.u32 1.1754944e-38, %v1805_v18 }
 0x4b4   :  { %v1724_v20 = vpop.f32.mrf.mxu3  ;;  %4837 = vrcp.f32 %v6842_v5  ;;  %vm1874_vm1 = vweird.f32 %v6842_v5 }
 0x4b5   :  { %v4832_v54 = vpop.eup %4831  ;;  %v1781_v11 = vadd.f32 %v1724_v20, %v1679_v34  ;;  %v1857_v34 = vmul.f32 %v6840_v25, %v1856_v15 }
 0x4b6   :  { %v1795_v9 = vmul.f32 %v4832_v54, %v1791_v1  ;;  %vm1800_vm5 = vweird.f32 %v4832_v54 }
 0x4b7   :  { %v4434_v35 = vmul.f32 -1.442695, %v1781_v11  ;;  %v4834_v19 = vpop.eup %4833  ;;  %vm1801_vm7 = vmor %vm1799_vm6, %vm1800_vm5 }
 0x4b8   :  { %v1796_v55 = vsub.f32 1.0, %v1795_v9  ;;  %v6848_v48 = vadd.f32 1.0, %v4834_v19  ;;  %v1686_v9 = vmul.f32 %v6800_v63, %v8329_v26  ;;  %v5324_v19 = vmov 8  }
 0x4b9   :  { %4839 = vpow2.f32 %v4434_v35  ;;  %v4836_v33 = vpop.eup %4835  ;;  %v1899_v35 = vadd.f32 %v1770_v17, %v5496_v50  ;;  %4640 = vset.pattern.permute.xlu0 %v5324_v19  ;;  %v1858_v63 = vadd.f32 %v6840_v25, %v1857_v34  ;;  %v1863_v17 = vand.u32 2147483647, %v6826_v60  ;;  %4642 = vset.pattern.permute.xlu2 %v5324_v19 }
 0x4ba   :  { %v1797_v3 = vmul.f32 %v4832_v54, %v1796_v55  ;;  %4841 = vrcp.f32 %v6848_v48  ;;  %v6851_v27 = vpop.eup %4837  ;;  %v6854_v11 = vadd.f32 1.0, %v4836_v33  ;;  %1936 = vperm.xlu0 %4640, %v6445_v57   ;;  %v1689_v33 = vadd.f32 %v1686_v9, %v5486_v46  ;;  %1940 = vperm.xlu2 %4642, %v6484_v32  }
 0x4bb   :  { %v1870_v1 = vmul.f32 %v6851_v27, %v6842_v5  ;;  %v1687_v9 = vmul.f32 %v6814_v41, %v8329_v26  ;;  %v1862_v57 = vsel %vm6875_vm12, %v6840_v25, %v1858_v63  ;;  %vm1864_vm13 = vcmp.eq.f32.partialorder %v1863_v17, 8.507059e+37 }
 0x4bc   :  { %v1798_v20 = vadd.f32 %v4832_v54, %v1797_v3  ;;  %4843 = vrcp.f32 %v6854_v11  ;;  %v1820_v13 = vand.u32 2147483648, %v6848_v48  ;;  %vm1814_vm15 = vweird.f32 %v6848_v48 }
 0x4bd   :  { %v1871_v39 = vsub.f32 1.0, %v1870_v1  ;;  %v1818_v1 = vand.u32 2147483647, %v6848_v48  ;;  %v1690_v25 = vadd.f32 %v1687_v9, %v5486_v46  ;;  %vm1875_vm4 = vweird.f32 %v6851_v27 }
 0x4be   :  { %v1802_v55 = vsel %vm1801_vm7, %v4832_v54, %v1798_v20  ;;  %v1865_v20 = vand.u32 2147483648, %v6826_v60  ;;  %vm6910_vm6 = vmor %vm1874_vm1, %vm1875_vm4 }
 0x4bf   :  { %v4840_v15 = vpop.eup %4839  ;;  %v1807_v3 = vsel %vm1804_vm8, %v1806_v40, %v1802_v55  ;;  %v1872_v41 = vmul.f32 %v6851_v27, %v1871_v39  ;;  %vm1819_vm3 = vcmp.eq.f32.partialorder %v1818_v1, 8.507059e+37  ;;  %v1878_v1 = vand.u32 2147483647, %v6842_v5 }
 0x4c0   :  { %v1902_v2 = vmul.f32 %v1899_v35, %v1807_v3  ;;  %v6866_v54 = vadd.f32 1.0, %v4840_v15  ;;  %v4842_v18 = vpop.eup %4841  ;;  %v1773_v15 = vpop.f32.mrf.mxu1  ;;  %v1866_v60 = vor.u32 1.1754944e-38, %v1865_v20  ;;  %v1821_v20 = vor.u32 1.1754944e-38, %v1820_v13 }
 0x4c1   :  { %v1810_v40 = vmul.f32 %v4842_v18, %v6848_v48  ;;  %vm1815_vm14 = vweird.f32 %v4842_v18  ;;  %v1900_v63 = vadd.f32 %v1773_v15, %v5496_v50  ;;  %v1873_v48 = vadd.f32 %v6851_v27, %v1872_v41 }
 0x4c2   :  { %4845 = vrcp.f32 %v6866_v54  ;;  %v1905_v35 = vadd.f32 %v1902_v2, %v1689_v33  ;;  %v6879_v55 = vpop.eup %4843  ;;  %v1867_v33 = vsel %vm1864_vm13, %v1866_v60, %v1862_v57  ;;  %vm1816_vm2 = vmor %vm1814_vm15, %vm1815_vm14  ;;  %v1835_v13 = vand.u32 2147483648, %v6866_v54  ;;  %1944 = vperm.xlu2 %4642, %v6513_v37  }
 0x4c3   :  { %v1811_v3 = vsub.f32 1.0, %v1810_v40  ;;  %v1885_v2 = vmul.f32 %v6879_v55, %v6854_v11  ;;  %v1911_v57 = vsub.f32 1.0, %v1867_v33  ;;  %v1917_v28 = vmul.f32 %v1867_v33, %v6675_v53 }
 0x4c4   :  { %4847 = vtanh.f32 %v1905_v35  ;;  %v1880_v35 = vand.u32 2147483648, %v6842_v5  ;;  %v1688_v53 = vmul.f32 %v6831_v7, %v8329_v26  ;;  %vm1829_vm7 = vweird.f32 %v6866_v54 }
 0x4c5   :  { %v1812_v29 = vmul.f32 %v4842_v18, %v1811_v3  ;;  %v1886_v3 = vsub.f32 1.0, %v1885_v2  ;;  %vm1879_vm11 = vcmp.eq.f32.partialorder %v1878_v1, 8.507059e+37  ;;  %vm1890_vm12 = vweird.f32 %v6879_v55 }
 0x4c6   :  { %v1881_v5 = vor.u32 1.1754944e-38, %v1880_v35  ;;  %vm1889_vm13 = vweird.f32 %v6854_v11 }
 0x4c7   :  { %v1813_v17 = vadd.f32 %v4842_v18, %v1812_v29  ;;  %v1887_v32 = vmul.f32 %v6879_v55, %v1886_v3  ;;  %vm6939_vm14 = vmor %vm1889_vm13, %vm1890_vm12 }
 0x4c8   :  { %v4846_v40 = vpop.eup %4845  ;;  %v1776_v2 = vpop.f32.mrf.mxu1 }
 0x4c9   :  { %v1825_v34 = vmul.f32 %v4846_v40, %v6866_v54  ;;  %v1817_v39 = vsel %vm1816_vm2, %v4842_v18, %v1813_v17  ;;  %vm1830_vm5 = vweird.f32 %v4846_v40  ;;  %v1833_v18 = vand.u32 2147483647, %v6866_v54 }
 0x4ca   :  { %v4848_v9 = vpop.eup %4847  ;;  %v1822_v15 = vsel %vm1819_vm3, %v1821_v20, %v1817_v39  ;;  %vm1831_vm8 = vmor %vm1829_vm7, %vm1830_vm5  ;;  %v1893_v39 = vand.u32 2147483647, %v6854_v11 }
 0x4cb   :  { %v1826_v29 = vsub.f32 1.0, %v1825_v34  ;;  %v1914_v60 = vmul.f32 %v4848_v9, %v1911_v57  ;;  %v1903_v36 = vmul.f32 %v1900_v63, %v1822_v15  ;;  %v1877_v63 = vsel %vm6910_vm6, %v6851_v27, %v1873_v48 }
 0x4cc   :  { %vm1834_vm10 = vcmp.eq.f32.partialorder %v1833_v18, 8.507059e+37  ;;  %v1882_v54 = vsel %vm1879_vm11, %v1881_v5, %v1877_v63  ;;  %v1691_v34 = vadd.f32 %v1688_v53, %v5486_v46  ;;  %vm1894_vm15 = vcmp.eq.f32.partialorder %v1893_v39, 8.507059e+37 }
 0x4cd   :  { %v1827_v19 = vmul.f32 %v4846_v40, %v1826_v29  ;;  %v6906_v17 = vadd.f32 %v1917_v28, %v1914_v60  ;;  %v1906_v20 = vadd.f32 %v1903_v36, %v1690_v25  ;;  %v1836_v28 = vor.u32 1.1754944e-38, %v1835_v13 }
 0x4ce   :  { %v1901_v36 = vadd.f32 %v1776_v2, %v5496_v50  ;;  %v1888_v25 = vadd.f32 %v6879_v55, %v1887_v32  ;;  %v1912_v3 = vsub.f32 1.0, %v1882_v54  ;;  %v1918_v29 = vmul.f32 %v1882_v54, %v6743_v47 }
 0x4cf   :  { %v1828_v33 = vadd.f32 %v4846_v40, %v1827_v19  ;;  %4438 = vmatmul.msk.f32.vlgmr.msrb.gmra.mxu2 %vm311_vm9, %v6906_v17  ;;  %4441 = vmatmul.msk.f32.vlgmr.msra.gmra.mxu3 %vm311_vm9, %v6906_v17  ;;  %4849 = vtanh.f32 %v1906_v20 }
 0x4d0   :  { %4444 = vmatmul.msk.f32.vlgmr.msrb.gmra.mxu0 %vm311_vm9, %v6906_v17  ;;  %2541 = vmatpush.msrb.mxu2 %v6693_v62  ;;  %v1892_v15 = vsel %vm6939_vm14, %v6879_v55, %v1888_v25 }
 0x4d1   :  { %v1832_v7 = vsel %vm1831_vm8, %v4846_v40, %v1828_v33  ;;  %2741 = vmatpush.msra.mxu3 %v6698_v10  ;;  %v1895_v40 = vand.u32 2147483648, %v6854_v11  ;;  %2767 = vmatpush.msrb.mxu0 %v6701_v21 }
 0x4d2   :  { %v1837_v27 = vsel %vm1834_vm10, %v1836_v28, %v1832_v7  ;;  %2542 = vmatpush.msrb.mxu2 %v6706_v24  ;;  %v8387_v28 = vld [vmem:[#allocation14_spill] sm:$0xff] }
 0x4d3   :  { %v1904_v35 = vmul.f32 %v1901_v36, %v1837_v27  ;;  %2742 = vmatpush.msra.mxu3 %v6715_v43  ;;  %2768 = vmatpush.msrb.mxu0 %v6718_v44  ;;  %v1896_v48 = vor.u32 1.1754944e-38, %v1895_v40  ;;  %v8388_v36 = vld [vmem:[#allocation15_spill] sm:$0xff] }
 0x4d4   :  { %2543 = vmatpush.msrb.mxu2 %v6724_v4 }
 0x4d5   :  { %v1907_v57 = vadd.f32 %v1904_v35, %v1691_v34  ;;  %v4850_v9 = vpop.eup %4849  ;;  %2743 = vmatpush.msra.mxu3 %v6727_v42  ;;  %2769 = vmatpush.msrb.mxu0 %v6730_v22  ;;  %v1897_v60 = vsel %vm1894_vm15, %v1896_v48, %v1892_v15 }
 0x4d6   :  { %v1915_v11 = vmul.f32 %v4850_v9, %v1912_v3  ;;  %2544 = vmatpush.msrb.mxu2 %v6734_v31  ;;  %v1913_v47 = vsub.f32 1.0, %v1897_v60  ;;  %v1919_v18 = vmul.f32 %v1897_v60, %v6773_v45  ;;  %v6983_v45 = vpop.permute.xlu2 %1924 }
 0x4d7   :  { %4851 = vtanh.f32 %v1907_v57  ;;  %2744 = vmatpush.msra.mxu3 %v6737_v61  ;;  %2770 = vmatpush.msrb.mxu0 %v6740_v16 }
 0x4d8   :  { %v6953_v13 = vadd.f32 %v1918_v29, %v1915_v11  ;;  %2545 = vmatpush.msrb.mxu2 %v6745_v49 }
 0x4d9   :  { %2745 = vmatpush.msra.mxu3 %v6748_v51  ;;  %2771 = vmatpush.msrb.mxu0 %v6751_v12 }
 0x4da   :  { %4439 = vmatmul.msk.f32.gmra.mxu2 %vm311_vm9, %v6953_v13  ;;  %4442 = vmatmul.msk.f32.gmra.mxu3 %vm311_vm9, %v6953_v13 }
 0x4db   :  { %4445 = vmatmul.msk.f32.gmra.mxu0 %vm311_vm9, %v6953_v13  ;;  %2546 = vmatpush.msrb.mxu2 %v6760_v52 }
 0x4dc   :  { %2746 = vmatpush.msra.mxu3 %v6764_v58  ;;  %2772 = vmatpush.msrb.mxu0 %v6767_v59 }
 0x4dd   :  { %v4852_v55 = vpop.eup %4851  ;;  %2547 = vmatpush.msrb.mxu2 %v6770_v6 }
 0x4de   :  { %v1916_v19 = vmul.f32 %v4852_v55, %v1913_v47  ;;  %2747 = vmatpush.msra.mxu3 %v6775_v0  ;;  %2773 = vmatpush.msrb.mxu0 %v6778_v14 }
 0x4df   :  { %2548 = vmatpush.msrb.mxu2 %v6781_v56  ;;  %v1929_v2 = vpop.permute.xlu1 %1928 }
 0x4e0   :  { %v6971_v1 = vadd.f32 %v1919_v18, %v1916_v19  ;;  %2748 = vmatpush.msra.mxu3 %v6784_v23  ;;  %2774 = vmatpush.msrb.mxu0 %v6787_v30 }
 0x4e2   :  { %4440 = vmatmul.msk.f32.gmra.mxu2 %vm311_vm9, %v6971_v1  ;;  %4443 = vmatmul.msk.f32.gmra.mxu3 %vm311_vm9, %v6971_v1 }
 0x4e3   :  { %4446 = vmatmul.msk.f32.gmra.mxu0 %vm311_vm9, %v6971_v1 }
 0x4e7   :  { %v7010_v9 = vpop.permute.xlu1 %1932 }
 0x4e8   :  { %8390 = vst [vmem:[#allocation52_spill] sm:$0xff] %v7010_v9 }
 0x514   :  { %v1941_v32 = vpop.permute.xlu2 %1940 }
 0x515   :  { %v6986_v41 = vsel %vm115_vm0, %v1941_v32, %v1929_v2  ;;  %v7002_v25 = vsel %vm115_vm0, %v1929_v2, %v1941_v32 }
 0x516   :  { %8386 = vst [vmem:[#allocation50_spill] sm:$0xff] %v6986_v41  ;;  %v1951_v3 = vmul.f32 %v7002_v25, %v8325_v38  ;;  %v1957_v37 = vmul.f32 %v7002_v25, %v8351_v8 }
 0x518   :  { %v1954_v15 = vadd.f32 %v1951_v3, %v8387_v28  ;;  %v1960_v11 = vadd.f32 %v1957_v37, %v8388_v36 }
 0x51c   :  { %v7008_v57 = vpop.permute.xlu2 %1944 }
 0x51d   :  { %8389 = vst [vmem:[#allocation51_spill] sm:$0xff] %v7008_v57  ;;  %v7017_v48 = vsel %vm115_vm0, %v7010_v9, %v7008_v57 }
 0x52c   :  { %v6988_v20 = vpop.permute.xlu0 %1936 }
 0x52d   :  { %v6993_v53 = vsel %vm115_vm0, %v6983_v45, %v6988_v20 }
 0x52e   :  { %v1950_v33 = vmul.f32 %v6993_v53, %v8325_v38  ;;  %v1956_v63 = vmul.f32 %v6993_v53, %v8351_v8 }
 0x530   :  { %v1953_v5 = vadd.f32 %v1950_v33, %v8387_v28  ;;  %v1959_v7 = vadd.f32 %v1956_v63, %v8388_v36  ;;  %v1952_v33 = vmul.f32 %v7017_v48, %v8325_v38  ;;  %v1958_v63 = vmul.f32 %v7017_v48, %v8351_v8 }
 0x552   :  { %v1994_v27 = vpop.f32.mrf.mxu2  ;;  %v2020_v54 = vpop.f32.mrf.mxu3 }
 0x553   :  { %v2055_v34 = vadd.f32 %v1994_v27, %v1953_v5  ;;  %v2115_v40 = vadd.f32 %v2020_v54, %v1959_v7  ;;  %v1955_v27 = vadd.f32 %v1952_v33, %v8387_v28  ;;  %v1961_v54 = vadd.f32 %v1958_v63, %v8388_v36 }
 0x555   :  { %v4447_v35 = vmul.f32 -1.442695, %v2055_v34  ;;  %v4450_v39 = vmul.f32 -1.442695, %v2115_v40 }
 0x557   :  { %4853 = vpow2.f32 %v4447_v35 }
 0x558   :  { %4855 = vpow2.f32 %v4450_v39 }
 0x55d   :  { %v4854_v29 = vpop.eup %4853  ;;  %v1997_v60 = vpop.f32.mrf.mxu2 }
 0x55e   :  { %v2023_v47 = vpop.f32.mrf.mxu3  ;;  %v4856_v55 = vpop.eup %4855  ;;  %v2067_v19 = vadd.f32 1.0, %v4854_v29  ;;  %v2056_v18 = vadd.f32 %v1997_v60, %v1954_v15 }
 0x55f   :  { %v2116_v32 = vadd.f32 %v2023_v47, %v1960_v11  ;;  %v7019_v2 = vadd.f32 1.0, %v4856_v55 }
 0x560   :  { %4857 = vrcp.f32 %v2067_v19  ;;  %v4448_v5 = vmul.f32 -1.442695, %v2056_v18  ;;  %v2046_v18 = vpop.f32.mrf.mxu0  ;;  %v2081_v33 = vand.u32 2147483648, %v2067_v19  ;;  %vm2075_vm2 = vweird.f32 %v2067_v19 }
 0x561   :  { %4859 = vrcp.f32 %v7019_v2  ;;  %v4451_v7 = vmul.f32 -1.442695, %v2116_v32  ;;  %v2079_v32 = vand.u32 2147483647, %v2067_v19  ;;  %vm2135_vm6 = vweird.f32 %v7019_v2 }
 0x562   :  { %4861 = vpow2.f32 %v4448_v5 }
 0x563   :  { %4863 = vpow2.f32 %v4451_v7  ;;  %vm2080_vm4 = vcmp.eq.f32.partialorder %v2079_v32, 8.507059e+37 }
 0x565   :  { %v2000_v34 = vpop.f32.mrf.mxu2 }
 0x566   :  { %v2026_v40 = vpop.f32.mrf.mxu3  ;;  %v4858_v35 = vpop.eup %4857  ;;  %v2057_v39 = vadd.f32 %v2000_v34, %v1955_v27 }
 0x567   :  { %v2117_v3 = vadd.f32 %v2026_v40, %v1961_v54  ;;  %v7028_v37 = vpop.eup %4859  ;;  %v2071_v15 = vmul.f32 %v4858_v35, %v2067_v19  ;;  %vm2076_vm1 = vweird.f32 %v4858_v35 }
 0x568   :  { %v2131_v11 = vmul.f32 %v7028_v37, %v7019_v2  ;;  %v4449_v29 = vmul.f32 -1.442695, %v2057_v39  ;;  %v4862_v55 = vpop.eup %4861  ;;  %vm2077_vm3 = vmor %vm2075_vm2, %vm2076_vm1  ;;  %v2082_v39 = vor.u32 1.1754944e-38, %v2081_v33  ;;  %vm2136_vm5 = vweird.f32 %v7028_v37 }
 0x569   :  { %v4452_v60 = vmul.f32 -1.442695, %v2117_v3  ;;  %v2072_v47 = vsub.f32 1.0, %v2071_v15  ;;  %v4864_v5 = vpop.eup %4863  ;;  %v2068_v27 = vadd.f32 1.0, %v4862_v55  ;;  %v2175_v3 = vadd.f32 %v2046_v18, %v5496_v50  ;;  %vm7052_vm7 = vmor %vm2135_vm6, %vm2136_vm5 }
 0x56a   :  { %v2132_v63 = vsub.f32 1.0, %v2131_v11  ;;  %4865 = vpow2.f32 %v4449_v29  ;;  %v7032_v54 = vadd.f32 1.0, %v4864_v5  ;;  %v1962_v15 = vmul.f32 %v6993_v53, %v8329_v26 }
 0x56b   :  { %v2073_v7 = vmul.f32 %v4858_v35, %v2072_v47  ;;  %4867 = vpow2.f32 %v4452_v60  ;;  %v2141_v33 = vand.u32 2147483648, %v7019_v2  ;;  %v2139_v53 = vand.u32 2147483647, %v7019_v2 }
 0x56c   :  { %v2133_v40 = vmul.f32 %v7028_v37, %v2132_v63  ;;  %4869 = vrcp.f32 %v2068_v27  ;;  %vm2090_vm11 = vweird.f32 %v2068_v27  ;;  %vm2150_vm1 = vweird.f32 %v7032_v54 }
 0x56d   :  { %v2074_v34 = vadd.f32 %v4858_v35, %v2073_v7  ;;  %4871 = vrcp.f32 %v7032_v54  ;;  %v1965_v7 = vadd.f32 %v1962_v15, %v5486_v46  ;;  %vm2140_vm8 = vcmp.eq.f32.partialorder %v2139_v53, 8.507059e+37 }
 0x56e   :  { %v2134_v19 = vadd.f32 %v7028_v37, %v2133_v40 }
 0x56f   :  { %v2078_v11 = vsel %vm2077_vm3, %v4858_v35, %v2074_v34  ;;  %v2049_v34 = vpop.f32.mrf.mxu0 }
 0x570   :  { %v4866_v29 = vpop.eup %4865  ;;  %v2083_v60 = vsel %vm2080_vm4, %v2082_v39, %v2078_v11  ;;  %v1963_v39 = vmul.f32 %v7002_v25, %v8329_v26  ;;  %v2138_v2 = vsel %vm7052_vm7, %v7028_v37, %v2134_v19  ;;  %v2142_v11 = vor.u32 1.1754944e-38, %v2141_v33 }
 0x571   :  { %v4868_v47 = vpop.eup %4867  ;;  %v2178_v55 = vmul.f32 %v2175_v3, %v2083_v60  ;;  %v7041_v63 = vadd.f32 1.0, %v4866_v29  ;;  %v2094_v60 = vand.u32 2147483647, %v2068_v27  ;;  %v2176_v8 = vadd.f32 %v2049_v34, %v5496_v50 }
 0x572   :  { %v7044_v5 = vadd.f32 1.0, %v4868_v47  ;;  %v4870_v18 = vpop.eup %4869  ;;  %v2096_v47 = vand.u32 2147483648, %v2068_v27  ;;  %v2143_v41 = vsel %vm2140_vm8, %v2142_v11, %v2138_v2  ;;  %v1966_v25 = vadd.f32 %v1963_v39, %v5486_v46 }
 0x573   :  { %4873 = vrcp.f32 %v7041_v63  ;;  %v7050_v35 = vpop.eup %4871  ;;  %v2086_v40 = vmul.f32 %v4870_v18, %v2068_v27  ;;  %v2181_v15 = vadd.f32 %v2178_v55, %v1965_v7  ;;  %vm2091_vm10 = vweird.f32 %v4870_v18 }
 0x574   :  { %4875 = vrcp.f32 %v7044_v5  ;;  %v2146_v3 = vmul.f32 %v7050_v35, %v7032_v54  ;;  %vm2095_vm12 = vcmp.eq.f32.partialorder %v2094_v60, 8.507059e+37  ;;  %v2156_v33 = vand.u32 2147483648, %v7032_v54  ;;  %vm2092_vm13 = vmor %vm2090_vm11, %vm2091_vm10 }
 0x575   :  { %v2087_v29 = vsub.f32 1.0, %v2086_v40  ;;  %4877 = vtanh.f32 %v2181_v15  ;;  %v2097_v7 = vor.u32 1.1754944e-38, %v2096_v47  ;;  %v2187_v40 = vsub.f32 1.0, %v2143_v41 }
 0x576   :  { %v2147_v57 = vsub.f32 1.0, %v2146_v3  ;;  %v2193_v39 = vmul.f32 %v2143_v41, %v6906_v17  ;;  %v2111_v3 = vand.u32 2147483648, %v7041_v63  ;;  %vm2151_vm14 = vweird.f32 %v7050_v35 }
 0x577   :  { %v2088_v9 = vmul.f32 %v4870_v18, %v2087_v29  ;;  %v2052_v29 = vpop.f32.mrf.mxu0  ;;  %v1964_v17 = vmul.f32 %v7017_v48, %v8329_v26  ;;  %vm2105_vm2 = vweird.f32 %v7041_v63  ;;  %vm7086_vm3 = vmor %vm2150_vm1, %vm2151_vm14  ;;  %vm2165_vm8 = vweird.f32 %v7044_v5 }
 0x578   :  { %v2148_v32 = vmul.f32 %v7050_v35, %v2147_v57  ;;  %v2109_v57 = vand.u32 2147483647, %v7041_v63  ;;  %v2112_v48 = vor.u32 1.1754944e-38, %v2111_v3 }
 0x579   :  { %v4874_v36 = vpop.eup %4873  ;;  %v2089_v55 = vadd.f32 %v4870_v18, %v2088_v9 }
 0x57a   :  { %v7067_v37 = vpop.eup %4875  ;;  %v2101_v19 = vmul.f32 %v4874_v36, %v7041_v63  ;;  %v2149_v11 = vadd.f32 %v7050_v35, %v2148_v32  ;;  %vm2106_vm15 = vweird.f32 %v4874_v36  ;;  %vm2110_vm5 = vcmp.eq.f32.partialorder %v2109_v57, 8.507059e+37 }
 0x57b   :  { %v2161_v53 = vmul.f32 %v7067_v37, %v7044_v5  ;;  %v2093_v34 = vsel %vm2092_vm13, %v4870_v18, %v2089_v55  ;;  %v4878_v9 = vpop.eup %4877  ;;  %v2154_v18 = vand.u32 2147483647, %v7032_v54  ;;  %vm2107_vm4 = vmor %vm2105_vm2, %vm2106_vm15  ;;  %v2157_v54 = vor.u32 1.1754944e-38, %v2156_v33 }
 0x57c   :  { %v2102_v27 = vsub.f32 1.0, %v2101_v19  ;;  %v2098_v2 = vsel %vm2095_vm12, %v2097_v7, %v2093_v34  ;;  %v2190_v47 = vmul.f32 %v4878_v9, %v2187_v40  ;;  %vm2166_vm7 = vweird.f32 %v7067_v37 }
 0x57d   :  { %v2162_v15 = vsub.f32 1.0, %v2161_v53  ;;  %v2179_v28 = vmul.f32 %v2176_v8, %v2098_v2  ;;  %v2177_v8 = vadd.f32 %v2052_v29, %v5496_v50  ;;  %v2153_v53 = vsel %vm7086_vm3, %v7050_v35, %v2149_v11  ;;  %vm7110_vm10 = vmor %vm2165_vm8, %vm2166_vm7  ;;  %v8401_v2 = vld [vmem:[#allocation52_spill] sm:$0xff] }
 0x57e   :  { %v2103_v60 = vmul.f32 %v4874_v36, %v2102_v27  ;;  %v7084_v32 = vadd.f32 %v2193_v39, %v2190_v47  ;;  %vm2155_vm6 = vcmp.eq.f32.partialorder %v2154_v18, 8.507059e+37  ;;  %v2169_v33 = vand.u32 2147483647, %v7044_v5 }
 0x57f   :  { %v2163_v41 = vmul.f32 %v7067_v37, %v2162_v15  ;;  %v2182_v7 = vadd.f32 %v2179_v28, %v1966_v25  ;;  %v2158_v35 = vsel %vm2155_vm6, %v2157_v54, %v2153_v53  ;;  %v2171_v25 = vand.u32 2147483648, %v7044_v5  ;;  %v8402_v15 = vld [vmem:[#allocation51_spill] sm:$0xff] }
 0x580   :  { %v2104_v55 = vadd.f32 %v4874_v36, %v2103_v60  ;;  %4453 = vmatmul.msk.f32.vlgmr.msrb.gmra.mxu1 %vm311_vm9, %v7084_v32  ;;  %4456 = vmatmul.msk.f32.vlgmr.msra.gmra.mxu2 %vm311_vm9, %v7084_v32  ;;  %v2188_v27 = vsub.f32 1.0, %v2158_v35  ;;  %v2194_v57 = vmul.f32 %v2158_v35, %v6953_v13  ;;  %vm2170_vm11 = vcmp.eq.f32.partialorder %v2169_v33, 8.507059e+37 }
 0x581   :  { %4879 = vtanh.f32 %v2182_v7  ;;  %4459 = vmatmul.msk.f32.vlgmr.msrb.gmra.mxu3 %vm311_vm9, %v7084_v32  ;;  %v2164_v28 = vadd.f32 %v7067_v37, %v2163_v41  ;;  %2793 = vmatpush.msrb.mxu1 %v6693_v62  ;;  %v2172_v5 = vor.u32 1.1754944e-38, %v2171_v25  ;;  %v7170_v11 = vsel %vm115_vm0, %v8402_v15, %v8401_v2 }
 0x582   :  { %v2108_v40 = vsel %vm2107_vm4, %v4874_v36, %v2104_v55  ;;  %v1967_v36 = vadd.f32 %v1964_v17, %v5486_v46  ;;  %2993 = vmatpush.msra.mxu2 %v6698_v10  ;;  %3019 = vmatpush.msrb.mxu3 %v6701_v21  ;;  %v2204_v47 = vmul.f32 %v7170_v11, %v8325_v38 }
 0x583   :  { %v2113_v63 = vsel %vm2110_vm5, %v2112_v48, %v2108_v40  ;;  %2794 = vmatpush.msrb.mxu1 %v6706_v24  ;;  %v2168_v10 = vsel %vm7110_vm10, %v7067_v37, %v2164_v28 }
 0x584   :  { %v2180_v39 = vmul.f32 %v2177_v8, %v2113_v63  ;;  %2994 = vmatpush.msra.mxu2 %v6715_v43  ;;  %3020 = vmatpush.msrb.mxu3 %v6718_v44  ;;  %v2173_v43 = vsel %vm2170_vm11, %v2172_v5, %v2168_v10 }
 0x585   :  { %2795 = vmatpush.msrb.mxu1 %v6724_v4  ;;  %v2189_v4 = vsub.f32 1.0, %v2173_v43 }
 0x586   :  { %v2183_v62 = vadd.f32 %v2180_v39, %v1967_v36  ;;  %2995 = vmatpush.msra.mxu2 %v6727_v42  ;;  %3021 = vmatpush.msrb.mxu3 %v6730_v22 }
 0x587   :  { %v4880_v21 = vpop.eup %4879  ;;  %2796 = vmatpush.msrb.mxu1 %v6734_v31  ;;  %v2195_v31 = vmul.f32 %v2173_v43, %v6971_v1 }
 0x588   :  { %4881 = vtanh.f32 %v2183_v62  ;;  %v2191_v24 = vmul.f32 %v4880_v21, %v2188_v27  ;;  %2996 = vmatpush.msra.mxu2 %v6737_v61  ;;  %3022 = vmatpush.msrb.mxu3 %v6740_v16  ;;  %v2199_v16 = vsel %vm115_vm0, %v6988_v20, %v6983_v45 }
 0x589   :  { %2797 = vmatpush.msrb.mxu1 %v6745_v49  ;;  %v2202_v49 = vmul.f32 %v2199_v16, %v8325_v38 }
 0x58a   :  { %v7126_v44 = vadd.f32 %v2194_v57, %v2191_v24  ;;  %2997 = vmatpush.msra.mxu2 %v6748_v51  ;;  %3023 = vmatpush.msrb.mxu3 %v6751_v12  ;;  %v8397_v51 = vld [vmem:[#allocation14_spill] sm:$0xff]  ;;  %v2214_v24 = vmul.f32 %v2199_v16, %v8329_v26 }
 0x58b   :  { %2798 = vmatpush.msrb.mxu1 %v6760_v52  ;;  %v2205_v12 = vadd.f32 %v2202_v49, %v8397_v51  ;;  %v2207_v8 = vadd.f32 %v2204_v47, %v8397_v51 }
 0x58c   :  { %4454 = vmatmul.msk.f32.gmra.mxu1 %vm311_vm9, %v7126_v44  ;;  %4457 = vmatmul.msk.f32.gmra.mxu2 %vm311_vm9, %v7126_v44 }
 0x58d   :  { %4460 = vmatmul.msk.f32.gmra.mxu3 %vm311_vm9, %v7126_v44  ;;  %2998 = vmatpush.msra.mxu2 %v6764_v58  ;;  %v8398_v58 = vld [vmem:[#allocation13_spill] sm:$0xff] }
 0x58e   :  { %v4882_v42 = vpop.eup %4881  ;;  %3024 = vmatpush.msrb.mxu3 %v6767_v59  ;;  %2799 = vmatpush.msrb.mxu1 %v6770_v6  ;;  %v2208_v59 = vmul.f32 %v2199_v16, %v8398_v58  ;;  %v2210_v40 = vmul.f32 %v7170_v11, %v8398_v58 }
 0x58f   :  { %v2192_v22 = vmul.f32 %v4882_v42, %v2189_v4  ;;  %2999 = vmatpush.msra.mxu2 %v6775_v0 }
 0x590   :  { %3025 = vmatpush.msrb.mxu3 %v6778_v14  ;;  %2800 = vmatpush.msrb.mxu1 %v6781_v56  ;;  %v8399_v14 = vld [vmem:[#allocation15_spill] sm:$0xff] }
 0x591   :  { %v7142_v61 = vadd.f32 %v2195_v31, %v2192_v22  ;;  %3000 = vmatpush.msra.mxu2 %v6784_v23  ;;  %v2211_v56 = vadd.f32 %v2208_v59, %v8399_v14  ;;  %v8400_v23 = vld [vmem:[#allocation50_spill] sm:$0xff]  ;;  %v2213_v34 = vadd.f32 %v2210_v40, %v8399_v14  ;;  %v2217_v59 = vadd.f32 %v2214_v24, %v5486_v46 }
 0x592   :  { %3026 = vmatpush.msrb.mxu3 %v6787_v30  ;;  %v2203_v30 = vmul.f32 %v8400_v23, %v8325_v38  ;;  %v2209_v9 = vmul.f32 %v8400_v23, %v8398_v58  ;;  %v2215_v2 = vmul.f32 %v8400_v23, %v8329_v26 }
 0x594   :  { %4455 = vmatmul.msk.f32.gmra.mxu1 %vm311_vm9, %v7142_v61  ;;  %4458 = vmatmul.msk.f32.gmra.mxu2 %vm311_vm9, %v7142_v61  ;;  %v2206_v45 = vadd.f32 %v2203_v30, %v8397_v51  ;;  %v2212_v41 = vadd.f32 %v2209_v9, %v8399_v14  ;;  %v2218_v23 = vadd.f32 %v2215_v2, %v5486_v46 }
 0x595   :  { %4461 = vmatmul.msk.f32.gmra.mxu3 %vm311_vm9, %v7142_v61 }
 0x5fd   :  { %v2246_v52 = vpop.f32.mrf.mxu1 }
 0x5fe   :  { %v2307_v6 = vadd.f32 %v2246_v52, %v2205_v12 }
 0x600   :  { %v4462_v0 = vmul.f32 -1.442695, %v2307_v6 }
 0x602   :  { %4883 = vpow2.f32 %v4462_v0 }
 0x603   :  { %v2272_v13 = vpop.f32.mrf.mxu2 }
 0x604   :  { %v2367_v1 = vadd.f32 %v2272_v13, %v2211_v56  ;;  %v2298_v62 = vpop.f32.mrf.mxu3 }
 0x605   :  { %v2427_v22 = vadd.f32 %v2298_v62, %v5496_v50 }
 0x606   :  { %v4465_v37 = vmul.f32 -1.442695, %v2367_v1 }
 0x608   :  { %v4884_v20 = vpop.eup %4883  ;;  %4885 = vpow2.f32 %v4465_v37 }
 0x609   :  { %v2249_v3 = vpop.f32.mrf.mxu1  ;;  %v2319_v29 = vadd.f32 1.0, %v4884_v20 }
 0x60a   :  { %v2308_v60 = vadd.f32 %v2249_v3, %v2206_v45 }
 0x60b   :  { %4887 = vrcp.f32 %v2319_v29  ;;  %v2333_v39 = vand.u32 2147483648, %v2319_v29  ;;  %v2331_v10 = vand.u32 2147483647, %v2319_v29  ;;  %vm2327_vm13 = vweird.f32 %v2319_v29 }
 0x60c   :  { %v4463_v17 = vmul.f32 -1.442695, %v2308_v60 }
 0x60d   :  { %v2334_v42 = vor.u32 1.1754944e-38, %v2333_v39  ;;  %vm2332_vm15 = vcmp.eq.f32.partialorder %v2331_v10, 8.507059e+37 }
 0x60e   :  { %v4886_v18 = vpop.eup %4885  ;;  %4889 = vpow2.f32 %v4463_v17 }
 0x60f   :  { %v2275_v55 = vpop.f32.mrf.mxu2  ;;  %v7175_v19 = vadd.f32 1.0, %v4886_v18 }
 0x610   :  { %v2368_v7 = vadd.f32 %v2275_v55, %v2212_v41  ;;  %v2301_v60 = vpop.f32.mrf.mxu3 }
 0x611   :  { %v2252_v48 = vpop.f32.mrf.mxu1  ;;  %v4888_v53 = vpop.eup %4887  ;;  %4891 = vrcp.f32 %v7175_v19  ;;  %v2393_v16 = vand.u32 2147483648, %v7175_v19  ;;  %v2391_v37 = vand.u32 2147483647, %v7175_v19  ;;  %vm2387_vm2 = vweird.f32 %v7175_v19 }
 0x612   :  { %v2323_v54 = vmul.f32 %v4888_v53, %v2319_v29  ;;  %v4466_v63 = vmul.f32 -1.442695, %v2368_v7  ;;  %v2309_v28 = vadd.f32 %v2252_v48, %v2207_v8  ;;  %vm2328_vm12 = vweird.f32 %v4888_v53 }
 0x613   :  { %vm2329_vm14 = vmor %vm2327_vm13, %vm2328_vm12  ;;  %v2394_v15 = vor.u32 1.1754944e-38, %v2393_v16  ;;  %vm2392_vm4 = vcmp.eq.f32.partialorder %v2391_v37, 8.507059e+37  ;;  %v2428_v40 = vadd.f32 %v2301_v60, %v5496_v50  ;;  %v7253_v37 = vld [vmem:[#allocation2 + $0xb0] sm:$0xff]  ;;  %v7265_v60 = vld [vmem:[#allocation2 + $0x98] sm:$0xff] }
 0x614   :  { %v4890_v36 = vpop.eup %4889  ;;  %v2324_v35 = vsub.f32 1.0, %v2323_v54  ;;  %4893 = vpow2.f32 %v4466_v63  ;;  %v4464_v25 = vmul.f32 -1.442695, %v2309_v28 }
 0x615   :  { %v7181_v33 = vadd.f32 1.0, %v4890_v36 }
 0x616   :  { %v2325_v27 = vmul.f32 %v4888_v53, %v2324_v35  ;;  %4895 = vpow2.f32 %v4464_v25 }
 0x617   :  { %v2278_v21 = vpop.f32.mrf.mxu2  ;;  %v4892_v5 = vpop.eup %4891  ;;  %4897 = vrcp.f32 %v7181_v33  ;;  %v2346_v17 = vand.u32 2147483647, %v7181_v33  ;;  %v2348_v41 = vand.u32 2147483648, %v7181_v33  ;;  %vm2342_vm6 = vweird.f32 %v7181_v33 }
 0x618   :  { %v2383_v57 = vmul.f32 %v4892_v5, %v7175_v19  ;;  %v2326_v43 = vadd.f32 %v4888_v53, %v2325_v27  ;;  %v2369_v4 = vadd.f32 %v2278_v21, %v2213_v34  ;;  %vm2388_vm1 = vweird.f32 %v4892_v5 }
 0x619   :  { %vm2389_vm3 = vmor %vm2387_vm2, %vm2388_vm1  ;;  %vm2347_vm8 = vcmp.eq.f32.partialorder %v2346_v17, 8.507059e+37  ;;  %v2349_v28 = vor.u32 1.1754944e-38, %v2348_v41 }
 0x61a   :  { %v4894_v31 = vpop.eup %4893  ;;  %v2384_v49 = vsub.f32 1.0, %v2383_v57  ;;  %v2330_v12 = vsel %vm2329_vm14, %v4888_v53, %v2326_v43  ;;  %v4467_v52 = vmul.f32 -1.442695, %v2369_v4 }
 0x61b   :  { %v2335_v6 = vsel %vm2332_vm15, %v2334_v42, %v2330_v12  ;;  %v7190_v0 = vadd.f32 1.0, %v4894_v31  ;;  %v2216_v12 = vmul.f32 %v7170_v11, %v8329_v26 }
 0x61c   :  { %v4896_v56 = vpop.eup %4895  ;;  %v2385_v30 = vmul.f32 %v4892_v5, %v2384_v49  ;;  %v2430_v13 = vmul.f32 %v2427_v22, %v2335_v6  ;;  %4899 = vpow2.f32 %v4467_v52  ;;  %v2304_v22 = vpop.f32.mrf.mxu3  ;;  %v7343_v52 = vld [vmem:[#allocation2] sm:$0xff] }
 0x61d   :  { %v4898_v1 = vpop.eup %4897  ;;  %4901 = vrcp.f32 %v7190_v0  ;;  %v7194_v45 = vadd.f32 1.0, %v4896_v56  ;;  %vm2402_vm10 = vweird.f32 %v7190_v0  ;;  %v2408_v27 = vand.u32 2147483648, %v7190_v0  ;;  %v7241_v56 = vld [vmem:[#allocation2 + $0xb8] sm:$0xff] }
 0x61e   :  { %v2386_v20 = vadd.f32 %v4892_v5, %v2385_v30  ;;  %v2433_v3 = vadd.f32 %v2430_v13, %v2217_v59  ;;  %v2338_v9 = vmul.f32 %v4898_v1, %v7181_v33  ;;  %vm2343_vm5 = vweird.f32 %v4898_v1 }
 0x61f   :  { %4903 = vrcp.f32 %v7194_v45  ;;  %vm2344_vm7 = vmor %vm2342_vm6, %vm2343_vm5  ;;  %v2361_v24 = vand.u32 2147483647, %v7194_v45  ;;  %v2363_v57 = vand.u32 2147483648, %v7194_v45  ;;  %v2406_v4 = vand.u32 2147483647, %v7190_v0 }
 0x620   :  { %v2390_v29 = vsel %vm2389_vm3, %v4892_v5, %v2386_v20  ;;  %4905 = vtanh.f32 %v2433_v3  ;;  %v2339_v47 = vsub.f32 1.0, %v2338_v9  ;;  %vm2357_vm13 = vweird.f32 %v7194_v45  ;;  %v7258_v9 = vld [vmem:[#allocation2 + $0xa0] sm:$0xff] }
 0x621   :  { %v2395_v55 = vsel %vm2392_vm4, %v2394_v15, %v2390_v29  ;;  %v2409_v59 = vor.u32 1.1754944e-38, %v2408_v27  ;;  %v2364_v30 = vor.u32 1.1754944e-38, %v2363_v57  ;;  %v2429_v13 = vadd.f32 %v2304_v22, %v5496_v50  ;;  %v7262_v29 = vld [vmem:[#allocation2 + $0x90] sm:$0xff]  ;;  %v7328_v57 = vld [vmem:[#allocation2 + $0x38] sm:$0xff] }
 0x622   :  { %v4900_v18 = vpop.eup %4899  ;;  %v2340_v19 = vmul.f32 %v4898_v1, %v2339_v47  ;;  %v2439_v63 = vsub.f32 1.0, %v2395_v55  ;;  %v2445_v33 = vmul.f32 %v2395_v55, %v7084_v32  ;;  %vm2407_vm1 = vcmp.eq.f32.partialorder %v2406_v4, 8.507059e+37 }
 0x623   :  { %v4902_v7 = vpop.eup %4901  ;;  %v7204_v8 = vadd.f32 1.0, %v4900_v18  ;;  %vm2362_vm2 = vcmp.eq.f32.partialorder %v2361_v24, 8.507059e+37  ;;  %v2219_v2 = vadd.f32 %v2216_v12, %v5486_v46  ;;  %v7271_v18 = vld [vmem:[#allocation2 + $0x88] sm:$0xff]  ;;  %v7325_v24 = vld [vmem:[#allocation2 + $0x30] sm:$0xff] }
 0x624   :  { %v2398_v48 = vmul.f32 %v4902_v7, %v7190_v0  ;;  %v2341_v53 = vadd.f32 %v4898_v1, %v2340_v19  ;;  %vm2403_vm11 = vweird.f32 %v4902_v7 }
 0x625   :  { %v4904_v54 = vpop.eup %4903  ;;  %4907 = vrcp.f32 %v7204_v8  ;;  %vm7231_vm14 = vmor %vm2402_vm10, %vm2403_vm11  ;;  %v2423_v41 = vand.u32 2147483648, %v7204_v8  ;;  %v2421_v19 = vand.u32 2147483647, %v7204_v8  ;;  %vm2417_vm4 = vweird.f32 %v7204_v8 }
 0x626   :  { %v4906_v36 = vpop.eup %4905  ;;  %v2399_v35 = vsub.f32 1.0, %v2398_v48  ;;  %v2345_v25 = vsel %vm2344_vm7, %v4898_v1, %v2341_v53  ;;  %v2353_v39 = vmul.f32 %v4904_v54, %v7194_v45  ;;  %vm2358_vm12 = vweird.f32 %v4904_v54  ;;  %v7250_v1 = vld [vmem:[#allocation2 + $0xa8] sm:$0xff] }
 0x627   :  { %v2442_v34 = vmul.f32 %v4906_v36, %v2439_v63  ;;  %v2350_v62 = vsel %vm2347_vm8, %v2349_v28, %v2345_v25  ;;  %vm7245_vm15 = vmor %vm2357_vm13, %vm2358_vm12  ;;  %vm2422_vm6 = vcmp.eq.f32.partialorder %v2421_v19, 8.507059e+37 }
 0x628   :  { %v2400_v10 = vmul.f32 %v4902_v7, %v2399_v35  ;;  %v2431_v21 = vmul.f32 %v2428_v40, %v2350_v62  ;;  %v2354_v5 = vsub.f32 1.0, %v2353_v39  ;;  %v7293_v35 = vld [vmem:[#allocation2 + $0x60] sm:$0xff]  ;;  %v7302_v39 = vld [vmem:[#allocation2 + $0x58] sm:$0xff]  ;;  %v7307_v62 = vld [vmem:[#allocation2 + $0x48] sm:$0xff] }
 0x629   :  { %v7216_v43 = vadd.f32 %v2445_v33, %v2442_v34  ;;  %v7310_v33 = vld [vmem:[#allocation2 + $0x50] sm:$0xff] }
 0x62a   :  { %v2434_v42 = vadd.f32 %v2431_v21, %v2218_v23  ;;  %v2355_v31 = vmul.f32 %v4904_v54, %v2354_v5  ;;  %v2401_v49 = vadd.f32 %v4902_v7, %v2400_v10  ;;  %v7278_v23 = vld [vmem:[#allocation2 + $0x80] sm:$0xff]  ;;  %v7322_v21 = vld [vmem:[#allocation2 + $0x28] sm:$0xff] }
 0x62b   :  { %v7219_v32 = vpop.eup %4907  ;;  %4468 = vmatmul.msk.f32.vlgmr.msra.gmra.mxu0 %vm311_vm9, %v7216_v43  ;;  %4471 = vmatmul.msk.f32.vlgmr.msra.gmra.mxu1 %vm311_vm9, %v7216_v43  ;;  %v7313_v10 = vld [vmem:[#allocation2 + $0x40] sm:$0xff] }
 0x62c   :  { %4909 = vtanh.f32 %v2434_v42  ;;  %v2413_v11 = vmul.f32 %v7219_v32, %v7204_v8  ;;  %v2356_v16 = vadd.f32 %v4904_v54, %v2355_v31  ;;  %4474 = vmatmul.msk.f32.vlgmr.msrb.gmra.mxu2 %vm311_vm9, %v7216_v43  ;;  %v2405_v6 = vsel %vm7231_vm14, %v4902_v7, %v2401_v49  ;;  %3045 = vmatpush.msra.mxu0 %v7241_v56  ;;  %v7275_v7 = vld [vmem:[#allocation2 + $0x78] sm:$0xff]  ;;  %v7296_v8 = vld [vmem:[#allocation2 + $0x68] sm:$0xff]  ;;  %v7331_v42 = vld [vmem:[#allocation2 + $0x10] sm:$0xff] }
 0x62d   :  { %3245 = vmatpush.msra.mxu1 %v7250_v1  ;;  %3271 = vmatpush.msrb.mxu2 %v7253_v37  ;;  %v2410_v3 = vsel %vm2407_vm1, %v2409_v59, %v2405_v6  ;;  %vm2418_vm3 = vweird.f32 %v7219_v32  ;;  %v7335_v49 = vld [vmem:[#allocation2 + $0x18] sm:$0xff]  ;;  %v7346_v59 = vld [vmem:[#allocation2 + $0x8] sm:$0xff] }
 0x62e   :  { %v2414_v45 = vsub.f32 1.0, %v2413_v11  ;;  %v2360_v20 = vsel %vm7245_vm15, %v4904_v54, %v2356_v16  ;;  %3046 = vmatpush.msra.mxu0 %v7258_v9  ;;  %v2440_v55 = vsub.f32 1.0, %v2410_v3  ;;  %v7283_v54 = vld [vmem:[#allocation2 + $0x70] sm:$0xff]  ;;  %v2446_v28 = vmul.f32 %v2410_v3, %v7126_v44  ;;  %vm7289_vm5 = vmor %vm2417_vm4, %vm2418_vm3 }
 0x62f   :  { %v2365_v15 = vsel %vm2362_vm2, %v2364_v30, %v2360_v20  ;;  %3246 = vmatpush.msra.mxu1 %v7262_v29  ;;  %3272 = vmatpush.msrb.mxu2 %v7265_v60  ;;  %v2424_v44 = vor.u32 1.1754944e-38, %v2423_v41 }
 0x630   :  { %v2415_v47 = vmul.f32 %v7219_v32, %v2414_v45  ;;  %v2432_v17 = vmul.f32 %v2429_v13, %v2365_v15  ;;  %3047 = vmatpush.msra.mxu0 %v7271_v18  ;;  %v8410_v15 = vld [vmem:[#allocation46_spill] sm:$0xff] }
 0x631   :  { %3247 = vmatpush.msra.mxu1 %v7275_v7  ;;  %3273 = vmatpush.msrb.mxu2 %v7278_v23 }
 0x632   :  { %v4910_v48 = vpop.eup %4909  ;;  %v2435_v53 = vadd.f32 %v2432_v17, %v2219_v2  ;;  %v2416_v40 = vadd.f32 %v7219_v32, %v2415_v47  ;;  %3048 = vmatpush.msra.mxu0 %v7283_v54  ;;  %v8411_v47 = vld [vmem:[#allocation47_spill] sm:$0xff] }
 0x633   :  { %v2443_v63 = vmul.f32 %v4910_v48, %v2440_v55  ;;  %3248 = vmatpush.msra.mxu1 %v7293_v35  ;;  %3274 = vmatpush.msrb.mxu2 %v7296_v8  ;;  %v7364_v17 = vsel %vm115_vm0, %v8411_v47, %v8410_v15 }
 0x634   :  { %4911 = vtanh.f32 %v2435_v53  ;;  %v2420_v25 = vsel %vm7289_vm5, %v7219_v32, %v2416_v40  ;;  %3049 = vmatpush.msra.mxu0 %v7302_v39  ;;  %v7338_v32 = vld [vmem:[#allocation2 + $0x20] sm:$0xff]  ;;  %v2455_v41 = vmul.f32 %v7364_v17, %v8325_v38  ;;  %v2461_v55 = vmul.f32 %v7364_v17, %v8398_v58 }
 0x635   :  { %v7305_v34 = vadd.f32 %v2446_v28, %v2443_v63  ;;  %3249 = vmatpush.msra.mxu1 %v7307_v62  ;;  %3275 = vmatpush.msrb.mxu2 %v7310_v33  ;;  %v2425_v27 = vsel %vm2422_vm6, %v2424_v44, %v2420_v25  ;;  %v8412_v63 = vld [vmem:[#allocation48_spill] sm:$0xff]  ;;  %v8413_v28 = vld [vmem:[#allocation49_spill] sm:$0xff] }
 0x636   :  { %3050 = vmatpush.msra.mxu0 %v7313_v10  ;;  %v2441_v5 = vsub.f32 1.0, %v2425_v27  ;;  %v2447_v31 = vmul.f32 %v2425_v27, %v7142_v61  ;;  %v8409_v61 = vld [vmem:[#allocation45_spill] sm:$0xff]  ;;  %v2458_v48 = vadd.f32 %v2455_v41, %v8397_v51  ;;  %v2464_v53 = vadd.f32 %v2461_v55, %v8399_v14 }
 0x637   :  { %4469 = vmatmul.msk.f32.gmra.mxu0 %vm311_vm9, %v7305_v34  ;;  %4472 = vmatmul.msk.f32.gmra.mxu1 %vm311_vm9, %v7305_v34  ;;  %v2454_v11 = vmul.f32 %v8409_v61, %v8325_v38  ;;  %v2460_v16 = vmul.f32 %v8409_v61, %v8398_v58  ;;  %v7375_v36 = vsel %vm115_vm0, %v8413_v28, %v8412_v63 }
 0x638   :  { %4475 = vmatmul.msk.f32.gmra.mxu2 %vm311_vm9, %v7305_v34  ;;  %3051 = vmatpush.msra.mxu0 %v7322_v21 }
 0x639   :  { %3250 = vmatpush.msra.mxu1 %v7325_v24  ;;  %3276 = vmatpush.msrb.mxu2 %v7328_v57  ;;  %v2457_v6 = vadd.f32 %v2454_v11, %v8397_v51  ;;  %v2463_v0 = vadd.f32 %v2460_v16, %v8399_v14  ;;  %v2462_v11 = vmul.f32 %v7375_v36, %v8398_v58 }
 0x63a   :  { %v4912_v4 = vpop.eup %4911  ;;  %3052 = vmatpush.msra.mxu0 %v7331_v42 }
 0x63b   :  { %v2444_v22 = vmul.f32 %v4912_v4, %v2441_v5  ;;  %3251 = vmatpush.msra.mxu1 %v7335_v49  ;;  %3277 = vmatpush.msrb.mxu2 %v7338_v32 }
 0x63d   :  { %v7341_v12 = vadd.f32 %v2447_v31, %v2444_v22  ;;  %3252 = vmatpush.msra.mxu1 %v7343_v52  ;;  %3278 = vmatpush.msrb.mxu2 %v7346_v59  ;;  %v2456_v31 = vmul.f32 %v7375_v36, %v8325_v38 }
 0x63f   :  { %4470 = vmatmul.msk.f32.gmra.mxu0 %vm311_vm9, %v7341_v12  ;;  %4473 = vmatmul.msk.f32.gmra.mxu1 %vm311_vm9, %v7341_v12 }
 0x640   :  { %4476 = vmatmul.msk.f32.gmra.mxu2 %vm311_vm9, %v7341_v12 }
 0x6a8   :  { %v2498_v30 = vpop.f32.mrf.mxu0  ;;  %v2524_v13 = vpop.f32.mrf.mxu1 }
 0x6a9   :  { %v2559_v45 = vadd.f32 %v2498_v30, %v2457_v6  ;;  %v2619_v20 = vadd.f32 %v2524_v13, %v2463_v0  ;;  %v2459_v0 = vadd.f32 %v2456_v31, %v8397_v51  ;;  %v2465_v30 = vadd.f32 %v2462_v11, %v8399_v14 }
 0x6ab   :  { %v4477_v3 = vmul.f32 -1.442695, %v2559_v45  ;;  %v4480_v2 = vmul.f32 -1.442695, %v2619_v20 }
 0x6ad   :  { %4913 = vpow2.f32 %v4477_v3 }
 0x6ae   :  { %4915 = vpow2.f32 %v4480_v2 }
 0x6af   :  { %v2550_v31 = vpop.f32.mrf.mxu2 }
 0x6b3   :  { %v4914_v19 = vpop.eup %4913 }
 0x6b4   :  { %v4916_v40 = vpop.eup %4915  ;;  %v2571_v25 = vadd.f32 1.0, %v4914_v19  ;;  %v2501_v44 = vpop.f32.mrf.mxu0 }
 0x6b5   :  { %v2527_v27 = vpop.f32.mrf.mxu1  ;;  %v7377_v5 = vadd.f32 1.0, %v4916_v40  ;;  %v2560_v4 = vadd.f32 %v2501_v44, %v2458_v48 }
 0x6b6   :  { %v2620_v22 = vadd.f32 %v2527_v27, %v2464_v53  ;;  %4917 = vrcp.f32 %v2571_v25  ;;  %v2583_v63 = vand.u32 2147483647, %v2571_v25  ;;  %v2585_v28 = vand.u32 2147483648, %v2571_v25 }
 0x6b7   :  { %4919 = vrcp.f32 %v7377_v5  ;;  %v4478_v16 = vmul.f32 -1.442695, %v2560_v4  ;;  %vm2579_vm8 = vweird.f32 %v2571_v25  ;;  %vm2639_vm13 = vweird.f32 %v7377_v5 }
 0x6b8   :  { %v4481_v6 = vmul.f32 -1.442695, %v2620_v22  ;;  %vm2584_vm11 = vcmp.eq.f32.partialorder %v2583_v63, 8.507059e+37 }
 0x6b9   :  { %4921 = vpow2.f32 %v4478_v16  ;;  %v2466_v16 = vmul.f32 %v8409_v61, %v8329_v26 }
 0x6ba   :  { %4923 = vpow2.f32 %v4481_v6 }
 0x6bc   :  { %v4918_v13 = vpop.eup %4917  ;;  %v2504_v45 = vpop.f32.mrf.mxu0 }
 0x6bd   :  { %v2530_v20 = vpop.f32.mrf.mxu1  ;;  %v4920_v3 = vpop.eup %4919  ;;  %v2575_v2 = vmul.f32 %v4918_v13, %v2571_v25  ;;  %v2561_v15 = vadd.f32 %v2504_v45, %v2459_v0  ;;  %vm2580_vm7 = vweird.f32 %v4918_v13  ;;  %v2586_v0 = vor.u32 1.1754944e-38, %v2585_v28 }
 0x6be   :  { %v2621_v47 = vadd.f32 %v2530_v20, %v2465_v30  ;;  %v2635_v41 = vmul.f32 %v4920_v3, %v7377_v5  ;;  %vm2581_vm10 = vmor %vm2579_vm8, %vm2580_vm7  ;;  %v2679_v45 = vadd.f32 %v2550_v31, %v5496_v50  ;;  %vm2640_vm12 = vweird.f32 %v4920_v3  ;;  %v2553_v31 = vpop.f32.mrf.mxu2 }
 0x6bf   :  { %v2576_v55 = vsub.f32 1.0, %v2575_v2  ;;  %v4479_v19 = vmul.f32 -1.442695, %v2561_v15  ;;  %v4922_v53 = vpop.eup %4921  ;;  %v2643_v25 = vand.u32 2147483647, %v7377_v5  ;;  %vm7399_vm14 = vmor %vm2639_vm13, %vm2640_vm12 }
 0x6c0   :  { %v4482_v48 = vmul.f32 -1.442695, %v2621_v47  ;;  %v2636_v40 = vsub.f32 1.0, %v2635_v41  ;;  %v4924_v44 = vpop.eup %4923  ;;  %v2572_v4 = vadd.f32 1.0, %v4922_v53  ;;  %v2469_v47 = vadd.f32 %v2466_v16, %v5486_v46 }
 0x6c1   :  { %v2577_v27 = vmul.f32 %v4918_v13, %v2576_v55  ;;  %4925 = vpow2.f32 %v4479_v19  ;;  %v7387_v11 = vadd.f32 1.0, %v4924_v44  ;;  %v2645_v41 = vand.u32 2147483648, %v7377_v5 }
 0x6c2   :  { %v2637_v22 = vmul.f32 %v4920_v3, %v2636_v40  ;;  %4927 = vpow2.f32 %v4482_v48  ;;  %v2467_v5 = vmul.f32 %v7364_v17, %v8329_v26  ;;  %vm2644_vm15 = vcmp.eq.f32.partialorder %v2643_v25, 8.507059e+37 }
 0x6c3   :  { %v2578_v6 = vadd.f32 %v4918_v13, %v2577_v27  ;;  %4929 = vrcp.f32 %v2572_v4  ;;  %v2646_v27 = vor.u32 1.1754944e-38, %v2645_v41  ;;  %vm2654_vm2 = vweird.f32 %v7387_v11 }
 0x6c4   :  { %4931 = vrcp.f32 %v7387_v11  ;;  %v2638_v20 = vadd.f32 %v4920_v3, %v2637_v22  ;;  %vm2594_vm3 = vweird.f32 %v2572_v4  ;;  %v2658_v48 = vand.u32 2147483647, %v7387_v11 }
 0x6c5   :  { %v2582_v30 = vsel %vm2581_vm10, %v4918_v13, %v2578_v6 }
 0x6c6   :  { %v2587_v2 = vsel %vm2584_vm11, %v2586_v0, %v2582_v30  ;;  %v2642_v28 = vsel %vm7399_vm14, %v4920_v3, %v2638_v20  ;;  %v2598_v30 = vand.u32 2147483647, %v2572_v4  ;;  %v2600_v3 = vand.u32 2147483648, %v2572_v4 }
 0x6c7   :  { %v4926_v15 = vpop.eup %4925  ;;  %v2682_v61 = vmul.f32 %v2679_v45, %v2587_v2  ;;  %v2647_v6 = vsel %vm2644_vm15, %v2646_v27, %v2642_v28  ;;  %v2470_v20 = vadd.f32 %v2467_v5, %v5486_v46  ;;  %v2680_v2 = vadd.f32 %v2553_v31, %v5496_v50 }
 0x6c8   :  { %v4928_v55 = vpop.eup %4927  ;;  %v7397_v19 = vadd.f32 1.0, %v4926_v15  ;;  %vm2599_vm5 = vcmp.eq.f32.partialorder %v2598_v30, 8.507059e+37  ;;  %v2697_v5 = vmul.f32 %v2647_v6, %v7216_v43  ;;  %vm2659_vm13 = vcmp.eq.f32.partialorder %v2658_v48, 8.507059e+37 }
 0x6c9   :  { %v4930_v13 = vpop.eup %4929  ;;  %v2685_v53 = vadd.f32 %v2682_v61, %v2469_v47  ;;  %v7403_v40 = vadd.f32 1.0, %v4928_v55  ;;  %v2691_v47 = vsub.f32 1.0, %v2647_v6  ;;  %v2601_v55 = vor.u32 1.1754944e-38, %v2600_v3 }
 0x6ca   :  { %v7405_v63 = vpop.eup %4931  ;;  %v2590_v44 = vmul.f32 %v4930_v13, %v2572_v4  ;;  %4933 = vrcp.f32 %v7397_v19  ;;  %vm2595_vm1 = vweird.f32 %v4930_v13  ;;  %v2660_v3 = vand.u32 2147483648, %v7387_v11 }
 0x6cb   :  { %4935 = vtanh.f32 %v2685_v53  ;;  %v2650_v22 = vmul.f32 %v7405_v63, %v7387_v11  ;;  %vm2596_vm4 = vmor %vm2594_vm3, %vm2595_vm1  ;;  %vm2655_vm6 = vweird.f32 %v7405_v63  ;;  %v2613_v43 = vand.u32 2147483647, %v7397_v19 }
 0x6cc   :  { %v2591_v16 = vsub.f32 1.0, %v2590_v44  ;;  %4937 = vrcp.f32 %v7403_v40  ;;  %v2468_v6 = vmul.f32 %v7375_v36, %v8329_v26  ;;  %vm7443_vm8 = vmor %vm2654_vm2, %vm2655_vm6  ;;  %vm2609_vm10 = vweird.f32 %v7397_v19 }
 0x6cd   :  { %v2651_v0 = vsub.f32 1.0, %v2650_v22  ;;  %vm2614_vm12 = vcmp.eq.f32.partialorder %v2613_v43, 8.507059e+37  ;;  %vm2669_vm15 = vweird.f32 %v7403_v40  ;;  %v2673_v48 = vand.u32 2147483647, %v7403_v40 }
 0x6ce   :  { %v2592_v45 = vmul.f32 %v4930_v13, %v2591_v16 }
 0x6cf   :  { %v2652_v17 = vmul.f32 %v7405_v63, %v2651_v0  ;;  %v2615_v0 = vand.u32 2147483648, %v7397_v19  ;;  %vm2674_vm2 = vcmp.eq.f32.partialorder %v2673_v48, 8.507059e+37 }
 0x6d0   :  { %v4934_v15 = vpop.eup %4933  ;;  %v2593_v41 = vadd.f32 %v4930_v13, %v2592_v45 }
 0x6d1   :  { %v4936_v61 = vpop.eup %4935  ;;  %v2605_v25 = vmul.f32 %v4934_v15, %v7397_v19  ;;  %v2653_v31 = vadd.f32 %v7405_v63, %v2652_v17  ;;  %vm2610_vm7 = vweird.f32 %v4934_v15  ;;  %v2616_v11 = vor.u32 1.1754944e-38, %v2615_v0 }
 0x6d2   :  { %v7421_v53 = vpop.eup %4937  ;;  %v2694_v28 = vmul.f32 %v4936_v61, %v2691_v47  ;;  %v2597_v44 = vsel %vm2596_vm4, %v4930_v13, %v2593_v41  ;;  %v2556_v41 = vpop.f32.mrf.mxu2  ;;  %vm2611_vm11 = vmor %vm2609_vm10, %vm2610_vm7 }
 0x6d3   :  { %v2602_v27 = vsel %vm2599_vm5, %v2601_v55, %v2597_v44  ;;  %v2665_v4 = vmul.f32 %v7421_v53, %v7403_v40  ;;  %v2606_v22 = vsub.f32 1.0, %v2605_v25  ;;  %v2657_v36 = vsel %vm7443_vm8, %v7405_v63, %v2653_v31 }
 0x6d4   :  { %v2683_v16 = vmul.f32 %v2680_v2, %v2602_v27  ;;  %v7429_v30 = vadd.f32 %v2697_v5, %v2694_v28  ;;  %v2681_v19 = vadd.f32 %v2556_v41, %v5496_v50  ;;  %vm2670_vm14 = vweird.f32 %v7421_v53  ;;  %v8420_v41 = vld [vmem:[#allocation40_spill] sm:$0xff] }
 0x6d5   :  { %v2666_v45 = vsub.f32 1.0, %v2665_v4  ;;  %v2607_v13 = vmul.f32 %v4934_v15, %v2606_v22  ;;  %v2471_v44 = vadd.f32 %v2468_v6, %v5486_v46  ;;  %vm7471_vm1 = vmor %vm2669_vm15, %vm2670_vm14 }
 0x6d6   :  { %v2686_v47 = vadd.f32 %v2683_v16, %v2470_v20  ;;  %4483 = vmatmul.msk.f32.vlgmr.msra.gmra.mxu3 %vm311_vm9, %v7429_v30  ;;  %4486 = vmatmul.msk.f32.vlgmr.msrb.gmra.mxu0 %vm311_vm9, %v7429_v30  ;;  %v2661_v20 = vor.u32 1.1754944e-38, %v2660_v3 }
 0x6d7   :  { %v2667_v2 = vmul.f32 %v7421_v53, %v2666_v45  ;;  %v2608_v61 = vadd.f32 %v4934_v15, %v2607_v13  ;;  %4489 = vmatmul.msk.f32.vlgmr.msrb.gmra.mxu1 %vm311_vm9, %v7429_v30  ;;  %3297 = vmatpush.msra.mxu3 %v7241_v56 }
 0x6d8   :  { %4939 = vtanh.f32 %v2686_v47  ;;  %3497 = vmatpush.msrb.mxu0 %v7250_v1  ;;  %3523 = vmatpush.msrb.mxu1 %v7253_v37  ;;  %v2662_v63 = vsel %vm2659_vm13, %v2661_v20, %v2657_v36 }
 0x6d9   :  { %v2612_v55 = vsel %vm2611_vm11, %v4934_v15, %v2608_v61  ;;  %3298 = vmatpush.msra.mxu3 %v7258_v9  ;;  %v2668_v28 = vadd.f32 %v7421_v53, %v2667_v2  ;;  %v2675_v15 = vand.u32 2147483648, %v7403_v40  ;;  %v2692_v4 = vsub.f32 1.0, %v2662_v63 }
 0x6da   :  { %v2617_v25 = vsel %vm2614_vm12, %v2616_v11, %v2612_v55  ;;  %3498 = vmatpush.msrb.mxu0 %v7262_v29  ;;  %3524 = vmatpush.msrb.mxu1 %v7265_v60  ;;  %v2698_v0 = vmul.f32 %v2662_v63, %v7305_v34  ;;  %v2706_v61 = vmul.f32 %v8420_v41, %v8325_v38  ;;  %v8421_v55 = vld [vmem:[#allocation41_spill] sm:$0xff] }
 0x6db   :  { %v2684_v5 = vmul.f32 %v2681_v19, %v2617_v25  ;;  %3299 = vmatpush.msra.mxu3 %v7271_v18  ;;  %v2672_v16 = vsel %vm7471_vm1, %v7421_v53, %v2668_v28  ;;  %v2676_v3 = vor.u32 1.1754944e-38, %v2675_v15  ;;  %v8422_v19 = vld [vmem:[#allocation42_spill] sm:$0xff] }
 0x6dc   :  { %3499 = vmatpush.msrb.mxu0 %v7275_v7  ;;  %3525 = vmatpush.msrb.mxu1 %v7278_v23  ;;  %v2709_v20 = vadd.f32 %v2706_v61, %v8397_v51  ;;  %v7520_v25 = vsel %vm115_vm0, %v8422_v19, %v8421_v55 }
 0x6dd   :  { %v2687_v27 = vadd.f32 %v2684_v5, %v2471_v44  ;;  %3300 = vmatpush.msra.mxu3 %v7283_v54  ;;  %v2677_v13 = vsel %vm2674_vm2, %v2676_v3, %v2672_v16  ;;  %v2713_v44 = vmul.f32 %v7520_v25, %v8398_v58 }
 0x6de   :  { %v4940_v31 = vpop.eup %4939  ;;  %3500 = vmatpush.msrb.mxu0 %v7293_v35  ;;  %3526 = vmatpush.msrb.mxu1 %v7296_v8  ;;  %v2693_v34 = vsub.f32 1.0, %v2677_v13  ;;  %v2699_v6 = vmul.f32 %v2677_v13, %v7341_v12  ;;  %v2712_v12 = vmul.f32 %v8420_v41, %v8398_v58 }
 0x6df   :  { %4941 = vtanh.f32 %v2687_v27  ;;  %v2695_v40 = vmul.f32 %v4940_v31, %v2692_v4  ;;  %3301 = vmatpush.msra.mxu3 %v7302_v39  ;;  %v8423_v27 = vld [vmem:[#allocation44_spill] sm:$0xff]  ;;  %v8424_v4 = vld [vmem:[#allocation43_spill] sm:$0xff]  ;;  %v2716_v31 = vadd.f32 %v2713_v44, %v8399_v14 }
 0x6e0   :  { %3501 = vmatpush.msrb.mxu0 %v7307_v62  ;;  %3527 = vmatpush.msrb.mxu1 %v7310_v33  ;;  %v2715_v17 = vadd.f32 %v2712_v12, %v8399_v14  ;;  %v7529_v22 = vsel %vm115_vm0, %v8424_v4, %v8423_v27 }
 0x6e1   :  { %v7485_v45 = vadd.f32 %v2698_v0, %v2695_v40  ;;  %3302 = vmatpush.msra.mxu3 %v7313_v10  ;;  %v2707_v40 = vmul.f32 %v7520_v25, %v8325_v38  ;;  %v2714_v3 = vmul.f32 %v7529_v22, %v8398_v58 }
 0x6e2   :  { %3502 = vmatpush.msrb.mxu0 %v7325_v24  ;;  %3528 = vmatpush.msrb.mxu1 %v7328_v57 }
 0x6e3   :  { %4484 = vmatmul.msk.f32.gmra.mxu3 %vm311_vm9, %v7485_v45  ;;  %4487 = vmatmul.msk.f32.gmra.mxu0 %vm311_vm9, %v7485_v45  ;;  %v2717_v12 = vadd.f32 %v2714_v3, %v8399_v14 }
 0x6e4   :  { %4490 = vmatmul.msk.f32.gmra.mxu1 %vm311_vm9, %v7485_v45  ;;  %3303 = vmatpush.msra.mxu3 %v7322_v21 }
 0x6e5   :  { %v4942_v53 = vpop.eup %4941  ;;  %3503 = vmatpush.msrb.mxu0 %v7335_v49  ;;  %3529 = vmatpush.msrb.mxu1 %v7338_v32 }
 0x6e6   :  { %v2696_v43 = vmul.f32 %v4942_v53, %v2693_v34  ;;  %3304 = vmatpush.msra.mxu3 %v7331_v42 }
 0x6e7   :  { %3504 = vmatpush.msrb.mxu0 %v7343_v52  ;;  %3530 = vmatpush.msrb.mxu1 %v7346_v59 }
 0x6e8   :  { %v7503_v47 = vadd.f32 %v2699_v6, %v2696_v43  ;;  %v2710_v43 = vadd.f32 %v2707_v40, %v8397_v51 }
 0x6eb   :  { %4485 = vmatmul.msk.f32.gmra.mxu3 %vm311_vm9, %v7503_v47  ;;  %4488 = vmatmul.msk.f32.gmra.mxu0 %vm311_vm9, %v7503_v47 }
 0x6ec   :  { %4491 = vmatmul.msk.f32.gmra.mxu1 %vm311_vm9, %v7503_v47 }
 0x753   :  { %v2776_v2 = vpop.f32.mrf.mxu0 }
 0x754   :  { %v2871_v36 = vadd.f32 %v2776_v2, %v2715_v17 }
 0x756   :  { %v4495_v11 = vmul.f32 -1.442695, %v2871_v36  ;;  %v2708_v36 = vmul.f32 %v7529_v22, %v8325_v38 }
 0x758   :  { %4943 = vpow2.f32 %v4495_v11 }
 0x759   :  { %v2750_v63 = vpop.f32.mrf.mxu3 }
 0x75a   :  { %v2811_v28 = vadd.f32 %v2750_v63, %v2709_v20 }
 0x75c   :  { %v4492_v5 = vmul.f32 -1.442695, %v2811_v28 }
 0x75e   :  { %v4944_v15 = vpop.eup %4943  ;;  %4945 = vpow2.f32 %v4492_v5  ;;  %v2711_v5 = vadd.f32 %v2708_v36, %v8397_v51 }
 0x75f   :  { %v7524_v48 = vadd.f32 1.0, %v4944_v15 }
 0x760   :  { %v2779_v16 = vpop.f32.mrf.mxu0 }
 0x761   :  { %v2872_v0 = vadd.f32 %v2779_v16, %v2716_v31  ;;  %4947 = vrcp.f32 %v7524_v48  ;;  %vm2891_vm8 = vweird.f32 %v7524_v48 }
 0x763   :  { %v4496_v34 = vmul.f32 -1.442695, %v2872_v0 }
 0x764   :  { %v4946_v13 = vpop.eup %4945 }
 0x765   :  { %v2823_v53 = vadd.f32 1.0, %v4946_v13  ;;  %4949 = vpow2.f32 %v4496_v34 }
 0x766   :  { %v2753_v6 = vpop.f32.mrf.mxu3 }
 0x767   :  { %4951 = vrcp.f32 %v2823_v53  ;;  %v2812_v17 = vadd.f32 %v2753_v6, %v2710_v43  ;;  %v7539_v61 = vpop.eup %4947  ;;  %v2837_v40 = vand.u32 2147483648, %v2823_v53  ;;  %v2835_v34 = vand.u32 2147483647, %v2823_v53 }
 0x768   :  { %v2782_v2 = vpop.f32.mrf.mxu0  ;;  %v2887_v63 = vmul.f32 %v7539_v61, %v7524_v48  ;;  %v2718_v6 = vmul.f32 %v8420_v41, %v8329_v26  ;;  %vm2831_vm4 = vweird.f32 %v2823_v53  ;;  %vm2892_vm7 = vweird.f32 %v7539_v61 }
 0x769   :  { %v2873_v11 = vadd.f32 %v2782_v2, %v2717_v12  ;;  %v4493_v20 = vmul.f32 -1.442695, %v2812_v17  ;;  %v2802_v12 = vpop.f32.mrf.mxu1  ;;  %vm2836_vm6 = vcmp.eq.f32.partialorder %v2835_v34, 8.507059e+37  ;;  %vm2893_vm10 = vmor %vm2891_vm8, %vm2892_vm7 }
 0x76a   :  { %v2888_v31 = vsub.f32 1.0, %v2887_v63  ;;  %v2721_v41 = vadd.f32 %v2718_v6, %v5486_v46 }
 0x76b   :  { %v4497_v55 = vmul.f32 -1.442695, %v2873_v11  ;;  %v4950_v19 = vpop.eup %4949  ;;  %4953 = vpow2.f32 %v4493_v20  ;;  %v2838_v20 = vor.u32 1.1754944e-38, %v2837_v40 }
 0x76c   :  { %v7545_v44 = vadd.f32 1.0, %v4950_v19  ;;  %v2889_v2 = vmul.f32 %v7539_v61, %v2888_v31  ;;  %v2931_v19 = vadd.f32 %v2802_v12, %v5496_v50 }
 0x76d   :  { %v4952_v28 = vpop.eup %4951  ;;  %4955 = vpow2.f32 %v4497_v55 }
 0x76e   :  { %v2827_v15 = vmul.f32 %v4952_v28, %v2823_v53  ;;  %v2756_v27 = vpop.f32.mrf.mxu3  ;;  %4957 = vrcp.f32 %v7545_v44  ;;  %vm2832_vm3 = vweird.f32 %v4952_v28  ;;  %vm2906_vm14 = vweird.f32 %v7545_v44 }
 0x76f   :  { %v2813_v4 = vadd.f32 %v2756_v27, %v2711_v5  ;;  %vm2833_vm5 = vmor %vm2831_vm4, %vm2832_vm3 }
 0x770   :  { %v2828_v16 = vsub.f32 1.0, %v2827_v15  ;;  %v2890_v15 = vadd.f32 %v7539_v61, %v2889_v2 }
 0x771   :  { %v4494_v0 = vmul.f32 -1.442695, %v2813_v4  ;;  %v4954_v3 = vpop.eup %4953  ;;  %v2897_v4 = vand.u32 2147483648, %v7524_v48 }
 0x772   :  { %v2829_v13 = vmul.f32 %v4952_v28, %v2828_v16  ;;  %v2824_v17 = vadd.f32 1.0, %v4954_v3 }
 0x773   :  { %v4956_v43 = vpop.eup %4955  ;;  %4959 = vpow2.f32 %v4494_v0  ;;  %v2898_v6 = vor.u32 1.1754944e-38, %v2897_v4 }
 0x774   :  { %v2830_v36 = vadd.f32 %v4952_v28, %v2829_v13  ;;  %v7552_v11 = vadd.f32 1.0, %v4956_v43  ;;  %4961 = vrcp.f32 %v2824_v17  ;;  %v7554_v55 = vpop.eup %4957  ;;  %v2894_v13 = vsel %vm2893_vm10, %v7539_v61, %v2890_v15 }
 0x775   :  { %v2902_v31 = vmul.f32 %v7554_v55, %v7545_v44  ;;  %v2719_v43 = vmul.f32 %v7520_v25, %v8329_v26  ;;  %vm2846_vm13 = vweird.f32 %v2824_v17  ;;  %vm2907_vm2 = vweird.f32 %v7554_v55 }
 0x776   :  { %v2834_v63 = vsel %vm2833_vm5, %v4952_v28, %v2830_v36  ;;  %4963 = vrcp.f32 %v7552_v11  ;;  %v2895_v28 = vand.u32 2147483647, %v7524_v48  ;;  %v2805_v48 = vpop.f32.mrf.mxu1  ;;  %v2852_v36 = vand.u32 2147483648, %v2824_v17  ;;  %vm7597_vm4 = vmor %vm2906_vm14, %vm2907_vm2 }
 0x777   :  { %v2839_v5 = vsel %vm2836_vm6, %v2838_v20, %v2834_v63  ;;  %v2903_v12 = vsub.f32 1.0, %v2902_v31  ;;  %v2850_v63 = vand.u32 2147483647, %v2824_v17  ;;  %v2722_v61 = vadd.f32 %v2719_v43, %v5486_v46 }
 0x778   :  { %v2934_v53 = vmul.f32 %v2931_v19, %v2839_v5  ;;  %vm2896_vm11 = vcmp.eq.f32.partialorder %v2895_v28, 8.507059e+37  ;;  %v2932_v25 = vadd.f32 %v2805_v48, %v5496_v50  ;;  %v2853_v31 = vor.u32 1.1754944e-38, %v2852_v36 }
 0x779   :  { %v4960_v27 = vpop.eup %4959  ;;  %v2899_v20 = vsel %vm2896_vm11, %v2898_v6, %v2894_v13  ;;  %vm2851_vm1 = vcmp.eq.f32.partialorder %v2850_v63, 8.507059e+37  ;;  %v2912_v36 = vand.u32 2147483648, %v7545_v44  ;;  %vm2921_vm11 = vweird.f32 %v7552_v11 }
 0x77a   :  { %v7566_v16 = vadd.f32 1.0, %v4960_v27  ;;  %v2937_v40 = vadd.f32 %v2934_v53, %v2721_v41  ;;  %v4962_v0 = vpop.eup %4961  ;;  %v2904_v41 = vmul.f32 %v7554_v55, %v2903_v12  ;;  %v2943_v27 = vsub.f32 1.0, %v2899_v20 }
 0x77b   :  { %v2842_v3 = vmul.f32 %v4962_v0, %v2824_v17  ;;  %vm2847_vm12 = vweird.f32 %v4962_v0 }
 0x77c   :  { %4965 = vrcp.f32 %v7566_v16  ;;  %v7570_v34 = vpop.eup %4963  ;;  %vm2848_vm15 = vmor %vm2846_vm13, %vm2847_vm12  ;;  %v2905_v48 = vadd.f32 %v7554_v55, %v2904_v41  ;;  %v2867_v17 = vand.u32 2147483648, %v7566_v16  ;;  %vm2861_vm5 = vweird.f32 %v7566_v16 }
 0x77d   :  { %4967 = vtanh.f32 %v2937_v40  ;;  %v2843_v2 = vsub.f32 1.0, %v2842_v3  ;;  %v2917_v5 = vmul.f32 %v7570_v34, %v7552_v11  ;;  %v2949_v40 = vmul.f32 %v2899_v20, %v7429_v30 }
 0x77e   :  { %v2865_v30 = vand.u32 2147483647, %v7566_v16  ;;  %v2808_v63 = vpop.f32.mrf.mxu1  ;;  %vm2922_vm10 = vweird.f32 %v7570_v34 }
 0x77f   :  { %v2844_v19 = vmul.f32 %v4962_v0, %v2843_v2  ;;  %v2918_v13 = vsub.f32 1.0, %v2917_v5  ;;  %vm7626_vm12 = vmor %vm2921_vm11, %vm2922_vm10 }
 0x780   :  { %vm2866_vm7 = vcmp.eq.f32.partialorder %v2865_v30, 8.507059e+37 }
 0x781   :  { %v2845_v53 = vadd.f32 %v4962_v0, %v2844_v19  ;;  %v2919_v20 = vmul.f32 %v7570_v34, %v2918_v13 }
 0x782   :  { %v4966_v15 = vpop.eup %4965 }
 0x783   :  { %v4968_v4 = vpop.eup %4967  ;;  %v2857_v28 = vmul.f32 %v4966_v15, %v7566_v16  ;;  %v2849_v3 = vsel %vm2848_vm15, %v4962_v0, %v2845_v53  ;;  %vm2862_vm3 = vweird.f32 %v4966_v15  ;;  %v2910_v0 = vand.u32 2147483647, %v7545_v44 }
 0x784   :  { %v2946_v43 = vmul.f32 %v4968_v4, %v2943_v27  ;;  %v2854_v6 = vsel %vm2851_vm1, %v2853_v31, %v2849_v3  ;;  %v2909_v27 = vsel %vm7597_vm4, %v7554_v55, %v2905_v48  ;;  %vm2863_vm6 = vmor %vm2861_vm5, %vm2862_vm3  ;;  %v2868_v44 = vor.u32 1.1754944e-38, %v2867_v17  ;;  %v8432_v3 = vld [vmem:[#allocation37_spill] sm:$0xff] }
 0x785   :  { %v2858_v12 = vsub.f32 1.0, %v2857_v28  ;;  %v2935_v19 = vmul.f32 %v2932_v25, %v2854_v6  ;;  %v2720_v25 = vmul.f32 %v7529_v22, %v8329_v26  ;;  %v2913_v4 = vor.u32 1.1754944e-38, %v2912_v36  ;;  %v8433_v36 = vld [vmem:[#allocation39_spill] sm:$0xff] }
 0x786   :  { %v7585_v2 = vadd.f32 %v2949_v40, %v2946_v43  ;;  %vm2911_vm8 = vcmp.eq.f32.partialorder %v2910_v0, 8.507059e+37  ;;  %v8431_v40 = vld [vmem:[#allocation36_spill] sm:$0xff] }
 0x787   :  { %v2859_v14 = vmul.f32 %v4966_v15, %v2858_v12  ;;  %v2938_v41 = vadd.f32 %v2935_v19, %v2722_v61  ;;  %v2914_v55 = vsel %vm2911_vm8, %v2913_v4, %v2909_v27  ;;  %v7675_v13 = vsel %vm115_vm0, %v8432_v3, %v8431_v40  ;;  %v8434_v19 = vld [vmem:[#allocation38_spill] sm:$0xff] }
 0x788   :  { %4498 = vmatmul.msk.f32.vlgmr.msra.gmra.mxu2 %vm311_vm9, %v7585_v2  ;;  %4501 = vmatmul.msk.f32.vlgmr.msrb.gmra.mxu3 %vm311_vm9, %v7585_v2  ;;  %v2959_v43 = vmul.f32 %v7675_v13, %v8325_v38  ;;  %v2965_v6 = vmul.f32 %v7675_v13, %v8398_v58  ;;  %v7684_v30 = vsel %vm115_vm0, %v8434_v19, %v8433_v36 }
 0x789   :  { %v2860_v53 = vadd.f32 %v4966_v15, %v2859_v14  ;;  %4504 = vmatmul.msk.f32.vlgmr.msra.gmra.mxu0 %vm311_vm9, %v7585_v2  ;;  %3549 = vmatpush.msra.mxu2 %v7241_v56  ;;  %4969 = vtanh.f32 %v2938_v41  ;;  %v2933_v14 = vadd.f32 %v2808_v63, %v5496_v50  ;;  %v2920_v56 = vadd.f32 %v7570_v34, %v2919_v20 }
 0x78a   :  { %3749 = vmatpush.msrb.mxu3 %v7250_v1  ;;  %3775 = vmatpush.msra.mxu0 %v7253_v37  ;;  %v2723_v1 = vadd.f32 %v2720_v25, %v5486_v46  ;;  %v2927_v37 = vand.u32 2147483648, %v7552_v11  ;;  %v2962_v5 = vadd.f32 %v2959_v43, %v8397_v51  ;;  %v2960_v25 = vmul.f32 %v7684_v30, %v8325_v38 }
 0x78b   :  { %v2864_v22 = vsel %vm2863_vm6, %v4966_v15, %v2860_v53  ;;  %3550 = vmatpush.msra.mxu2 %v7258_v9  ;;  %v2925_v9 = vand.u32 2147483647, %v7552_v11  ;;  %v2944_v15 = vsub.f32 1.0, %v2914_v55  ;;  %v2966_v53 = vmul.f32 %v7684_v30, %v8398_v58 }
 0x78c   :  { %v2869_v16 = vsel %vm2866_vm7, %v2868_v44, %v2864_v22  ;;  %3750 = vmatpush.msrb.mxu3 %v7262_v29  ;;  %3776 = vmatpush.msra.mxu0 %v7265_v60  ;;  %v2928_v11 = vor.u32 1.1754944e-38, %v2927_v37 }
 0x78d   :  { %v2936_v61 = vmul.f32 %v2933_v14, %v2869_v16  ;;  %3551 = vmatpush.msra.mxu2 %v7271_v18  ;;  %v2924_v18 = vsel %vm7626_vm12, %v7570_v34, %v2920_v56  ;;  %vm2926_vm13 = vcmp.eq.f32.partialorder %v2925_v9, 8.507059e+37  ;;  %v2963_v16 = vadd.f32 %v2960_v25, %v8397_v51 }
 0x78e   :  { %3751 = vmatpush.msrb.mxu3 %v7275_v7  ;;  %3777 = vmatpush.msra.mxu0 %v7278_v23  ;;  %v2950_v23 = vmul.f32 %v2914_v55, %v7485_v45  ;;  %v2929_v28 = vsel %vm2926_vm13, %v2928_v11, %v2924_v18 }
 0x78f   :  { %v2939_v60 = vadd.f32 %v2936_v61, %v2723_v1  ;;  %3552 = vmatpush.msra.mxu2 %v7283_v54  ;;  %v4970_v31 = vpop.eup %4969 }
 0x790   :  { %3752 = vmatpush.msrb.mxu3 %v7293_v35  ;;  %3778 = vmatpush.msra.mxu0 %v7296_v8  ;;  %v2947_v7 = vmul.f32 %v4970_v31, %v2944_v15  ;;  %v2945_v35 = vsub.f32 1.0, %v2929_v28 }
 0x791   :  { %4971 = vtanh.f32 %v2939_v60  ;;  %3553 = vmatpush.msra.mxu2 %v7302_v39 }
 0x792   :  { %3753 = vmatpush.msrb.mxu3 %v7307_v62  ;;  %3779 = vmatpush.msra.mxu0 %v7310_v33  ;;  %v7640_v54 = vadd.f32 %v2950_v23, %v2947_v7  ;;  %v2951_v62 = vmul.f32 %v2929_v28, %v7503_v47 }
 0x793   :  { %3554 = vmatpush.msra.mxu2 %v7313_v10  ;;  %v8429_v10 = vld [vmem:[#allocation35_spill] sm:$0xff] }
 0x794   :  { %3754 = vmatpush.msrb.mxu3 %v7325_v24  ;;  %3780 = vmatpush.msra.mxu0 %v7328_v57  ;;  %v2964_v24 = vmul.f32 %v8429_v10, %v8398_v58 }
 0x795   :  { %4499 = vmatmul.msk.f32.gmra.mxu2 %vm311_vm9, %v7640_v54  ;;  %4502 = vmatmul.msk.f32.gmra.mxu3 %vm311_vm9, %v7640_v54 }
 0x796   :  { %4505 = vmatmul.msk.f32.gmra.mxu0 %vm311_vm9, %v7640_v54  ;;  %3555 = vmatpush.msra.mxu2 %v7322_v21  ;;  %v2958_v21 = vmul.f32 %v8429_v10, %v8325_v38 }
 0x797   :  { %v4972_v8 = vpop.eup %4971  ;;  %3755 = vmatpush.msrb.mxu3 %v7335_v49  ;;  %3781 = vmatpush.msra.mxu0 %v7338_v32 }
 0x798   :  { %v2948_v39 = vmul.f32 %v4972_v8, %v2945_v35  ;;  %3556 = vmatpush.msra.mxu2 %v7331_v42  ;;  %v2961_v57 = vadd.f32 %v2958_v21, %v8397_v51  ;;  %v8430_v42 = vld [vmem:[#allocation15_spill] sm:$0xff]  ;;  %v2970_v8 = vmul.f32 %v8429_v10, %v8329_v26 }
 0x799   :  { %3756 = vmatpush.msrb.mxu3 %v7343_v52  ;;  %3782 = vmatpush.msra.mxu0 %v7346_v59  ;;  %v2967_v49 = vadd.f32 %v2964_v24, %v8430_v42  ;;  %v2968_v41 = vadd.f32 %v2965_v6, %v8430_v42  ;;  %v2969_v55 = vadd.f32 %v2966_v53, %v8430_v42 }
 0x79a   :  { %v7658_v33 = vadd.f32 %v2951_v62, %v2948_v39  ;;  %v2973_v10 = vadd.f32 %v2970_v8, %v5486_v46 }
 0x79d   :  { %4500 = vmatmul.msk.f32.gmra.mxu2 %vm311_vm9, %v7658_v33  ;;  %4503 = vmatmul.msk.f32.gmra.mxu3 %vm311_vm9, %v7658_v33 }
 0x79e   :  { %4506 = vmatmul.msk.f32.gmra.mxu0 %vm311_vm9, %v7658_v33 }
 0x806   :  { %v3054_v39 = vpop.f32.mrf.mxu0 }
 0x80b   :  { %v3002_v32 = vpop.f32.mrf.mxu2  ;;  %v3028_v52 = vpop.f32.mrf.mxu3 }
 0x80c   :  { %v3063_v59 = vadd.f32 %v3002_v32, %v2961_v57  ;;  %v3123_v45 = vadd.f32 %v3028_v52, %v2967_v49  ;;  %v3183_v52 = vadd.f32 %v3054_v39, %v5496_v50 }
 0x80e   :  { %v4507_v47 = vmul.f32 -1.442695, %v3063_v59  ;;  %v4510_v34 = vmul.f32 -1.442695, %v3123_v45 }
 0x810   :  { %4973 = vpow2.f32 %v4507_v47 }
 0x811   :  { %4975 = vpow2.f32 %v4510_v34 }
 0x813   :  { %v3057_v53 = vpop.f32.mrf.mxu0 }
 0x816   :  { %v4974_v12 = vpop.eup %4973 }
 0x817   :  { %v4976_v48 = vpop.eup %4975  ;;  %v3075_v17 = vadd.f32 1.0, %v4974_v12 }
 0x818   :  { %v7686_v0 = vadd.f32 1.0, %v4976_v48  ;;  %v3005_v20 = vpop.f32.mrf.mxu2  ;;  %v3031_v63 = vpop.f32.mrf.mxu3 }
 0x819   :  { %4977 = vrcp.f32 %v3075_v17  ;;  %v3064_v27 = vadd.f32 %v3005_v20, %v2962_v5  ;;  %v3124_v44 = vadd.f32 %v3031_v63, %v2968_v41  ;;  %v3089_v31 = vand.u32 2147483648, %v3075_v17 }
 0x81a   :  { %4979 = vrcp.f32 %v7686_v0  ;;  %v3087_v28 = vand.u32 2147483647, %v3075_v17  ;;  %vm3083_vm15 = vweird.f32 %v3075_v17  ;;  %v3149_v40 = vand.u32 2147483648, %v7686_v0 }
 0x81b   :  { %v4508_v4 = vmul.f32 -1.442695, %v3064_v27  ;;  %v4511_v14 = vmul.f32 -1.442695, %v3124_v44  ;;  %v3090_v49 = vor.u32 1.1754944e-38, %v3089_v31  ;;  %vm3143_vm4 = vweird.f32 %v7686_v0 }
 0x81c   :  { %vm3088_vm2 = vcmp.eq.f32.partialorder %v3087_v28, 8.507059e+37  ;;  %v3147_v43 = vand.u32 2147483647, %v7686_v0  ;;  %v3150_v20 = vor.u32 1.1754944e-38, %v3149_v40  ;;  %v2972_v40 = vmul.f32 %v7684_v30, %v8329_v26 }
 0x81d   :  { %4981 = vpow2.f32 %v4508_v4 }
 0x81e   :  { %4983 = vpow2.f32 %v4511_v14  ;;  %vm3148_vm6 = vcmp.eq.f32.partialorder %v3147_v43, 8.507059e+37 }
 0x81f   :  { %v4978_v22 = vpop.eup %4977 }
 0x820   :  { %v4980_v56 = vpop.eup %4979  ;;  %v3079_v1 = vmul.f32 %v4978_v22, %v3075_v17  ;;  %v3008_v37 = vpop.f32.mrf.mxu2  ;;  %vm3084_vm14 = vweird.f32 %v4978_v22 }
 0x821   :  { %v3034_v61 = vpop.f32.mrf.mxu3  ;;  %v3139_v9 = vmul.f32 %v4980_v56, %v7686_v0  ;;  %v3065_v15 = vadd.f32 %v3008_v37, %v2963_v16  ;;  %vm3085_vm1 = vmor %vm3083_vm15, %vm3084_vm14  ;;  %vm3144_vm3 = vweird.f32 %v4980_v56  ;;  %v2971_v0 = vmul.f32 %v7675_v13, %v8329_v26 }
 0x822   :  { %v3125_v29 = vadd.f32 %v3034_v61, %v2969_v55  ;;  %v3080_v60 = vsub.f32 1.0, %v3079_v1  ;;  %vm3145_vm5 = vmor %vm3143_vm4, %vm3144_vm3 }
 0x823   :  { %v3140_v18 = vsub.f32 1.0, %v3139_v9  ;;  %v4509_v7 = vmul.f32 -1.442695, %v3065_v15  ;;  %v4982_v35 = vpop.eup %4981 }
 0x824   :  { %v4512_v23 = vmul.f32 -1.442695, %v3125_v29  ;;  %v3081_v11 = vmul.f32 %v4978_v22, %v3080_v60  ;;  %v4984_v21 = vpop.eup %4983  ;;  %v3076_v57 = vadd.f32 1.0, %v4982_v35  ;;  %v3184_v29 = vadd.f32 %v3057_v53, %v5496_v50 }
 0x825   :  { %v3141_v62 = vmul.f32 %v4980_v56, %v3140_v18  ;;  %4985 = vpow2.f32 %v4509_v7  ;;  %v7700_v32 = vadd.f32 1.0, %v4984_v21  ;;  %v2975_v53 = vadd.f32 %v2972_v40, %v5486_v46 }
 0x826   :  { %v3082_v24 = vadd.f32 %v4978_v22, %v3081_v11  ;;  %4987 = vpow2.f32 %v4512_v23  ;;  %v3102_v44 = vand.u32 2147483647, %v3076_v57  ;;  %v3104_v4 = vand.u32 2147483648, %v3076_v57 }
 0x827   :  { %4989 = vrcp.f32 %v3076_v57  ;;  %v3142_v47 = vadd.f32 %v4980_v56, %v3141_v62  ;;  %vm3098_vm8 = vweird.f32 %v3076_v57  ;;  %vm3158_vm12 = vweird.f32 %v7700_v32 }
 0x828   :  { %v3086_v59 = vsel %vm3085_vm1, %v4978_v22, %v3082_v24  ;;  %4991 = vrcp.f32 %v7700_v32  ;;  %vm3103_vm11 = vcmp.eq.f32.partialorder %v3102_v44, 8.507059e+37  ;;  %v3105_v60 = vor.u32 1.1754944e-38, %v3104_v4  ;;  %v7774_v4 = vld [vmem:[#allocation2 + $0x70] sm:$0xff] }
 0x829   :  { %v3091_v45 = vsel %vm3088_vm2, %v3090_v49, %v3086_v59  ;;  %v3146_v17 = vsel %vm3145_vm5, %v4980_v56, %v3142_v47  ;;  %v2974_v56 = vadd.f32 %v2971_v0, %v5486_v46  ;;  %v3164_v39 = vand.u32 2147483648, %v7700_v32  ;;  %v7744_v49 = vld [vmem:[#allocation2 + $0xb8] sm:$0xff] }
 0x82a   :  { %v3186_v34 = vmul.f32 %v3183_v52, %v3091_v45  ;;  %v3151_v41 = vsel %vm3148_vm6, %v3150_v20, %v3146_v17  ;;  %v3060_v52 = vpop.f32.mrf.mxu0  ;;  %v5205_v17 = vld [vmem:[#allocation2 + $0x90] sm:$0xff]  ;;  %v7767_v20 = vld [vmem:[#allocation2 + $0x88] sm:$0xff] }
 0x82b   :  { %v4986_v3 = vpop.eup %4985  ;;  %v3195_v22 = vsub.f32 1.0, %v3151_v41  ;;  %v3201_v9 = vmul.f32 %v3151_v41, %v7585_v2  ;;  %v3185_v30 = vadd.f32 %v3060_v52, %v5496_v50  ;;  %v5208_v41 = vld [vmem:[#allocation2 + $0x78] sm:$0xff]  ;;  %v8439_v45 = vld [vmem:[#allocation19_spill] sm:$0xff] }
 0x82c   :  { %v4988_v6 = vpop.eup %4987  ;;  %v3189_v12 = vadd.f32 %v3186_v34, %v2973_v10  ;;  %v7708_v48 = vadd.f32 1.0, %v4986_v3  ;;  %v5202_v10 = vld [vmem:[#allocation2 + $0xa8] sm:$0xff]  ;;  %v5203_v34 = vld [vmem:[#allocation2 + $0xb0] sm:$0xff] }
 0x82d   :  { %v7710_v36 = vadd.f32 1.0, %v4988_v6  ;;  %v4990_v19 = vpop.eup %4989 }
 0x82e   :  { %4993 = vtanh.f32 %v3189_v12  ;;  %v7712_v63 = vpop.eup %4991  ;;  %v3094_v5 = vmul.f32 %v4990_v19, %v3076_v57  ;;  %vm3099_vm7 = vweird.f32 %v4990_v19  ;;  %v3119_v35 = vand.u32 2147483648, %v7708_v48 }
 0x82f   :  { %4995 = vrcp.f32 %v7708_v48  ;;  %v3154_v25 = vmul.f32 %v7712_v63, %v7700_v32  ;;  %vm3100_vm10 = vmor %vm3098_vm8, %vm3099_vm7  ;;  %vm3159_vm13 = vweird.f32 %v7712_v63  ;;  %v3117_v24 = vand.u32 2147483647, %v7708_v48 }
 0x830   :  { %4997 = vrcp.f32 %v7710_v36  ;;  %v3095_v27 = vsub.f32 1.0, %v3094_v5  ;;  %v3162_v57 = vand.u32 2147483647, %v7700_v32  ;;  %vm7752_vm15 = vmor %vm3158_vm12, %vm3159_vm13  ;;  %vm3113_vm1 = vweird.f32 %v7708_v48  ;;  %v7762_v32 = vld [vmem:[#allocation2 + $0xa0] sm:$0xff] }
 0x831   :  { %v3155_v14 = vsub.f32 1.0, %v3154_v25  ;;  %v3120_v6 = vor.u32 1.1754944e-38, %v3119_v35  ;;  %v3165_v12 = vor.u32 1.1754944e-38, %v3164_v39  ;;  %vm3118_vm3 = vcmp.eq.f32.partialorder %v3117_v24, 8.507059e+37  ;;  %v5209_v25 = vld [vmem:[#allocation2 + $0x80] sm:$0xff]  ;;  %v5220_v35 = vld [vmem:[#allocation2 + $0x18] sm:$0xff] }
 0x832   :  { %v3096_v16 = vmul.f32 %v4990_v19, %v3095_v27  ;;  %vm3163_vm4 = vcmp.eq.f32.partialorder %v3162_v57, 8.507059e+37  ;;  %v3179_v27 = vand.u32 2147483648, %v7710_v36  ;;  %vm3173_vm6 = vweird.f32 %v7710_v36  ;;  %v7806_v39 = vld [vmem:[#allocation2 + $0x10] sm:$0xff]  ;;  %v5224_v24 = vld [vmem:[#allocation2 + $0x8] sm:$0xff] }
 0x833   :  { %v3156_v1 = vmul.f32 %v7712_v63, %v3155_v14  ;;  %v3177_v14 = vand.u32 2147483647, %v7710_v36 }
 0x834   :  { %v4994_v55 = vpop.eup %4993  ;;  %v3097_v37 = vadd.f32 %v4990_v19, %v3096_v16  ;;  %v5212_v16 = vld [vmem:[#allocation2 + $0x68] sm:$0xff] }
 0x835   :  { %v4996_v13 = vpop.eup %4995  ;;  %v3198_v61 = vmul.f32 %v4994_v55, %v3195_v22  ;;  %v3157_v2 = vadd.f32 %v7712_v63, %v3156_v1  ;;  %v5211_v22 = vld [vmem:[#allocation2 + $0x60] sm:$0xff]  ;;  %vm3178_vm8 = vcmp.eq.f32.partialorder %v3177_v14, 8.507059e+37 }
 0x836   :  { %v7723_v15 = vpop.eup %4997  ;;  %v3109_v31 = vmul.f32 %v4996_v13, %v7708_v48  ;;  %v3101_v18 = vsel %vm3100_vm10, %v4990_v19, %v3097_v37  ;;  %vm3114_vm14 = vweird.f32 %v4996_v13  ;;  %v5206_v19 = vld [vmem:[#allocation2 + $0x98] sm:$0xff] }
 0x837   :  { %v3169_v7 = vmul.f32 %v7723_v15, %v7710_v36  ;;  %v7730_v23 = vadd.f32 %v3201_v9, %v3198_v61  ;;  %v3106_v11 = vsel %vm3103_vm11, %v3105_v60, %v3101_v18  ;;  %v3161_v43 = vsel %vm7752_vm15, %v7712_v63, %v3157_v2  ;;  %vm3115_vm2 = vmor %vm3113_vm1, %vm3114_vm14  ;;  %v5214_v61 = vld [vmem:[#allocation2 + $0x48] sm:$0xff]  ;;  %v5215_v9 = vld [vmem:[#allocation2 + $0x50] sm:$0xff] }
 0x838   :  { %v3110_v28 = vsub.f32 1.0, %v3109_v31  ;;  %v3187_v62 = vmul.f32 %v3184_v29, %v3106_v11  ;;  %v3166_v5 = vsel %vm3163_vm4, %v3165_v12, %v3161_v43  ;;  %vm3174_vm5 = vweird.f32 %v7723_v15  ;;  %v7792_v18 = vld [vmem:[#allocation2 + $0x40] sm:$0xff]  ;;  %v5218_v11 = vld [vmem:[#allocation2 + $0x38] sm:$0xff]  ;;  %v7797_v2 = vld [vmem:[#allocation2 + $0x28] sm:$0xff] }
 0x839   :  { %v3170_v8 = vsub.f32 1.0, %v3169_v7  ;;  %4513 = vmatmul.msk.f32.vlgmr.msra.gmra.mxu1 %vm311_vm9, %v7730_v23  ;;  %4516 = vmatmul.msk.f32.vlgmr.msrb.gmra.mxu2 %vm311_vm9, %v7730_v23  ;;  %v3196_v55 = vsub.f32 1.0, %v3166_v5  ;;  %vm7781_vm7 = vmor %vm3173_vm6, %vm3174_vm5  ;;  %v3202_v60 = vmul.f32 %v3166_v5, %v7640_v54  ;;  %v3180_v31 = vor.u32 1.1754944e-38, %v3179_v27  ;;  %v5217_v7 = vld [vmem:[#allocation2 + $0x30] sm:$0xff]  ;;  %v5221_v54 = vld [vmem:[#allocation2 + $0x20] sm:$0xff] }
 0x83a   :  { %v3111_v21 = vmul.f32 %v4996_v13, %v3110_v28  ;;  %4519 = vmatmul.msk.f32.vlgmr.msra.gmra.mxu3 %vm311_vm9, %v7730_v23  ;;  %3801 = vmatpush.msra.mxu1 %v7744_v49  ;;  %v3190_v47 = vadd.f32 %v3187_v62, %v2974_v56  ;;  %v8440_v12 = vld [vmem:[#allocation31_spill] sm:$0xff] }
 0x83b   :  { %v3171_v59 = vmul.f32 %v7723_v15, %v3170_v8  ;;  %4001 = vmatpush.msrb.mxu2 %v5202_v10  ;;  %4027 = vmatpush.msra.mxu3 %v5203_v34 }
 0x83c   :  { %v3112_v3 = vadd.f32 %v4996_v13, %v3111_v21  ;;  %3802 = vmatpush.msra.mxu1 %v7762_v32  ;;  %4999 = vtanh.f32 %v3190_v47  ;;  %v5223_v21 = vld [vmem:[#allocation2] sm:$0xff]  ;;  %v3210_v47 = vmul.f32 %v8439_v45, %v8325_v38 }
 0x83d   :  { %4002 = vmatpush.msrb.mxu2 %v5205_v17  ;;  %4028 = vmatpush.msra.mxu3 %v5206_v19  ;;  %v3172_v0 = vadd.f32 %v7723_v15, %v3171_v59  ;;  %v8441_v17 = vld [vmem:[#allocation32_spill] sm:$0xff] }
 0x83e   :  { %v3116_v48 = vsel %vm3115_vm2, %v4996_v13, %v3112_v3  ;;  %3803 = vmatpush.msra.mxu1 %v7767_v20  ;;  %v7785_v13 = vld [vmem:[#allocation2 + $0x58] sm:$0xff]  ;;  %v3213_v10 = vadd.f32 %v3210_v47, %v8397_v51  ;;  %v7827_v19 = vsel %vm115_vm0, %v8441_v17, %v8440_v12 }
 0x83f   :  { %v3121_v63 = vsel %vm3118_vm3, %v3120_v6, %v3116_v48  ;;  %4003 = vmatpush.msrb.mxu2 %v5208_v41  ;;  %4029 = vmatpush.msra.mxu3 %v5209_v25  ;;  %v3176_v36 = vsel %vm7781_vm7, %v7723_v15, %v3172_v0  ;;  %v8442_v25 = vld [vmem:[#allocation33_spill] sm:$0xff]  ;;  %v3217_v14 = vmul.f32 %v7827_v19, %v8398_v58 }
 0x840   :  { %v3188_v44 = vmul.f32 %v3185_v30, %v3121_v63  ;;  %3804 = vmatpush.msra.mxu1 %v7774_v4  ;;  %v3181_v15 = vsel %vm3178_vm8, %v3180_v31, %v3176_v36  ;;  %v3211_v63 = vmul.f32 %v7827_v19, %v8325_v38 }
 0x841   :  { %4004 = vmatpush.msrb.mxu2 %v5211_v22  ;;  %4030 = vmatpush.msra.mxu3 %v5212_v16  ;;  %v3197_v8 = vsub.f32 1.0, %v3181_v15  ;;  %v3203_v52 = vmul.f32 %v3181_v15, %v7658_v33  ;;  %v3216_v33 = vmul.f32 %v8439_v45, %v8398_v58  ;;  %v3220_v36 = vadd.f32 %v3217_v14, %v8430_v42 }
 0x842   :  { %v3191_v1 = vadd.f32 %v3188_v44, %v2975_v53  ;;  %3805 = vmatpush.msra.mxu1 %v7785_v13  ;;  %v5000_v37 = vpop.eup %4999  ;;  %v3214_v41 = vadd.f32 %v3211_v63, %v8397_v51  ;;  %v8443_v53 = vld [vmem:[#allocation34_spill] sm:$0xff] }
 0x843   :  { %4005 = vmatpush.msrb.mxu2 %v5214_v61  ;;  %4031 = vmatpush.msra.mxu3 %v5215_v9  ;;  %v3199_v29 = vmul.f32 %v5000_v37, %v3196_v55  ;;  %v3219_v43 = vadd.f32 %v3216_v33, %v8430_v42  ;;  %v7835_v27 = vsel %vm115_vm0, %v8443_v53, %v8442_v25 }
 0x844   :  { %5001 = vtanh.f32 %v3191_v1  ;;  %3806 = vmatpush.msra.mxu1 %v7792_v18  ;;  %v3212_v55 = vmul.f32 %v7835_v27, %v8325_v38 }
 0x845   :  { %4006 = vmatpush.msrb.mxu2 %v5217_v7  ;;  %4032 = vmatpush.msra.mxu3 %v5218_v11  ;;  %v7795_v28 = vadd.f32 %v3202_v60, %v3199_v29  ;;  %v3218_v11 = vmul.f32 %v7835_v27, %v8398_v58 }
 0x846   :  { %3807 = vmatpush.msra.mxu1 %v7797_v2  ;;  %v3215_v60 = vadd.f32 %v3212_v55, %v8397_v51 }
 0x847   :  { %4007 = vmatpush.msrb.mxu2 %v5220_v35  ;;  %4033 = vmatpush.msra.mxu3 %v5221_v54 }
 0x848   :  { %4514 = vmatmul.msk.f32.gmra.mxu1 %vm311_vm9, %v7795_v28  ;;  %4517 = vmatmul.msk.f32.gmra.mxu2 %vm311_vm9, %v7795_v28 }
 0x849   :  { %4520 = vmatmul.msk.f32.gmra.mxu3 %vm311_vm9, %v7795_v28  ;;  %3808 = vmatpush.msra.mxu1 %v7806_v39 }
 0x84a   :  { %v5002_v62 = vpop.eup %5001  ;;  %4008 = vmatpush.msrb.mxu2 %v5223_v21  ;;  %4034 = vmatpush.msra.mxu3 %v5224_v24  ;;  %v3222_v24 = vmul.f32 %v8439_v45, %v8329_v26 }
 0x84b   :  { %v3200_v57 = vmul.f32 %v5002_v62, %v3197_v8 }
 0x84c   :  { %v3225_v45 = vadd.f32 %v3222_v24, %v5486_v46 }
 0x84d   :  { %v7810_v59 = vadd.f32 %v3203_v52, %v3200_v57 }
 0x850   :  { %4515 = vmatmul.msk.f32.gmra.mxu1 %vm311_vm9, %v7810_v59  ;;  %4518 = vmatmul.msk.f32.gmra.mxu2 %vm311_vm9, %v7810_v59 }
 0x851   :  { %4521 = vmatmul.msk.f32.gmra.mxu3 %vm311_vm9, %v7810_v59 }
 0x8b6   :  { %v3254_v34 = vpop.f32.mrf.mxu1 }
 0x8b7   :  { %v3315_v40 = vadd.f32 %v3254_v34, %v3213_v10 }
 0x8b9   :  { %v4522_v3 = vmul.f32 -1.442695, %v3315_v40 }
 0x8bb   :  { %5003 = vpow2.f32 %v4522_v3  ;;  %v3221_v3 = vadd.f32 %v3218_v11, %v8430_v42 }
 0x8bc   :  { %v3280_v6 = vpop.f32.mrf.mxu2 }
 0x8bd   :  { %v3375_v30 = vadd.f32 %v3280_v6, %v3219_v43  ;;  %v3306_v57 = vpop.f32.mrf.mxu3 }
 0x8be   :  { %v3435_v12 = vadd.f32 %v3306_v57, %v5496_v50 }
 0x8bf   :  { %v4525_v48 = vmul.f32 -1.442695, %v3375_v30 }
 0x8c1   :  { %v5004_v5 = vpop.eup %5003  ;;  %5005 = vpow2.f32 %v4525_v48 }
 0x8c2   :  { %v3327_v0 = vadd.f32 1.0, %v5004_v5 }
 0x8c4   :  { %5007 = vrcp.f32 %v3327_v0  ;;  %v3341_v15 = vand.u32 2147483648, %v3327_v0  ;;  %v3339_v62 = vand.u32 2147483647, %v3327_v0  ;;  %vm3335_vm11 = vweird.f32 %v3327_v0 }
 0x8c5   :  { %v3257_v44 = vpop.f32.mrf.mxu1 }
 0x8c6   :  { %v3316_v22 = vadd.f32 %v3257_v44, %v3214_v41  ;;  %v3342_v33 = vor.u32 1.1754944e-38, %v3341_v15  ;;  %vm3340_vm13 = vcmp.eq.f32.partialorder %v3339_v62, 8.507059e+37 }
 0x8c7   :  { %v5006_v16 = vpop.eup %5005 }
 0x8c8   :  { %v3387_v56 = vadd.f32 1.0, %v5006_v16  ;;  %v4523_v1 = vmul.f32 -1.442695, %v3316_v22 }
 0x8ca   :  { %v5008_v37 = vpop.eup %5007  ;;  %5009 = vrcp.f32 %v3387_v56  ;;  %v3401_v30 = vand.u32 2147483648, %v3387_v56  ;;  %v3399_v25 = vand.u32 2147483647, %v3387_v56  ;;  %vm3395_vm15 = vweird.f32 %v3387_v56 }
 0x8cb   :  { %v3331_v61 = vmul.f32 %v5008_v37, %v3327_v0  ;;  %5011 = vpow2.f32 %v4523_v1  ;;  %v3283_v9 = vpop.f32.mrf.mxu2  ;;  %vm3336_vm10 = vweird.f32 %v5008_v37 }
 0x8cc   :  { %v3376_v29 = vadd.f32 %v3283_v9, %v3220_v36  ;;  %vm3337_vm12 = vmor %vm3335_vm11, %vm3336_vm10  ;;  %v3402_v16 = vor.u32 1.1754944e-38, %v3401_v30  ;;  %vm3400_vm2 = vcmp.eq.f32.partialorder %v3399_v25, 8.507059e+37  ;;  %v3224_v25 = vmul.f32 %v7835_v27, %v8329_v26 }
 0x8cd   :  { %v3332_v31 = vsub.f32 1.0, %v3331_v61  ;;  %v3260_v7 = vpop.f32.mrf.mxu1 }
 0x8ce   :  { %v4526_v35 = vmul.f32 -1.442695, %v3376_v29  ;;  %v3317_v54 = vadd.f32 %v3260_v7, %v3215_v60  ;;  %v3223_v29 = vmul.f32 %v7827_v19, %v8329_v26 }
 0x8cf   :  { %v3333_v8 = vmul.f32 %v5008_v37, %v3332_v31  ;;  %v3309_v31 = vpop.f32.mrf.mxu3 }
 0x8d0   :  { %v5010_v21 = vpop.eup %5009  ;;  %5013 = vpow2.f32 %v4526_v35  ;;  %v4524_v52 = vmul.f32 -1.442695, %v3317_v54 }
 0x8d1   :  { %v5012_v47 = vpop.eup %5011  ;;  %v3391_v10 = vmul.f32 %v5010_v21, %v3387_v56  ;;  %v3334_v34 = vadd.f32 %v5008_v37, %v3333_v8  ;;  %vm3396_vm14 = vweird.f32 %v5010_v21 }
 0x8d2   :  { %v3328_v40 = vadd.f32 1.0, %v5012_v47  ;;  %5015 = vpow2.f32 %v4524_v52  ;;  %vm3397_vm1 = vmor %vm3395_vm15, %vm3396_vm14  ;;  %v3226_v52 = vadd.f32 %v3223_v29, %v5486_v46 }
 0x8d3   :  { %v3392_v43 = vsub.f32 1.0, %v3391_v10  ;;  %v3338_v6 = vsel %vm3337_vm12, %v5008_v37, %v3334_v34  ;;  %v3286_v17 = vpop.f32.mrf.mxu2  ;;  %v3436_v10 = vadd.f32 %v3309_v31, %v5496_v50 }
 0x8d4   :  { %v3343_v48 = vsel %vm3340_vm13, %v3342_v33, %v3338_v6  ;;  %5017 = vrcp.f32 %v3328_v40  ;;  %v3377_v0 = vadd.f32 %v3286_v17, %v3221_v3  ;;  %v3356_v7 = vand.u32 2147483648, %v3328_v40 }
 0x8d5   :  { %v3393_v63 = vmul.f32 %v5010_v21, %v3392_v43  ;;  %v3438_v5 = vmul.f32 %v3435_v12, %v3343_v48  ;;  %v3354_v35 = vand.u32 2147483647, %v3328_v40  ;;  %vm3350_vm4 = vweird.f32 %v3328_v40 }
 0x8d6   :  { %v5014_v41 = vpop.eup %5013  ;;  %v4527_v37 = vmul.f32 -1.442695, %v3377_v0  ;;  %v3357_v19 = vor.u32 1.1754944e-38, %v3356_v7 }
 0x8d7   :  { %v3394_v53 = vadd.f32 %v5010_v21, %v3393_v63  ;;  %v3441_v44 = vadd.f32 %v3438_v5, %v3225_v45  ;;  %v7850_v14 = vadd.f32 1.0, %v5014_v41  ;;  %vm3355_vm6 = vcmp.eq.f32.partialorder %v3354_v35, 8.507059e+37 }
 0x8d8   :  { %v5016_v22 = vpop.eup %5015 }
 0x8d9   :  { %v3398_v55 = vsel %vm3397_vm1, %v5010_v21, %v3394_v53  ;;  %5019 = vtanh.f32 %v3441_v44  ;;  %v7852_v1 = vadd.f32 1.0, %v5016_v22  ;;  %vm3410_vm7 = vweird.f32 %v7850_v14  ;;  %v3312_v53 = vpop.f32.mrf.mxu3 }
 0x8da   :  { %v5018_v36 = vpop.eup %5017  ;;  %5021 = vrcp.f32 %v7850_v14  ;;  %v3403_v61 = vsel %vm3400_vm2, %v3402_v16, %v3398_v55  ;;  %v3414_v63 = vand.u32 2147483647, %v7850_v14 }
 0x8db   :  { %v3346_v9 = vmul.f32 %v5018_v36, %v3328_v40  ;;  %5023 = vrcp.f32 %v7852_v1  ;;  %v3447_v60 = vsub.f32 1.0, %v3403_v61  ;;  %vm3351_vm3 = vweird.f32 %v5018_v36 }
 0x8dc   :  { %5025 = vpow2.f32 %v4527_v37  ;;  %v3453_v62 = vmul.f32 %v3403_v61, %v7730_v23  ;;  %vm3352_vm5 = vmor %vm3350_vm4, %vm3351_vm3  ;;  %v3416_v40 = vand.u32 2147483648, %v7850_v14  ;;  %v3369_v30 = vand.u32 2147483647, %v7852_v1 }
 0x8dd   :  { %v3347_v56 = vsub.f32 1.0, %v3346_v9  ;;  %v3371_v48 = vand.u32 2147483648, %v7852_v1  ;;  %vm3365_vm11 = vweird.f32 %v7852_v1  ;;  %vm3415_vm14 = vcmp.eq.f32.partialorder %v3414_v63, 8.507059e+37 }
 0x8de   :  { %v3417_v22 = vor.u32 1.1754944e-38, %v3416_v40  ;;  %vm3370_vm15 = vcmp.eq.f32.partialorder %v3369_v30, 8.507059e+37 }
 0x8df   :  { %v5020_v11 = vpop.eup %5019  ;;  %v3348_v15 = vmul.f32 %v5018_v36, %v3347_v56  ;;  %v3372_v16 = vor.u32 1.1754944e-38, %v3371_v48 }
 0x8e0   :  { %v5022_v54 = vpop.eup %5021  ;;  %v3450_v8 = vmul.f32 %v5020_v11, %v3447_v60 }
 0x8e1   :  { %v3406_v21 = vmul.f32 %v5022_v54, %v7850_v14  ;;  %v3349_v24 = vadd.f32 %v5018_v36, %v3348_v15  ;;  %v5024_v57 = vpop.eup %5023  ;;  %vm3411_vm8 = vweird.f32 %v5022_v54  ;;  %v3227_v14 = vadd.f32 %v3224_v25, %v5486_v46  ;;  %v8448_v25 = vld [vmem:[#allocation12_spill] sm:$0xff] }
 0x8e2   :  { %v7861_v47 = vadd.f32 %v3453_v62, %v3450_v8  ;;  %v5026_v34 = vpop.eup %5025  ;;  %v3361_v43 = vmul.f32 %v5024_v57, %v7852_v1  ;;  %vm3366_vm10 = vweird.f32 %v5024_v57  ;;  %vm3412_vm12 = vmor %vm3410_vm7, %vm3411_vm8 }
 0x8e3   :  { %v3407_v33 = vsub.f32 1.0, %v3406_v21  ;;  %v3353_v3 = vsel %vm3352_vm5, %v5018_v36, %v3349_v24  ;;  %v7866_v6 = vadd.f32 1.0, %v5026_v34  ;;  %vm3367_vm13 = vmor %vm3365_vm11, %vm3366_vm10  ;;  %v8444_v21 = vld [vmem:[#allocation27_spill] sm:$0xff]  ;;  %v8445_v24 = vld [vmem:[#allocation29_spill] sm:$0xff] }
 0x8e4   :  { %v3358_v23 = vsel %vm3355_vm6, %v3357_v19, %v3353_v3  ;;  %4528 = vmatmul.msk.f32.vlgmr.msrb.gmra.mxu0 %vm311_vm9, %v7861_v47  ;;  %4531 = vmatmul.msk.f32.vlgmr.msrb.gmra.mxu1 %vm311_vm9, %v7861_v47  ;;  %v3362_v45 = vsub.f32 1.0, %v3361_v43 }
 0x8e5   :  { %v3408_v12 = vmul.f32 %v5022_v54, %v3407_v33  ;;  %v3439_v17 = vmul.f32 %v3436_v10, %v3358_v23  ;;  %4534 = vmatmul.msk.f32.vlgmr.msra.gmra.mxu2 %vm311_vm9, %v7861_v47  ;;  %4053 = vmatpush.msrb.mxu0 %v7744_v49  ;;  %5027 = vrcp.f32 %v7866_v6  ;;  %v3429_v11 = vand.u32 2147483647, %v7866_v6 }
 0x8e6   :  { %v3363_v0 = vmul.f32 %v5024_v57, %v3362_v45  ;;  %vm3425_vm2 = vweird.f32 %v7866_v6 }
 0x8e7   :  { %v3442_v5 = vadd.f32 %v3439_v17, %v3226_v52  ;;  %v3409_v41 = vadd.f32 %v5022_v54, %v3408_v12  ;;  %4054 = vmatpush.msrb.mxu0 %v7762_v32  ;;  %v3437_v32 = vadd.f32 %v3312_v53, %v5496_v50  ;;  %vm3430_vm4 = vcmp.eq.f32.partialorder %v3429_v11, 8.507059e+37  ;;  %v8446_v12 = vld [vmem:[#allocation28_spill] sm:$0xff] }
 0x8e8   :  { %v3364_v49 = vadd.f32 %v5024_v57, %v3363_v0  ;;  %v3463_v17 = vmul.f32 %v8446_v12, %v8325_v38  ;;  %v3469_v45 = vmul.f32 %v8446_v12, %v8398_v58 }
 0x8e9   :  { %5029 = vtanh.f32 %v3442_v5  ;;  %v3413_v44 = vsel %vm3412_vm12, %v5022_v54, %v3409_v41  ;;  %4055 = vmatpush.msrb.mxu0 %v7767_v20  ;;  %v8447_v41 = vld [vmem:[#allocation30_spill] sm:$0xff] }
 0x8ea   :  { %v3368_v55 = vsel %vm3367_vm13, %v5024_v57, %v3364_v49  ;;  %v3418_v27 = vsel %vm3415_vm14, %v3417_v22, %v3413_v44  ;;  %v3459_v57 = vsel %vm115_vm0, %v8445_v24, %v8444_v21  ;;  %v3466_v5 = vadd.f32 %v3463_v17, %v8397_v51 }
 0x8eb   :  { %4056 = vmatpush.msrb.mxu0 %v7774_v4  ;;  %v5028_v1 = vpop.eup %5027  ;;  %v3373_v37 = vsel %vm3370_vm15, %v3372_v16, %v3368_v55  ;;  %v3448_v20 = vsub.f32 1.0, %v3418_v27  ;;  %v3454_v31 = vmul.f32 %v3418_v27, %v7795_v28  ;;  %v3431_v4 = vand.u32 2147483648, %v7866_v6 }
 0x8ec   :  { %v3421_v36 = vmul.f32 %v5028_v1, %v7866_v6  ;;  %v3440_v61 = vmul.f32 %v3437_v32, %v3373_v37  ;;  %vm3426_vm1 = vweird.f32 %v5028_v1  ;;  %v3462_v52 = vmul.f32 %v3459_v57, %v8325_v38 }
 0x8ed   :  { %4057 = vmatpush.msrb.mxu0 %v7785_v13  ;;  %vm3427_vm3 = vmor %vm3425_vm2, %vm3426_vm1  ;;  %v3468_v19 = vmul.f32 %v3459_v57, %v8398_v58  ;;  %v3472_v0 = vadd.f32 %v3469_v45, %v8430_v42  ;;  %v7935_v53 = vsel %vm115_vm0, %v8448_v25, %v8447_v41 }
 0x8ee   :  { %v3422_v56 = vsub.f32 1.0, %v3421_v36  ;;  %v3443_v29 = vadd.f32 %v3440_v61, %v3227_v14  ;;  %v3464_v55 = vmul.f32 %v7935_v53, %v8325_v38  ;;  %v3470_v37 = vmul.f32 %v7935_v53, %v8398_v58 }
 0x8ef   :  { %v5030_v9 = vpop.eup %5029  ;;  %4058 = vmatpush.msrb.mxu0 %v7792_v18  ;;  %v3432_v18 = vor.u32 1.1754944e-38, %v3431_v4  ;;  %v3471_v10 = vadd.f32 %v3468_v19, %v8430_v42 }
 0x8f0   :  { %v3451_v60 = vmul.f32 %v5030_v9, %v3448_v20  ;;  %v3423_v7 = vmul.f32 %v5028_v1, %v3422_v56  ;;  %5031 = vtanh.f32 %v3443_v29  ;;  %v3467_v9 = vadd.f32 %v3464_v55, %v8397_v51 }
 0x8f1   :  { %4059 = vmatpush.msrb.mxu0 %v7797_v2  ;;  %v3473_v4 = vadd.f32 %v3470_v37, %v8430_v42 }
 0x8f2   :  { %v7897_v15 = vadd.f32 %v3454_v31, %v3451_v60  ;;  %v3424_v13 = vadd.f32 %v5028_v1, %v3423_v7 }
 0x8f3   :  { %4060 = vmatpush.msrb.mxu0 %v7806_v39 }
 0x8f4   :  { %4529 = vmatmul.msk.f32.gmra.mxu0 %vm311_vm9, %v7897_v15  ;;  %4532 = vmatmul.msk.f32.gmra.mxu1 %vm311_vm9, %v7897_v15  ;;  %v3428_v28 = vsel %vm3427_vm3, %v5028_v1, %v3424_v13 }
 0x8f5   :  { %4535 = vmatmul.msk.f32.gmra.mxu2 %vm311_vm9, %v7897_v15  ;;  %v3433_v2 = vsel %vm3430_vm4, %v3432_v18, %v3428_v28 }
 0x8f6   :  { %v5032_v35 = vpop.eup %5031  ;;  %v3449_v54 = vsub.f32 1.0, %v3433_v2  ;;  %v3455_v62 = vmul.f32 %v3433_v2, %v7810_v59  ;;  %v3465_v59 = vadd.f32 %v3462_v52, %v8397_v51 }
 0x8f8   :  { %v3452_v8 = vmul.f32 %v5032_v35, %v3449_v54  ;;  %v3474_v54 = vmul.f32 %v3459_v57, %v8329_v26 }
 0x8fa   :  { %v7908_v39 = vadd.f32 %v3455_v62, %v3452_v8  ;;  %v3477_v57 = vadd.f32 %v3474_v54, %v5486_v46 }
 0x8fc   :  { %4530 = vmatmul.msk.f32.gmra.mxu0 %vm311_vm9, %v7908_v39  ;;  %4533 = vmatmul.msk.f32.gmra.mxu1 %vm311_vm9, %v7908_v39 }
 0x8fd   :  { %4536 = vmatmul.msk.f32.gmra.mxu2 %vm311_vm9, %v7908_v39 }
 0x961   :  { %v3506_v34 = vpop.f32.mrf.mxu0  ;;  %v3532_v33 = vpop.f32.mrf.mxu1 }
 0x962   :  { %v3567_v3 = vadd.f32 %v3506_v34, %v3465_v59  ;;  %v3627_v43 = vadd.f32 %v3532_v33, %v3471_v10 }
 0x964   :  { %v4537_v23 = vmul.f32 -1.442695, %v3567_v3  ;;  %v4540_v6 = vmul.f32 -1.442695, %v3627_v43 }
 0x966   :  { %5033 = vpow2.f32 %v4537_v23 }
 0x967   :  { %5035 = vpow2.f32 %v4540_v6 }
 0x968   :  { %v3558_v29 = vpop.f32.mrf.mxu2 }
 0x969   :  { %v3687_v24 = vadd.f32 %v3558_v29, %v5496_v50 }
 0x96c   :  { %v5034_v40 = vpop.eup %5033 }
 0x96d   :  { %v5036_v30 = vpop.eup %5035  ;;  %v3579_v48 = vadd.f32 1.0, %v5034_v40 }
 0x96e   :  { %v7927_v63 = vadd.f32 1.0, %v5036_v30 }
 0x96f   :  { %5037 = vrcp.f32 %v3579_v48  ;;  %v3591_v60 = vand.u32 2147483647, %v3579_v48  ;;  %v3593_v31 = vand.u32 2147483648, %v3579_v48  ;;  %vm3587_vm6 = vweird.f32 %v3579_v48 }
 0x970   :  { %5039 = vrcp.f32 %v7927_v63  ;;  %v3653_v43 = vand.u32 2147483648, %v7927_v63  ;;  %vm3647_vm11 = vweird.f32 %v7927_v63  ;;  %v3651_v6 = vand.u32 2147483647, %v7927_v63 }
 0x971   :  { %v3509_v49 = vpop.f32.mrf.mxu0  ;;  %v3535_v44 = vpop.f32.mrf.mxu1  ;;  %vm3592_vm8 = vcmp.eq.f32.partialorder %v3591_v60, 8.507059e+37  ;;  %v3594_v21 = vor.u32 1.1754944e-38, %v3593_v31 }
 0x972   :  { %v3568_v22 = vadd.f32 %v3509_v49, %v3466_v5  ;;  %v3628_v16 = vadd.f32 %v3535_v44, %v3472_v0  ;;  %v3654_v45 = vor.u32 1.1754944e-38, %v3653_v43  ;;  %vm3652_vm13 = vcmp.eq.f32.partialorder %v3651_v6, 8.507059e+37 }
 0x974   :  { %v4538_v32 = vmul.f32 -1.442695, %v3568_v22  ;;  %v4541_v27 = vmul.f32 -1.442695, %v3628_v16 }
 0x975   :  { %v5038_v1 = vpop.eup %5037 }
 0x976   :  { %v5040_v14 = vpop.eup %5039  ;;  %v3583_v36 = vmul.f32 %v5038_v1, %v3579_v48  ;;  %5041 = vpow2.f32 %v4538_v32  ;;  %vm3588_vm5 = vweird.f32 %v5038_v1 }
 0x977   :  { %v3643_v61 = vmul.f32 %v5040_v14, %v7927_v63  ;;  %5043 = vpow2.f32 %v4541_v27  ;;  %vm3589_vm7 = vmor %vm3587_vm6, %vm3588_vm5  ;;  %vm3648_vm10 = vweird.f32 %v5040_v14 }
 0x978   :  { %v3584_v20 = vsub.f32 1.0, %v3583_v36  ;;  %vm3649_vm12 = vmor %vm3647_vm11, %vm3648_vm10 }
 0x979   :  { %v3644_v56 = vsub.f32 1.0, %v3643_v61  ;;  %v3512_v11 = vpop.f32.mrf.mxu0  ;;  %v3538_v13 = vpop.f32.mrf.mxu1 }
 0x97a   :  { %v3585_v7 = vmul.f32 %v5038_v1, %v3584_v20  ;;  %v3569_v28 = vadd.f32 %v3512_v11, %v3467_v9  ;;  %v3629_v2 = vadd.f32 %v3538_v13, %v3473_v4  ;;  %v3561_v20 = vpop.f32.mrf.mxu2  ;;  %v3475_v9 = vmul.f32 %v8446_v12, %v8329_v26 }
 0x97b   :  { %v3645_v18 = vmul.f32 %v5040_v14, %v3644_v56  ;;  %v3688_v4 = vadd.f32 %v3561_v20, %v5496_v50 }
 0x97c   :  { %v5042_v35 = vpop.eup %5041  ;;  %v3586_v8 = vadd.f32 %v5038_v1, %v3585_v7  ;;  %v4539_v10 = vmul.f32 -1.442695, %v3569_v28  ;;  %v4542_v3 = vmul.f32 -1.442695, %v3629_v2  ;;  %v3478_v12 = vadd.f32 %v3475_v9, %v5486_v46 }
 0x97d   :  { %v5044_v62 = vpop.eup %5043  ;;  %v3580_v52 = vadd.f32 1.0, %v5042_v35  ;;  %v3646_v34 = vadd.f32 %v5040_v14, %v3645_v18 }
 0x97e   :  { %v3590_v19 = vsel %vm3589_vm7, %v5038_v1, %v3586_v8  ;;  %v7946_v59 = vadd.f32 1.0, %v5044_v62 }
 0x97f   :  { %v3595_v33 = vsel %vm3592_vm8, %v3594_v21, %v3590_v19  ;;  %5045 = vrcp.f32 %v3580_v52  ;;  %v3650_v17 = vsel %vm3649_vm12, %v5040_v14, %v3646_v34  ;;  %v3608_v63 = vand.u32 2147483648, %v3580_v52 }
 0x980   :  { %v3690_v23 = vmul.f32 %v3687_v24, %v3595_v33  ;;  %5047 = vrcp.f32 %v7946_v59  ;;  %v3655_v5 = vsel %vm3652_vm13, %v3654_v45, %v3650_v17  ;;  %v3606_v1 = vand.u32 2147483647, %v3580_v52 }
 0x981   :  { %5049 = vpow2.f32 %v4539_v10  ;;  %v3699_v22 = vsub.f32 1.0, %v3655_v5  ;;  %v3705_v36 = vmul.f32 %v3655_v5, %v7861_v47  ;;  %vm3602_vm15 = vweird.f32 %v3580_v52 }
 0x982   :  { %v3693_v40 = vadd.f32 %v3690_v23, %v3477_v57  ;;  %5051 = vpow2.f32 %v4542_v3  ;;  %v3609_v60 = vor.u32 1.1754944e-38, %v3608_v63  ;;  %vm3607_vm2 = vcmp.eq.f32.partialorder %v3606_v1, 8.507059e+37  ;;  %v3564_v57 = vpop.f32.mrf.mxu2 }
 0x983   :  { %v3668_v13 = vand.u32 2147483648, %v7946_v59  ;;  %vm3662_vm4 = vweird.f32 %v7946_v59  ;;  %v3666_v28 = vand.u32 2147483647, %v7946_v59  ;;  %v3689_v45 = vadd.f32 %v3564_v57, %v5496_v50 }
 0x984   :  { %5053 = vtanh.f32 %v3693_v40 }
 0x985   :  { %v5046_v30 = vpop.eup %5045  ;;  %v3669_v24 = vor.u32 1.1754944e-38, %v3668_v13  ;;  %vm3667_vm6 = vcmp.eq.f32.partialorder %v3666_v28, 8.507059e+37 }
 0x986   :  { %v5048_v48 = vpop.eup %5047  ;;  %v3598_v0 = vmul.f32 %v5046_v30, %v3580_v52  ;;  %vm3603_vm14 = vweird.f32 %v5046_v30 }
 0x987   :  { %v3658_v41 = vmul.f32 %v5048_v48, %v7946_v59  ;;  %v5050_v25 = vpop.eup %5049  ;;  %vm3604_vm1 = vmor %vm3602_vm15, %vm3603_vm14  ;;  %vm3663_vm3 = vweird.f32 %v5048_v48  ;;  %v3476_v59 = vmul.f32 %v7935_v53, %v8329_v26 }
 0x988   :  { %v3599_v49 = vsub.f32 1.0, %v3598_v0  ;;  %v5052_v44 = vpop.eup %5051  ;;  %v3581_v55 = vadd.f32 1.0, %v5050_v25  ;;  %vm3664_vm5 = vmor %vm3662_vm4, %vm3663_vm3 }
 0x989   :  { %v3659_v16 = vsub.f32 1.0, %v3658_v41  ;;  %v7954_v37 = vadd.f32 1.0, %v5052_v44  ;;  %v3479_v41 = vadd.f32 %v3476_v59, %v5486_v46 }
 0x98a   :  { %v5054_v32 = vpop.eup %5053  ;;  %v3600_v27 = vmul.f32 %v5046_v30, %v3599_v49  ;;  %5055 = vrcp.f32 %v3581_v55  ;;  %v3623_v19 = vand.u32 2147483648, %v3581_v55  ;;  %v3621_v34 = vand.u32 2147483647, %v3581_v55 }
 0x98b   :  { %v3702_v14 = vmul.f32 %v5054_v32, %v3699_v22  ;;  %v3660_v61 = vmul.f32 %v5048_v48, %v3659_v16  ;;  %5057 = vrcp.f32 %v7954_v37  ;;  %vm3617_vm8 = vweird.f32 %v3581_v55 }
 0x98c   :  { %v3601_v56 = vadd.f32 %v5046_v30, %v3600_v27  ;;  %v3624_v23 = vor.u32 1.1754944e-38, %v3623_v19  ;;  %vm3622_vm11 = vcmp.eq.f32.partialorder %v3621_v34, 8.507059e+37  ;;  %v3683_v53 = vand.u32 2147483648, %v7954_v37  ;;  %v8453_v19 = vld [vmem:[#allocation25_spill] sm:$0xff] }
 0x98d   :  { %v7960_v29 = vadd.f32 %v3705_v36, %v3702_v14  ;;  %v3661_v47 = vadd.f32 %v5048_v48, %v3660_v61  ;;  %vm3677_vm13 = vweird.f32 %v7954_v37  ;;  %v3681_v44 = vand.u32 2147483647, %v7954_v37  ;;  %v8449_v14 = vld [vmem:[#allocation22_spill] sm:$0xff] }
 0x98e   :  { %v3605_v31 = vsel %vm3604_vm1, %v5046_v30, %v3601_v56  ;;  %v3684_v16 = vor.u32 1.1754944e-38, %v3683_v53  ;;  %v3720_v36 = vmul.f32 %v8449_v14, %v8398_v58 }
 0x98f   :  { %v3610_v7 = vsel %vm3607_vm2, %v3609_v60, %v3605_v31  ;;  %4543 = vmatmul.msk.f32.vlgmr.msrb.gmra.mxu3 %vm311_vm9, %v7960_v29  ;;  %4546 = vmatmul.msk.f32.vlgmr.msra.gmra.mxu0 %vm311_vm9, %v7960_v29  ;;  %v3665_v62 = vsel %vm3664_vm5, %v5048_v48, %v3661_v47  ;;  %vm3682_vm15 = vcmp.eq.f32.partialorder %v3681_v44, 8.507059e+37  ;;  %v8451_v47 = vld [vmem:[#allocation23_spill] sm:$0xff] }
 0x990   :  { %v3691_v11 = vmul.f32 %v3688_v4, %v3610_v7  ;;  %4549 = vmatmul.msk.f32.vlgmr.msra.gmra.mxu1 %vm311_vm9, %v7960_v29  ;;  %v5056_v18 = vpop.eup %5055  ;;  %v3670_v33 = vsel %vm3667_vm6, %v3669_v24, %v3665_v62  ;;  %v3723_v61 = vadd.f32 %v3720_v36, %v8430_v42  ;;  %v8450_v7 = vld [vmem:[#allocation26_spill] sm:$0xff] }
 0x991   :  { %v5058_v2 = vpop.eup %5057  ;;  %v3613_v54 = vmul.f32 %v5056_v18, %v3581_v55  ;;  %vm3618_vm7 = vweird.f32 %v5056_v18  ;;  %v3700_v6 = vsub.f32 1.0, %v3670_v33  ;;  %v3706_v30 = vmul.f32 %v3670_v33, %v7897_v15 }
 0x992   :  { %v3694_v35 = vadd.f32 %v3691_v11, %v3478_v12  ;;  %v3673_v8 = vmul.f32 %v5058_v2, %v7954_v37  ;;  %vm3619_vm10 = vmor %vm3617_vm8, %vm3618_vm7  ;;  %vm3678_vm12 = vweird.f32 %v5058_v2  ;;  %v8008_v12 = vsel %vm115_vm0, %v8451_v47, %v8450_v7 }
 0x993   :  { %v3614_v21 = vsub.f32 1.0, %v3613_v54  ;;  %vm3679_vm14 = vmor %vm3677_vm13, %vm3678_vm12 }
 0x994   :  { %5059 = vtanh.f32 %v3694_v35  ;;  %v3674_v52 = vsub.f32 1.0, %v3673_v8  ;;  %v3715_v8 = vmul.f32 %v8008_v12, %v8325_v38 }
 0x995   :  { %v3615_v10 = vmul.f32 %v5056_v18, %v3614_v21 }
 0x996   :  { %v3675_v3 = vmul.f32 %v5058_v2, %v3674_v52  ;;  %v8452_v52 = vld [vmem:[#allocation24_spill] sm:$0xff]  ;;  %v3718_v34 = vadd.f32 %v3715_v8, %v8397_v51 }
 0x997   :  { %v3616_v43 = vadd.f32 %v5056_v18, %v3615_v10  ;;  %v8021_v10 = vsel %vm115_vm0, %v8453_v19, %v8452_v52 }
 0x998   :  { %v3676_v0 = vadd.f32 %v5058_v2, %v3675_v3  ;;  %v3722_v57 = vmul.f32 %v8021_v10, %v8398_v58 }
 0x999   :  { %v3620_v17 = vsel %vm3619_vm10, %v5056_v18, %v3616_v43  ;;  %v3721_v18 = vmul.f32 %v8008_v12, %v8398_v58 }
 0x99a   :  { %v5060_v40 = vpop.eup %5059  ;;  %v3625_v48 = vsel %vm3622_vm11, %v3624_v23, %v3620_v17  ;;  %v3680_v15 = vsel %vm3679_vm14, %v5058_v2, %v3676_v0 }
 0x99b   :  { %v3703_v5 = vmul.f32 %v5060_v40, %v3700_v6  ;;  %v3692_v25 = vmul.f32 %v3689_v45, %v3625_v48  ;;  %v3685_v63 = vsel %vm3682_vm15, %v3684_v16, %v3680_v15  ;;  %v3724_v2 = vadd.f32 %v3721_v18, %v8430_v42 }
 0x99c   :  { %v3701_v55 = vsub.f32 1.0, %v3685_v63  ;;  %v3707_v1 = vmul.f32 %v3685_v63, %v7908_v39  ;;  %v3714_v39 = vmul.f32 %v8449_v14, %v8325_v38  ;;  %v3725_v45 = vadd.f32 %v3722_v57, %v8430_v42 }
 0x99d   :  { %v7981_v49 = vadd.f32 %v3706_v30, %v3703_v5  ;;  %v3695_v22 = vadd.f32 %v3692_v25, %v3479_v41  ;;  %v3716_v30 = vmul.f32 %v8021_v10, %v8325_v38  ;;  %v3726_v16 = vmul.f32 %v8449_v14, %v8329_v26 }
 0x99e   :  { %v3717_v60 = vadd.f32 %v3714_v39, %v8397_v51 }
 0x99f   :  { %4544 = vmatmul.msk.f32.gmra.mxu3 %vm311_vm9, %v7981_v49  ;;  %4547 = vmatmul.msk.f32.gmra.mxu0 %vm311_vm9, %v7981_v49  ;;  %5061 = vtanh.f32 %v3695_v22  ;;  %v3729_v14 = vadd.f32 %v3726_v16, %v5486_v46 }
 0x9a0   :  { %4550 = vmatmul.msk.f32.gmra.mxu1 %vm311_vm9, %v7981_v49 }
 0x9a5   :  { %v5062_v32 = vpop.eup %5061 }
 0x9a6   :  { %v3704_v27 = vmul.f32 %v5062_v32, %v3701_v55  ;;  %v3719_v55 = vadd.f32 %v3716_v30, %v8397_v51 }
 0x9a8   :  { %v7991_v37 = vadd.f32 %v3707_v1, %v3704_v27 }
 0x9aa   :  { %4545 = vmatmul.msk.f32.gmra.mxu3 %vm311_vm9, %v7991_v37  ;;  %4548 = vmatmul.msk.f32.gmra.mxu0 %vm311_vm9, %v7991_v37 }
 0x9ab   :  { %4551 = vmatmul.msk.f32.gmra.mxu1 %vm311_vm9, %v7991_v37 }
 0xa0c   :  { %v3784_v20 = vpop.f32.mrf.mxu0 }
 0xa0d   :  { %v3879_v9 = vadd.f32 %v3784_v20, %v3723_v61  ;;  %v3810_v63 = vpop.f32.mrf.mxu1 }
 0xa0e   :  { %v3939_v39 = vadd.f32 %v3810_v63, %v5496_v50 }
 0xa0f   :  { %v4555_v56 = vmul.f32 -1.442695, %v3879_v9 }
 0xa11   :  { %5063 = vpow2.f32 %v4555_v56 }
 0xa12   :  { %v3758_v31 = vpop.f32.mrf.mxu3 }
 0xa13   :  { %v3819_v4 = vadd.f32 %v3758_v31, %v3717_v60 }
 0xa15   :  { %v4552_v11 = vmul.f32 -1.442695, %v3819_v4 }
 0xa17   :  { %v5064_v13 = vpop.eup %5063  ;;  %5065 = vpow2.f32 %v4552_v11 }
 0xa18   :  { %v8012_v28 = vadd.f32 1.0, %v5064_v13 }
 0xa1a   :  { %5067 = vrcp.f32 %v8012_v28  ;;  %v3905_v11 = vand.u32 2147483648, %v8012_v28  ;;  %vm3899_vm6 = vweird.f32 %v8012_v28  ;;  %v3903_v18 = vand.u32 2147483647, %v8012_v28 }
 0xa1c   :  { %v3787_v35 = vpop.f32.mrf.mxu0  ;;  %vm3904_vm8 = vcmp.eq.f32.partialorder %v3903_v18, 8.507059e+37 }
 0xa1d   :  { %v5066_v54 = vpop.eup %5065  ;;  %v3880_v62 = vadd.f32 %v3787_v35, %v3724_v2 }
 0xa1e   :  { %v3831_v21 = vadd.f32 1.0, %v5066_v54 }
 0xa1f   :  { %v4556_v24 = vmul.f32 -1.442695, %v3880_v62 }
 0xa20   :  { %5069 = vrcp.f32 %v3831_v21  ;;  %v8024_v33 = vpop.eup %5067  ;;  %v3843_v53 = vand.u32 2147483647, %v3831_v21  ;;  %v3845_v44 = vand.u32 2147483648, %v3831_v21  ;;  %vm3839_vm2 = vweird.f32 %v3831_v21 }
 0xa21   :  { %5071 = vpow2.f32 %v4556_v24  ;;  %v3895_v43 = vmul.f32 %v8024_v33, %v8012_v28  ;;  %vm3900_vm5 = vweird.f32 %v8024_v33 }
 0xa22   :  { %v3761_v3 = vpop.f32.mrf.mxu3  ;;  %v3846_v36 = vor.u32 1.1754944e-38, %v3845_v44  ;;  %vm3844_vm4 = vcmp.eq.f32.partialorder %v3843_v53, 8.507059e+37  ;;  %vm3901_vm7 = vmor %vm3899_vm6, %vm3900_vm5 }
 0xa23   :  { %v3820_v59 = vadd.f32 %v3761_v3, %v3718_v34  ;;  %v3896_v0 = vsub.f32 1.0, %v3895_v43 }
 0xa25   :  { %v4553_v23 = vmul.f32 -1.442695, %v3820_v59  ;;  %v3897_v27 = vmul.f32 %v8024_v33, %v3896_v0 }
 0xa26   :  { %v5070_v6 = vpop.eup %5069 }
 0xa27   :  { %v5072_v40 = vpop.eup %5071  ;;  %v3835_v17 = vmul.f32 %v5070_v6, %v3831_v21  ;;  %5073 = vpow2.f32 %v4553_v23  ;;  %v3790_v5 = vpop.f32.mrf.mxu0  ;;  %vm3840_vm1 = vweird.f32 %v5070_v6  ;;  %v3898_v4 = vadd.f32 %v8024_v33, %v3897_v27 }
 0xa28   :  { %v8033_v48 = vadd.f32 1.0, %v5072_v40  ;;  %v3881_v25 = vadd.f32 %v3790_v5, %v3725_v45  ;;  %vm3841_vm3 = vmor %vm3839_vm2, %vm3840_vm1  ;;  %v3906_v21 = vor.u32 1.1754944e-38, %v3905_v11 }
 0xa29   :  { %v3836_v41 = vsub.f32 1.0, %v3835_v17  ;;  %v3902_v8 = vsel %vm3901_vm7, %v8024_v33, %v3898_v4  ;;  %v3727_v33 = vmul.f32 %v8008_v12, %v8329_v26  ;;  %v3813_v17 = vpop.f32.mrf.mxu1 }
 0xa2a   :  { %5075 = vrcp.f32 %v8033_v48  ;;  %v4557_v15 = vmul.f32 -1.442695, %v3881_v25  ;;  %v3907_v52 = vsel %vm3904_vm8, %v3906_v21, %v3902_v8  ;;  %v3940_v25 = vadd.f32 %v3813_v17, %v5496_v50 }
 0xa2b   :  { %v3837_v22 = vmul.f32 %v5070_v6, %v3836_v41  ;;  %v3951_v43 = vsub.f32 1.0, %v3907_v52  ;;  %v3957_v0 = vmul.f32 %v3907_v52, %v7960_v29  ;;  %v3730_v16 = vadd.f32 %v3727_v33, %v5486_v46  ;;  %v8454_v33 = vld [vmem:[#allocation18_spill] sm:$0xff] }
 0xa2c   :  { %5077 = vpow2.f32 %v4557_v15  ;;  %v3920_v29 = vand.u32 2147483648, %v8033_v48  ;;  %vm3914_vm15 = vweird.f32 %v8033_v48 }
 0xa2d   :  { %v5074_v32 = vpop.eup %5073  ;;  %v3838_v1 = vadd.f32 %v5070_v6, %v3837_v22  ;;  %v3764_v20 = vpop.f32.mrf.mxu3 }
 0xa2e   :  { %v3832_v61 = vadd.f32 1.0, %v5074_v32  ;;  %v3821_v56 = vadd.f32 %v3764_v20, %v3719_v55  ;;  %v3918_v32 = vand.u32 2147483647, %v8033_v48 }
 0xa2f   :  { %v3842_v9 = vsel %vm3841_vm3, %v5070_v6, %v3838_v1 }
 0xa30   :  { %v3847_v60 = vsel %vm3844_vm4, %v3846_v36, %v3842_v9  ;;  %5079 = vrcp.f32 %v3832_v61  ;;  %v8042_v31 = vpop.eup %5075  ;;  %v4554_v47 = vmul.f32 -1.442695, %v3821_v56  ;;  %v3860_v3 = vand.u32 2147483648, %v3832_v61 }
 0xa31   :  { %v3942_v7 = vmul.f32 %v3939_v39, %v3847_v60  ;;  %v3910_v35 = vmul.f32 %v8042_v31, %v8033_v48  ;;  %v3858_v6 = vand.u32 2147483647, %v3832_v61  ;;  %vm3854_vm11 = vweird.f32 %v3832_v61 }
 0xa32   :  { %v5078_v13 = vpop.eup %5077  ;;  %5081 = vpow2.f32 %v4554_v47  ;;  %v3861_v41 = vor.u32 1.1754944e-38, %v3860_v3  ;;  %vm3915_vm14 = vweird.f32 %v8042_v31  ;;  %v3921_v39 = vor.u32 1.1754944e-38, %v3920_v29 }
 0xa33   :  { %v3945_v2 = vadd.f32 %v3942_v7, %v3729_v14  ;;  %v8051_v54 = vadd.f32 1.0, %v5078_v13  ;;  %v3911_v19 = vsub.f32 1.0, %v3910_v35  ;;  %vm3859_vm13 = vcmp.eq.f32.partialorder %v3858_v6, 8.507059e+37  ;;  %vm3916_vm1 = vmor %vm3914_vm15, %vm3915_vm14  ;;  %v3816_v7 = vpop.f32.mrf.mxu1 }
 0xa34   :  { %vm3919_vm2 = vcmp.eq.f32.partialorder %v3918_v32, 8.507059e+37  ;;  %v3728_v48 = vmul.f32 %v8021_v10, %v8329_v26  ;;  %v3941_v18 = vadd.f32 %v3816_v7, %v5496_v50  ;;  %v8458_v7 = vld [vmem:[#allocation11_spill] sm:$0xff] }
 0xa35   :  { %5083 = vtanh.f32 %v3945_v2  ;;  %v3912_v40 = vmul.f32 %v8042_v31, %v3911_v19  ;;  %vm3929_vm8 = vweird.f32 %v8051_v54 }
 0xa36   :  { %v5080_v62 = vpop.eup %5079  ;;  %5085 = vrcp.f32 %v8051_v54  ;;  %v3731_v10 = vadd.f32 %v3728_v48, %v5486_v46  ;;  %v8459_v48 = vld [vmem:[#allocation16_spill] sm:$0xff] }
 0xa37   :  { %v3850_v24 = vmul.f32 %v5080_v62, %v3832_v61  ;;  %vm3855_vm10 = vweird.f32 %v5080_v62  ;;  %v3913_v15 = vadd.f32 %v8042_v31, %v3912_v40  ;;  %v8455_v40 = vld [vmem:[#allocation21_spill] sm:$0xff] }
 0xa38   :  { %v5082_v28 = vpop.eup %5081  ;;  %vm3856_vm12 = vmor %vm3854_vm11, %vm3855_vm10  ;;  %v3963_v17 = vsel %vm115_vm0, %v8455_v40, %v8454_v33 }
 0xa39   :  { %v3851_v34 = vsub.f32 1.0, %v3850_v24  ;;  %v3833_v57 = vadd.f32 1.0, %v5082_v28  ;;  %v3917_v61 = vsel %vm3916_vm1, %v8042_v31, %v3913_v15  ;;  %v3935_v24 = vand.u32 2147483648, %v8051_v54  ;;  %v8456_v15 = vld [vmem:[#allocation17_spill] sm:$0xff] }
 0xa3a   :  { %v3922_v60 = vsel %vm3919_vm2, %v3921_v39, %v3917_v61  ;;  %v3933_v28 = vand.u32 2147483647, %v8051_v54 }
 0xa3b   :  { %v5084_v59 = vpop.eup %5083  ;;  %v3852_v23 = vmul.f32 %v5080_v62, %v3851_v34  ;;  %5087 = vrcp.f32 %v3833_v57  ;;  %v3875_v9 = vand.u32 2147483648, %v3833_v57  ;;  %v3873_v14 = vand.u32 2147483647, %v3833_v57 }
 0xa3c   :  { %v8058_v45 = vpop.eup %5085  ;;  %v3954_v5 = vmul.f32 %v5084_v59, %v3951_v43  ;;  %vm3869_vm4 = vweird.f32 %v3833_v57  ;;  %v3952_v31 = vsub.f32 1.0, %v3922_v60  ;;  %v3958_v35 = vmul.f32 %v3922_v60, %v7981_v49 }
 0xa3d   :  { %v3853_v30 = vadd.f32 %v5080_v62, %v3852_v23  ;;  %v3925_v22 = vmul.f32 %v8058_v45, %v8051_v54  ;;  %v3876_v11 = vor.u32 1.1754944e-38, %v3875_v9  ;;  %vm3874_vm6 = vcmp.eq.f32.partialorder %v3873_v14, 8.507059e+37 }
 0xa3e   :  { %v8062_v44 = vadd.f32 %v3957_v0, %v3954_v5  ;;  %vm3930_vm7 = vweird.f32 %v8058_v45  ;;  %v3936_v3 = vor.u32 1.1754944e-38, %v3935_v24  ;;  %vm3934_vm11 = vcmp.eq.f32.partialorder %v3933_v28, 8.507059e+37 }
 0xa3f   :  { %v3857_v53 = vsel %vm3856_vm12, %v5080_v62, %v3853_v30  ;;  %v3926_v36 = vsub.f32 1.0, %v3925_v22  ;;  %vm3931_vm10 = vmor %vm3929_vm8, %vm3930_vm7  ;;  %v3972_v30 = vmul.f32 %v3963_v17, %v8398_v58 }
 0xa40   :  { %v3862_v12 = vsel %vm3859_vm13, %v3861_v41, %v3857_v53  ;;  %4558 = vmatmul.msk.f32.vlgmr.msrb.gmra.mxu2 %vm311_vm9, %v8062_v44  ;;  %4561 = vmatmul.msk.f32.vlgmr.msra.gmra.mxu3 %vm311_vm9, %v8062_v44 }
 0xa41   :  { %v3943_v63 = vmul.f32 %v3940_v25, %v3862_v12  ;;  %v5088_v55 = vpop.eup %5087  ;;  %4564 = vmatmul.msk.f32.vlgmr.msrb.gmra.mxu0 %vm311_vm9, %v8062_v44  ;;  %v3927_v4 = vmul.f32 %v8058_v45, %v3926_v36  ;;  %v3975_v5 = vadd.f32 %v3972_v30, %v8430_v42 }
 0xa42   :  { %v3865_v27 = vmul.f32 %v5088_v55, %v3833_v57  ;;  %vm3870_vm3 = vweird.f32 %v5088_v55 }
 0xa43   :  { %v3946_v1 = vadd.f32 %v3943_v63, %v3730_v16  ;;  %vm3871_vm5 = vmor %vm3869_vm4, %vm3870_vm3  ;;  %v3928_v21 = vadd.f32 %v8058_v45, %v3927_v4  ;;  %v8457_v16 = vld [vmem:[#allocation20_spill] sm:$0xff] }
 0xa44   :  { %v3866_v20 = vsub.f32 1.0, %v3865_v27  ;;  %v8118_v29 = vsel %vm115_vm0, %v8457_v16, %v8456_v15 }
 0xa45   :  { %5089 = vtanh.f32 %v3946_v1  ;;  %v3932_v49 = vsel %vm3931_vm10, %v8058_v45, %v3928_v21  ;;  %v3966_v45 = vmul.f32 %v3963_v17, %v8325_v38  ;;  %v3967_v63 = vmul.f32 %v8118_v29, %v8325_v38 }
 0xa46   :  { %v3867_v56 = vmul.f32 %v5088_v55, %v3866_v20  ;;  %v3937_v57 = vsel %vm3934_vm11, %v3936_v3, %v3932_v49 }
 0xa47   :  { %v3953_v59 = vsub.f32 1.0, %v3937_v57  ;;  %v3959_v23 = vmul.f32 %v3937_v57, %v7991_v37  ;;  %v3969_v37 = vadd.f32 %v3966_v45, %v8397_v51  ;;  %v3970_v61 = vadd.f32 %v3967_v63, %v8397_v51 }
 0xa48   :  { %v3868_v47 = vadd.f32 %v5088_v55, %v3867_v56 }
 0xa4a   :  { %v3872_v2 = vsel %vm3871_vm5, %v5088_v55, %v3868_v47  ;;  %v3973_v55 = vmul.f32 %v8118_v29, %v8398_v58  ;;  %v8132_v47 = vsel %vm115_vm0, %v8459_v48, %v8458_v7 }
 0xa4b   :  { %v5090_v13 = vpop.eup %5089  ;;  %v3877_v8 = vsel %vm3874_vm6, %v3876_v11, %v3872_v2  ;;  %v3974_v2 = vmul.f32 %v8132_v47, %v8398_v58 }
 0xa4c   :  { %v3955_v62 = vmul.f32 %v5090_v13, %v3952_v31  ;;  %v3944_v52 = vmul.f32 %v3941_v18, %v3877_v8  ;;  %v3976_v20 = vadd.f32 %v3973_v55, %v8430_v42  ;;  %v3968_v18 = vmul.f32 %v8132_v47, %v8325_v38 }
 0xa4d   :  { %v3977_v38 = vadd.f32 %v3974_v2, %v8430_v42  ;;  %v3979_v2 = vmul.f32 %v8118_v29, %v8329_v26 }
 0xa4e   :  { %v8089_v19 = vadd.f32 %v3958_v35, %v3955_v62  ;;  %v3947_v34 = vadd.f32 %v3944_v52, %v3731_v10  ;;  %v3971_v3 = vadd.f32 %v3968_v18, %v8397_v51 }
 0xa50   :  { %4559 = vmatmul.msk.f32.gmra.mxu2 %vm311_vm9, %v8089_v19  ;;  %4562 = vmatmul.msk.f32.gmra.mxu3 %vm311_vm9, %v8089_v19  ;;  %5091 = vtanh.f32 %v3947_v34  ;;  %v3978_v34 = vmul.f32 %v3963_v17, %v8329_v26 }
 0xa51   :  { %4565 = vmatmul.msk.f32.gmra.mxu0 %vm311_vm9, %v8089_v19 }
 0xa56   :  { %v5092_v43 = vpop.eup %5091 }
 0xa57   :  { %v3956_v54 = vmul.f32 %v5092_v43, %v3953_v59 }
 0xa59   :  { %v8100_v6 = vadd.f32 %v3959_v23, %v3956_v54 }
 0xa5b   :  { %4560 = vmatmul.msk.f32.gmra.mxu2 %vm311_vm9, %v8100_v6  ;;  %4563 = vmatmul.msk.f32.gmra.mxu3 %vm311_vm9, %v8100_v6 }
 0xa5c   :  { %4566 = vmatmul.msk.f32.gmra.mxu0 %vm311_vm9, %v8100_v6 }
 0xabe   :  { %v4062_v62 = vpop.f32.mrf.mxu0 }
 0xabf   :  { %v4191_v58 = vadd.f32 %v4062_v62, %v5496_v50  ;;  %v4215_v62 = vld [vmem:[#allocation5] sm:$0xff] }
 0xac3   :  { %v4010_v0 = vpop.f32.mrf.mxu2  ;;  %v4036_v41 = vpop.f32.mrf.mxu3 }
 0xac4   :  { %v4071_v25 = vadd.f32 %v4010_v0, %v3969_v37  ;;  %v4131_v53 = vadd.f32 %v4036_v41, %v3975_v5  ;;  %v3981_v5 = vadd.f32 %v3978_v34, %v5486_v46 }
 0xac6   :  { %v4567_v12 = vmul.f32 -1.442695, %v4071_v25  ;;  %v4570_v22 = vmul.f32 -1.442695, %v4131_v53 }
 0xac8   :  { %5093 = vpow2.f32 %v4567_v12 }
 0xac9   :  { %5095 = vpow2.f32 %v4570_v22 }
 0xace   :  { %v5094_v32 = vpop.eup %5093  ;;  %v4065_v48 = vpop.f32.mrf.mxu0 }
 0xacf   :  { %v5096_v27 = vpop.eup %5095  ;;  %v4083_v1 = vadd.f32 1.0, %v5094_v32 }
 0xad0   :  { %v8124_v36 = vadd.f32 1.0, %v5096_v27 }
 0xad1   :  { %5097 = vrcp.f32 %v4083_v1  ;;  %v4097_v21 = vand.u32 2147483648, %v4083_v1  ;;  %v4095_v52 = vand.u32 2147483647, %v4083_v1  ;;  %vm4091_vm12 = vweird.f32 %v4083_v1 }
 0xad2   :  { %5099 = vrcp.f32 %v8124_v36  ;;  %v4157_v41 = vand.u32 2147483648, %v8124_v36  ;;  %vm4151_vm1 = vweird.f32 %v8124_v36  ;;  %v4155_v53 = vand.u32 2147483647, %v8124_v36 }
 0xad3   :  { %v4013_v39 = vpop.f32.mrf.mxu2  ;;  %v4039_v9 = vpop.f32.mrf.mxu3  ;;  %v4098_v33 = vor.u32 1.1754944e-38, %v4097_v21  ;;  %vm4096_vm14 = vcmp.eq.f32.partialorder %v4095_v52, 8.507059e+37  ;;  %v4192_v21 = vadd.f32 %v4065_v48, %v5496_v50 }
 0xad4   :  { %v4072_v56 = vadd.f32 %v4013_v39, %v3970_v61  ;;  %v4132_v14 = vadd.f32 %v4039_v9, %v3976_v20  ;;  %v4158_v16 = vor.u32 1.1754944e-38, %v4157_v41  ;;  %vm4156_vm3 = vcmp.eq.f32.partialorder %v4155_v53, 8.507059e+37 }
 0xad6   :  { %v4568_v60 = vmul.f32 -1.442695, %v4072_v56  ;;  %v4571_v4 = vmul.f32 -1.442695, %v4132_v14 }
 0xad7   :  { %v5098_v11 = vpop.eup %5097 }
 0xad8   :  { %5101 = vpow2.f32 %v4568_v60  ;;  %v5100_v31 = vpop.eup %5099  ;;  %v4087_v13 = vmul.f32 %v5098_v11, %v4083_v1  ;;  %vm4092_vm0 = vweird.f32 %v5098_v11 }
 0xad9   :  { %5103 = vpow2.f32 %v4571_v4  ;;  %v4147_v35 = vmul.f32 %v5100_v31, %v8124_v36  ;;  %vm4093_vm13 = vmor %vm4091_vm12, %vm4092_vm0  ;;  %vm4152_vm15 = vweird.f32 %v5100_v31  ;;  %v4068_v41 = vpop.f32.mrf.mxu0 }
 0xada   :  { %v4088_v8 = vsub.f32 1.0, %v4087_v13  ;;  %vm4153_vm2 = vmor %vm4151_vm1, %vm4152_vm15 }
 0xadb   :  { %v4148_v10 = vsub.f32 1.0, %v4147_v35 }
 0xadc   :  { %v4089_v24 = vmul.f32 %v5098_v11, %v4088_v8  ;;  %v4218_v8 = vld [vmem:[#allocation5 + $0x18] sm:$0xff] }
 0xadd   :  { %v4149_v49 = vmul.f32 %v5100_v31, %v4148_v10 }
 0xade   :  { %v5102_v28 = vpop.eup %5101  ;;  %v4090_v59 = vadd.f32 %v5098_v11, %v4089_v24  ;;  %v4016_v54 = vpop.f32.mrf.mxu2 }
 0xadf   :  { %v5104_v57 = vpop.eup %5103  ;;  %v8143_v43 = vadd.f32 1.0, %v5102_v28  ;;  %v4042_v23 = vpop.f32.mrf.mxu3  ;;  %v4073_v45 = vadd.f32 %v4016_v54, %v3971_v3  ;;  %v4150_v37 = vadd.f32 %v5100_v31, %v4149_v49  ;;  %v3982_v3 = vadd.f32 %v3979_v2, %v5486_v46 }
 0xae0   :  { %v8145_v40 = vadd.f32 1.0, %v5104_v57  ;;  %v4133_v17 = vadd.f32 %v4042_v23, %v3977_v38  ;;  %v4094_v30 = vsel %vm4093_vm13, %v5098_v11, %v4090_v59 }
 0xae1   :  { %5105 = vrcp.f32 %v8143_v43  ;;  %v4099_v51 = vsel %vm4096_vm14, %v4098_v33, %v4094_v30  ;;  %v4569_v42 = vmul.f32 -1.442695, %v4073_v45  ;;  %v4154_v22 = vsel %vm4153_vm2, %v5100_v31, %v4150_v37 }
 0xae2   :  { %5107 = vrcp.f32 %v8145_v40  ;;  %v4572_v0 = vmul.f32 -1.442695, %v4133_v17  ;;  %v4194_v25 = vmul.f32 %v4191_v58, %v4099_v51  ;;  %v4159_v27 = vsel %vm4156_vm3, %v4158_v16, %v4154_v22 }
 0xae3   :  { %5109 = vpow2.f32 %v4569_v42  ;;  %v4110_v36 = vand.u32 2147483647, %v8143_v43  ;;  %v4112_v39 = vand.u32 2147483648, %v8143_v43  ;;  %v4203_v4 = vsub.f32 1.0, %v4159_v27 }
 0xae4   :  { %5111 = vpow2.f32 %v4572_v0  ;;  %v4197_v12 = vadd.f32 %v4194_v25, %v3981_v5  ;;  %vm4106_vm5 = vweird.f32 %v8143_v43  ;;  %v4209_v11 = vmul.f32 %v4159_v27, %v8062_v44 }
 0xae5   :  { %v4113_v35 = vor.u32 1.1754944e-38, %v4112_v39  ;;  %vm4111_vm7 = vcmp.eq.f32.partialorder %v4110_v36, 8.507059e+37  ;;  %vm4166_vm10 = vweird.f32 %v8145_v40  ;;  %v4172_v38 = vand.u32 2147483648, %v8145_v40  ;;  %v4219_v36 = vld [vmem:[#allocation5 + $0x20] sm:$0xff]  ;;  %v4216_v39 = vld [vmem:[#allocation5 + $0x8] sm:$0xff] }
 0xae6   :  { %5113 = vtanh.f32 %v4197_v12  ;;  %v4170_v54 = vand.u32 2147483647, %v8145_v40  ;;  %v3980_v0 = vmul.f32 %v8132_v47, %v8329_v26 }
 0xae7   :  { %v5106_v15 = vpop.eup %5105 }
 0xae8   :  { %v8153_v63 = vpop.eup %5107  ;;  %v4102_v55 = vmul.f32 %v5106_v15, %v8143_v43  ;;  %vm4107_vm4 = vweird.f32 %v5106_v15  ;;  %vm4171_vm12 = vcmp.eq.f32.partialorder %v4170_v54, 8.507059e+37 }
 0xae9   :  { %v4162_v32 = vmul.f32 %v8153_v63, %v8145_v40  ;;  %v5110_v1 = vpop.eup %5109  ;;  %vm4108_vm6 = vmor %vm4106_vm5, %vm4107_vm4  ;;  %vm4167_vm8 = vweird.f32 %v8153_v63  ;;  %v4173_v40 = vor.u32 1.1754944e-38, %v4172_v38  ;;  %vm4276_vm5 = vcmask 130112  }
 0xaea   :  { %v4103_v61 = vsub.f32 1.0, %v4102_v55  ;;  %v5112_v20 = vpop.eup %5111  ;;  %v8160_v56 = vadd.f32 1.0, %v5110_v1  ;;  %vm8188_vm11 = vmor %vm4166_vm10, %vm4167_vm8  ;;  %vm4296_vm8 = vcmask 195584   ;;  %vm4322_vm10 = vcmask 17408  }
 0xaeb   :  { %v4163_v9 = vsub.f32 1.0, %v4162_v32  ;;  %v8162_v60 = vadd.f32 1.0, %v5112_v20  ;;  %v3983_v32 = vadd.f32 %v3980_v0, %v5486_v46 }
 0xaec   :  { %v4104_v14 = vmul.f32 %v5106_v15, %v4103_v61  ;;  %v5114_v7 = vpop.eup %5113  ;;  %5115 = vrcp.f32 %v8160_v56  ;;  %v4127_v51 = vand.u32 2147483648, %v8160_v56  ;;  %v4125_v5 = vand.u32 2147483647, %v8160_v56 }
 0xaed   :  { %v4164_v13 = vmul.f32 %v8153_v63, %v4163_v9  ;;  %5117 = vrcp.f32 %v8162_v60  ;;  %v4206_v18 = vmul.f32 %v5114_v7, %v4203_v4  ;;  %vm4121_vm13 = vweird.f32 %v8160_v56 }
 0xaee   :  { %v4105_v31 = vadd.f32 %v5106_v15, %v4104_v14  ;;  %v4128_v22 = vor.u32 1.1754944e-38, %v4127_v51  ;;  %vm4126_vm15 = vcmp.eq.f32.partialorder %v4125_v5, 8.507059e+37  ;;  %v4187_v61 = vand.u32 2147483648, %v8162_v60 }
 0xaef   :  { %v8172_v24 = vadd.f32 %v4209_v11, %v4206_v18  ;;  %v4165_v34 = vadd.f32 %v8153_v63, %v4164_v13  ;;  %vm4181_vm2 = vweird.f32 %v8162_v60 }
 0xaf0   :  { %v4109_v10 = vsel %vm4108_vm6, %v5106_v15, %v4105_v31  ;;  %v4193_v15 = vadd.f32 %v4068_v41, %v5496_v50  ;;  %v4185_v50 = vand.u32 2147483647, %v8162_v60  ;;  %v4188_v7 = vor.u32 1.1754944e-38, %v4187_v61  ;;  %v4221_v31 = vld [vmem:[#allocation5 + $0x30] sm:$0xff]  ;;  %v4260_v61 = vld [vmem:[%s8231_s4] sm:$0x3] }
 0xaf1   :  { %v4114_v44 = vsel %vm4111_vm7, %v4113_v35, %v4109_v10  ;;  %v4227_v52 = vmul.f32 %v4218_v8, %v8172_v24  ;;  %v4224_v28 = vmul.f32 %v4215_v62, %v8172_v24  ;;  %v4169_v30 = vsel %vm8188_vm11, %v8153_v63, %v4165_v34  ;;  %v4220_v8 = vld [vmem:[#allocation5 + $0x28] sm:$0xff]  ;;  %v4217_v62 = vld [vmem:[#allocation5 + $0x10] sm:$0xff] }
 0xaf2   :  { %v4195_v29 = vmul.f32 %v4192_v21, %v4114_v44  ;;  %v5116_v49 = vpop.eup %5115  ;;  %v4174_v53 = vsel %vm4171_vm12, %v4173_v40, %v4169_v30  ;;  %vm4186_vm4 = vcmp.eq.f32.partialorder %v4185_v50, 8.507059e+37  ;;  %vm4292_vm6 = vcmask 1041409  }
 0xaf3   :  { %v5118_v57 = vpop.eup %5117  ;;  %v4117_v58 = vmul.f32 %v5116_v49, %v8160_v56  ;;  %v4242_v59 = vsel %vm311_vm9, %v4227_v52, 0.0  ;;  %v4233_v43 = vsel %vm311_vm9, %v4224_v28, 0.0  ;;  %vm4122_vm0 = vweird.f32 %v5116_v49 }
 0xaf4   :  { %v4177_v23 = vmul.f32 %v5118_v57, %v8162_v60  ;;  %4243 = vadd.xlane.f32.xlu2 %v4242_v59  ;;  %4234 = vadd.xlane.f32.xlu0 %v4233_v43  ;;  %v4198_v45 = vadd.f32 %v4195_v29, %v3982_v3  ;;  %vm4123_vm14 = vmor %vm4121_vm13, %vm4122_vm0  ;;  %v4204_v63 = vsub.f32 1.0, %v4174_v53  ;;  %vm4182_vm1 = vweird.f32 %v5118_v57  ;;  %v4223_v29 = vld [vmem:[#allocation5 + $0x40] sm:$0xff] }
 0xaf5   :  { %v4118_v17 = vsub.f32 1.0, %v4117_v58  ;;  %v4210_v47 = vmul.f32 %v4174_v53, %v8089_v19  ;;  %vm4183_vm3 = vmor %vm4181_vm2, %vm4182_vm1  ;;  %v4230_v60 = vmul.f32 %v4221_v31, %v8172_v24  ;;  %v4271_v43 = vlaneseq }
 0xaf6   :  { %v4178_v42 = vsub.f32 1.0, %v4177_v23  ;;  %5119 = vtanh.f32 %v4198_v45  ;;  %vm4294_vm7 = vcmask 1042434  }
 0xaf7   :  { %v4119_v37 = vmul.f32 %v5116_v49, %v4118_v17  ;;  %v4251_v10 = vsel %vm311_vm9, %v4230_v60, 0.0  ;;  %v4272_v23 = vand.u32 127, %v4271_v43 }
 0xaf8   :  { %v4179_v25 = vmul.f32 %v5118_v57, %v4178_v42 }
 0xaf9   :  { %v4120_v12 = vadd.f32 %v5116_v49, %v4119_v37  ;;  %v4274_v33 = vadd.s32 4294967288, %v4272_v23  ;;  %v4278_v30 = vadd.s32 4294967280, %v4272_v23 }
 0xafa   :  { %v4180_v1 = vadd.f32 %v5118_v57, %v4179_v25 }
 0xafb   :  { %v4124_v16 = vsel %vm4123_vm14, %v5116_v49, %v4120_v12  ;;  %v4222_v49 = vld [vmem:[#allocation5 + $0x38] sm:$0xff] }
 0xafc   :  { %v5120_v55 = vpop.eup %5119  ;;  %v4129_v27 = vsel %vm4126_vm15, %v4128_v22, %v4124_v16  ;;  %v4184_v14 = vsel %vm4183_vm3, %v5118_v57, %v4180_v1 }
 0xafd   :  { %v4207_v26 = vmul.f32 %v5120_v55, %v4204_v63  ;;  %v4196_v20 = vmul.f32 %v4193_v15, %v4129_v27  ;;  %v4189_v11 = vsel %vm4186_vm4, %v4188_v7, %v4184_v14 }
 0xafe   :  { %v4205_v13 = vsub.f32 1.0, %v4189_v11  ;;  %v4211_v35 = vmul.f32 %v4189_v11, %v8100_v6 }
 0xaff   :  { %v4213_v9 = vadd.f32 %v4210_v47, %v4207_v26  ;;  %v4199_v56 = vadd.f32 %v4196_v20, %v3983_v32  ;;  %v5225_v20 = vld [vmem:[%s8228_s1] sm:$0xff] }
 0xb01   :  { %v4228_v46 = vmul.f32 %v4219_v36, %v4213_v9  ;;  %v4225_v4 = vmul.f32 %v4216_v39, %v4213_v9  ;;  %5121 = vtanh.f32 %v4199_v56  ;;  %v4231_v3 = vmul.f32 %v4222_v49, %v4213_v9 }
 0xb02   :  { %v4261_v36 = vperm.slane %v5225_v20, 7 }
 0xb03   :  { %v4245_v19 = vsel %vm311_vm9, %v4228_v46, 0.0  ;;  %v4236_v48 = vsel %vm311_vm9, %v4225_v4, 0.0  ;;  %v4254_v38 = vsel %vm311_vm9, %v4231_v3, 0.0 }
 0xb04   :  { %4246 = vadd.xlane.f32.xlu2 %v4245_v19  ;;  %4237 = vadd.xlane.f32.xlu1 %v4236_v48 }
 0xb07   :  { %v5122_v18 = vpop.eup %5121 }
 0xb08   :  { %v4208_v2 = vmul.f32 %v5122_v18, %v4205_v13 }
 0xb0a   :  { %v4214_v21 = vadd.f32 %v4211_v35, %v4208_v2 }
 0xb0c   :  { %4252 = vadd.xlane.f32.xlu2 %v4251_v10  ;;  %v4229_v44 = vmul.f32 %v4220_v8, %v4214_v21  ;;  %v4226_v52 = vmul.f32 %v4217_v62, %v4214_v21  ;;  %v4232_v24 = vmul.f32 %v4223_v29, %v4214_v21 }
 0xb0e   :  { %v4248_v28 = vsel %vm311_vm9, %v4229_v44, 0.0  ;;  %v4239_v34 = vsel %vm311_vm9, %v4226_v52, 0.0  ;;  %v4257_v6 = vsel %vm311_vm9, %v4232_v24, 0.0  ;;  %vm4280_vm9 = vcmask 195712  }
 0xb0f   :  { %4249 = vadd.xlane.f32.xlu1 %v4248_v28  ;;  %4240 = vadd.xlane.f32.xlu0 %v4239_v34 }
 0xb17   :  { %4258 = vadd.xlane.f32.xlu1 %v4257_v6  ;;  %4255 = vadd.xlane.f32.xlu0 %v4254_v38 }
 0xb67   :  { %v4244_v57 = vpop.xlane.xlu2 %4243  ;;  %v4235_v59 = vpop.xlane.xlu0 %4234 }
 0xb68   :  { %v4282_v0 = vperm.slane %v4244_v57, %v4272_v23  ;;  %v4273_v41 = vperm.slane %v4235_v59, %v4272_v23 }
 0xb77   :  { %v4238_v58 = vpop.xlane.xlu1 %4237  ;;  %v4247_v54 = vpop.xlane.xlu2 %4246 }
 0xb78   :  { %v4283_v51 = vperm.slane %v4247_v54, %v4274_v33  ;;  %v4275_v42 = vperm.slane %v4238_v58, %v4274_v33 }
 0xb7a   :  { %v4284_v25 = vsel %vm4276_vm5, %v4283_v51, %v4282_v0  ;;  %v4277_v53 = vsel %vm4276_vm5, %v4275_v42, %v4273_v41 }
 0xb7f   :  { %v4253_v40 = vpop.xlane.xlu2 %4252 }
 0xb80   :  { %v4287_v12 = vperm.slane %v4253_v40, %v4272_v23 }
 0xb82   :  { %v4250_v45 = vpop.xlane.xlu1 %4249  ;;  %v4241_v17 = vpop.xlane.xlu0 %4240 }
 0xb83   :  { %v4285_v37 = vperm.slane %v4250_v45, %v4278_v30  ;;  %v4279_v5 = vperm.slane %v4241_v17, %v4278_v30 }
 0xb85   :  { %v4286_v16 = vsel %vm4280_vm9, %v4285_v37, %v4284_v25  ;;  %v4281_v63 = vsel %vm4280_vm9, %v4279_v5, %v4277_v53 }
 0xb86   :  { %v4293_v1 = vsel %vm4292_vm6, %v4286_v16, %v4281_v63 }
 0xb8a   :  { %v4259_v22 = vpop.xlane.xlu1 %4258  ;;  %v4256_v15 = vpop.xlane.xlu0 %4255 }
 0xb8b   :  { %v4290_v55 = vperm.slane %v4259_v22, %v4278_v30  ;;  %v4288_v32 = vperm.slane %v4256_v15, %v4274_v33 }
 0xb8d   :  { %v4289_v27 = vsel %vm4276_vm5, %v4288_v32, %v4287_v12 }
 0xb8e   :  { %v4291_v26 = vsel %vm4280_vm9, %v4290_v55, %v4289_v27 }
 0xb8f   :  { %v4295_v47 = vsel %vm4294_vm7, %v4291_v26, %v4293_v1 }
 0xb90   :  { %4573 = vmatpush.xpose.msk.msrb.mxu1 %vm4296_vm8, %v4295_v47 }
 0xb93   :  { %4574 = vmatmul.msk.f32.vlgmr.msrb.gmra.mxu1 %vm4296_vm8, %v4260_v61 }
 0xc10   :  { %v4319_v39 = vpop.f32.mrf.mxu1 }
 0xc11   :  { %v4320_v50 = vadd.f32 %v4319_v39, %v4261_v36 }
 0xc13   :  { %4323 = vst.msk [vmem:[#allocation7] sm:$0x3] %vm4322_vm10, %v4320_v50 }
 0xc14   :  { %4334 = dma.vmem_to_hbm [thread:$0]  %s4330_s29, 32, %s4332_s2, [#allocation4]  }
 0xc15   :  { %5302 = dma.done.wait [#allocation4], 32  }
 0xc16   :  { %5303 = vsyncadd [#allocation4], 4294967264 }
 0xc17   :  { %4339 = vsyncpa [#allocation3], 1 }
 0xc18   :  { %4340 = vsyncpa [#allocation6], 1 }
 0xc19   :  { %4341 = vsyncpa [#allocation4], 1 }

</bundles_post_ra>
